<compile_context>
chip_gen: v6e
topology: v6e:2x2x1
jax: 0.10.0
libtpu: 0.0.40
codegen_flags: <defaults>
</compile_context>

<pallas_src>
import functools
import math

import jax
import jax.numpy as jnp
from jax import lax
from jax.experimental import pallas as pl
from jax.experimental.pallas import tpu as pltpu

# ---------------------------------------------------------------------------
# Model dimensions (DDAE_02) and lane-dense padded sizes.
# ---------------------------------------------------------------------------
D_SPEC = 257
D_EMMA = 18
D_IN = D_SPEC + D_EMMA        # 275
D_H = 257                     # hidden width
D_WIDE = 257 * 3              # 771 (Dense_L output / bottleneck input)

DP = 384                      # 275 / 257 padded to 3*128 lanes
WP = 896                      # 771 padded to 7*128 lanes
HALO = 8                      # >= receptive-field radius (7 stacked TDNNs)
N_TDNN = 7                    # 3 encoder + 4 decoder TDNN layers


# ---------------------------------------------------------------------------
# Fused kernel: one grid step = one (batch, time-tile) slab through all layers.
# ---------------------------------------------------------------------------
def _ddae_kernel(x_hbm, tw_ref, tb_ref, dw_ref, db_ref, lw_ref, o_ref,
                 xbuf, sem, *, seq_len, time_tile, rows):
    b = pl.program_id(0)
    j = pl.program_id(1)

    # DMA this slab (time_tile rows + 2*HALO halo rows) from HBM into VMEM.
    start = pl.multiple_of(j * time_tile, 16)
    cp = pltpu.make_async_copy(x_hbm.at[b, pl.ds(start, rows)], xbuf, sem.at[0])
    cp.start()

    # Tile-local rows of the true sequence boundaries (may lie outside [0,rows)).
    left_b = HALO - j * time_tile
    right_b = HALO + (seq_len - 1) - j * time_tile
    ridx = lax.broadcasted_iota(jnp.int32, (rows, 1), 0)
    lmask = ridx <= left_b
    rmask = ridx >= right_b

    cp.wait()
    h = xbuf[...]                                      # (rows, DP) bf16

    def tdnn(v, l, out_dtype):
        # Single fused matmul against the 3 N-stacked context chunks.
        p = jnp.dot(v, tw_ref[l], preferred_element_type=jnp.float32)
        p_m = p[:, 0 * DP:1 * DP]      # x[t] @ W(-1): consumed by row t+1
        p_c = p[:, 1 * DP:2 * DP]      # x[t] @ W( 0)
        p_p = p[:, 2 * DP:3 * DP]      # x[t] @ W(+1): consumed by row t-1
        # y[t] = p_m[t-1] + p_c[t] + p_p[t+1] + b, with per-layer replicate
        # clamping at the true sequence boundary (== F.pad mode='replicate').
        # pltpu.roll's circular wrap only touches rows 0 / rows-1, which stay
        # inside the HALO and never reach the stored output.
        sm = jnp.where(lmask, p_m, pltpu.roll(p_m, shift=1, axis=0))
        sp = jnp.where(rmask, p_p, pltpu.roll(p_p, shift=rows - 1, axis=0))
        acc = sm + p_c + sp + tb_ref[l]
        return jnp.maximum(acc, 0.0).astype(out_dtype)

    # ddae encoder: TDNN x3 (bf16 activations between layers).
    for l in range(3):
        h = tdnn(h, l, jnp.bfloat16)
    # Dense_L: 257(->384) -> 771(->896), relu.
    d = jnp.dot(h, dw_ref[...], preferred_element_type=jnp.float32) + db_ref[...]
    d = jnp.maximum(d, 0.0).astype(jnp.bfloat16)
    # bottleneck Linear: 771(->896) -> 257(->384), no bias / no relu.
    h = jnp.dot(d, lw_ref[...], preferred_element_type=jnp.float32)
    h = h.astype(jnp.bfloat16)
    # ddae decoder: TDNN x4; the last layer stays f32 so the HALO-offset slice
    # and the store below remain sublane-aligned.
    for l in range(3, N_TDNN):
        h = tdnn(h, l, jnp.float32 if l == N_TDNN - 1 else jnp.bfloat16)

    # Drop the halo rows; store is lane-dense (time_tile, DP) f32.
    o_ref[0] = h[HALO:HALO + time_tile, :]


def _round_up(x, m):
    return (x + m - 1) // m * m


@functools.partial(jax.jit, static_argnames=("time_tile",))
def ddae_02_forward(params, spec, emma, *, time_tile=496):
    B, T, _ = spec.shape
    x = jnp.concatenate([spec, emma], axis=-1)                  # (B, T, 275)
    x = jnp.pad(x, ((0, 0), (0, 0), (0, DP - x.shape[-1])))     # -> (B, T, 384)

    # TT multiple of 16 keeps every DMA slab offset aligned to bf16 tiling and
    # (for the default 496) makes ROWS = 512, a multiple of 256 for the MXU.
    TT = max(16, min(_round_up(time_tile, 16), _round_up(T, 16)))
    NT = pl.cdiv(T, TT)
    ROWS = TT + 2 * HALO

    # Replicate-pad time once (halo + round-up to the tile grid), cast to bf16.
    x = jnp.pad(x, ((0, 0), (HALO, HALO + NT * TT - T), (0, 0)), mode="edge")
    x = x.astype(jnp.bfloat16)                 # (B, NT*TT + 2*HALO, DP) in HBM

    kernel = functools.partial(_ddae_kernel, seq_len=T, time_tile=TT, rows=ROWS)
    out = pl.pallas_call(
        kernel,
        out_shape=jax.ShapeDtypeStruct((B, NT * TT, DP), jnp.float32),
        grid_spec=pltpu.PrefetchScalarGridSpec(
            num_scalar_prefetch=0,
            grid=(B, NT),
            in_specs=[
                pl.BlockSpec(memory_space=pl.ANY),                 # x stays in HBM
                pl.BlockSpec((N_TDNN, DP, 3 * DP), lambda b, j: (0, 0, 0)),
                pl.BlockSpec((N_TDNN, 1, DP), lambda b, j: (0, 0, 0)),
                pl.BlockSpec((DP, WP), lambda b, j: (0, 0)),
                pl.BlockSpec((1, WP), lambda b, j: (0, 0)),
                pl.BlockSpec((WP, DP), lambda b, j: (0, 0)),
            ],
            out_specs=pl.BlockSpec((1, TT, DP), lambda b, j: (b, j, 0)),
            scratch_shapes=[
                pltpu.VMEM((ROWS, DP), jnp.bfloat16),   # input slab buffer
                pltpu.SemaphoreType.DMA((1,)),
            ]),
        compiler_params=pltpu.CompilerParams(
            dimension_semantics=("parallel", "parallel"),
            vmem_limit_bytes=48 * 1024 * 1024),
    )(x, params["tdnn_w"], params["tdnn_b"], params["dense_w"],
      params["dense_b"], params["lin_w"])

    return out[:, :T, :D_H]


# ---------------------------------------------------------------------------
# Parameter init: torch.nn.Linear-style uniform(+-1/sqrt(fan_in)).
# TDNN weights are packed N-stacked: (N_TDNN, DP, 3*DP), context chunk c lives
# in lanes [c*DP, c*DP + D_H); padding rows/lanes are zero (mathematically
# inert: relu(0 + 0 bias) = 0).
# ---------------------------------------------------------------------------
def init_params(key):
    keys = jax.random.split(key, 2 * N_TDNN + 3)

    def uni(k, fan_in, shape):
        bound = 1.0 / math.sqrt(fan_in)
        return jax.random.uniform(k, shape, jnp.float32, -bound, bound)

    tdnn_w = jnp.zeros((N_TDNN, DP, 3 * DP), jnp.float32)
    tdnn_b = jnp.zeros((N_TDNN, 1, DP), jnp.float32)
    in_sizes = [D_IN] + [D_H] * (N_TDNN - 1)      # enc: 275,257,257  dec: 257x4
    for l, k_in in enumerate(in_sizes):
        fan_in = 3 * k_in
        w = uni(keys[2 * l], fan_in, (3, k_in, D_H))
        bvec = uni(keys[2 * l + 1], fan_in, (D_H,))
        for c in range(3):
            tdnn_w = tdnn_w.at[l, :k_in, c * DP:c * DP + D_H].set(w[c])
        tdnn_b = tdnn_b.at[l, 0, :D_H].set(bvec)

    dense_w = jnp.zeros((DP, WP), jnp.float32).at[:D_H, :D_WIDE].set(
        uni(keys[-3], D_H, (D_H, D_WIDE)))
    dense_b = jnp.zeros((1, WP), jnp.float32).at[0, :D_WIDE].set(
        uni(keys[-2], D_H, (D_WIDE,)))
    lin_w = jnp.zeros((WP, DP), jnp.float32).at[:D_WIDE, :D_H].set(
        uni(keys[-1], D_WIDE, (D_WIDE, D_H)))

    return {
        "tdnn_w": tdnn_w.astype(jnp.bfloat16),
        "tdnn_b": tdnn_b,
        "dense_w": dense_w.astype(jnp.bfloat16),
        "dense_b": dense_b,
        "lin_w": lin_w.astype(jnp.bfloat16),
    }


# ---------------------------------------------------------------------------
# Pure-jnp reference (same bf16-matmul / f32-accumulate / bf16-activation
# chain as the kernel) for validation.
# ---------------------------------------------------------------------------
def ddae_02_reference(params, spec, emma):
    x = jnp.concatenate([spec, emma], axis=-1)
    x = jnp.pad(x, ((0, 0), (0, 0), (0, DP - x.shape[-1]))).astype(jnp.bfloat16)

    def mm(a, w):
        return jnp.einsum("btk,kn->btn", a, w,
                          preferred_element_type=jnp.float32)

    def tdnn(v, l):
        w = params["tdnn_w"][l]
        vpad = jnp.pad(v, ((0, 0), (1, 1), (0, 0)), mode="edge")
        acc = (mm(vpad[:, :-2], w[:, 0:DP])
               + mm(vpad[:, 1:-1], w[:, DP:2 * DP])
               + mm(vpad[:, 2:], w[:, 2 * DP:3 * DP])
               + params["tdnn_b"][l])
        return jnp.maximum(acc, 0.0)

    h = x
    for l in range(3):
        h = tdnn(h, l).astype(jnp.bfloat16)
    d = jnp.maximum(mm(h, params["dense_w"]) + params["dense_b"], 0.0)
    d = d.astype(jnp.bfloat16)
    h = mm(d, params["lin_w"]).astype(jnp.bfloat16)
    for l in range(3, N_TDNN):
        h = tdnn(h, l)
        if l != N_TDNN - 1:
            h = h.astype(jnp.bfloat16)
    return h[..., :D_H]


if __name__ == "__main__":
    key = jax.random.PRNGKey(0)
    kp, ks, ke = jax.random.split(key, 3)

    B, T = 2, 8
    spec = jax.random.normal(ks, (B, T, D_SPEC), jnp.float32)
    emma = jax.random.normal(ke, (B, T, D_EMMA), jnp.float32)

    params = init_params(kp)

    out = ddae_02_forward(params, spec, emma)
    out = jax.block_until_ready(out)

    assert out.shape == (B, T, D_H), out.shape
    assert bool(jnp.all(jnp.isfinite(out)))

    ref = ddae_02_reference(params, spec, emma)
    max_err = float(jnp.max(jnp.abs(out - ref)))
    assert bool(jnp.allclose(out, ref, atol=1e-2, rtol=1e-2)), max_err

    print("KERNEL_OK")
</pallas_src>

<mosaic_0001>
module attributes {stable_mosaic.version = 11 : i64} {
  func.func @_ddae_kernel(%arg0: i32, %arg1: i32, %arg2: memref<2x32x384xbf16, #tpu.memory_space<any>>, %arg3: memref<7x384x1152xbf16, #tpu.memory_space<vmem>>, %arg4: memref<7x1x384xf32, #tpu.memory_space<vmem>>, %arg5: memref<384x896xbf16, #tpu.memory_space<vmem>>, %arg6: memref<1x896xf32, #tpu.memory_space<vmem>>, %arg7: memref<896x384xbf16, #tpu.memory_space<vmem>>, %arg8: memref<1x16x384xf32, #tpu.memory_space<vmem>>, %arg9: memref<32x384xbf16, #tpu.memory_space<vmem>>, %arg10: memref<1x!tpu.dma_semaphore, #tpu.memory_space<semaphore_mem>>) attributes {dimension_semantics = [#tpu.dimension_semantics<parallel>, #tpu.dimension_semantics<parallel>], iteration_bounds = array<i64: 2, 1>, scalar_prefetch = 0 : i64, scratch_operands = 2 : i64, tpu.core_type = #tpu.core_type<tc>, window_params = [{}, {pipeline_mode = #tpu.pipeline_mode<synchronous>, transform_indices = @transform_1, window_bounds = array<i64: 7, 384, 1152>}, {pipeline_mode = #tpu.pipeline_mode<synchronous>, transform_indices = @transform_2, window_bounds = array<i64: 7, 1, 384>}, {pipeline_mode = #tpu.pipeline_mode<synchronous>, transform_indices = @transform_3, window_bounds = array<i64: 384, 896>}, {pipeline_mode = #tpu.pipeline_mode<synchronous>, transform_indices = @transform_4, window_bounds = array<i64: 1, 896>}, {pipeline_mode = #tpu.pipeline_mode<synchronous>, transform_indices = @transform_5, window_bounds = array<i64: 896, 384>}, {transform_indices = @transform_6, window_bounds = array<i64: 1, 16, 384>}]} {
    %c16_i32 = arith.constant 16 : i32
    %0 = arith.muli %arg1, %c16_i32 : i32
    %1 = tpu.assume_multiple %0, 16 : i32
    %c0_i32 = arith.constant 0 : i32
    %c0_i32_0 = arith.constant 0 : i32
    %2 = tpu.memref_slice %arg2[%arg0, %1, %c0_i32_0] : memref<2x32x384xbf16, #tpu.memory_space<any>> -> memref<1x32x384xbf16, #tpu.memory_space<any>>
    %3 = tpu.memref_squeeze %2 : memref<1x32x384xbf16, #tpu.memory_space<any>> -> memref<32x384xbf16, #tpu.memory_space<any>>
    %4 = tpu.memref_slice %arg10[%c0_i32] : memref<1x!tpu.dma_semaphore, #tpu.memory_space<semaphore_mem>> -> memref<1x!tpu.dma_semaphore, #tpu.memory_space<semaphore_mem>>
    %5 = tpu.memref_squeeze %4 : memref<1x!tpu.dma_semaphore, #tpu.memory_space<semaphore_mem>> -> memref<!tpu.dma_semaphore, #tpu.memory_space<semaphore_mem>>
    tpu.enqueue_dma source(%3 : memref<32x384xbf16, #tpu.memory_space<any>>) target(%arg9 : memref<32x384xbf16, #tpu.memory_space<vmem>>) target_semaphore(%5 : memref<!tpu.dma_semaphore, #tpu.memory_space<semaphore_mem>>)
    %c16_i32_1 = arith.constant 16 : i32
    %6 = arith.muli %arg1, %c16_i32_1 : i32
    %c8_i32 = arith.constant 8 : i32
    %7 = arith.subi %c8_i32, %6 : i32
    %c16_i32_2 = arith.constant 16 : i32
    %8 = arith.muli %arg1, %c16_i32_2 : i32
    %c15_i32 = arith.constant 15 : i32
    %9 = arith.subi %c15_i32, %8 : i32
    %10 = tpu.iota {dimensions = array<i32: 0>} : vector<32x1xi32>
    %11 = vector.broadcast %7 : i32 to vector<32x1xi32>
    %12 = arith.cmpi sle, %10, %11 : vector<32x1xi32>
    %13 = vector.broadcast %9 : i32 to vector<32x1xi32>
    %14 = arith.cmpi sge, %10, %13 : vector<32x1xi32>
    %c0_i32_3 = arith.constant 0 : i32
    %c0_i32_4 = arith.constant 0 : i32
    %15 = tpu.memref_slice %arg2[%arg0, %1, %c0_i32_4] : memref<2x32x384xbf16, #tpu.memory_space<any>> -> memref<1x32x384xbf16, #tpu.memory_space<any>>
    %16 = tpu.memref_squeeze %15 : memref<1x32x384xbf16, #tpu.memory_space<any>> -> memref<32x384xbf16, #tpu.memory_space<any>>
    %17 = tpu.memref_slice %arg10[%c0_i32_3] : memref<1x!tpu.dma_semaphore, #tpu.memory_space<semaphore_mem>> -> memref<1x!tpu.dma_semaphore, #tpu.memory_space<semaphore_mem>>
    %18 = tpu.memref_squeeze %17 : memref<1x!tpu.dma_semaphore, #tpu.memory_space<semaphore_mem>> -> memref<!tpu.dma_semaphore, #tpu.memory_space<semaphore_mem>>
    tpu.wait_dma2 semaphore(%18 : memref<!tpu.dma_semaphore, #tpu.memory_space<semaphore_mem>>) src(%16 : memref<32x384xbf16, #tpu.memory_space<any>>) dst(%arg9 : memref<32x384xbf16, #tpu.memory_space<vmem>>)
    %c0 = arith.constant 0 : index
    %c0_5 = arith.constant 0 : index
    %19 = vector.load %arg9[%c0, %c0_5] : memref<32x384xbf16, #tpu.memory_space<vmem>>, vector<32x384xbf16>
    %c0_6 = arith.constant 0 : index
    %c0_7 = arith.constant 0 : index
    %c0_8 = arith.constant 0 : index
    %20 = vector.load %arg3[%c0_6, %c0_7, %c0_8] : memref<7x384x1152xbf16, #tpu.memory_space<vmem>>, vector<1x384x1152xbf16>
    %21 = vector.shape_cast %20 : vector<1x384x1152xbf16> to vector<384x1152xbf16>
    %cst = arith.constant dense<0.000000e+00> : vector<32x1152xf32>
    %22 = tpu.matmul %19, %21, %cst {dimension_numbers = #tpu.dot_dimension_numbers<[1], [0], [0], [1], [0, 0, 1, 1], [], []>} : vector<32x384xbf16>, vector<384x1152xbf16>, vector<32x1152xf32> -> vector<32x1152xf32>
    %23 = vector.extract_strided_slice %22 {offsets = [0, 0], sizes = [32, 384], strides = [1, 1]} : vector<32x1152xf32> to vector<32x384xf32>
    %24 = vector.extract_strided_slice %22 {offsets = [0, 384], sizes = [32, 384], strides = [1, 1]} : vector<32x1152xf32> to vector<32x384xf32>
    %25 = vector.extract_strided_slice %22 {offsets = [0, 768], sizes = [32, 384], strides = [1, 1]} : vector<32x1152xf32> to vector<32x384xf32>
    %c1_i32 = arith.constant 1 : i32
    %26 = tpu.dynamic_rotate %23 by %c1_i32 dim 0 : vector<32x384xf32>, i32 -> vector<32x384xf32>
    %27 = vector.shape_cast %12 : vector<32x1xi1> to vector<32x1xi1>
    %28 = vector.broadcast %27 : vector<32x1xi1> to vector<32x384xi1>
    %29 = arith.select %28, %23, %26 : vector<32x384xi1>, vector<32x384xf32>
    %c31_i32 = arith.constant 31 : i32
    %30 = tpu.dynamic_rotate %25 by %c31_i32 dim 0 : vector<32x384xf32>, i32 -> vector<32x384xf32>
    %31 = vector.shape_cast %14 : vector<32x1xi1> to vector<32x1xi1>
    %32 = vector.broadcast %31 : vector<32x1xi1> to vector<32x384xi1>
    %33 = arith.select %32, %25, %30 : vector<32x384xi1>, vector<32x384xf32>
    %34 = arith.addf %29, %24 : vector<32x384xf32>
    %35 = arith.addf %34, %33 : vector<32x384xf32>
    %c0_9 = arith.constant 0 : index
    %c0_10 = arith.constant 0 : index
    %c0_11 = arith.constant 0 : index
    %36 = vector.load %arg4[%c0_9, %c0_10, %c0_11] : memref<7x1x384xf32, #tpu.memory_space<vmem>>, vector<1x1x384xf32>
    %37 = vector.shape_cast %36 : vector<1x1x384xf32> to vector<1x384xf32>
    %38 = vector.broadcast %37 : vector<1x384xf32> to vector<32x384xf32>
    %39 = arith.addf %35, %38 : vector<32x384xf32>
    %cst_12 = arith.constant 0.000000e+00 : f32
    %40 = vector.broadcast %cst_12 : f32 to vector<32x384xf32>
    %41 = arith.maximumf %39, %40 : vector<32x384xf32>
    %42 = arith.truncf %41 : vector<32x384xf32> to vector<32x384xbf16>
    %c1 = arith.constant 1 : index
    %c0_13 = arith.constant 0 : index
    %c0_14 = arith.constant 0 : index
    %43 = vector.load %arg3[%c1, %c0_13, %c0_14] : memref<7x384x1152xbf16, #tpu.memory_space<vmem>>, vector<1x384x1152xbf16>
    %44 = vector.shape_cast %43 : vector<1x384x1152xbf16> to vector<384x1152xbf16>
    %cst_15 = arith.constant dense<0.000000e+00> : vector<32x1152xf32>
    %45 = tpu.matmul %42, %44, %cst_15 {dimension_numbers = #tpu.dot_dimension_numbers<[1], [0], [0], [1], [0, 0, 1, 1], [], []>} : vector<32x384xbf16>, vector<384x1152xbf16>, vector<32x1152xf32> -> vector<32x1152xf32>
    %46 = vector.extract_strided_slice %45 {offsets = [0, 0], sizes = [32, 384], strides = [1, 1]} : vector<32x1152xf32> to vector<32x384xf32>
    %47 = vector.extract_strided_slice %45 {offsets = [0, 384], sizes = [32, 384], strides = [1, 1]} : vector<32x1152xf32> to vector<32x384xf32>
    %48 = vector.extract_strided_slice %45 {offsets = [0, 768], sizes = [32, 384], strides = [1, 1]} : vector<32x1152xf32> to vector<32x384xf32>
    %c1_i32_16 = arith.constant 1 : i32
    %49 = tpu.dynamic_rotate %46 by %c1_i32_16 dim 0 : vector<32x384xf32>, i32 -> vector<32x384xf32>
    %50 = vector.shape_cast %12 : vector<32x1xi1> to vector<32x1xi1>
    %51 = vector.broadcast %50 : vector<32x1xi1> to vector<32x384xi1>
    %52 = arith.select %51, %46, %49 : vector<32x384xi1>, vector<32x384xf32>
    %c31_i32_17 = arith.constant 31 : i32
    %53 = tpu.dynamic_rotate %48 by %c31_i32_17 dim 0 : vector<32x384xf32>, i32 -> vector<32x384xf32>
    %54 = vector.shape_cast %14 : vector<32x1xi1> to vector<32x1xi1>
    %55 = vector.broadcast %54 : vector<32x1xi1> to vector<32x384xi1>
    %56 = arith.select %55, %48, %53 : vector<32x384xi1>, vector<32x384xf32>
    %57 = arith.addf %52, %47 : vector<32x384xf32>
    %58 = arith.addf %57, %56 : vector<32x384xf32>
    %c1_18 = arith.constant 1 : index
    %c0_19 = arith.constant 0 : index
    %c0_20 = arith.constant 0 : index
    %59 = vector.load %arg4[%c1_18, %c0_19, %c0_20] : memref<7x1x384xf32, #tpu.memory_space<vmem>>, vector<1x1x384xf32>
    %60 = vector.shape_cast %59 : vector<1x1x384xf32> to vector<1x384xf32>
    %61 = vector.broadcast %60 : vector<1x384xf32> to vector<32x384xf32>
    %62 = arith.addf %58, %61 : vector<32x384xf32>
    %cst_21 = arith.constant 0.000000e+00 : f32
    %63 = vector.broadcast %cst_21 : f32 to vector<32x384xf32>
    %64 = arith.maximumf %62, %63 : vector<32x384xf32>
    %65 = arith.truncf %64 : vector<32x384xf32> to vector<32x384xbf16>
    %c2 = arith.constant 2 : index
    %c0_22 = arith.constant 0 : index
    %c0_23 = arith.constant 0 : index
    %66 = vector.load %arg3[%c2, %c0_22, %c0_23] : memref<7x384x1152xbf16, #tpu.memory_space<vmem>>, vector<1x384x1152xbf16>
    %67 = vector.shape_cast %66 : vector<1x384x1152xbf16> to vector<384x1152xbf16>
    %cst_24 = arith.constant dense<0.000000e+00> : vector<32x1152xf32>
    %68 = tpu.matmul %65, %67, %cst_24 {dimension_numbers = #tpu.dot_dimension_numbers<[1], [0], [0], [1], [0, 0, 1, 1], [], []>} : vector<32x384xbf16>, vector<384x1152xbf16>, vector<32x1152xf32> -> vector<32x1152xf32>
    %69 = vector.extract_strided_slice %68 {offsets = [0, 0], sizes = [32, 384], strides = [1, 1]} : vector<32x1152xf32> to vector<32x384xf32>
    %70 = vector.extract_strided_slice %68 {offsets = [0, 384], sizes = [32, 384], strides = [1, 1]} : vector<32x1152xf32> to vector<32x384xf32>
    %71 = vector.extract_strided_slice %68 {offsets = [0, 768], sizes = [32, 384], strides = [1, 1]} : vector<32x1152xf32> to vector<32x384xf32>
    %c1_i32_25 = arith.constant 1 : i32
    %72 = tpu.dynamic_rotate %69 by %c1_i32_25 dim 0 : vector<32x384xf32>, i32 -> vector<32x384xf32>
    %73 = vector.shape_cast %12 : vector<32x1xi1> to vector<32x1xi1>
    %74 = vector.broadcast %73 : vector<32x1xi1> to vector<32x384xi1>
    %75 = arith.select %74, %69, %72 : vector<32x384xi1>, vector<32x384xf32>
    %c31_i32_26 = arith.constant 31 : i32
    %76 = tpu.dynamic_rotate %71 by %c31_i32_26 dim 0 : vector<32x384xf32>, i32 -> vector<32x384xf32>
    %77 = vector.shape_cast %14 : vector<32x1xi1> to vector<32x1xi1>
    %78 = vector.broadcast %77 : vector<32x1xi1> to vector<32x384xi1>
    %79 = arith.select %78, %71, %76 : vector<32x384xi1>, vector<32x384xf32>
    %80 = arith.addf %75, %70 : vector<32x384xf32>
    %81 = arith.addf %80, %79 : vector<32x384xf32>
    %c2_27 = arith.constant 2 : index
    %c0_28 = arith.constant 0 : index
    %c0_29 = arith.constant 0 : index
    %82 = vector.load %arg4[%c2_27, %c0_28, %c0_29] : memref<7x1x384xf32, #tpu.memory_space<vmem>>, vector<1x1x384xf32>
    %83 = vector.shape_cast %82 : vector<1x1x384xf32> to vector<1x384xf32>
    %84 = vector.broadcast %83 : vector<1x384xf32> to vector<32x384xf32>
    %85 = arith.addf %81, %84 : vector<32x384xf32>
    %cst_30 = arith.constant 0.000000e+00 : f32
    %86 = vector.broadcast %cst_30 : f32 to vector<32x384xf32>
    %87 = arith.maximumf %85, %86 : vector<32x384xf32>
    %88 = arith.truncf %87 : vector<32x384xf32> to vector<32x384xbf16>
    %c0_31 = arith.constant 0 : index
    %c0_32 = arith.constant 0 : index
    %89 = vector.load %arg5[%c0_31, %c0_32] : memref<384x896xbf16, #tpu.memory_space<vmem>>, vector<384x896xbf16>
    %cst_33 = arith.constant dense<0.000000e+00> : vector<32x896xf32>
    %90 = tpu.matmul %88, %89, %cst_33 {dimension_numbers = #tpu.dot_dimension_numbers<[1], [0], [0], [1], [0, 0, 1, 1], [], []>} : vector<32x384xbf16>, vector<384x896xbf16>, vector<32x896xf32> -> vector<32x896xf32>
    %c0_34 = arith.constant 0 : index
    %c0_35 = arith.constant 0 : index
    %91 = vector.load %arg6[%c0_34, %c0_35] : memref<1x896xf32, #tpu.memory_space<vmem>>, vector<1x896xf32>
    %92 = vector.broadcast %91 : vector<1x896xf32> to vector<32x896xf32>
    %93 = arith.addf %90, %92 : vector<32x896xf32>
    %cst_36 = arith.constant 0.000000e+00 : f32
    %94 = vector.broadcast %cst_36 : f32 to vector<32x896xf32>
    %95 = arith.maximumf %93, %94 : vector<32x896xf32>
    %96 = arith.truncf %95 : vector<32x896xf32> to vector<32x896xbf16>
    %c0_37 = arith.constant 0 : index
    %c0_38 = arith.constant 0 : index
    %97 = vector.load %arg7[%c0_37, %c0_38] : memref<896x384xbf16, #tpu.memory_space<vmem>>, vector<896x384xbf16>
    %cst_39 = arith.constant dense<0.000000e+00> : vector<32x384xf32>
    %98 = tpu.matmul %96, %97, %cst_39 {dimension_numbers = #tpu.dot_dimension_numbers<[1], [0], [0], [1], [0, 0, 1, 1], [], []>} : vector<32x896xbf16>, vector<896x384xbf16>, vector<32x384xf32> -> vector<32x384xf32>
    %99 = arith.truncf %98 : vector<32x384xf32> to vector<32x384xbf16>
    %c3 = arith.constant 3 : index
    %c0_40 = arith.constant 0 : index
    %c0_41 = arith.constant 0 : index
    %100 = vector.load %arg3[%c3, %c0_40, %c0_41] : memref<7x384x1152xbf16, #tpu.memory_space<vmem>>, vector<1x384x1152xbf16>
    %101 = vector.shape_cast %100 : vector<1x384x1152xbf16> to vector<384x1152xbf16>
    %cst_42 = arith.constant dense<0.000000e+00> : vector<32x1152xf32>
    %102 = tpu.matmul %99, %101, %cst_42 {dimension_numbers = #tpu.dot_dimension_numbers<[1], [0], [0], [1], [0, 0, 1, 1], [], []>} : vector<32x384xbf16>, vector<384x1152xbf16>, vector<32x1152xf32> -> vector<32x1152xf32>
    %103 = vector.extract_strided_slice %102 {offsets = [0, 0], sizes = [32, 384], strides = [1, 1]} : vector<32x1152xf32> to vector<32x384xf32>
    %104 = vector.extract_strided_slice %102 {offsets = [0, 384], sizes = [32, 384], strides = [1, 1]} : vector<32x1152xf32> to vector<32x384xf32>
    %105 = vector.extract_strided_slice %102 {offsets = [0, 768], sizes = [32, 384], strides = [1, 1]} : vector<32x1152xf32> to vector<32x384xf32>
    %c1_i32_43 = arith.constant 1 : i32
    %106 = tpu.dynamic_rotate %103 by %c1_i32_43 dim 0 : vector<32x384xf32>, i32 -> vector<32x384xf32>
    %107 = vector.shape_cast %12 : vector<32x1xi1> to vector<32x1xi1>
    %108 = vector.broadcast %107 : vector<32x1xi1> to vector<32x384xi1>
    %109 = arith.select %108, %103, %106 : vector<32x384xi1>, vector<32x384xf32>
    %c31_i32_44 = arith.constant 31 : i32
    %110 = tpu.dynamic_rotate %105 by %c31_i32_44 dim 0 : vector<32x384xf32>, i32 -> vector<32x384xf32>
    %111 = vector.shape_cast %14 : vector<32x1xi1> to vector<32x1xi1>
    %112 = vector.broadcast %111 : vector<32x1xi1> to vector<32x384xi1>
    %113 = arith.select %112, %105, %110 : vector<32x384xi1>, vector<32x384xf32>
    %114 = arith.addf %109, %104 : vector<32x384xf32>
    %115 = arith.addf %114, %113 : vector<32x384xf32>
    %c3_45 = arith.constant 3 : index
    %c0_46 = arith.constant 0 : index
    %c0_47 = arith.constant 0 : index
    %116 = vector.load %arg4[%c3_45, %c0_46, %c0_47] : memref<7x1x384xf32, #tpu.memory_space<vmem>>, vector<1x1x384xf32>
    %117 = vector.shape_cast %116 : vector<1x1x384xf32> to vector<1x384xf32>
    %118 = vector.broadcast %117 : vector<1x384xf32> to vector<32x384xf32>
    %119 = arith.addf %115, %118 : vector<32x384xf32>
    %cst_48 = arith.constant 0.000000e+00 : f32
    %120 = vector.broadcast %cst_48 : f32 to vector<32x384xf32>
    %121 = arith.maximumf %119, %120 : vector<32x384xf32>
    %122 = arith.truncf %121 : vector<32x384xf32> to vector<32x384xbf16>
    %c4 = arith.constant 4 : index
    %c0_49 = arith.constant 0 : index
    %c0_50 = arith.constant 0 : index
    %123 = vector.load %arg3[%c4, %c0_49, %c0_50] : memref<7x384x1152xbf16, #tpu.memory_space<vmem>>, vector<1x384x1152xbf16>
    %124 = vector.shape_cast %123 : vector<1x384x1152xbf16> to vector<384x1152xbf16>
    %cst_51 = arith.constant dense<0.000000e+00> : vector<32x1152xf32>
    %125 = tpu.matmul %122, %124, %cst_51 {dimension_numbers = #tpu.dot_dimension_numbers<[1], [0], [0], [1], [0, 0, 1, 1], [], []>} : vector<32x384xbf16>, vector<384x1152xbf16>, vector<32x1152xf32> -> vector<32x1152xf32>
    %126 = vector.extract_strided_slice %125 {offsets = [0, 0], sizes = [32, 384], strides = [1, 1]} : vector<32x1152xf32> to vector<32x384xf32>
    %127 = vector.extract_strided_slice %125 {offsets = [0, 384], sizes = [32, 384], strides = [1, 1]} : vector<32x1152xf32> to vector<32x384xf32>
    %128 = vector.extract_strided_slice %125 {offsets = [0, 768], sizes = [32, 384], strides = [1, 1]} : vector<32x1152xf32> to vector<32x384xf32>
    %c1_i32_52 = arith.constant 1 : i32
    %129 = tpu.dynamic_rotate %126 by %c1_i32_52 dim 0 : vector<32x384xf32>, i32 -> vector<32x384xf32>
    %130 = vector.shape_cast %12 : vector<32x1xi1> to vector<32x1xi1>
    %131 = vector.broadcast %130 : vector<32x1xi1> to vector<32x384xi1>
    %132 = arith.select %131, %126, %129 : vector<32x384xi1>, vector<32x384xf32>
    %c31_i32_53 = arith.constant 31 : i32
    %133 = tpu.dynamic_rotate %128 by %c31_i32_53 dim 0 : vector<32x384xf32>, i32 -> vector<32x384xf32>
    %134 = vector.shape_cast %14 : vector<32x1xi1> to vector<32x1xi1>
    %135 = vector.broadcast %134 : vector<32x1xi1> to vector<32x384xi1>
    %136 = arith.select %135, %128, %133 : vector<32x384xi1>, vector<32x384xf32>
    %137 = arith.addf %132, %127 : vector<32x384xf32>
    %138 = arith.addf %137, %136 : vector<32x384xf32>
    %c4_54 = arith.constant 4 : index
    %c0_55 = arith.constant 0 : index
    %c0_56 = arith.constant 0 : index
    %139 = vector.load %arg4[%c4_54, %c0_55, %c0_56] : memref<7x1x384xf32, #tpu.memory_space<vmem>>, vector<1x1x384xf32>
    %140 = vector.shape_cast %139 : vector<1x1x384xf32> to vector<1x384xf32>
    %141 = vector.broadcast %140 : vector<1x384xf32> to vector<32x384xf32>
    %142 = arith.addf %138, %141 : vector<32x384xf32>
    %cst_57 = arith.constant 0.000000e+00 : f32
    %143 = vector.broadcast %cst_57 : f32 to vector<32x384xf32>
    %144 = arith.maximumf %142, %143 : vector<32x384xf32>
    %145 = arith.truncf %144 : vector<32x384xf32> to vector<32x384xbf16>
    %c5 = arith.constant 5 : index
    %c0_58 = arith.constant 0 : index
    %c0_59 = arith.constant 0 : index
    %146 = vector.load %arg3[%c5, %c0_58, %c0_59] : memref<7x384x1152xbf16, #tpu.memory_space<vmem>>, vector<1x384x1152xbf16>
    %147 = vector.shape_cast %146 : vector<1x384x1152xbf16> to vector<384x1152xbf16>
    %cst_60 = arith.constant dense<0.000000e+00> : vector<32x1152xf32>
    %148 = tpu.matmul %145, %147, %cst_60 {dimension_numbers = #tpu.dot_dimension_numbers<[1], [0], [0], [1], [0, 0, 1, 1], [], []>} : vector<32x384xbf16>, vector<384x1152xbf16>, vector<32x1152xf32> -> vector<32x1152xf32>
    %149 = vector.extract_strided_slice %148 {offsets = [0, 0], sizes = [32, 384], strides = [1, 1]} : vector<32x1152xf32> to vector<32x384xf32>
    %150 = vector.extract_strided_slice %148 {offsets = [0, 384], sizes = [32, 384], strides = [1, 1]} : vector<32x1152xf32> to vector<32x384xf32>
    %151 = vector.extract_strided_slice %148 {offsets = [0, 768], sizes = [32, 384], strides = [1, 1]} : vector<32x1152xf32> to vector<32x384xf32>
    %c1_i32_61 = arith.constant 1 : i32
    %152 = tpu.dynamic_rotate %149 by %c1_i32_61 dim 0 : vector<32x384xf32>, i32 -> vector<32x384xf32>
    %153 = vector.shape_cast %12 : vector<32x1xi1> to vector<32x1xi1>
    %154 = vector.broadcast %153 : vector<32x1xi1> to vector<32x384xi1>
    %155 = arith.select %154, %149, %152 : vector<32x384xi1>, vector<32x384xf32>
    %c31_i32_62 = arith.constant 31 : i32
    %156 = tpu.dynamic_rotate %151 by %c31_i32_62 dim 0 : vector<32x384xf32>, i32 -> vector<32x384xf32>
    %157 = vector.shape_cast %14 : vector<32x1xi1> to vector<32x1xi1>
    %158 = vector.broadcast %157 : vector<32x1xi1> to vector<32x384xi1>
    %159 = arith.select %158, %151, %156 : vector<32x384xi1>, vector<32x384xf32>
    %160 = arith.addf %155, %150 : vector<32x384xf32>
    %161 = arith.addf %160, %159 : vector<32x384xf32>
    %c5_63 = arith.constant 5 : index
    %c0_64 = arith.constant 0 : index
    %c0_65 = arith.constant 0 : index
    %162 = vector.load %arg4[%c5_63, %c0_64, %c0_65] : memref<7x1x384xf32, #tpu.memory_space<vmem>>, vector<1x1x384xf32>
    %163 = vector.shape_cast %162 : vector<1x1x384xf32> to vector<1x384xf32>
    %164 = vector.broadcast %163 : vector<1x384xf32> to vector<32x384xf32>
    %165 = arith.addf %161, %164 : vector<32x384xf32>
    %cst_66 = arith.constant 0.000000e+00 : f32
    %166 = vector.broadcast %cst_66 : f32 to vector<32x384xf32>
    %167 = arith.maximumf %165, %166 : vector<32x384xf32>
    %168 = arith.truncf %167 : vector<32x384xf32> to vector<32x384xbf16>
    %c6 = arith.constant 6 : index
    %c0_67 = arith.constant 0 : index
    %c0_68 = arith.constant 0 : index
    %169 = vector.load %arg3[%c6, %c0_67, %c0_68] : memref<7x384x1152xbf16, #tpu.memory_space<vmem>>, vector<1x384x1152xbf16>
    %170 = vector.shape_cast %169 : vector<1x384x1152xbf16> to vector<384x1152xbf16>
    %cst_69 = arith.constant dense<0.000000e+00> : vector<32x1152xf32>
    %171 = tpu.matmul %168, %170, %cst_69 {dimension_numbers = #tpu.dot_dimension_numbers<[1], [0], [0], [1], [0, 0, 1, 1], [], []>} : vector<32x384xbf16>, vector<384x1152xbf16>, vector<32x1152xf32> -> vector<32x1152xf32>
    %172 = vector.extract_strided_slice %171 {offsets = [0, 0], sizes = [32, 384], strides = [1, 1]} : vector<32x1152xf32> to vector<32x384xf32>
    %173 = vector.extract_strided_slice %171 {offsets = [0, 384], sizes = [32, 384], strides = [1, 1]} : vector<32x1152xf32> to vector<32x384xf32>
    %174 = vector.extract_strided_slice %171 {offsets = [0, 768], sizes = [32, 384], strides = [1, 1]} : vector<32x1152xf32> to vector<32x384xf32>
    %c1_i32_70 = arith.constant 1 : i32
    %175 = tpu.dynamic_rotate %172 by %c1_i32_70 dim 0 : vector<32x384xf32>, i32 -> vector<32x384xf32>
    %176 = vector.shape_cast %12 : vector<32x1xi1> to vector<32x1xi1>
    %177 = vector.broadcast %176 : vector<32x1xi1> to vector<32x384xi1>
    %178 = arith.select %177, %172, %175 : vector<32x384xi1>, vector<32x384xf32>
    %c31_i32_71 = arith.constant 31 : i32
    %179 = tpu.dynamic_rotate %174 by %c31_i32_71 dim 0 : vector<32x384xf32>, i32 -> vector<32x384xf32>
    %180 = vector.shape_cast %14 : vector<32x1xi1> to vector<32x1xi1>
    %181 = vector.broadcast %180 : vector<32x1xi1> to vector<32x384xi1>
    %182 = arith.select %181, %174, %179 : vector<32x384xi1>, vector<32x384xf32>
    %183 = arith.addf %178, %173 : vector<32x384xf32>
    %184 = arith.addf %183, %182 : vector<32x384xf32>
    %c6_72 = arith.constant 6 : index
    %c0_73 = arith.constant 0 : index
    %c0_74 = arith.constant 0 : index
    %185 = vector.load %arg4[%c6_72, %c0_73, %c0_74] : memref<7x1x384xf32, #tpu.memory_space<vmem>>, vector<1x1x384xf32>
    %186 = vector.shape_cast %185 : vector<1x1x384xf32> to vector<1x384xf32>
    %187 = vector.broadcast %186 : vector<1x384xf32> to vector<32x384xf32>
    %188 = arith.addf %184, %187 : vector<32x384xf32>
    %cst_75 = arith.constant 0.000000e+00 : f32
    %189 = vector.broadcast %cst_75 : f32 to vector<32x384xf32>
    %190 = arith.maximumf %188, %189 : vector<32x384xf32>
    %191 = vector.extract_strided_slice %190 {offsets = [8, 0], sizes = [16, 384], strides = [1, 1]} : vector<32x384xf32> to vector<16x384xf32>
    %c0_76 = arith.constant 0 : index
    %c0_77 = arith.constant 0 : index
    %c0_78 = arith.constant 0 : index
    %192 = vector.load %arg8[%c0_76, %c0_77, %c0_78] : memref<1x16x384xf32, #tpu.memory_space<vmem>>, vector<1x16x384xf32>
    %193 = vector.shape_cast %192 : vector<1x16x384xf32> to vector<16x384xf32>
    %194 = vector.shape_cast %191 : vector<16x384xf32> to vector<1x16x384xf32>
    tpu.vector_store %arg8[%c0_76, %c0_77, %c0_78], %194 {strides = array<i32>} : memref<1x16x384xf32, #tpu.memory_space<vmem>>, vector<1x16x384xf32>,
    return
  }
  func.func @transform_1(%arg0: i32, %arg1: i32) -> (i32, i32, i32) {
    %c0_i32 = arith.constant 0 : i32
    %c0_i32_0 = arith.constant 0 : i32
    %c0_i32_1 = arith.constant 0 : i32
    %c0_i32_2 = arith.constant 0 : i32
    return %c0_i32, %c0_i32_0, %c0_i32_1 : i32, i32, i32
  }
  func.func @transform_2(%arg0: i32, %arg1: i32) -> (i32, i32, i32) {
    %c0_i32 = arith.constant 0 : i32
    %c0_i32_0 = arith.constant 0 : i32
    %c0_i32_1 = arith.constant 0 : i32
    %c0_i32_2 = arith.constant 0 : i32
    return %c0_i32, %c0_i32_0, %c0_i32_1 : i32, i32, i32
  }
  func.func @transform_3(%arg0: i32, %arg1: i32) -> (i32, i32) {
    %c0_i32 = arith.constant 0 : i32
    %c0_i32_0 = arith.constant 0 : i32
    %c0_i32_1 = arith.constant 0 : i32
    return %c0_i32, %c0_i32_0 : i32, i32
  }
  func.func @transform_4(%arg0: i32, %arg1: i32) -> (i32, i32) {
    %c0_i32 = arith.constant 0 : i32
    %c0_i32_0 = arith.constant 0 : i32
    %c0_i32_1 = arith.constant 0 : i32
    return %c0_i32, %c0_i32_0 : i32, i32
  }
  func.func @transform_5(%arg0: i32, %arg1: i32) -> (i32, i32) {
    %c0_i32 = arith.constant 0 : i32
    %c0_i32_0 = arith.constant 0 : i32
    %c0_i32_1 = arith.constant 0 : i32
    return %c0_i32, %c0_i32_0 : i32, i32
  }
  func.func @transform_6(%arg0: i32, %arg1: i32) -> (i32, i32, i32) {
    %c0_i32 = arith.constant 0 : i32
    %c0_i32_0 = arith.constant 0 : i32
    return %arg0, %arg1, %c0_i32 : i32, i32, i32
  }
}

</mosaic_0001>

<bundles_post_ra>
// kernel: ddae_02_forward.1
= control target key start
LH: loop header
LB: loop body
LE: loop exit
PB: predicated region body
PF: predicated region fallthrough
CT: control target
= control target key end

     0   :  { %11 = vsyncpa [#allocation5], 0  ;;  %s24872_s0 = inlined_call_operand.vmem [shape: bf16[2,32,384], index: 0, kind: input, shape index: {}]   ;;  %s24873_s1 = inlined_call_operand.hbm [shape: bf16[7,384,1152], index: 1, kind: input, shape index: {}]   ;;  %s24874_s2 = inlined_call_operand.hbm [shape: f32[7,1,384], index: 2, kind: input, shape index: {}]   ;;  %s24875_s3 = inlined_call_operand.hbm [shape: bf16[384,896], index: 3, kind: input, shape index: {}]   ;;  %s24876_s4 = inlined_call_operand.hbm [shape: f32[1,896], index: 4, kind: input, shape index: {}]   ;;  %s24877_s5 = inlined_call_operand.hbm [shape: bf16[896,384], index: 5, kind: input, shape index: {}]   ;;  %s24878_s6 = inlined_call_operand.vmem [shape: f32[2,16,384], index: 6, kind: output, shape index: {}]  }
   0x1   :  { %12 = vsyncpa [#allocation7], 0 }
   0x2   :  { %13 = vsyncpa [#allocation10], 0  ;;  %s23085_s21 = smov 0   ;;  %s23087_s22 = smov 0  }
   0x3   :  { %s23089_s23 = smov 0  }
   0x4 LB: > { %s23036_s24 = smov [#allocation6]   ;;  %s17669_s26 = sadd.s32 4294967295, %s23034_s23   ;;  %s23034_s23 = sphi %s23089_s23, %s19_s23   ;;  %s23030_s22 = sphi %s23087_s22, %s24950_s22   ;;  %s23026_s21 = sphi %s23085_s21, %s24949_s21  }
   0x5   : > { %s194_s25 = sshll.u32 %s23036_s24, 4  ;;  %p17671_p0 = scmp.ge.s32.totalorder %s23034_s23, 1  ;;  %s195_s25 = int_to_ptr.vmem [resolvable:$true] %s194_s25 }
   0x6   : > { %p169_p1 = scmp.lt.s32.totalorder %s23034_s23, 3  ;;  %p23103_p2 = scmp.eq.s32.totalorder %s17669_s26, 0 }
   0x7   : > { %s23037_s29 = smov [#allocation9]   ;;  %s31_s8 = sadd.s32 1, %s23030_s22 }
   0x8   : > { %p23107_p3 = pnand %p17671_p0, %p169_p1  ;;  %s221_s30 = sshll.u32 %s23037_s29, 4  ;;  %s222_s30 = int_to_ptr.vmem [resolvable:$true] %s221_s30 }
   0x9   : > { %s22879_s10 = scalar_lea.vmem %s195_s25, 336  ;;  %s22886_s11 = scalar_lea.vmem %s195_s25, 352 }
   0xa   : > { %p20142_p4 = pneg %p23107_p3  ;;  %p22880_p7 = scmp.ne.s32.totalorder %s195_s25, %s22879_s10 }
   0xb   : > { %p22887_p10 = scmp.lt.s32.totalorder %s195_s25, %s195_s25  ;;  %p22888_p11 = scmp.lt.s32.totalorder %s22886_s11, %s22879_s10 }
   0xc   : > { %p23115_p5 = pnand %p23103_p2, %p20142_p4 }
   0xd   : > { %p22889_p12 = por %p22888_p11, %p22887_p10 }
   0xe   : > { %p23122_p6 = pneg %p23115_p5 }
  0x10   : > { %p22882_p8 = pnand %p22880_p7, %p23122_p6 }
  0x12   : > { %p22883_p9 = pneg %p22882_p8 }
  0x14   : > { %p22890_p13 = pnand %p22889_p12, %p22883_p9 }
  0x16   : > { %22893 = shalt.err (!%p22890_p13)
}
  0x17   : > { %s23038_s12 = smov 48   ;;  %s23039_s13 = smov 3  }
  0x18   : > { %20148 = dma.hbm_to_vmem [thread:$0]  (!%p23115_p5), %s24874_s2, 336, %s195_s25, [#allocation7], %s23038_s12, %s23038_s12, %s23039_s13  }
  0x19   : > { %s22905_s16 = scalar_lea.vmem %s222_s30, 112  ;;  %s22912_s17 = scalar_lea.vmem %s222_s30, 128 }
  0x1a   : > { %p22906_p0 = scmp.ne.s32.totalorder %s222_s30, %s22905_s16  ;;  %p22913_p7 = scmp.lt.s32.totalorder %s222_s30, %s222_s30 }
  0x1b   : > { %p22914_p8 = scmp.lt.s32.totalorder %s22912_s17, %s22905_s16 }
  0x1c   : > { %p22908_p1 = pnand %p22906_p0, %p23122_p6 }
  0x1d   : > { %p22915_p10 = por %p22914_p8, %p22913_p7 }
  0x1e   : > { %p22909_p4 = pneg %p22908_p1 }
  0x20   : > { %p22916_p9 = pnand %p22915_p10, %p22909_p4 }
  0x22   : > { %22919 = shalt.err (!%p22916_p9)
}
  0x23   : > { %20154 = dma.hbm_to_vmem [thread:$0]  (!%p23115_p5), %s24876_s4, 112, %s222_s30, [#allocation10]  }
  0x24   : > { %p33_p11 = scmp.ge.s32.totalorder %s31_s8, 2  ;;  %s23040_s20 = smov [#allocation4]  }
  0x25   : > { %s181_s24 = sshll.u32 %s23040_s20, 4  ;;  %s182_s24 = int_to_ptr.vmem [resolvable:$true] %s181_s24 }
  0x26   : > { %s24952_s8 = smov (%p33_p11, %s31_s8), 0  ;;  %s22931_s25 = scalar_lea.vmem %s182_s24, 193536 }
  0x27   : > { %p22932_p12 = scmp.ne.s32.totalorder %s182_s24, %s22931_s25  ;;  %p22939_p1 = scmp.lt.s32.totalorder %s182_s24, %s182_s24 }
  0x28   : > { %p22940_p4 = scmp.lt.s32.totalorder %s22931_s25, %s22931_s25 }
  0x29   : > { %p22934_p13 = pnand %p22932_p12, %p23122_p6 }
  0x2a   : > { %p22941_p7 = por %p22940_p4, %p22939_p1 }
  0x2b   : > { %p22935_p0 = pneg %p22934_p13 }
  0x2d   : > { %p22942_p8 = pnand %p22941_p7, %p22935_p0 }
  0x2f   : > { %22945 = shalt.err (!%p22942_p8)
}
  0x30   : > { %s23041_s26 = smov 576   ;;  %s23042_s29 = smov 36  }
  0x31   : > { %20145 = dma.hbm_to_vmem [thread:$0]  (!%p23115_p5), %s24873_s1, 193536, %s182_s24, [#allocation5], %s23041_s26, %s23041_s26, %s23042_s29  }
  0x32   : > { %s23043_s11 = smov [#allocation8]  }
  0x33   : > { %s207_s12 = sshll.u32 %s23043_s11, 4  ;;  %s208_s12 = int_to_ptr.vmem [resolvable:$true] %s207_s12 }
  0x34   : > { %s22957_s13 = scalar_lea.vmem %s208_s12, 21504  ;;  %p22965_p12 = scmp.lt.s32.totalorder %s208_s12, %s208_s12 }
  0x35   : > { %p22958_p10 = scmp.ne.s32.totalorder %s208_s12, %s22957_s13  ;;  %p22966_p13 = scmp.lt.s32.totalorder %s22957_s13, %s22957_s13 }
  0x37   : > { %p22960_p9 = pnand %p22958_p10, %p23122_p6  ;;  %p22967_p0 = por %p22966_p13, %p22965_p12 }
  0x39   : > { %p22961_p11 = pneg %p22960_p9 }
  0x3b   : > { %p22968_p1 = pnand %p22967_p0, %p22961_p11 }
  0x3d   : > { %22971 = shalt.err (!%p22968_p1)
}
  0x3e   : > { %s23044_s14 = smov 448   ;;  %s23045_s15 = smov 28  }
  0x3f   : > { %20151 = dma.hbm_to_vmem [thread:$0]  (!%p23115_p5), %s24875_s3, 21504, %s208_s12, [#allocation7], %s23044_s14, %s23044_s14, %s23045_s15  }
  0x40   : > { %s23046_s18 = smov [#allocation11]  }
  0x41   : > { %s231_s19 = sshll.u32 %s23046_s18, 4  ;;  %s232_s19 = int_to_ptr.vmem [resolvable:$true] %s231_s19 }
  0x42   : > { %s22983_s20 = scalar_lea.vmem %s232_s19, 21504  ;;  %p22991_p10 = scmp.lt.s32.totalorder %s232_s19, %s232_s19 }
  0x43   : > { %p22984_p4 = scmp.ne.s32.totalorder %s232_s19, %s22983_s20  ;;  %p22992_p9 = scmp.lt.s32.totalorder %s22983_s20, %s22983_s20 }
  0x45   : > { %p22986_p7 = pnand %p22984_p4, %p23122_p6  ;;  %p22993_p11 = por %p22992_p9, %p22991_p10 }
  0x47   : > { %p22987_p8 = pneg %p22986_p7 }
  0x49   : > { %p22994_p12 = pnand %p22993_p11, %p22987_p8 }
  0x4b   : > { %22997 = shalt.err (!%p22994_p12)
}
  0x4c   : > { %s23047_s24 = smov 192   ;;  %s23048_s25 = smov 12  }
  0x4d   : > { %20157 = dma.hbm_to_vmem [thread:$0]  (!%p23115_p5), %s24877_s5, 21504, %s232_s19, [#allocation10], %s23047_s24, %s23047_s24, %s23048_s25  }
  0x4e   : > { %247 = sbr.rel (%p23107_p3) target bundleno = 3587 (0xe03), region = 40 }
  0x53   : > { %23011 = dma.done.wait (%p23103_p2), [#allocation5], 193536  }
  0x54   : > { %23013 = vsyncadd (%p23103_p2), [#allocation5], 4294773760 }
  0x55   : > { %23015 = dma.done.wait (%p23103_p2), [#allocation7], 21840  }
  0x56   : > { %23017 = vsyncadd (%p23103_p2), [#allocation7], 4294945456 }
  0x57   : > { %23019 = dma.done.wait (%p23103_p2), [#allocation10], 21616  }
  0x58   : > { %23021 = vsyncadd (%p23103_p2), [#allocation10], 4294945680  ;;  %p292_p3 = scmp.lt.s32.totalorder %s23026_s21, 1  ;;  %s19542_s28 = smul.u32 48, %s23026_s21 }
  0x5a   : > { %s24954_s21 = smov (!%p292_p3, %s23026_s21), 1  ;;  %s310_s10 = scalar_lea.vmem %s24872_s0, %s19542_s28 }
  0x5b   : > { %s20121_s7 = smul.u32 48, %s24954_s21  ;;  %v344_v0 = vld [vmem:[%s310_s10] sm:$0xff]  ;;  %v346_v1 = vld [vmem:[%s310_s10 + $0x8] sm:$0xff]  ;;  %v348_v2 = vld [vmem:[%s310_s10 + $0x10] sm:$0xff] }
  0x5c   : > { %345 = vst [vmem:[#allocation2] sm:$0xff] %v344_v0  ;;  %347 = vst [vmem:[#allocation2 + $0x8] sm:$0xff] %v346_v1  ;;  %v350_v3 = vld [vmem:[%s310_s10 + $0x18] sm:$0xff]  ;;  %v352_v4 = vld [vmem:[%s310_s10 + $0x20] sm:$0xff] }
  0x5d   : > { %s23186_s13 = scalar_lea.vmem %s24878_s6, %s20121_s7  ;;  %349 = vst [vmem:[#allocation2 + $0x10] sm:$0xff] %v348_v2  ;;  %v354_v5 = vld [vmem:[%s310_s10 + $0x28] sm:$0xff]  ;;  %351 = vst [vmem:[#allocation2 + $0x18] sm:$0xff] %v350_v3 }
  0x5e   : > { %353 = vst [vmem:[#allocation2 + $0x20] sm:$0xff] %v352_v4  ;;  %355 = vst [vmem:[#allocation2 + $0x28] sm:$0xff] %v354_v5 }
  0x5f   : > { %363 = vsyncadd [#allocation3], 768  ;;  %v366_v6 = vlaneseq }
  0x61   : > { %v23188_v7 = vshrl.u32 %v366_v6, 7 }
  0x63   : > { %v23191_v8 = vadd.s32 8, %v23188_v7 }
  0x65   : > { %vm373_vm0 = vcmp.le.s32.totalorder %v23191_v8, 8  ;;  %vm378_vm1 = vcmp.ge.s32.totalorder %v23191_v8, 15 }
  0x66   : > { %23022 = dma.done.wait [#allocation3], 768 }
  0x67   : > { %23023 = vsyncadd [#allocation3], 4294966528  ;;  %v24879_v9 = vmov 0   ;;  %v20206_v10 = vld [vmem:[#allocation4 + $0x1fc] ss:$36 sps:$4 sm:$0xff]   ;;  %vm2303_vm2 = vcmp.lt.s32.totalorder %v23188_v7, 1 }
  0x68   : > { %1854 = vmatprep.mubr.bf16.mxu1 %v24879_v9  ;;  %v20208_v11 = vld [vmem:[#allocation4 + $0x67c] ss:$36 sps:$4 sm:$0xff]   ;;  %1769 = vmatprep.subr.bf16.mxu0 %v20206_v10  ;;  %v20212_v14 = vld [vmem:[#allocation4 + $0x1b4] ss:$36 sps:$4 sm:$0xff]   ;;  %v20218_v18 = vld [vmem:[#allocation4 + $0x16c] ss:$36 sps:$4 sm:$0xff]  }
  0x69   : > { %v20210_v12 = vld [vmem:[#allocation4 + $0x1f8] ss:$36 sps:$4 sm:$0xff]   ;;  %1822 = vmatprep.subr.bf16.mxu1 %v20208_v11  ;;  %v20216_v16 = vld [vmem:[#allocation4 + $0x1b0] ss:$36 sps:$4 sm:$0xff]   ;;  %v20222_v20 = vld [vmem:[#allocation4 + $0x168] ss:$36 sps:$4 sm:$0xff]  }
  0x6a   : > { %v20211_v13 = vld [vmem:[#allocation4 + $0x678] ss:$36 sps:$4 sm:$0xff]   ;;  %1770 = vmatpush1.bf16.msra.mxu0 %v20210_v12  ;;  %v20217_v17 = vld [vmem:[#allocation4 + $0x630] ss:$36 sps:$4 sm:$0xff]   ;;  %v20223_v21 = vld [vmem:[#allocation4 + $0x5e8] ss:$36 sps:$4 sm:$0xff]  }
  0x6b   : > { %1823 = vmatpush1.bf16.msra.mxu1 %v20211_v13  ;;  %v20214_v15 = vld [vmem:[#allocation4 + $0x634] ss:$36 sps:$4 sm:$0xff]   ;;  %1771 = vmatprep.subr.bf16.mxu0 %v20212_v14  ;;  %v20220_v19 = vld [vmem:[#allocation4 + $0x5ec] ss:$36 sps:$4 sm:$0xff]   ;;  %v20224_v22 = vld [vmem:[#allocation4 + $0x124] ss:$36 sps:$4 sm:$0xff]  }
  0x6c   : > { %1824 = vmatprep.subr.bf16.mxu1 %v20214_v15  ;;  %v20226_v23 = vld [vmem:[#allocation4 + $0x5a4] ss:$36 sps:$4 sm:$0xff]   ;;  %v20230_v26 = vld [vmem:[#allocation4 + $0xdc] ss:$36 sps:$4 sm:$0xff]   ;;  %v20236_v30 = vld [vmem:[#allocation4 + $0x94] ss:$36 sps:$4 sm:$0xff]  }
  0x6d   : > { %v20228_v24 = vld [vmem:[#allocation4 + $0x120] ss:$36 sps:$4 sm:$0xff]   ;;  %v20234_v28 = vld [vmem:[#allocation4 + $0xd8] ss:$36 sps:$4 sm:$0xff]   ;;  %v20240_v32 = vld [vmem:[#allocation4 + $0x90] ss:$36 sps:$4 sm:$0xff]  }
  0x6e   : > { %1772 = vmatpush1.bf16.msra.mxu0 %v20216_v16  ;;  %v20229_v25 = vld [vmem:[#allocation4 + $0x5a0] ss:$36 sps:$4 sm:$0xff]   ;;  %v20235_v29 = vld [vmem:[#allocation4 + $0x558] ss:$36 sps:$4 sm:$0xff]   ;;  %v20241_v33 = vld [vmem:[#allocation4 + $0x510] ss:$36 sps:$4 sm:$0xff]  }
  0x6f   : > { %1825 = vmatpush1.bf16.msra.mxu1 %v20217_v17  ;;  %1773 = vmatprep.subr.bf16.mxu0 %v20218_v18  ;;  %v20232_v27 = vld [vmem:[#allocation4 + $0x55c] ss:$36 sps:$4 sm:$0xff]   ;;  %v20238_v31 = vld [vmem:[#allocation4 + $0x514] ss:$36 sps:$4 sm:$0xff]   ;;  %v20242_v34 = vld [vmem:[#allocation4 + $0x4c] ss:$36 sps:$4 sm:$0xff]  }
  0x70   : > { %1826 = vmatprep.subr.bf16.mxu1 %v20220_v19  ;;  %v20244_v35 = vld [vmem:[#allocation4 + $0x4cc] ss:$36 sps:$4 sm:$0xff]   ;;  %v20248_v38 = vld [vmem:[#allocation4 + $0x4] ss:$36 sps:$4 sm:$0xff]   ;;  %v20254_v42 = vld [vmem:[#allocation4 + $0x43c] ss:$36 sps:$4 sm:$0xff]  }
  0x71   : > { %v20246_v36 = vld [vmem:[#allocation4 + $0x48] ss:$36 sps:$4 sm:$0xff]   ;;  %v20252_v40 = vld [vmem:[#allocation4] ss:$36 sps:$4 sm:$0xff]   ;;  %v20259_v46 = vld [vmem:[#allocation4 + $0x438] ss:$36 sps:$4 sm:$0xff]  }
  0x72   : > { %1774 = vmatpush1.bf16.msra.mxu0 %v20222_v20  ;;  %v20247_v37 = vld [vmem:[#allocation4 + $0x4c8] ss:$36 sps:$4 sm:$0xff]   ;;  %v20253_v41 = vld [vmem:[#allocation4 + $0x480] ss:$36 sps:$4 sm:$0xff]   ;;  %v20261_v47 = vld [vmem:[#allocation4 + $0x3f4] ss:$36 sps:$4 sm:$0xff]  }
  0x73   : > { %1827 = vmatpush1.bf16.msra.mxu1 %v20223_v21  ;;  %1775 = vmatprep.subr.bf16.mxu0 %v20224_v22  ;;  %v20250_v39 = vld [vmem:[#allocation4 + $0x484] ss:$36 sps:$4 sm:$0xff]   ;;  %v20265_v48 = vld [vmem:[#allocation4 + $0x1bc] ss:$36 sps:$4 sm:$0xff]   ;;  %v20266_v50 = vld [vmem:[#allocation4 + $0x3f0] ss:$36 sps:$4 sm:$0xff]  }
  0x74   : > { %1828 = vmatprep.subr.bf16.mxu1 %v20226_v23  ;;  %v20258_v43 = vld [vmem:[#allocation4 + $0x204] ss:$36 sps:$4 sm:$0xff]   ;;  %v20263_v49 = vld [vmem:[#allocation4 + $0x1b8] ss:$36 sps:$4 sm:$0xff]   ;;  %v20267_v51 = vld [vmem:[#allocation4 + $0x3ac] ss:$36 sps:$4 sm:$0xff]  }
  0x75   : > { %v23196_v44 = vld [vmem:[#allocation2 + $0x8] ss:$12 sps:$4 sm:$0xff]   ;;  %v20269_v53 = vld [vmem:[#allocation4 + $0x170] ss:$36 sps:$4 sm:$0xff]   ;;  %v20272_v54 = vld [vmem:[#allocation4 + $0x3a8] ss:$36 sps:$4 sm:$0xff]  }
  0x76   : > { %1776 = vmatpush1.bf16.msra.mxu0 %v20228_v24  ;;  %v20256_v45 = vld [vmem:[#allocation4 + $0x200] ss:$36 sps:$4 sm:$0xff]   ;;  %v20271_v52 = vld [vmem:[#allocation4 + $0x174] ss:$36 sps:$4 sm:$0xff]   ;;  %v20277_v56 = vld [vmem:[#allocation4 + $0x12c] ss:$36 sps:$4 sm:$0xff]  }
  0x77   : > { %1829 = vmatpush1.bf16.msra.mxu1 %v20229_v25  ;;  %1777 = vmatprep.subr.bf16.mxu0 %v20230_v26  ;;  %v20273_v55 = vld [vmem:[#allocation4 + $0x364] ss:$36 sps:$4 sm:$0xff]   ;;  %v20279_v59 = vld [vmem:[#allocation4 + $0x31c] ss:$36 sps:$4 sm:$0xff]   ;;  %v20285_v0 = vld [vmem:[#allocation4 + $0x2d4] ss:$36 sps:$4 sm:$0xff]  }
  0x78   : > { %1830 = vmatprep.subr.bf16.mxu1 %v20232_v27  ;;  %v20275_v57 = vld [vmem:[#allocation4 + $0x128] ss:$36 sps:$4 sm:$0xff]   ;;  %v20278_v58 = vld [vmem:[#allocation4 + $0x360] ss:$36 sps:$4 sm:$0xff]   ;;  %v20284_v63 = vld [vmem:[#allocation4 + $0x318] ss:$36 sps:$4 sm:$0xff]  }
  0x79   : > { %v23200_v60 = vld [vmem:[#allocation2 + $0x4] ss:$12 sps:$4 sm:$0xff]   ;;  %v20283_v61 = vld [vmem:[#allocation4 + $0xe4] ss:$36 sps:$4 sm:$0xff]   ;;  %v20287_v2 = vld [vmem:[#allocation4 + $0x98] ss:$36 sps:$4 sm:$0xff]  }
  0x7a   : > { %1778 = vmatpush1.bf16.msra.mxu0 %v20234_v28  ;;  %1801 = vmatprep.mubr.bf16.mxu0 %v23200_v60  ;;  %v20281_v62 = vld [vmem:[#allocation4 + $0xe0] ss:$36 sps:$4 sm:$0xff]   ;;  %v20290_v3 = vld [vmem:[#allocation4 + $0x2d0] ss:$36 sps:$4 sm:$0xff]   ;;  %v20296_v11 = vld [vmem:[#allocation4 + $0x288] ss:$36 sps:$4 sm:$0xff]  }
  0x7b   : > { %1831 = vmatpush1.bf16.msra.mxu1 %v20235_v29  ;;  %1779 = vmatprep.subr.bf16.mxu0 %v20236_v30  ;;  %v20289_v1 = vld [vmem:[#allocation4 + $0x9c] ss:$36 sps:$4 sm:$0xff]   ;;  %v20291_v5 = vld [vmem:[#allocation4 + $0x28c] ss:$36 sps:$4 sm:$0xff]   ;;  %v20295_v6 = vld [vmem:[#allocation4 + $0x54] ss:$36 sps:$4 sm:$0xff]  }
  0x7c   : > { %1832 = vmatprep.subr.bf16.mxu1 %v20238_v31  ;;  %v23203_v4 = vld [vmem:[#allocation2 + $0x20] ss:$12 sps:$4 sm:$0xff]   ;;  %v20297_v12 = vld [vmem:[#allocation4 + $0x244] ss:$36 sps:$4 sm:$0xff]   ;;  %v23209_v23 = vld [vmem:[#allocation2 + $0x1c] ss:$12 sps:$4 sm:$0xff]  }
  0x7d   : > { %v20293_v10 = vld [vmem:[#allocation4 + $0x50] ss:$36 sps:$4 sm:$0xff]   ;;  %v20299_v14 = vld [vmem:[#allocation4 + $0x8] ss:$36 sps:$4 sm:$0xff]   ;;  %v20302_v15 = vld [vmem:[#allocation4 + $0x240] ss:$36 sps:$4 sm:$0xff]  }
  0x7e   : > { %1780 = vmatpush1.bf16.msra.mxu0 %v20240_v32  ;;  %v20301_v13 = vld [vmem:[#allocation4 + $0xc] ss:$36 sps:$4 sm:$0xff]   ;;  %v20308_v16 = vld [vmem:[#allocation4 + $0x444] ss:$36 sps:$4 sm:$0xff]   ;;  %v20314_v21 = vld [vmem:[#allocation4 + $0x3fc] ss:$36 sps:$4 sm:$0xff]  }
  0x7f   : > { %1833 = vmatpush1.bf16.msra.mxu1 %v20241_v33  ;;  %1781 = vmatprep.subr.bf16.mxu0 %v20242_v34  ;;  %v20311_v17 = vld [vmem:[#allocation4 + $0x684] ss:$36 sps:$4 sm:$0xff]   ;;  %v23207_v18 = vld [vmem:[#allocation2] ss:$12 sps:$4 sm:$0xff]   ;;  %v20324_v26 = vld [vmem:[#allocation4 + $0x3b4] ss:$36 sps:$4 sm:$0xff]  }
  0x80   : > { %1834 = vmatprep.subr.bf16.mxu1 %v20244_v35  ;;  %v20306_v19 = vld [vmem:[#allocation4 + $0x440] ss:$36 sps:$4 sm:$0xff]   ;;  %v20312_v24 = vld [vmem:[#allocation4 + $0x3f8] ss:$36 sps:$4 sm:$0xff]   ;;  %v23213_v28 = vld [vmem:[#allocation2 + $0x18] ss:$12 sps:$4 sm:$0xff]  }
  0x81   : > { %v20309_v20 = vld [vmem:[#allocation4 + $0x680] ss:$36 sps:$4 sm:$0xff]   ;;  %v20315_v25 = vld [vmem:[#allocation4 + $0x638] ss:$36 sps:$4 sm:$0xff]   ;;  %v20322_v29 = vld [vmem:[#allocation4 + $0x3b0] ss:$36 sps:$4 sm:$0xff]  }
  0x82   : > { %1782 = vmatpush1.bf16.msra.mxu0 %v20246_v36  ;;  %v20317_v22 = vld [vmem:[#allocation4 + $0x63c] ss:$36 sps:$4 sm:$0xff]   ;;  %v20327_v27 = vld [vmem:[#allocation4 + $0x5f4] ss:$36 sps:$4 sm:$0xff]   ;;  %v20330_v31 = vld [vmem:[#allocation4 + $0x36c] ss:$36 sps:$4 sm:$0xff]  }
  0x83   : > { %1835 = vmatpush1.bf16.msra.mxu1 %v20247_v37  ;;  %1783 = vmatprep.subr.bf16.mxu0 %v20248_v38  ;;  %v20325_v30 = vld [vmem:[#allocation4 + $0x5f0] ss:$36 sps:$4 sm:$0xff]   ;;  %v20328_v33 = vld [vmem:[#allocation4 + $0x368] ss:$36 sps:$4 sm:$0xff]   ;;  %v20334_v37 = vld [vmem:[#allocation4 + $0x320] ss:$36 sps:$4 sm:$0xff]  }
  0x84   : > { %1836 = vmatprep.subr.bf16.mxu1 %v20250_v39  ;;  %v20333_v32 = vld [vmem:[#allocation4 + $0x5ac] ss:$36 sps:$4 sm:$0xff]   ;;  %v20336_v35 = vld [vmem:[#allocation4 + $0x324] ss:$36 sps:$4 sm:$0xff]   ;;  %v20342_v39 = vld [vmem:[#allocation4 + $0x2dc] ss:$36 sps:$4 sm:$0xff]  }
  0x85   : > { %v20331_v34 = vld [vmem:[#allocation4 + $0x5a8] ss:$36 sps:$4 sm:$0xff]   ;;  %v20337_v38 = vld [vmem:[#allocation4 + $0x560] ss:$36 sps:$4 sm:$0xff]   ;;  %vm2348_vm3 = vcmp.lt.s32.totalorder %v23188_v7, 7 }
  0x86   : > { %1784 = vmatpush1.bf16.msra.mxu0 %v20252_v40  ;;  %v20339_v36 = vld [vmem:[#allocation4 + $0x564] ss:$36 sps:$4 sm:$0xff]   ;;  %v20345_v40 = vld [vmem:[#allocation4 + $0x51c] ss:$36 sps:$4 sm:$0xff]  }
  0x87   : > { %1837 = vmatpush1.bf16.msra.mxu1 %v20253_v41  ;;  %1785 = vmatprep.subr.bf16.mxu0 %v20254_v42  ;;  %v20340_v41 = vld [vmem:[#allocation4 + $0x2d8] ss:$36 sps:$4 sm:$0xff]  }
  0x88   : > { %1875 = vmatprep.subr.bf16.mxu1 %v20258_v43  ;;  %v20343_v42 = vld [vmem:[#allocation4 + $0x518] ss:$36 sps:$4 sm:$0xff]  }
  0x89   : > { %v20348_v43 = vld [vmem:[#allocation4 + $0x294] ss:$36 sps:$4 sm:$0xff]  }
  0x8a   : > { %1855 = vmatmul.mubr.bf16.vlgmr.msra.gmra.mxu1 %v23196_v44  ;;  %1786 = vmatpush2.bf16.msra.mxu0 %v20259_v46  ;;  %v20346_v46 = vld [vmem:[#allocation4 + $0x290] ss:$36 sps:$4 sm:$0xff]  }
  0x8b   : > { %1876 = vmatpush1.bf16.msra.mxu1 %v20256_v45  ;;  %1787 = vmatprep.subr.bf16.mxu0 %v20261_v47  ;;  %v20351_v45 = vld [vmem:[#allocation4 + $0x4d4] ss:$36 sps:$4 sm:$0xff]  }
  0x8c   : > { %1877 = vmatprep.subr.bf16.mxu1 %v20265_v48  ;;  %1864 = vmatprep.mubr.bf16.mxu1 %v24879_v9  ;;  %v20349_v47 = vld [vmem:[#allocation4 + $0x4d0] ss:$36 sps:$4 sm:$0xff]  }
  0x8d   : > { %v20354_v48 = vld [vmem:[#allocation4 + $0x24c] ss:$36 sps:$4 sm:$0xff]  }
  0x8e   : > { %1788 = vmatpush2.bf16.msra.mxu0 %v20266_v50  ;;  %v20352_v50 = vld [vmem:[#allocation4 + $0x248] ss:$36 sps:$4 sm:$0xff]  }
  0x8f   : > { %1878 = vmatpush1.bf16.msra.mxu1 %v20263_v49  ;;  %1789 = vmatprep.subr.bf16.mxu0 %v20267_v51  ;;  %v20357_v49 = vld [vmem:[#allocation4 + $0x48c] ss:$36 sps:$4 sm:$0xff]  }
  0x90   : > { %1879 = vmatprep.subr.bf16.mxu1 %v20271_v52  ;;  %v20355_v51 = vld [vmem:[#allocation4 + $0x488] ss:$36 sps:$4 sm:$0xff]  }
  0x91   : > { %v20360_v52 = vld [vmem:[#allocation4 + $0x20c] ss:$36 sps:$4 sm:$0xff]  }
  0x92   : > { %1790 = vmatpush2.bf16.msra.mxu0 %v20272_v54  ;;  %1865 = vmatmul.mubr.bf16.gmra.mxu1 %v23203_v4  ;;  %v20358_v54 = vld [vmem:[#allocation4 + $0x208] ss:$36 sps:$4 sm:$0xff]  }
  0x93   : > { %1880 = vmatpush1.bf16.msra.mxu1 %v20269_v53  ;;  %1791 = vmatprep.subr.bf16.mxu0 %v20273_v55  ;;  %v20363_v53 = vld [vmem:[#allocation4 + $0x68c] ss:$36 sps:$4 sm:$0xff]  }
  0x94   : > { %1881 = vmatprep.subr.bf16.mxu1 %v20277_v56  ;;  %1907 = vmatprep.mubr.bf16.mxu1 %v23200_v60  ;;  %v20361_v55 = vld [vmem:[#allocation4 + $0x688] ss:$36 sps:$4 sm:$0xff]  }
  0x95   : > { %v20366_v56 = vld [vmem:[#allocation4 + $0x1c4] ss:$36 sps:$4 sm:$0xff]  }
  0x96   : > { %1792 = vmatpush2.bf16.msra.mxu0 %v20278_v58  ;;  %v20364_v58 = vld [vmem:[#allocation4 + $0x1c0] ss:$36 sps:$4 sm:$0xff]  }
  0x97   : > { %1882 = vmatpush1.bf16.msra.mxu1 %v20275_v57  ;;  %1793 = vmatprep.subr.bf16.mxu0 %v20279_v59  ;;  %v20369_v57 = vld [vmem:[#allocation4 + $0x644] ss:$36 sps:$4 sm:$0xff]  }
  0x98   : > { %1883 = vmatprep.subr.bf16.mxu1 %v20283_v61  ;;  %v20367_v59 = vld [vmem:[#allocation4 + $0x640] ss:$36 sps:$4 sm:$0xff]  }
  0x99   : > { %v20372_v61 = vld [vmem:[#allocation4 + $0x17c] ss:$36 sps:$4 sm:$0xff]  }
  0x9a   : > { %1794 = vmatpush2.bf16.msra.mxu0 %v20284_v63  ;;  %v20370_v63 = vld [vmem:[#allocation4 + $0x178] ss:$36 sps:$4 sm:$0xff]  }
  0x9b   : > { %1884 = vmatpush1.bf16.msra.mxu1 %v20281_v62  ;;  %1795 = vmatprep.subr.bf16.mxu0 %v20285_v0  ;;  %v20375_v62 = vld [vmem:[#allocation4 + $0x5fc] ss:$36 sps:$4 sm:$0xff]  }
  0x9c   : > { %1885 = vmatprep.subr.bf16.mxu1 %v20289_v1  ;;  %v20373_v0 = vld [vmem:[#allocation4 + $0x5f8] ss:$36 sps:$4 sm:$0xff]  }
  0x9d   : > { %v20378_v1 = vld [vmem:[#allocation4 + $0x134] ss:$36 sps:$4 sm:$0xff]  }
  0x9e   : > { %1796 = vmatpush2.bf16.msra.mxu0 %v20290_v3  ;;  %v20376_v3 = vld [vmem:[#allocation4 + $0x130] ss:$36 sps:$4 sm:$0xff]  }
  0x9f   : > { %1886 = vmatpush1.bf16.msra.mxu1 %v20287_v2  ;;  %1797 = vmatprep.subr.bf16.mxu0 %v20291_v5  ;;  %v20381_v2 = vld [vmem:[#allocation4 + $0x5b4] ss:$36 sps:$4 sm:$0xff]  }
  0xa0   : > { %1887 = vmatprep.subr.bf16.mxu1 %v20295_v6  ;;  %v20379_v5 = vld [vmem:[#allocation4 + $0x5b0] ss:$36 sps:$4 sm:$0xff]  }
  0xa1   : > { %v20384_v6 = vld [vmem:[#allocation4 + $0xec] ss:$36 sps:$4 sm:$0xff]  }
  0xa2   : > { %1798 = vmatpush2.bf16.msra.mxu0 %v20296_v11  ;;  %v20382_v11 = vld [vmem:[#allocation4 + $0xe8] ss:$36 sps:$4 sm:$0xff]  }
  0xa3   : > { %1888 = vmatpush1.bf16.msra.mxu1 %v20293_v10  ;;  %1799 = vmatprep.subr.bf16.mxu0 %v20297_v12  ;;  %v20387_v10 = vld [vmem:[#allocation4 + $0x56c] ss:$36 sps:$4 sm:$0xff]  }
  0xa4   : > { %1889 = vmatprep.subr.bf16.mxu1 %v20301_v13  ;;  %v20385_v12 = vld [vmem:[#allocation4 + $0x568] ss:$36 sps:$4 sm:$0xff]  }
  0xa5   : > { %v20390_v13 = vld [vmem:[#allocation4 + $0xa4] ss:$36 sps:$4 sm:$0xff]  }
  0xa6   : > { %1800 = vmatpush2.bf16.msra.mxu0 %v20302_v15  ;;  %v20388_v15 = vld [vmem:[#allocation4 + $0xa0] ss:$36 sps:$4 sm:$0xff]  }
  0xa7   : > { %1890 = vmatpush1.bf16.msra.mxu1 %v20299_v14  ;;  %1928 = vmatprep.subr.bf16.mxu0 %v20311_v17  ;;  %v20393_v14 = vld [vmem:[#allocation4 + $0x524] ss:$36 sps:$4 sm:$0xff]   ;;  %v20396_v17 = vld [vmem:[#allocation4 + $0x5c] ss:$36 sps:$4 sm:$0xff]  }
  0xa8   : > { %1891 = vmatprep.subr.bf16.mxu1 %v20308_v16  ;;  %v20391_v16 = vld [vmem:[#allocation4 + $0x520] ss:$36 sps:$4 sm:$0xff]  }
  0xa9   : > { %1802 = vmatmul.mubr.bf16.vlgmr.msra.gmra.mxu0 %v23207_v18 }
  0xaa   : > { %1929 = vmatpush1.bf16.msra.mxu0 %v20309_v20  ;;  %1811 = vmatprep.mubr.bf16.mxu0 %v23209_v23  ;;  %v20394_v20 = vld [vmem:[#allocation4 + $0x58] ss:$36 sps:$4 sm:$0xff]  }
  0xab   : > { %1892 = vmatpush2.bf16.msra.mxu1 %v20306_v19  ;;  %1930 = vmatprep.subr.bf16.mxu0 %v20317_v22  ;;  %v20399_v19 = vld [vmem:[#allocation4 + $0x4dc] ss:$36 sps:$4 sm:$0xff]   ;;  %v20402_v22 = vld [vmem:[#allocation4 + $0x14] ss:$36 sps:$4 sm:$0xff]  }
  0xac   : > { %1893 = vmatprep.subr.bf16.mxu1 %v20314_v21  ;;  %v20397_v21 = vld [vmem:[#allocation4 + $0x4d8] ss:$36 sps:$4 sm:$0xff]  }
  0xae   : > { %1931 = vmatpush1.bf16.msra.mxu0 %v20315_v25  ;;  %v20400_v25 = vld [vmem:[#allocation4 + $0x10] ss:$36 sps:$4 sm:$0xff]  }
  0xaf   : > { %1894 = vmatpush2.bf16.msra.mxu1 %v20312_v24  ;;  %1932 = vmatprep.subr.bf16.mxu0 %v20327_v27  ;;  %v20405_v24 = vld [vmem:[#allocation4 + $0x494] ss:$36 sps:$4 sm:$0xff]   ;;  %v20408_v27 = vld [vmem:[#allocation4 + $0x44c] ss:$36 sps:$4 sm:$0xff]  }
  0xb0   : > { %1895 = vmatprep.subr.bf16.mxu1 %v20324_v26  ;;  %v20403_v26 = vld [vmem:[#allocation4 + $0x490] ss:$36 sps:$4 sm:$0xff]  }
  0xb1   : > { %1812 = vmatmul.mubr.bf16.gmra.mxu0 %v23213_v28 }
  0xb2   : > { %1933 = vmatpush1.bf16.msra.mxu0 %v20325_v30  ;;  %1960 = vmatprep.mubr.bf16.mxu0 %v24879_v9  ;;  %v20406_v30 = vld [vmem:[#allocation4 + $0x448] ss:$36 sps:$4 sm:$0xff]  }
  0xb3   : > { %1896 = vmatpush2.bf16.msra.mxu1 %v20322_v29  ;;  %1934 = vmatprep.subr.bf16.mxu0 %v20333_v32  ;;  %v20411_v29 = vld [vmem:[#allocation4 + $0x214] ss:$36 sps:$4 sm:$0xff]   ;;  %v20414_v32 = vld [vmem:[#allocation4 + $0x404] ss:$36 sps:$4 sm:$0xff]  }
  0xb4   : > { %1897 = vmatprep.subr.bf16.mxu1 %v20330_v31  ;;  %v20409_v31 = vld [vmem:[#allocation4 + $0x210] ss:$36 sps:$4 sm:$0xff]  }
  0xb6   : > { %1935 = vmatpush1.bf16.msra.mxu0 %v20331_v34  ;;  %v20412_v34 = vld [vmem:[#allocation4 + $0x400] ss:$36 sps:$4 sm:$0xff]  }
  0xb7   : > { %1898 = vmatpush2.bf16.msra.mxu1 %v20328_v33  ;;  %1936 = vmatprep.subr.bf16.mxu0 %v20339_v36  ;;  %v20417_v33 = vld [vmem:[#allocation4 + $0x1cc] ss:$36 sps:$4 sm:$0xff]   ;;  %v20420_v36 = vld [vmem:[#allocation4 + $0x3bc] ss:$36 sps:$4 sm:$0xff]  }
  0xb8   : > { %1899 = vmatprep.subr.bf16.mxu1 %v20336_v35  ;;  %v20415_v35 = vld [vmem:[#allocation4 + $0x1c8] ss:$36 sps:$4 sm:$0xff]  }
  0xba   : > { %1937 = vmatpush1.bf16.msra.mxu0 %v20337_v38  ;;  %v20418_v38 = vld [vmem:[#allocation4 + $0x3b8] ss:$36 sps:$4 sm:$0xff]  }
  0xbb   : > { %1900 = vmatpush2.bf16.msra.mxu1 %v20334_v37  ;;  %1938 = vmatprep.subr.bf16.mxu0 %v20345_v40  ;;  %v20423_v37 = vld [vmem:[#allocation4 + $0x184] ss:$36 sps:$4 sm:$0xff]   ;;  %v20426_v40 = vld [vmem:[#allocation4 + $0x374] ss:$36 sps:$4 sm:$0xff]  }
  0xbc   : > { %1901 = vmatprep.subr.bf16.mxu1 %v20342_v39  ;;  %v20421_v39 = vld [vmem:[#allocation4 + $0x180] ss:$36 sps:$4 sm:$0xff]  }
  0xbe   : > { %1939 = vmatpush1.bf16.msra.mxu0 %v20343_v42  ;;  %v20424_v42 = vld [vmem:[#allocation4 + $0x370] ss:$36 sps:$4 sm:$0xff]  }
  0xbf   : > { %1902 = vmatpush2.bf16.msra.mxu1 %v20340_v41  ;;  %1940 = vmatprep.subr.bf16.mxu0 %v20351_v45  ;;  %v20429_v41 = vld [vmem:[#allocation4 + $0x13c] ss:$36 sps:$4 sm:$0xff]   ;;  %v20435_v45 = vld [vmem:[#allocation4 + $0xf4] ss:$36 sps:$4 sm:$0xff]  }
  0xc0   : > { %1903 = vmatprep.subr.bf16.mxu1 %v20348_v43  ;;  %v20432_v43 = vld [vmem:[#allocation4 + $0x32c] ss:$36 sps:$4 sm:$0xff]  }
  0xc2   : > { %1941 = vmatpush1.bf16.msra.mxu0 %v20349_v47  ;;  %v20433_v47 = vld [vmem:[#allocation4 + $0xf0] ss:$36 sps:$4 sm:$0xff]  }
  0xc3   : > { %1904 = vmatpush2.bf16.msra.mxu1 %v20346_v46  ;;  %1942 = vmatprep.subr.bf16.mxu0 %v20357_v49  ;;  %v20430_v46 = vld [vmem:[#allocation4 + $0x328] ss:$36 sps:$4 sm:$0xff]  }
  0xc4   : > { %1905 = vmatprep.subr.bf16.mxu1 %v20354_v48  ;;  %v20438_v48 = vld [vmem:[#allocation4 + $0x2e4] ss:$36 sps:$4 sm:$0xff]   ;;  %v20441_v49 = vld [vmem:[#allocation4 + $0xac] ss:$36 sps:$4 sm:$0xff]  }
  0xc6   : > { %1943 = vmatpush1.bf16.msra.mxu0 %v20355_v51  ;;  %v20439_v51 = vld [vmem:[#allocation4 + $0xa8] ss:$36 sps:$4 sm:$0xff]  }
  0xc7   : > { %1906 = vmatpush2.bf16.msra.mxu1 %v20352_v50  ;;  %1981 = vmatprep.subr.bf16.mxu0 %v20360_v52  ;;  %v20436_v50 = vld [vmem:[#allocation4 + $0x2e0] ss:$36 sps:$4 sm:$0xff]  }
  0xc8   : > { %2034 = vmatprep.subr.bf16.mxu1 %v20363_v53  ;;  %v20447_v52 = vld [vmem:[#allocation4 + $0x64] ss:$36 sps:$4 sm:$0xff]   ;;  %v20442_v53 = vld [vmem:[#allocation4 + $0x298] ss:$36 sps:$4 sm:$0xff]  }
  0xc9   : > { %1961 = vmatmul.mubr.bf16.vlgmr.msra.gmra.mxu0 %v23196_v44 }
  0xca   : > { %1908 = vmatmul.mubr.bf16.vlgmr.msra.gmra.mxu1 %v23207_v18  ;;  %1982 = vmatpush1.bf16.msra.mxu0 %v20358_v54  ;;  %v20445_v54 = vld [vmem:[#allocation4 + $0x60] ss:$36 sps:$4 sm:$0xff]  }
  0xcb   : > { %2035 = vmatpush1.bf16.msra.mxu1 %v20361_v55  ;;  %1983 = vmatprep.subr.bf16.mxu0 %v20366_v56  ;;  %v20453_v55 = vld [vmem:[#allocation4 + $0x1c] ss:$36 sps:$4 sm:$0xff]   ;;  %v20448_v56 = vld [vmem:[#allocation4 + $0x250] ss:$36 sps:$4 sm:$0xff]  }
  0xcc   : > { %2036 = vmatprep.subr.bf16.mxu1 %v20369_v57  ;;  %1917 = vmatprep.mubr.bf16.mxu1 %v23209_v23  ;;  %v20451_v57 = vld [vmem:[#allocation4 + $0x18] ss:$36 sps:$4 sm:$0xff]  }
  0xcd   : > { %1970 = vmatprep.mubr.bf16.mxu0 %v24879_v9 }
  0xce   : > { %1984 = vmatpush1.bf16.msra.mxu0 %v20364_v58  ;;  %v20456_v58 = vld [vmem:[#allocation4 + $0x454] ss:$36 sps:$4 sm:$0xff]  }
  0xcf   : > { %2037 = vmatpush1.bf16.msra.mxu1 %v20367_v59  ;;  %1985 = vmatprep.subr.bf16.mxu0 %v20372_v61  ;;  %v20459_v59 = vld [vmem:[#allocation4 + $0x694] ss:$36 sps:$4 sm:$0xff]  }
  0xd0   : > { %2038 = vmatprep.subr.bf16.mxu1 %v20375_v62  ;;  %v20454_v61 = vld [vmem:[#allocation4 + $0x450] ss:$36 sps:$4 sm:$0xff]  }
  0xd1   : > { %1971 = vmatmul.mubr.bf16.gmra.mxu0 %v23203_v4  ;;  %v20457_v62 = vld [vmem:[#allocation4 + $0x690] ss:$36 sps:$4 sm:$0xff]  }
  0xd2   : > { %1918 = vmatmul.mubr.bf16.gmra.mxu1 %v23213_v28  ;;  %1986 = vmatpush1.bf16.msra.mxu0 %v20370_v63  ;;  %v20462_v63 = vld [vmem:[#allocation4 + $0x40c] ss:$36 sps:$4 sm:$0xff]  }
  0xd3   : > { %2039 = vmatpush1.bf16.msra.mxu1 %v20373_v0  ;;  %1987 = vmatprep.subr.bf16.mxu0 %v20378_v1  ;;  %v20465_v0 = vld [vmem:[#allocation4 + $0x64c] ss:$36 sps:$4 sm:$0xff]  }
  0xd4   : > { %2040 = vmatprep.subr.bf16.mxu1 %v20381_v2  ;;  %2066 = vmatprep.mubr.bf16.mxu1 %v24879_v9  ;;  %v20460_v1 = vld [vmem:[#allocation4 + $0x408] ss:$36 sps:$4 sm:$0xff]  }
  0xd5   : > { %2013 = vmatprep.mubr.bf16.mxu0 %v23200_v60  ;;  %v20463_v2 = vld [vmem:[#allocation4 + $0x648] ss:$36 sps:$4 sm:$0xff]  }
  0xd6   : > { %1988 = vmatpush1.bf16.msra.mxu0 %v20376_v3  ;;  %v20468_v3 = vld [vmem:[#allocation4 + $0x3c4] ss:$36 sps:$4 sm:$0xff]  }
  0xd7   : > { %2041 = vmatpush1.bf16.msra.mxu1 %v20379_v5  ;;  %1989 = vmatprep.subr.bf16.mxu0 %v20384_v6  ;;  %v20471_v5 = vld [vmem:[#allocation4 + $0x604] ss:$36 sps:$4 sm:$0xff]  }
  0xd8   : > { %2042 = vmatprep.subr.bf16.mxu1 %v20387_v10  ;;  %v20466_v6 = vld [vmem:[#allocation4 + $0x3c0] ss:$36 sps:$4 sm:$0xff]  }
  0xd9   : > { %v20469_v10 = vld [vmem:[#allocation4 + $0x600] ss:$36 sps:$4 sm:$0xff]  }
  0xda   : > { %1990 = vmatpush1.bf16.msra.mxu0 %v20382_v11  ;;  %v20474_v11 = vld [vmem:[#allocation4 + $0x37c] ss:$36 sps:$4 sm:$0xff]  }
  0xdb   : > { %2043 = vmatpush1.bf16.msra.mxu1 %v20385_v12  ;;  %1991 = vmatprep.subr.bf16.mxu0 %v20390_v13  ;;  %v20477_v12 = vld [vmem:[#allocation4 + $0x5bc] ss:$36 sps:$4 sm:$0xff]  }
  0xdc   : > { %2044 = vmatprep.subr.bf16.mxu1 %v20393_v14  ;;  %v20472_v13 = vld [vmem:[#allocation4 + $0x378] ss:$36 sps:$4 sm:$0xff]  }
  0xdd   : > { %v20475_v14 = vld [vmem:[#allocation4 + $0x5b8] ss:$36 sps:$4 sm:$0xff]  }
  0xde   : > { %1992 = vmatpush1.bf16.msra.mxu0 %v20388_v15  ;;  %v20483_v15 = vld [vmem:[#allocation4 + $0x574] ss:$36 sps:$4 sm:$0xff]  }
  0xdf   : > { %2045 = vmatpush1.bf16.msra.mxu1 %v20391_v16  ;;  %1993 = vmatprep.subr.bf16.mxu0 %v20396_v17  ;;  %v20478_v16 = vld [vmem:[#allocation4 + $0x330] ss:$36 sps:$4 sm:$0xff]  }
  0xe0   : > { %2046 = vmatprep.subr.bf16.mxu1 %v20399_v19  ;;  %v20486_v17 = vld [vmem:[#allocation4 + $0x2ec] ss:$36 sps:$4 sm:$0xff]  }
  0xe1   : > { %v20489_v19 = vld [vmem:[#allocation4 + $0x52c] ss:$36 sps:$4 sm:$0xff]  }
  0xe2   : > { %1994 = vmatpush1.bf16.msra.mxu0 %v20394_v20  ;;  %v20484_v20 = vld [vmem:[#allocation4 + $0x2e8] ss:$36 sps:$4 sm:$0xff]  }
  0xe3   : > { %2047 = vmatpush1.bf16.msra.mxu1 %v20397_v21  ;;  %1995 = vmatprep.subr.bf16.mxu0 %v20402_v22  ;;  %v20487_v21 = vld [vmem:[#allocation4 + $0x528] ss:$36 sps:$4 sm:$0xff]  }
  0xe4   : > { %2048 = vmatprep.subr.bf16.mxu1 %v20405_v24  ;;  %v20492_v22 = vld [vmem:[#allocation4 + $0x2a4] ss:$36 sps:$4 sm:$0xff]  }
  0xe5   : > { %v20490_v24 = vld [vmem:[#allocation4 + $0x2a0] ss:$36 sps:$4 sm:$0xff]  }
  0xe6   : > { %1996 = vmatpush1.bf16.msra.mxu0 %v20400_v25  ;;  %v20493_v25 = vld [vmem:[#allocation4 + $0x4e0] ss:$36 sps:$4 sm:$0xff]  }
  0xe7   : > { %2049 = vmatpush1.bf16.msra.mxu1 %v20403_v26  ;;  %1997 = vmatprep.subr.bf16.mxu0 %v20408_v27  ;;  %v20498_v26 = vld [vmem:[#allocation4 + $0x25c] ss:$36 sps:$4 sm:$0xff]  }
  0xe8   : > { %2087 = vmatprep.subr.bf16.mxu1 %v20411_v29  ;;  %v20501_v27 = vld [vmem:[#allocation4 + $0x49c] ss:$36 sps:$4 sm:$0xff]  }
  0xe9   : > { %v20496_v29 = vld [vmem:[#allocation4 + $0x258] ss:$36 sps:$4 sm:$0xff]  }
  0xea   : > { %2067 = vmatmul.mubr.bf16.vlgmr.msra.gmra.mxu1 %v23196_v44  ;;  %1998 = vmatpush2.bf16.msra.mxu0 %v20406_v30  ;;  %v20427_v44 = vld [vmem:[#allocation4 + $0x138] ss:$36 sps:$4 sm:$0xff]  }
  0xeb   : > { %2088 = vmatpush1.bf16.msra.mxu1 %v20409_v31  ;;  %1999 = vmatprep.subr.bf16.mxu0 %v20414_v32  ;;  %v20499_v30 = vld [vmem:[#allocation4 + $0x498] ss:$36 sps:$4 sm:$0xff]  }
  0xec   : > { %2089 = vmatprep.subr.bf16.mxu1 %v20417_v33  ;;  %2076 = vmatprep.mubr.bf16.mxu1 %v24879_v9  ;;  %v20502_v31 = vld [vmem:[#allocation4 + $0x458] ss:$36 sps:$4 sm:$0xff]  }
  0xed   : > { %v20503_v32 = vld [vmem:[#allocation4 + $0x698] ss:$36 sps:$4 sm:$0xff]  }
  0xee   : > { %2000 = vmatpush2.bf16.msra.mxu0 %v20412_v34  ;;  %v20504_v33 = vld [vmem:[#allocation4 + $0x218] ss:$36 sps:$4 sm:$0xff]   ;;  %v20505_v34 = vld [vmem:[#allocation4 + $0x410] ss:$36 sps:$4 sm:$0xff]  }
  0xef   : > { %2090 = vmatpush1.bf16.msra.mxu1 %v20415_v35  ;;  %2001 = vmatprep.subr.bf16.mxu0 %v20420_v36  ;;  %v20506_v35 = vld [vmem:[#allocation4 + $0x650] ss:$36 sps:$4 sm:$0xff]  }
  0xf0   : > { %2091 = vmatprep.subr.bf16.mxu1 %v20423_v37  ;;  %v20507_v36 = vld [vmem:[#allocation4 + $0x1d0] ss:$36 sps:$4 sm:$0xff]  }
  0xf1   : > { %v23233_v37 = vld [vmem:[#allocation2] ss:$12 sps:$4 sm:$0xff]  }
  0xf2   : > { %2077 = vmatmul.mubr.bf16.gmra.mxu1 %v23203_v4  ;;  %2002 = vmatpush2.bf16.msra.mxu0 %v20418_v38  ;;  %v20444_v4 = vld [vmem:[#allocation4 + $0x29c] ss:$36 sps:$4 sm:$0xff]   ;;  %v22863_v38 = vld [vmem:[#allocation2 + $0x8] ss:$12 sps:$4 sm:$0xff]  }
  0xf3   : > { %2092 = vmatpush1.bf16.msra.mxu1 %v20421_v39  ;;  %2003 = vmatprep.subr.bf16.mxu0 %v20426_v40  ;;  %v20508_v39 = vld [vmem:[#allocation4 + $0x3c8] ss:$36 sps:$4 sm:$0xff]  }
  0xf4   : > { %2093 = vmatprep.subr.bf16.mxu1 %v20429_v41  ;;  %2119 = vmatprep.mubr.bf16.mxu1 %v23200_v60  ;;  %v20450_v60 = vld [vmem:[#allocation4 + $0x254] ss:$36 sps:$4 sm:$0xff]   ;;  %v20509_v40 = vld [vmem:[#allocation4 + $0x608] ss:$36 sps:$4 sm:$0xff]  }
  0xf5   : > { %v22864_v41 = vld [vmem:[#allocation2 + $0x1c] ss:$12 sps:$4 sm:$0xff]  }
  0xf6   : > { %2004 = vmatpush2.bf16.msra.mxu0 %v20424_v42  ;;  %v20510_v42 = vld [vmem:[#allocation4 + $0x188] ss:$36 sps:$4 sm:$0xff]  }
  0xf7   : > { %2094 = vmatpush1.bf16.msra.mxu1 %v20427_v44  ;;  %2005 = vmatprep.subr.bf16.mxu0 %v20432_v43  ;;  %v20511_v44 = vld [vmem:[#allocation4 + $0x380] ss:$36 sps:$4 sm:$0xff]  }
  0xf8   : > { %2095 = vmatprep.subr.bf16.mxu1 %v20435_v45  ;;  %v20512_v43 = vld [vmem:[#allocation4 + $0x5c0] ss:$36 sps:$4 sm:$0xff]  }
  0xf9   : > { %v20513_v45 = vld [vmem:[#allocation4 + $0x140] ss:$36 sps:$4 sm:$0xff]  }
  0xfa   : > { %2006 = vmatpush2.bf16.msra.mxu0 %v20430_v46  ;;  %v22865_v46 = vld [vmem:[#allocation2 + $0x18] ss:$12 sps:$4 sm:$0xff]  }
  0xfb   : > { %2096 = vmatpush1.bf16.msra.mxu1 %v20433_v47  ;;  %2007 = vmatprep.subr.bf16.mxu0 %v20438_v48  ;;  %v22866_v47 = vld [vmem:[#allocation2 + $0x20] ss:$12 sps:$4 sm:$0xff]  }
  0xfc   : > { %2097 = vmatprep.subr.bf16.mxu1 %v20441_v49  ;;  %v20514_v48 = vld [vmem:[#allocation4 + $0x338] ss:$36 sps:$4 sm:$0xff]  }
  0xfd   : > { %v20515_v49 = vld [vmem:[#allocation4 + $0x578] ss:$36 sps:$4 sm:$0xff]  }
  0xfe   : > { %2008 = vmatpush2.bf16.msra.mxu0 %v20436_v50  ;;  %v20516_v50 = vld [vmem:[#allocation4 + $0xf8] ss:$36 sps:$4 sm:$0xff]  }
  0xff   : > { %2098 = vmatpush1.bf16.msra.mxu1 %v20439_v51  ;;  %2009 = vmatprep.subr.bf16.mxu0 %v20444_v4  ;;  %v22867_v51 = vld [vmem:[#allocation2 + $0x4] ss:$12 sps:$4 sm:$0xff]  }
 0x100   : > { %2099 = vmatprep.subr.bf16.mxu1 %v20447_v52  ;;  %v20517_v4 = vld [vmem:[#allocation4 + $0x2f0] ss:$36 sps:$4 sm:$0xff]  }
 0x101   : > { %v20518_v52 = vld [vmem:[#allocation4 + $0x530] ss:$36 sps:$4 sm:$0xff]  }
 0x102   : > { %2010 = vmatpush2.bf16.msra.mxu0 %v20442_v53  ;;  %v20519_v53 = vld [vmem:[#allocation4 + $0xb0] ss:$36 sps:$4 sm:$0xff]  }
 0x103   : > { %2100 = vmatpush1.bf16.msra.mxu1 %v20445_v54  ;;  %2011 = vmatprep.subr.bf16.mxu0 %v20450_v60  ;;  %v20520_v54 = vld [vmem:[#allocation4 + $0x2a8] ss:$36 sps:$4 sm:$0xff]  }
 0x104   : > { %2101 = vmatprep.subr.bf16.mxu1 %v20453_v55  ;;  %v20521_v60 = vld [vmem:[#allocation4 + $0x4e8] ss:$36 sps:$4 sm:$0xff]  }
 0x105   : > { %v20522_v55 = vld [vmem:[#allocation4 + $0x68] ss:$36 sps:$4 sm:$0xff]  }
 0x106   : > { %2012 = vmatpush2.bf16.msra.mxu0 %v20448_v56  ;;  %v20523_v56 = vld [vmem:[#allocation4 + $0x260] ss:$36 sps:$4 sm:$0xff]  }
 0x107   : > { %2102 = vmatpush1.bf16.msra.mxu1 %v20451_v57  ;;  %2140 = vmatprep.subr.bf16.mxu0 %v20459_v59  ;;  %v20524_v57 = vld [vmem:[#allocation4 + $0x4a0] ss:$36 sps:$4 sm:$0xff]  }
 0x108   : > { %2103 = vmatprep.subr.bf16.mxu1 %v20456_v58  ;;  %v20525_v58 = vld [vmem:[#allocation4 + $0x20] ss:$36 sps:$4 sm:$0xff]  }
 0x109   : > { %2014 = vmatmul.mubr.bf16.vlgmr.msra.gmra.mxu0 %v23207_v18  ;;  %v20480_v18 = vld [vmem:[#allocation4 + $0x334] ss:$36 sps:$4 sm:$0xff]   ;;  %v20528_v59 = vld [vmem:[#allocation4 + $0x8bc] ss:$36 sps:$4 sm:$0xff]  }
 0x10a   : > { %2141 = vmatpush1.bf16.msra.mxu0 %v20457_v62  ;;  %2023 = vmatprep.mubr.bf16.mxu0 %v23209_v23  ;;  %v20481_v23 = vld [vmem:[#allocation4 + $0x570] ss:$36 sps:$4 sm:$0xff]  }
 0x10b   : > { %2104 = vmatpush2.bf16.msra.mxu1 %v20454_v61  ;;  %2142 = vmatprep.subr.bf16.mxu0 %v20465_v0  ;;  %v20526_v61 = vld [vmem:[#allocation4 + $0x8b8] ss:$36 sps:$4 sm:$0xff]   ;;  %v20534_v0 = vld [vmem:[#allocation4 + $0x82c] ss:$36 sps:$4 sm:$0xff]  }
 0x10c   : > { %2105 = vmatprep.subr.bf16.mxu1 %v20462_v63  ;;  %v20531_v62 = vld [vmem:[#allocation4 + $0x874] ss:$36 sps:$4 sm:$0xff]  }
 0x10d   : > { %v20529_v63 = vld [vmem:[#allocation4 + $0x870] ss:$36 sps:$4 sm:$0xff]  }
 0x10e   : > { %2143 = vmatpush1.bf16.msra.mxu0 %v20463_v2  ;;  %v20537_v2 = vld [vmem:[#allocation4 + $0x7e4] ss:$36 sps:$4 sm:$0xff]  }
 0x10f   : > { %2106 = vmatpush2.bf16.msra.mxu1 %v20460_v1  ;;  %2144 = vmatprep.subr.bf16.mxu0 %v20471_v5  ;;  %v20532_v1 = vld [vmem:[#allocation4 + $0x828] ss:$36 sps:$4 sm:$0xff]   ;;  %v20540_v5 = vld [vmem:[#allocation4 + $0x79c] ss:$36 sps:$4 sm:$0xff]  }
 0x110   : > { %2107 = vmatprep.subr.bf16.mxu1 %v20468_v3  ;;  %v20535_v3 = vld [vmem:[#allocation4 + $0x7e0] ss:$36 sps:$4 sm:$0xff]  }
 0x111   : > { %2024 = vmatmul.mubr.bf16.gmra.mxu0 %v23213_v28  ;;  %v20495_v28 = vld [vmem:[#allocation4 + $0x4e4] ss:$36 sps:$4 sm:$0xff]  }
 0x112   : > { %2145 = vmatpush1.bf16.msra.mxu0 %v20469_v10  ;;  %2172 = vmatprep.mubr.bf16.mxu0 %v24879_v9  ;;  %v20543_v10 = vld [vmem:[#allocation4 + $0x754] ss:$36 sps:$4 sm:$0xff]  }
 0x113   : > { %2108 = vmatpush2.bf16.msra.mxu1 %v20466_v6  ;;  %2146 = vmatprep.subr.bf16.mxu0 %v20477_v12  ;;  %v20538_v6 = vld [vmem:[#allocation4 + $0x798] ss:$36 sps:$4 sm:$0xff]   ;;  %v20546_v12 = vld [vmem:[#allocation4 + $0x70c] ss:$36 sps:$4 sm:$0xff]  }
 0x114   : > { %2109 = vmatprep.subr.bf16.mxu1 %v20474_v11  ;;  %v20541_v11 = vld [vmem:[#allocation4 + $0x750] ss:$36 sps:$4 sm:$0xff]  }
 0x116   : > { %2147 = vmatpush1.bf16.msra.mxu0 %v20475_v14  ;;  %v20549_v14 = vld [vmem:[#allocation4 + $0x6c4] ss:$36 sps:$4 sm:$0xff]  }
 0x117   : > { %2110 = vmatpush2.bf16.msra.mxu1 %v20472_v13  ;;  %2148 = vmatprep.subr.bf16.mxu0 %v20483_v15  ;;  %v20544_v13 = vld [vmem:[#allocation4 + $0x708] ss:$36 sps:$4 sm:$0xff]   ;;  %v20552_v15 = vld [vmem:[#allocation4 + $0xafc] ss:$36 sps:$4 sm:$0xff]  }
 0x118   : > { %2111 = vmatprep.subr.bf16.mxu1 %v20480_v18  ;;  %v20547_v18 = vld [vmem:[#allocation4 + $0x6c0] ss:$36 sps:$4 sm:$0xff]  }
 0x11a   : > { %2149 = vmatpush1.bf16.msra.mxu0 %v20481_v23  ;;  %v20555_v23 = vld [vmem:[#allocation4 + $0xab4] ss:$36 sps:$4 sm:$0xff]  }
 0x11b   : > { %2112 = vmatpush2.bf16.msra.mxu1 %v20478_v16  ;;  %2150 = vmatprep.subr.bf16.mxu0 %v20489_v19  ;;  %v20550_v16 = vld [vmem:[#allocation4 + $0xaf8] ss:$36 sps:$4 sm:$0xff]   ;;  %v20558_v19 = vld [vmem:[#allocation4 + $0xa6c] ss:$36 sps:$4 sm:$0xff]  }
 0x11c   : > { %2113 = vmatprep.subr.bf16.mxu1 %v20486_v17  ;;  %v20553_v17 = vld [vmem:[#allocation4 + $0xab0] ss:$36 sps:$4 sm:$0xff]  }
 0x11e   : > { %2151 = vmatpush1.bf16.msra.mxu0 %v20487_v21  ;;  %v20556_v21 = vld [vmem:[#allocation4 + $0xa68] ss:$36 sps:$4 sm:$0xff]  }
 0x11f   : > { %2114 = vmatpush2.bf16.msra.mxu1 %v20484_v20  ;;  %2152 = vmatprep.subr.bf16.mxu0 %v20495_v28 }
 0x120   : > { %2115 = vmatprep.subr.bf16.mxu1 %v20492_v22  ;;  %v20561_v22 = vld [vmem:[#allocation4 + $0xa24] ss:$36 sps:$4 sm:$0xff]  }
 0x122   : > { %2153 = vmatpush1.bf16.msra.mxu0 %v20493_v25  ;;  %v20559_v25 = vld [vmem:[#allocation4 + $0xa20] ss:$36 sps:$4 sm:$0xff]  }
 0x123   : > { %2116 = vmatpush2.bf16.msra.mxu1 %v20490_v24  ;;  %2154 = vmatprep.subr.bf16.mxu0 %v20501_v27 }
 0x124   : > { %2117 = vmatprep.subr.bf16.mxu1 %v20498_v26  ;;  %v20564_v26 = vld [vmem:[#allocation4 + $0x9dc] ss:$36 sps:$4 sm:$0xff]  }
 0x126   : > { %2155 = vmatpush1.bf16.msra.mxu0 %v20499_v30  ;;  %v20562_v30 = vld [vmem:[#allocation4 + $0x9d8] ss:$36 sps:$4 sm:$0xff]  }
 0x127   : > { %2118 = vmatpush2.bf16.msra.mxu1 %v20496_v29  ;;  %19543 = vmatprep.subr.bf16.mxu0 %v20502_v31 }
 0x128   : > { %19941 = vmatprep.subr.bf16.mxu1 %v20503_v32 }
 0x129   : > { %2173 = vmatmul.mubr.bf16.vlgmr.msra.gmra.mxu0 %v22863_v38 }
 0x12a   : > { %2120 = vmatmul.mubr.bf16.vlgmr.msra.gmra.mxu1 %v23233_v37  ;;  %19544 = vmatpush3.bf16.msra.mxu0 %v20504_v33 }
 0x12b   : > { %19942 = vmatpush3.bf16.msra.mxu1 %v20503_v32  ;;  %19545 = vmatprep.subr.bf16.mxu0 %v20505_v34  ;;  %v20567_v32 = vld [vmem:[#allocation4 + $0x994] ss:$36 sps:$4 sm:$0xff]  }
 0x12c   : > { %19943 = vmatprep.subr.bf16.mxu1 %v20506_v35  ;;  %2129 = vmatprep.mubr.bf16.mxu1 %v22864_v41  ;;  %v20565_v34 = vld [vmem:[#allocation4 + $0x990] ss:$36 sps:$4 sm:$0xff]  }
 0x12d   : > { %2182 = vmatprep.mubr.bf16.mxu0 %v24879_v9 }
 0x12e   : > { %19546 = vmatpush3.bf16.msra.mxu0 %v20507_v36  ;;  %v20570_v36 = vld [vmem:[#allocation4 + $0x94c] ss:$36 sps:$4 sm:$0xff]  }
 0x12f   : > { %19944 = vmatpush3.bf16.msra.mxu1 %v20506_v35  ;;  %19547 = vmatprep.subr.bf16.mxu0 %v20508_v39  ;;  %v20568_v39 = vld [vmem:[#allocation4 + $0x948] ss:$36 sps:$4 sm:$0xff]  }
 0x130   : > { %19945 = vmatprep.subr.bf16.mxu1 %v20509_v40 }
 0x131   : > { %2183 = vmatmul.mubr.bf16.gmra.mxu0 %v22866_v47 }
 0x132   : > { %2130 = vmatmul.mubr.bf16.gmra.mxu1 %v22865_v46  ;;  %19548 = vmatpush3.bf16.msra.mxu0 %v20510_v42 }
 0x133   : > { %19946 = vmatpush3.bf16.msra.mxu1 %v20509_v40  ;;  %19549 = vmatprep.subr.bf16.mxu0 %v20511_v44  ;;  %v20573_v40 = vld [vmem:[#allocation4 + $0x904] ss:$36 sps:$4 sm:$0xff]  }
 0x134   : > { %19947 = vmatprep.subr.bf16.mxu1 %v20512_v43  ;;  %2225 = vmatprep.mubr.bf16.mxu0 %v22867_v51  ;;  %v20571_v44 = vld [vmem:[#allocation4 + $0x900] ss:$36 sps:$4 sm:$0xff]  }
 0x135   : > { %19957 = vmatprep.mubr.bf16.mxu1 %v22863_v38 }
 0x136   : > { %19550 = vmatpush3.bf16.msra.mxu0 %v20513_v45 }
 0x137   : > { %19948 = vmatpush3.bf16.msra.mxu1 %v20512_v43  ;;  %19551 = vmatprep.subr.bf16.mxu0 %v20514_v48  ;;  %v20576_v43 = vld [vmem:[#allocation4 + $0xd3c] ss:$36 sps:$4 sm:$0xff]   ;;  %v20579_v48 = vld [vmem:[#allocation4 + $0xd44] ss:$36 sps:$4 sm:$0xff]  }
 0x138   : > { %19949 = vmatprep.subr.bf16.mxu1 %v20515_v49 }
 0x13a   : > { %19552 = vmatpush3.bf16.msra.mxu0 %v20516_v50  ;;  %v20580_v50 = vld [vmem:[#allocation4 + $0xcf0] ss:$36 sps:$4 sm:$0xff]  }
 0x13b   : > { %19950 = vmatpush3.bf16.msra.mxu1 %v20515_v49  ;;  %19553 = vmatprep.subr.bf16.mxu0 %v20517_v4  ;;  %v20582_v49 = vld [vmem:[#allocation4 + $0xcf4] ss:$36 sps:$4 sm:$0xff]  }
 0x13c   : > { %19951 = vmatprep.subr.bf16.mxu1 %v20518_v52 }
 0x13e   : > { %19554 = vmatpush3.bf16.msra.mxu0 %v20519_v53 }
 0x13f   : > { %19952 = vmatpush3.bf16.msra.mxu1 %v20518_v52  ;;  %19555 = vmatprep.subr.bf16.mxu0 %v20520_v54 }
 0x140   : > { %19953 = vmatprep.subr.bf16.mxu1 %v20521_v60 }
 0x142   : > { %19556 = vmatpush3.bf16.msra.mxu0 %v20522_v55 }
 0x143   : > { %19954 = vmatpush3.bf16.msra.mxu1 %v20521_v60  ;;  %19557 = vmatprep.subr.bf16.mxu0 %v20523_v56  ;;  %v20588_v60 = vld [vmem:[#allocation4 + $0xcac] ss:$36 sps:$4 sm:$0xff]  }
 0x144   : > { %19955 = vmatprep.subr.bf16.mxu1 %v20524_v57 }
 0x146   : > { %19558 = vmatpush3.bf16.msra.mxu0 %v20525_v58 }
 0x147   : > { %19956 = vmatpush3.bf16.msra.mxu1 %v20524_v57  ;;  %3797 = vmatprep.subr.bf16.mxu0 %v20528_v59  ;;  %v20586_v57 = vld [vmem:[#allocation4 + $0xca8] ss:$36 sps:$4 sm:$0xff]  }
 0x148   : > { %3850 = vmatprep.subr.bf16.mxu1 %v20576_v43 }
 0x149   : > { %2226 = vmatmul.mubr.bf16.vlgmr.msra.gmra.mxu0 %v23233_v37 }
 0x14a   : > { %19958 = vmatmul.mubr.bf16.vlgmr.msra.gmra.mxu1 %v22866_v47  ;;  %2233 = vmatprep.mubr.bf16.mxu0 %v22864_v41  ;;  %v23241_v28 = vpop.f32.mrf.mxu1  ;;  %v20574_v47 = vld [vmem:[#allocation4 + $0xd38] ss:$36 sps:$4 sm:$0xff]  }
 0x14b   : > { %3798 = vmatpush1.bf16.msra.mxu0 %v20526_v61  ;;  %3882 = vmatprep.mubr.bf16.mxu1 %v24879_v9 }
 0x14c   : > { %3799 = vmatprep.subr.bf16.mxu0 %v20531_v62  ;;  %v23245_v27 = vpop.f32.mrf.mxu1  ;;  %3851 = vmatpush1.bf16.msra.mxu1 %v20574_v47  ;;  %v20594_v62 = vld [vmem:[#allocation4 + $0xc64] ss:$36 sps:$4 sm:$0xff]  }
 0x14d   : > { %3852 = vmatprep.subr.bf16.mxu1 %v20582_v49 }
 0x14e   : > { %v23249_v31 = vpop.f32.mrf.mxu1 }
 0x14f   : > { %3800 = vmatpush1.bf16.msra.mxu0 %v20529_v63 }
 0x150   : > { %3801 = vmatprep.subr.bf16.mxu0 %v20534_v0  ;;  %v23253_v35 = vpop.f32.mrf.mxu1  ;;  %3853 = vmatpush1.bf16.msra.mxu1 %v20580_v50 }
 0x151   : > { %2234 = vmatmul.mubr.bf16.gmra.mxu0 %v22865_v46  ;;  %3854 = vmatprep.subr.bf16.mxu1 %v20588_v60 }
 0x152   : > { %v23257_v38 = vpop.f32.mrf.mxu1 }
 0x153   : > { %3802 = vmatpush1.bf16.msra.mxu0 %v20532_v1  ;;  %v20592_v1 = vld [vmem:[#allocation4 + $0xc60] ss:$36 sps:$4 sm:$0xff]  }
 0x154   : > { %3803 = vmatprep.subr.bf16.mxu0 %v20537_v2  ;;  %v23261_v42 = vpop.f32.mrf.mxu1  ;;  %3855 = vmatpush1.bf16.msra.mxu1 %v20586_v57 }
 0x155   : > { %3856 = vmatprep.subr.bf16.mxu1 %v20594_v62 }
 0x156   : > { %v23265_v46 = vpop.f32.mrf.mxu1 }
 0x157   : > { %3804 = vmatpush1.bf16.msra.mxu0 %v20535_v3 }
 0x158   : > { %3805 = vmatprep.subr.bf16.mxu0 %v20540_v5  ;;  %v23269_v4 = vpop.f32.mrf.mxu1  ;;  %3857 = vmatpush1.bf16.msra.mxu1 %v20592_v1 }
 0x15b   : > { %3806 = vmatpush1.bf16.msra.mxu0 %v20538_v6 }
 0x15c   : > { %3807 = vmatprep.subr.bf16.mxu0 %v20543_v10 }
 0x15f   : > { %3808 = vmatpush1.bf16.msra.mxu0 %v20541_v11 }
 0x160   : > { %3809 = vmatprep.subr.bf16.mxu0 %v20546_v12  ;;  %v20600_v12 = vld [vmem:[#allocation4 + $0xc1c] ss:$36 sps:$4 sm:$0xff]  }
 0x161   : > { %3858 = vmatprep.subr.bf16.mxu1 %v20600_v12 }
 0x163   : > { %3810 = vmatpush1.bf16.msra.mxu0 %v20544_v13 }
 0x164   : > { %3811 = vmatprep.subr.bf16.mxu0 %v20549_v14 }
 0x167   : > { %3812 = vmatpush1.bf16.msra.mxu0 %v20547_v18 }
 0x168   : > { %3813 = vmatprep.subr.bf16.mxu0 %v20552_v15  ;;  %v20598_v15 = vld [vmem:[#allocation4 + $0xc18] ss:$36 sps:$4 sm:$0xff]  }
 0x169   : > { %v23239_v20 = vpop.f32.mrf.mxu0  ;;  %3859 = vmatpush1.bf16.msra.mxu1 %v20598_v15 }
 0x16b   : > { %3814 = vmatpush2.bf16.msra.mxu0 %v20550_v16  ;;  %v23243_v24 = vpop.f32.mrf.mxu0 }
 0x16c   : > { %3815 = vmatprep.subr.bf16.mxu0 %v20555_v23 }
 0x16d   : > { %v23247_v29 = vpop.f32.mrf.mxu0 }
 0x16e   : > { %v23319_v1 = vadd.f32 %v23249_v31, %v23247_v29 }
 0x16f   : > { %3816 = vmatpush2.bf16.msra.mxu0 %v20553_v17  ;;  %v23251_v33 = vpop.f32.mrf.mxu0 }
 0x170   : > { %3817 = vmatprep.subr.bf16.mxu0 %v20558_v19 }
 0x171   : > { %v23255_v37 = vpop.f32.mrf.mxu0 }
 0x173   : > { %3818 = vmatpush2.bf16.msra.mxu0 %v20556_v21  ;;  %v23259_v41 = vpop.f32.mrf.mxu0 }
 0x174   : > { %3819 = vmatprep.subr.bf16.mxu0 %v20561_v22  ;;  %v20606_v22 = vld [vmem:[#allocation4 + $0xbd4] ss:$36 sps:$4 sm:$0xff]  }
 0x175   : > { %v23263_v45 = vpop.f32.mrf.mxu0  ;;  %3860 = vmatprep.subr.bf16.mxu1 %v20606_v22  ;;  %v23350_v22 = vsub.s32 1, %v23188_v7 }
 0x177   : > { %3820 = vmatpush2.bf16.msra.mxu0 %v20559_v25  ;;  %v23267_v51 = vpop.f32.mrf.mxu0  ;;  %v20604_v25 = vld [vmem:[#allocation4 + $0xbd0] ss:$36 sps:$4 sm:$0xff]  }
 0x178   : > { %3821 = vmatprep.subr.bf16.mxu0 %v20564_v26  ;;  %3861 = vmatpush1.bf16.msra.mxu1 %v20604_v25 }
 0x17b   : > { %3822 = vmatpush2.bf16.msra.mxu0 %v20562_v30 }
 0x17c   : > { %3823 = vmatprep.subr.bf16.mxu0 %v20567_v32  ;;  %v20612_v32 = vld [vmem:[#allocation4 + $0xb8c] ss:$36 sps:$4 sm:$0xff]  }
 0x17d   : > { %3862 = vmatprep.subr.bf16.mxu1 %v20612_v32 }
 0x17f   : > { %3824 = vmatpush2.bf16.msra.mxu0 %v20565_v34  ;;  %v20610_v34 = vld [vmem:[#allocation4 + $0xb88] ss:$36 sps:$4 sm:$0xff]  }
 0x180   : > { %3825 = vmatprep.subr.bf16.mxu0 %v20570_v36  ;;  %3863 = vmatpush1.bf16.msra.mxu1 %v20610_v34  ;;  %v20618_v36 = vld [vmem:[#allocation4 + $0xb44] ss:$36 sps:$4 sm:$0xff]  }
 0x181   : > { %3864 = vmatprep.subr.bf16.mxu1 %v20618_v36 }
 0x183   : > { %3826 = vmatpush2.bf16.msra.mxu0 %v20568_v39  ;;  %v20616_v39 = vld [vmem:[#allocation4 + $0xb40] ss:$36 sps:$4 sm:$0xff]  }
 0x184   : > { %3827 = vmatprep.subr.bf16.mxu0 %v20573_v40  ;;  %3865 = vmatpush1.bf16.msra.mxu1 %v20616_v39  ;;  %v20624_v40 = vld [vmem:[#allocation4 + $0x8c4] ss:$36 sps:$4 sm:$0xff]  }
 0x185   : > { %3903 = vmatprep.subr.bf16.mxu1 %v20624_v40 }
 0x187   : > { %3828 = vmatpush2.bf16.msra.mxu0 %v20571_v44 }
 0x188   : > { %3956 = vmatprep.subr.bf16.mxu0 %v20579_v48 }
 0x189   : > { %v1962_v53 = vpop.f32.mrf.mxu0 }
 0x18a   : > { %v1909_v52 = vpop.f32.mrf.mxu1 }
 0x18b   : > { %v23271_v54 = vadd.f32 %v1962_v53, %v1909_v52  ;;  %v23275_v56 = vpop.f32.mrf.mxu0 }
 0x18c   : > { %v23273_v55 = vpop.f32.mrf.mxu1 }
 0x18d   : > { %v1966_v59 = vpop.f32.mrf.mxu0  ;;  %v2293_v2 = vrot.slane %v23271_v54, 7 }
 0x18e   : > { %v1913_v58 = vpop.f32.mrf.mxu1 }
 0x18f   : > { %v1967_v61 = vadd.f32 %v1966_v59, %v1913_v58  ;;  %v23279_v0 = vpop.f32.mrf.mxu0 }
 0x190   : > { %v23277_v63 = vpop.f32.mrf.mxu1 }
 0x191   : > { %v2296_v3 = vrot.slane %v1967_v61, 7  ;;  %v1972_v6 = vpop.f32.mrf.mxu0 }
 0x192   : > { %v1919_v5 = vpop.f32.mrf.mxu1 }
 0x193   : > { %v2312_v10 = vsel %vm2303_vm2, %v2293_v2, %v2296_v3  ;;  %v1973_v11 = vadd.f32 %v1972_v6, %v1919_v5  ;;  %v23291_v18 = vpop.f32.mrf.mxu0  ;;  %v1857_v5 = vadd.f32 %v23241_v28, %v23239_v20  ;;  %v1863_v6 = vadd.f32 %v23253_v35, %v23251_v33 }
 0x194   : > { %v23287_v13 = vsel %vm373_vm0, %v1967_v61, %v2312_v10  ;;  %v23289_v14 = vpop.f32.mrf.mxu1  ;;  %v24881_v10 = vrot.slane %v23319_v1, 7  ;;  %v23339_v28 = vsub.s32 0, %v23188_v7 }
 0x195   : > { %v2299_v16 = vrot.slane %v1973_v11, 7  ;;  %v1976_v17 = vpop.f32.mrf.mxu0  ;;  %v1859_v11 = vadd.f32 %v23245_v27, %v23243_v24  ;;  %v2291_v29 = vrot.slane %v1857_v5, 7  ;;  %v2295_v31 = vrot.slane %v1863_v6, 7 }
 0x196   : > { %v1923_v23 = vpop.f32.mrf.mxu1  ;;  %v23343_v24 = vadd.f32 %v23257_v38, %v23255_v37  ;;  %v1869_v27 = vadd.f32 %v23261_v42, %v23259_v41 }
 0x197   : > { %v1977_v19 = vadd.f32 %v1976_v17, %v1923_v23  ;;  %v23295_v21 = vsel %vm2303_vm2, %v2296_v3, %v2299_v16  ;;  %v23301_v44 = vpop.f32.mrf.mxu0  ;;  %v2310_v20 = vsel %vm2303_vm2, %v2291_v29, %v24881_v10  ;;  %v2292_v33 = vrot.slane %v1859_v11, 7 }
 0x198   : > { %v23303_v43 = vpop.f32.mrf.mxu1  ;;  %v2327_v25 = vsel %vm373_vm0, %v23319_v1, %v2310_v20  ;;  %v2297_v39 = vrot.slane %v23343_v24, 7  ;;  %v2298_v40 = vrot.slane %v1869_v27, 7  ;;  %v1969_v24 = vadd.f32 %v23279_v0, %v23277_v63 }
 0x199   : > { %v2302_v26 = vrot.slane %v1977_v19, 7  ;;  %v23347_v19 = vld [vmem:[#allocation6] sm:$0x7]  ;;  %v2311_v37 = vsel %vm2303_vm2, %v2292_v33, %v2295_v31 }
 0x19a   : > { %v23362_v36 = vrot.slane %v23347_v19, %v23339_v28  ;;  %v2328_v33 = vsel %vm373_vm0, %v1863_v6, %v2311_v37 }
 0x19b   : > { %v23299_v30 = vsel %vm2303_vm2, %v2299_v16, %v2302_v26  ;;  %v1873_v26 = vadd.f32 %v23269_v4, %v23267_v51  ;;  %v1871_v51 = vadd.f32 %v23265_v46, %v23263_v45 }
 0x19d   : > { %v2300_v6 = vrot.slane %v1871_v51, 7 }
 0x1aa   : > { %v2068_v48 = vpop.f32.mrf.mxu1 }
 0x1ac   : > { %v23307_v50 = vpop.f32.mrf.mxu1 }
 0x1ae   : > { %v2072_v53 = vpop.f32.mrf.mxu1 }
 0x1b0   : > { %v23311_v57 = vpop.f32.mrf.mxu1 }
 0x1b2   : > { %v2078_v59 = vpop.f32.mrf.mxu1 }
 0x1b4   : > { %v23315_v62 = vpop.f32.mrf.mxu1 }
 0x1b6   : > { %v2082_v3 = vpop.f32.mrf.mxu1 }
 0x1b8   : > { %v23332_v15 = vpop.f32.mrf.mxu1 }
 0x1c9   : > { %v2015_v47 = vpop.f32.mrf.mxu0 }
 0x1ca   : > { %v2069_v4 = vadd.f32 %v2068_v48, %v2015_v47 }
 0x1cb   : > { %v23305_v49 = vpop.f32.mrf.mxu0 }
 0x1cc   : > { %v2382_v37 = vadd.f32 %v2069_v4, %v1859_v11 }
 0x1cd   : > { %v2019_v52 = vpop.f32.mrf.mxu0 }
 0x1cf   : > { %v23309_v60 = vpop.f32.mrf.mxu0 }
 0x1d1   : > { %v2025_v58 = vpop.f32.mrf.mxu0 }
 0x1d2   : > { %v2079_v27 = vadd.f32 %v2078_v59, %v2025_v58  ;;  %v2384_v59 = vadd.f32 %v2327_v25, %v1969_v24 }
 0x1d3   : > { %v23313_v61 = vpop.f32.mrf.mxu0 }
 0x1d5   : > { %v23321_v2 = vpop.f32.mrf.mxu0 }
 0x1d7   : > { %v23330_v12 = vpop.f32.mrf.mxu0 }
 0x1e9   : > { %v2174_v23 = vpop.f32.mrf.mxu0 }
 0x1ea   : > { %v2121_v16 = vpop.f32.mrf.mxu1 }
 0x1eb   : > { %v2176_v17 = vpop.f32.mrf.mxu0  ;;  %v2175_v41 = vadd.f32 %v2174_v23, %v2121_v16  ;;  %v2414_v23 = vrot.slane %v23347_v19, %v23350_v22 }
 0x1ec   : > { %v2123_v35 = vpop.f32.mrf.mxu1 }
 0x1ed   : > { %v2178_v32 = vpop.f32.mrf.mxu0  ;;  %v2177_v42 = vadd.f32 %v2176_v17, %v2123_v35  ;;  %v2301_v35 = vrot.slane %v1873_v26, 7  ;;  %v1965_v17 = vadd.f32 %v23275_v56, %v23273_v55  ;;  %v2336_v47 = vrot.slane %v2175_v41, 1 }
 0x1ee   : > { %v2125_v38 = vpop.f32.mrf.mxu1  ;;  %v2083_v41 = vadd.f32 %v2082_v3, %v23321_v2 }
 0x1ef   : > { %v2179_v34 = vadd.f32 %v2178_v32, %v2125_v38  ;;  %v2180_v20 = vpop.f32.mrf.mxu0  ;;  %v2337_v48 = vrot.slane %v2177_v42, 1  ;;  %v2381_v58 = vadd.f32 %v1965_v17, %v1857_v5  ;;  %v1979_v5 = vadd.f32 %v23301_v44, %v23303_v43 }
 0x1f0   : > { %v2127_v29 = vpop.f32.mrf.mxu1  ;;  %v2304_v44 = vsel %vm2303_vm2, %v2297_v39, %v2300_v6 }
 0x1f1   : > { %v2339_v9 = vrot.slane %v2179_v34, 1  ;;  %v2181_v16 = vadd.f32 %v2180_v20, %v2127_v29  ;;  %v2184_v46 = vpop.f32.mrf.mxu0  ;;  %v2073_v29 = vadd.f32 %v2072_v53, %v2019_v52  ;;  %v2308_v20 = vsel %vm2303_vm2, %v2295_v31, %v2298_v40 }
 0x1f2   : > { %v2131_v45 = vpop.f32.mrf.mxu1  ;;  %v2305_v52 = vsel %vm2303_vm2, %v2298_v40, %v2301_v35  ;;  %v2388_v31 = vadd.f32 %v2308_v20, %v2079_v27 }
 0x1f3   : > { %v2340_v38 = vrot.slane %v2181_v16, 1  ;;  %v2185_v32 = vadd.f32 %v2184_v46, %v2131_v45  ;;  %v2186_v10 = vpop.f32.mrf.mxu0  ;;  %v2355_v55 = vsel %vm2348_vm3, %v2336_v47, %v2339_v9  ;;  %v1975_v45 = vadd.f32 %v23291_v18, %v23289_v14 }
 0x1f4   : > { %v2133_v26 = vpop.f32.mrf.mxu1  ;;  %v2385_v40 = vadd.f32 %v2328_v33, %v2073_v29  ;;  %v2390_v47 = vadd.f32 %v2304_v44, %v1979_v5  ;;  %v20597_v5 = vld [vmem:[#allocation4 + $0xc6c] ss:$36 sps:$4 sm:$0xff]  }
 0x1f5   : > { %v2356_v56 = vsel %vm2348_vm3, %v2337_v48, %v2340_v38  ;;  %v2342_v63 = vrot.slane %v2185_v32, 1  ;;  %v2187_v0 = vadd.f32 %v2186_v10, %v2133_v26  ;;  %v2188_v11 = vpop.f32.mrf.mxu0  ;;  %v2393_v10 = vadd.f32 %v2381_v58, %v2355_v55 }
 0x1f6   : > { %v2135_v53 = vpop.f32.mrf.mxu1  ;;  %v2394_v42 = vadd.f32 %v2382_v37, %v2356_v56 }
 0x1f7   : > { %v2352_v51 = vsel %vm2348_vm3, %v2339_v9, %v2342_v63  ;;  %v2343_v4 = vrot.slane %v2187_v0, 1  ;;  %v2190_v25 = vpop.f32.mrf.mxu0  ;;  %v2400_v24 = vadd.f32 %v2388_v31, %v2187_v0  ;;  %v2391_v9 = vadd.f32 %v2305_v52, %v2083_v41  ;;  %v20577_v0 = vld [vmem:[#allocation4 + $0xd40] ss:$36 sps:$4 sm:$0xff]  }
 0x1f8   : > { %v2372_v2 = vsel %vm378_vm1, %v2179_v34, %v2352_v51  ;;  %v2137_v3 = vpop.f32.mrf.mxu1  ;;  %v2189_v14 = vadd.f32 %v2188_v11, %v2135_v53  ;;  %v2423_v43 = vadd.f32 %v2414_v23, %v2394_v42  ;;  %v2422_v33 = vadd.f32 %v23362_v36, %v2393_v10  ;;  %v20585_v52 = vld [vmem:[#allocation4 + $0xcfc] ss:$36 sps:$4 sm:$0xff]   ;;  %v20591_v42 = vld [vmem:[#allocation4 + $0xcb4] ss:$36 sps:$4 sm:$0xff]  }
 0x1f9   : > { %v2396_v35 = vadd.f32 %v2384_v59, %v2372_v2  ;;  %v2353_v17 = vsel %vm2348_vm3, %v2340_v38, %v2343_v4  ;;  %v2191_v18 = vadd.f32 %v2190_v25, %v2137_v3  ;;  %v24895_v38 = vrot.slane %v23319_v1, 7 }
 0x1fa   : > { %v2373_v27 = vsel %vm378_vm1, %v2181_v16, %v2353_v17  ;;  %v2429_v16 = vadd.f32 %v2414_v23, %v2400_v24  ;;  %v2402_v55 = vadd.f32 %v2390_v47, %v2189_v14  ;;  %v2435_v6 = vmax.f32 %v2423_v43, 0.0  ;;  %v20603_v17 = vld [vmem:[#allocation4 + $0xc24] ss:$36 sps:$4 sm:$0xff]  }
 0x1fb   : > { %v2425_v34 = vadd.f32 %v23362_v36, %v2396_v35  ;;  %v2397_v46 = vadd.f32 %v2385_v40, %v2373_v27  ;;  %v2403_v48 = vadd.f32 %v2391_v9, %v2191_v18  ;;  %v2307_v37 = vsel %vm2303_vm2, %v24895_v38, %v2297_v39  ;;  %v20595_v35 = vld [vmem:[#allocation4 + $0xc68] ss:$36 sps:$4 sm:$0xff]   ;;  %v20601_v43 = vld [vmem:[#allocation4 + $0xc20] ss:$36 sps:$4 sm:$0xff]  }
 0x1fc   : > { %v2387_v20 = vadd.f32 %v2307_v37, %v1975_v45  ;;  %v2434_v58 = vmax.f32 %v2422_v33, 0.0  ;;  %v2441_v53 = vmax.f32 %v2429_v16, 0.0  ;;  %v2431_v1 = vadd.f32 %v23362_v36, %v2402_v55  ;;  %v20589_v45 = vld [vmem:[#allocation4 + $0xcb0] ss:$36 sps:$4 sm:$0xff]   ;;  %v20609_v33 = vld [vmem:[#allocation4 + $0xbdc] ss:$36 sps:$4 sm:$0xff]  }
 0x1fd   : > { %v2426_v29 = vadd.f32 %v2414_v23, %v2397_v46  ;;  %v2437_v26 = vmax.f32 %v2425_v34, 0.0  ;;  %v2432_v56 = vadd.f32 %v2414_v23, %v2403_v48  ;;  %v24896_v24 = vmov 0  }
 0x1fe   : > { %v2399_v59 = vadd.f32 %v2387_v20, %v2185_v32  ;;  %v20583_v32 = vld [vmem:[#allocation4 + $0xcf8] ss:$36 sps:$4 sm:$0xff]   ;;  %v2443_v51 = vmax.f32 %v2431_v1, 0.0  ;;  %v2071_v34 = vadd.f32 %v23307_v50, %v23305_v49  ;;  %v2081_v48 = vadd.f32 %v23315_v62, %v23313_v61 }
 0x1ff   : > { %v2438_v63 = vmax.f32 %v2426_v29, 0.0  ;;  %v2444_v41 = vmax.f32 %v2432_v56, 0.0  ;;  %v23407_v31 = vpack.c.bf16 %v2437_v26, %v2434_v58  ;;  %v23424_v29 = vsub.s32 2, %v23188_v7  ;;  %v20607_v20 = vld [vmem:[#allocation4 + $0xbd8] ss:$36 sps:$4 sm:$0xff]  }
 0x200   : > { %v2428_v23 = vadd.f32 %v23362_v36, %v2399_v59  ;;  %v2383_v56 = vadd.f32 %v2071_v34, %v23271_v54  ;;  %v2075_v49 = vadd.f32 %v23311_v57, %v23309_v60  ;;  %v2389_v61 = vadd.f32 %v23295_v21, %v2081_v48  ;;  %v20634_v34 = vld [vmem:[#allocation4 + $0x830] ss:$36 sps:$4 sm:$0xff]   ;;  %v20640_v48 = vld [vmem:[#allocation4 + $0x7e8] ss:$36 sps:$4 sm:$0xff]  }
 0x201   : > { %v23404_v11 = vpack.c.bf16 %v2438_v63, %v2435_v6  ;;  %v23409_v39 = vpack.c.bf16 %v2444_v41, %v2441_v53  ;;  %v20615_v6 = vld [vmem:[#allocation4 + $0xb94] ss:$36 sps:$4 sm:$0xff]   ;;  %v2085_v62 = vadd.f32 %v23332_v15, %v23330_v12  ;;  %v2418_v59 = vrot.slane %v23347_v19, %v23424_v29  ;;  %v20621_v53 = vld [vmem:[#allocation4 + $0xb4c] ss:$36 sps:$4 sm:$0xff]  }
 0x202   : > { %v2440_v4 = vmax.f32 %v2428_v23, 0.0  ;;  %v20613_v41 = vld [vmem:[#allocation4 + $0xb90] ss:$36 sps:$4 sm:$0xff]   ;;  %v2386_v21 = vadd.f32 %v23287_v13, %v2075_v49  ;;  %v20652_v49 = vld [vmem:[#allocation4 + $0x758] ss:$36 sps:$4 sm:$0xff]  }
 0x203   : > { %3829 = vmatprep.mubr.bf16.mxu0 %v23404_v11  ;;  %v2392_v12 = vadd.f32 %v23299_v30, %v2085_v62  ;;  %v20622_v30 = vld [vmem:[#allocation4 + $0x8c0] ss:$36 sps:$4 sm:$0xff]   ;;  %v20658_v62 = vld [vmem:[#allocation4 + $0x710] ss:$36 sps:$4 sm:$0xff]  }
 0x204   : > { %3830 = vmatmul.mubr.bf16.vlgmr.msra.gmra.mxu0 %v23407_v31  ;;  %v23415_v10 = vpack.c.bf16 %v2443_v51, %v2440_v4  ;;  %v20619_v4 = vld [vmem:[#allocation4 + $0xb48] ss:$36 sps:$4 sm:$0xff]  }
 0x205   : > { %3839 = vmatprep.mubr.bf16.mxu0 %v23409_v39  ;;  %3957 = vmatpush1.bf16.msra.mxu0 %v20577_v0 }
 0x206   : > { %3958 = vmatprep.subr.bf16.mxu0 %v20585_v52 }
 0x209   : > { %3959 = vmatpush1.bf16.msra.mxu0 %v20583_v32  ;;  %v19559_v2 = vpop.f32.mrf.mxu0 }
 0x20a   : > { %v19959_v3 = vpop.f32.mrf.mxu1  ;;  %3960 = vmatprep.subr.bf16.mxu0 %v20591_v42 }
 0x20b   : > { %v19560_v25 = vpop.f32.mrf.mxu0 }
 0x20c   : > { %v2276_v36 = vpop.f32.mrf.mxu1  ;;  %3840 = vmatmul.mubr.bf16.gmra.mxu0 %v23415_v10  ;;  %v19561_v40 = vadd.f32 %v19560_v25, %v19559_v2  ;;  %v20625_v25 = vld [vmem:[#allocation4 + $0x8c8] ss:$36 sps:$4 sm:$0xff]  }
 0x20d   : > { %3961 = vmatpush1.bf16.msra.mxu0 %v20589_v45  ;;  %3988 = vmatprep.mubr.bf16.mxu0 %v24896_v24  ;;  %v19562_v9 = vpop.f32.mrf.mxu0  ;;  %v20627_v45 = vld [vmem:[#allocation4 + $0x8cc] ss:$36 sps:$4 sm:$0xff]  }
 0x20e   : > { %v19960_v27 = vpop.f32.mrf.mxu1  ;;  %3962 = vmatprep.subr.bf16.mxu0 %v20597_v5  ;;  %v2277_v14 = vadd.f32 %v19561_v40, %v2276_v36 }
 0x20f   : > { %v19563_v18 = vpop.f32.mrf.mxu0 }
 0x210   : > { %v19564_v44 = vadd.f32 %v19563_v18, %v19562_v9  ;;  %v2279_v46 = vpop.f32.mrf.mxu1  ;;  %v2338_v37 = vrot.slane %v2277_v14, 1  ;;  %v20628_v14 = vld [vmem:[#allocation4 + $0x878] ss:$36 sps:$4 sm:$0xff]   ;;  %v20631_v18 = vld [vmem:[#allocation4 + $0x880] ss:$36 sps:$4 sm:$0xff]  }
 0x211   : > { %3963 = vmatpush1.bf16.msra.mxu0 %v20595_v35  ;;  %v19565_v47 = vpop.f32.mrf.mxu0  ;;  %v20630_v35 = vld [vmem:[#allocation4 + $0x87c] ss:$36 sps:$4 sm:$0xff]  }
 0x212   : > { %3964 = vmatprep.subr.bf16.mxu0 %v20603_v17  ;;  %v2280_v38 = vadd.f32 %v19564_v44, %v2279_v46  ;;  %v20633_v17 = vld [vmem:[#allocation4 + $0x884] ss:$36 sps:$4 sm:$0xff]   ;;  %v20636_v44 = vld [vmem:[#allocation4 + $0x834] ss:$36 sps:$4 sm:$0xff]  }
 0x213   : > { %v19566_v16 = vpop.f32.mrf.mxu0  ;;  %v20637_v46 = vld [vmem:[#allocation4 + $0x838] ss:$36 sps:$4 sm:$0xff]  }
 0x214   : > { %v2341_v26 = vrot.slane %v2280_v38, 1  ;;  %v19567_v55 = vadd.f32 %v19566_v16, %v19565_v47  ;;  %v20642_v47 = vld [vmem:[#allocation4 + $0x7ec] ss:$36 sps:$4 sm:$0xff]  }
 0x215   : > { %3965 = vmatpush1.bf16.msra.mxu0 %v20601_v43  ;;  %v19568_v50 = vpop.f32.mrf.mxu0  ;;  %v20639_v43 = vld [vmem:[#allocation4 + $0x83c] ss:$36 sps:$4 sm:$0xff]   ;;  %v20651_v16 = vld [vmem:[#allocation4 + $0x7ac] ss:$36 sps:$4 sm:$0xff]  }
 0x216   : > { %3966 = vmatprep.subr.bf16.mxu0 %v20609_v33  ;;  %v2357_v63 = vsel %vm2348_vm3, %v2338_v37, %v2341_v26  ;;  %v2285_v0 = vadd.f32 %v19959_v3, %v19567_v55  ;;  %v20645_v33 = vld [vmem:[#allocation4 + $0x7f4] ss:$36 sps:$4 sm:$0xff]   ;;  %v20648_v37 = vld [vmem:[#allocation4 + $0x7a4] ss:$36 sps:$4 sm:$0xff]   ;;  %v20654_v55 = vld [vmem:[#allocation4 + $0x75c] ss:$36 sps:$4 sm:$0xff]  }
 0x217   : > { %v2395_v58 = vadd.f32 %v2383_v56, %v2357_v63  ;;  %v19569_v54 = vpop.f32.mrf.mxu0  ;;  %v20657_v56 = vld [vmem:[#allocation4 + $0x764] ss:$36 sps:$4 sm:$0xff]   ;;  %v20661_v63 = vld [vmem:[#allocation4 + $0x718] ss:$36 sps:$4 sm:$0xff]  }
 0x218   : > { %v2344_v52 = vrot.slane %v2285_v0, 1  ;;  %v2401_v60 = vadd.f32 %v2389_v61, %v2285_v0  ;;  %v19570_v57 = vadd.f32 %v19569_v54, %v19568_v50  ;;  %v20655_v50 = vld [vmem:[#allocation4 + $0x760] ss:$36 sps:$4 sm:$0xff]   ;;  %v20666_v0 = vld [vmem:[#allocation4 + $0x6cc] ss:$36 sps:$4 sm:$0xff]  }
 0x219   : > { %3967 = vmatpush1.bf16.msra.mxu0 %v20607_v20  ;;  %v2424_v23 = vadd.f32 %v2418_v59, %v2395_v58  ;;  %v20646_v20 = vld [vmem:[#allocation4 + $0x7a0] ss:$36 sps:$4 sm:$0xff]   ;;  %v20669_v58 = vld [vmem:[#allocation4 + $0x6d4] ss:$36 sps:$4 sm:$0xff]  }
 0x21a   : > { %3968 = vmatprep.subr.bf16.mxu0 %v20615_v6  ;;  %v2354_v15 = vsel %vm2348_vm3, %v2341_v26, %v2344_v52  ;;  %v2288_v1 = vadd.f32 %v19960_v27, %v19570_v57  ;;  %v2430_v32 = vadd.f32 %v2418_v59, %v2401_v60  ;;  %v20649_v26 = vld [vmem:[#allocation4 + $0x7a8] ss:$36 sps:$4 sm:$0xff]   ;;  %v20660_v6 = vld [vmem:[#allocation4 + $0x714] ss:$36 sps:$4 sm:$0xff]   ;;  %v20663_v61 = vld [vmem:[#allocation4 + $0x71c] ss:$36 sps:$4 sm:$0xff]  }
 0x21b   : > { %v2374_v19 = vsel %vm378_vm1, %v2280_v38, %v2354_v15  ;;  %v2436_v13 = vmax.f32 %v2424_v23, 0.0  ;;  %v20643_v38 = vld [vmem:[#allocation4 + $0x7f0] ss:$36 sps:$4 sm:$0xff]   ;;  %v20670_v60 = vld [vmem:[#allocation4 + $0xb00] ss:$36 sps:$4 sm:$0xff]  }
 0x21c   : > { %v2398_v42 = vadd.f32 %v2386_v21, %v2374_v19  ;;  %v2404_v51 = vadd.f32 %v2392_v12, %v2288_v1  ;;  %v2442_v3 = vmax.f32 %v2430_v32, 0.0  ;;  %v20667_v54 = vld [vmem:[#allocation4 + $0x6d0] ss:$36 sps:$4 sm:$0xff]   ;;  %v20673_v57 = vld [vmem:[#allocation4 + $0xb08] ss:$36 sps:$4 sm:$0xff]  }
 0x21d   : > { %3969 = vmatpush1.bf16.msra.mxu0 %v20613_v41  ;;  %v20672_v41 = vld [vmem:[#allocation4 + $0xb04] ss:$36 sps:$4 sm:$0xff]   ;;  %v20675_v52 = vld [vmem:[#allocation4 + $0xb0c] ss:$36 sps:$4 sm:$0xff]   ;;  %v20676_v12 = vld [vmem:[#allocation4 + $0xab8] ss:$36 sps:$4 sm:$0xff]  }
 0x21e   : > { %3970 = vmatprep.subr.bf16.mxu0 %v20621_v53  ;;  %v2427_v5 = vadd.f32 %v2418_v59, %v2398_v42  ;;  %v2433_v2 = vadd.f32 %v2418_v59, %v2404_v51  ;;  %v20664_v59 = vld [vmem:[#allocation4 + $0x6c8] ss:$36 sps:$4 sm:$0xff]   ;;  %v20678_v53 = vld [vmem:[#allocation4 + $0xabc] ss:$36 sps:$4 sm:$0xff]   ;;  %v20684_v1 = vld [vmem:[#allocation4 + $0xa74] ss:$36 sps:$4 sm:$0xff]  }
 0x21f   : > { %v20681_v21 = vld [vmem:[#allocation4 + $0xac4] ss:$36 sps:$4 sm:$0xff]   ;;  %v20687_v23 = vld [vmem:[#allocation4 + $0xa7c] ss:$36 sps:$4 sm:$0xff]   ;;  %v20682_v19 = vld [vmem:[#allocation4 + $0xa70] ss:$36 sps:$4 sm:$0xff]  }
 0x220   : > { %v2439_v36 = vmax.f32 %v2427_v5, 0.0  ;;  %v2445_v40 = vmax.f32 %v2433_v2, 0.0  ;;  %v20679_v15 = vld [vmem:[#allocation4 + $0xac0] ss:$36 sps:$4 sm:$0xff]   ;;  %v20685_v32 = vld [vmem:[#allocation4 + $0xa78] ss:$36 sps:$4 sm:$0xff]  }
 0x221   : > { %3971 = vmatpush1.bf16.msra.mxu0 %v20619_v4  ;;  %v20690_v42 = vld [vmem:[#allocation4 + $0xa2c] ss:$36 sps:$4 sm:$0xff]   ;;  %v20693_v51 = vld [vmem:[#allocation4 + $0xa34] ss:$36 sps:$4 sm:$0xff]   ;;  %v20696_v5 = vld [vmem:[#allocation4 + $0x9e4] ss:$36 sps:$4 sm:$0xff]  }
 0x222   : > { %4009 = vmatprep.subr.bf16.mxu0 %v20627_v45  ;;  %v23442_v9 = vpack.c.bf16 %v2445_v40, %v2442_v3  ;;  %v23444_v27 = vpack.c.bf16 %v2439_v36, %v2436_v13  ;;  %v20688_v4 = vld [vmem:[#allocation4 + $0xa28] ss:$36 sps:$4 sm:$0xff]   ;;  %v20691_v45 = vld [vmem:[#allocation4 + $0xa30] ss:$36 sps:$4 sm:$0xff]   ;;  %v20694_v13 = vld [vmem:[#allocation4 + $0x9e0] ss:$36 sps:$4 sm:$0xff]  }
 0x223   : > { %v20699_v2 = vld [vmem:[#allocation4 + $0x9ec] ss:$36 sps:$4 sm:$0xff]   ;;  %v20700_v36 = vld [vmem:[#allocation4 + $0x998] ss:$36 sps:$4 sm:$0xff]   ;;  %v20703_v40 = vld [vmem:[#allocation4 + $0x9a0] ss:$36 sps:$4 sm:$0xff]  }
 0x224   : > { %3883 = vmatmul.mubr.bf16.vlgmr.msra.gmra.mxu1 %v23444_v27  ;;  %3989 = vmatmul.mubr.bf16.vlgmr.msra.gmra.mxu0 %v23444_v27  ;;  %v20697_v3 = vld [vmem:[#allocation4 + $0x9e8] ss:$36 sps:$4 sm:$0xff]  }
 0x225   : > { %3904 = vmatpush1.bf16.msra.mxu1 %v20622_v30  ;;  %4010 = vmatpush1.bf16.msra.mxu0 %v20625_v25  ;;  %v20702_v30 = vld [vmem:[#allocation4 + $0x99c] ss:$36 sps:$4 sm:$0xff]   ;;  %v20705_v25 = vld [vmem:[#allocation4 + $0x9a4] ss:$36 sps:$4 sm:$0xff]  }
 0x226   : > { %3905 = vmatprep.subr.bf16.mxu1 %v20630_v35  ;;  %4011 = vmatprep.subr.bf16.mxu0 %v20633_v17  ;;  %v20708_v35 = vld [vmem:[#allocation4 + $0x954] ss:$36 sps:$4 sm:$0xff]   ;;  %v20711_v17 = vld [vmem:[#allocation4 + $0x95c] ss:$36 sps:$4 sm:$0xff]  }
 0x227   : > { %3892 = vmatprep.mubr.bf16.mxu1 %v24896_v24  ;;  %3998 = vmatprep.mubr.bf16.mxu0 %v24896_v24 }
 0x229   : > { %3906 = vmatpush1.bf16.msra.mxu1 %v20628_v14  ;;  %4012 = vmatpush1.bf16.msra.mxu0 %v20631_v18  ;;  %v20706_v14 = vld [vmem:[#allocation4 + $0x950] ss:$36 sps:$4 sm:$0xff]   ;;  %v20709_v18 = vld [vmem:[#allocation4 + $0x958] ss:$36 sps:$4 sm:$0xff]  }
 0x22a   : > { %3907 = vmatprep.subr.bf16.mxu1 %v20636_v44  ;;  %4013 = vmatprep.subr.bf16.mxu0 %v20639_v43  ;;  %v20714_v44 = vld [vmem:[#allocation4 + $0x90c] ss:$36 sps:$4 sm:$0xff]   ;;  %v20717_v43 = vld [vmem:[#allocation4 + $0x914] ss:$36 sps:$4 sm:$0xff]  }
 0x22c   : > { %3893 = vmatmul.mubr.bf16.gmra.mxu1 %v23442_v9  ;;  %3999 = vmatmul.mubr.bf16.gmra.mxu0 %v23442_v9 }
 0x22d   : > { %3908 = vmatpush1.bf16.msra.mxu1 %v20634_v34  ;;  %4014 = vmatpush1.bf16.msra.mxu0 %v20637_v46  ;;  %v20712_v34 = vld [vmem:[#allocation4 + $0x908] ss:$36 sps:$4 sm:$0xff]   ;;  %v20715_v46 = vld [vmem:[#allocation4 + $0x910] ss:$36 sps:$4 sm:$0xff]  }
 0x22e   : > { %3935 = vmatprep.mubr.bf16.mxu1 %v23404_v11  ;;  %4041 = vmatprep.mubr.bf16.mxu0 %v23404_v11 }
 0x22f   : > { %3909 = vmatprep.subr.bf16.mxu1 %v20642_v47  ;;  %4015 = vmatprep.subr.bf16.mxu0 %v20645_v33  ;;  %v20720_v47 = vld [vmem:[#allocation4 + $0xd4c] ss:$36 sps:$4 sm:$0xff]   ;;  %v20723_v33 = vld [vmem:[#allocation4 + $0xd54] ss:$36 sps:$4 sm:$0xff]  }
 0x231   : > { %3910 = vmatpush1.bf16.msra.mxu1 %v20640_v48  ;;  %4016 = vmatpush1.bf16.msra.mxu0 %v20643_v38  ;;  %v20718_v48 = vld [vmem:[#allocation4 + $0xd48] ss:$36 sps:$4 sm:$0xff]   ;;  %v20721_v38 = vld [vmem:[#allocation4 + $0xd50] ss:$36 sps:$4 sm:$0xff]  }
 0x232   : > { %3911 = vmatprep.subr.bf16.mxu1 %v20648_v37  ;;  %4017 = vmatprep.subr.bf16.mxu0 %v20651_v16  ;;  %v20726_v37 = vld [vmem:[#allocation4 + $0xd04] ss:$36 sps:$4 sm:$0xff]   ;;  %v20729_v16 = vld [vmem:[#allocation4 + $0xd0c] ss:$36 sps:$4 sm:$0xff]  }
 0x235   : > { %3912 = vmatpush1.bf16.msra.mxu1 %v20646_v20  ;;  %4018 = vmatpush1.bf16.msra.mxu0 %v20649_v26  ;;  %v20724_v20 = vld [vmem:[#allocation4 + $0xd00] ss:$36 sps:$4 sm:$0xff]   ;;  %v20727_v26 = vld [vmem:[#allocation4 + $0xd08] ss:$36 sps:$4 sm:$0xff]  }
 0x236   : > { %3913 = vmatprep.subr.bf16.mxu1 %v20654_v55  ;;  %4019 = vmatprep.subr.bf16.mxu0 %v20657_v56  ;;  %v20732_v55 = vld [vmem:[#allocation4 + $0xcbc] ss:$36 sps:$4 sm:$0xff]   ;;  %v20735_v56 = vld [vmem:[#allocation4 + $0xcc4] ss:$36 sps:$4 sm:$0xff]  }
 0x239   : > { %3914 = vmatpush1.bf16.msra.mxu1 %v20652_v49  ;;  %4020 = vmatpush1.bf16.msra.mxu0 %v20655_v50  ;;  %v20730_v49 = vld [vmem:[#allocation4 + $0xcb8] ss:$36 sps:$4 sm:$0xff]   ;;  %v20733_v50 = vld [vmem:[#allocation4 + $0xcc0] ss:$36 sps:$4 sm:$0xff]  }
 0x23a   : > { %3915 = vmatprep.subr.bf16.mxu1 %v20660_v6  ;;  %4021 = vmatprep.subr.bf16.mxu0 %v20663_v61  ;;  %v20738_v6 = vld [vmem:[#allocation4 + $0xc74] ss:$36 sps:$4 sm:$0xff]   ;;  %v20741_v61 = vld [vmem:[#allocation4 + $0xc7c] ss:$36 sps:$4 sm:$0xff]  }
 0x23d   : > { %3916 = vmatpush1.bf16.msra.mxu1 %v20658_v62  ;;  %4022 = vmatpush1.bf16.msra.mxu0 %v20661_v63  ;;  %v20736_v62 = vld [vmem:[#allocation4 + $0xc70] ss:$36 sps:$4 sm:$0xff]   ;;  %v20739_v63 = vld [vmem:[#allocation4 + $0xc78] ss:$36 sps:$4 sm:$0xff]  }
 0x23e   : > { %3917 = vmatprep.subr.bf16.mxu1 %v20666_v0  ;;  %4023 = vmatprep.subr.bf16.mxu0 %v20669_v58  ;;  %v20744_v0 = vld [vmem:[#allocation4 + $0xc2c] ss:$36 sps:$4 sm:$0xff]   ;;  %v20747_v58 = vld [vmem:[#allocation4 + $0xc34] ss:$36 sps:$4 sm:$0xff]  }
 0x241   : > { %3918 = vmatpush1.bf16.msra.mxu1 %v20664_v59  ;;  %4024 = vmatpush1.bf16.msra.mxu0 %v20667_v54  ;;  %v20742_v59 = vld [vmem:[#allocation4 + $0xc28] ss:$36 sps:$4 sm:$0xff]   ;;  %v20745_v54 = vld [vmem:[#allocation4 + $0xc30] ss:$36 sps:$4 sm:$0xff]  }
 0x242   : > { %3919 = vmatprep.subr.bf16.mxu1 %v20672_v41  ;;  %4025 = vmatprep.subr.bf16.mxu0 %v20675_v52  ;;  %v20750_v41 = vld [vmem:[#allocation4 + $0xbe4] ss:$36 sps:$4 sm:$0xff]   ;;  %v20753_v52 = vld [vmem:[#allocation4 + $0xbec] ss:$36 sps:$4 sm:$0xff]  }
 0x245   : > { %3920 = vmatpush2.bf16.msra.mxu1 %v20670_v60  ;;  %4026 = vmatpush2.bf16.msra.mxu0 %v20673_v57  ;;  %v20748_v60 = vld [vmem:[#allocation4 + $0xbe0] ss:$36 sps:$4 sm:$0xff]   ;;  %v20751_v57 = vld [vmem:[#allocation4 + $0xbe8] ss:$36 sps:$4 sm:$0xff]  }
 0x246   : > { %3921 = vmatprep.subr.bf16.mxu1 %v20678_v53  ;;  %4027 = vmatprep.subr.bf16.mxu0 %v20681_v21  ;;  %v20756_v53 = vld [vmem:[#allocation4 + $0xb9c] ss:$36 sps:$4 sm:$0xff]   ;;  %v20759_v21 = vld [vmem:[#allocation4 + $0xba4] ss:$36 sps:$4 sm:$0xff]  }
 0x249   : > { %3922 = vmatpush2.bf16.msra.mxu1 %v20676_v12  ;;  %4028 = vmatpush2.bf16.msra.mxu0 %v20679_v15  ;;  %v20754_v12 = vld [vmem:[#allocation4 + $0xb98] ss:$36 sps:$4 sm:$0xff]   ;;  %v20757_v15 = vld [vmem:[#allocation4 + $0xba0] ss:$36 sps:$4 sm:$0xff]  }
 0x24a   : > { %3923 = vmatprep.subr.bf16.mxu1 %v20684_v1  ;;  %4029 = vmatprep.subr.bf16.mxu0 %v20687_v23  ;;  %v20762_v1 = vld [vmem:[#allocation4 + $0xb54] ss:$36 sps:$4 sm:$0xff]   ;;  %v20765_v23 = vld [vmem:[#allocation4 + $0xb5c] ss:$36 sps:$4 sm:$0xff]  }
 0x24d   : > { %3924 = vmatpush2.bf16.msra.mxu1 %v20682_v19  ;;  %4030 = vmatpush2.bf16.msra.mxu0 %v20685_v32  ;;  %v20760_v19 = vld [vmem:[#allocation4 + $0xb50] ss:$36 sps:$4 sm:$0xff]   ;;  %v20763_v32 = vld [vmem:[#allocation4 + $0xb58] ss:$36 sps:$4 sm:$0xff]  }
 0x24e   : > { %3925 = vmatprep.subr.bf16.mxu1 %v20690_v42  ;;  %4031 = vmatprep.subr.bf16.mxu0 %v20693_v51  ;;  %v20768_v42 = vld [vmem:[#allocation4 + $0x8d4] ss:$36 sps:$4 sm:$0xff]  }
 0x24f   : > { %v20769_v51 = vld [vmem:[#allocation4 + $0xb18] ss:$36 sps:$4 sm:$0xff]  }
 0x251   : > { %3926 = vmatpush2.bf16.msra.mxu1 %v20688_v4  ;;  %4032 = vmatpush2.bf16.msra.mxu0 %v20691_v45  ;;  %v20766_v4 = vld [vmem:[#allocation4 + $0x8d0] ss:$36 sps:$4 sm:$0xff]   ;;  %v20770_v45 = vld [vmem:[#allocation4 + $0x8d8] ss:$36 sps:$4 sm:$0xff]  }
 0x252   : > { %3927 = vmatprep.subr.bf16.mxu1 %v20696_v5  ;;  %4033 = vmatprep.subr.bf16.mxu0 %v20699_v2  ;;  %v20773_v5 = vld [vmem:[#allocation4 + $0x88c] ss:$36 sps:$4 sm:$0xff]  }
 0x253   : > { %v20774_v2 = vld [vmem:[#allocation4 + $0xad0] ss:$36 sps:$4 sm:$0xff]  }
 0x255   : > { %3928 = vmatpush2.bf16.msra.mxu1 %v20694_v13  ;;  %4034 = vmatpush2.bf16.msra.mxu0 %v20697_v3  ;;  %v20771_v13 = vld [vmem:[#allocation4 + $0x888] ss:$36 sps:$4 sm:$0xff]   ;;  %v20775_v3 = vld [vmem:[#allocation4 + $0x890] ss:$36 sps:$4 sm:$0xff]  }
 0x256   : > { %3929 = vmatprep.subr.bf16.mxu1 %v20702_v30  ;;  %4035 = vmatprep.subr.bf16.mxu0 %v20705_v25  ;;  %v20778_v30 = vld [vmem:[#allocation4 + $0x844] ss:$36 sps:$4 sm:$0xff]  }
 0x257   : > { %v20779_v25 = vld [vmem:[#allocation4 + $0xa88] ss:$36 sps:$4 sm:$0xff]  }
 0x259   : > { %3930 = vmatpush2.bf16.msra.mxu1 %v20700_v36  ;;  %4036 = vmatpush2.bf16.msra.mxu0 %v20703_v40  ;;  %v20776_v36 = vld [vmem:[#allocation4 + $0x840] ss:$36 sps:$4 sm:$0xff]   ;;  %v20780_v40 = vld [vmem:[#allocation4 + $0x848] ss:$36 sps:$4 sm:$0xff]  }
 0x25a   : > { %3931 = vmatprep.subr.bf16.mxu1 %v20708_v35  ;;  %4037 = vmatprep.subr.bf16.mxu0 %v20711_v17  ;;  %v20783_v35 = vld [vmem:[#allocation4 + $0x7fc] ss:$36 sps:$4 sm:$0xff]  }
 0x25b   : > { %v20784_v17 = vld [vmem:[#allocation4 + $0xa40] ss:$36 sps:$4 sm:$0xff]  }
 0x25d   : > { %3932 = vmatpush2.bf16.msra.mxu1 %v20706_v14  ;;  %4038 = vmatpush2.bf16.msra.mxu0 %v20709_v18  ;;  %v20781_v14 = vld [vmem:[#allocation4 + $0x7f8] ss:$36 sps:$4 sm:$0xff]   ;;  %v20785_v18 = vld [vmem:[#allocation4 + $0x800] ss:$36 sps:$4 sm:$0xff]  }
 0x25e   : > { %3933 = vmatprep.subr.bf16.mxu1 %v20714_v44  ;;  %4039 = vmatprep.subr.bf16.mxu0 %v20717_v43  ;;  %v20788_v44 = vld [vmem:[#allocation4 + $0x7b4] ss:$36 sps:$4 sm:$0xff]  }
 0x25f   : > { %v20789_v43 = vld [vmem:[#allocation4 + $0x9f8] ss:$36 sps:$4 sm:$0xff]  }
 0x261   : > { %3934 = vmatpush2.bf16.msra.mxu1 %v20712_v34  ;;  %4040 = vmatpush2.bf16.msra.mxu0 %v20715_v46  ;;  %v20786_v34 = vld [vmem:[#allocation4 + $0x7b0] ss:$36 sps:$4 sm:$0xff]   ;;  %v20790_v46 = vld [vmem:[#allocation4 + $0x7b8] ss:$36 sps:$4 sm:$0xff]  }
 0x262   : > { %4062 = vmatprep.subr.bf16.mxu1 %v20720_v47  ;;  %4168 = vmatprep.subr.bf16.mxu0 %v20723_v33  ;;  %v20793_v47 = vld [vmem:[#allocation4 + $0x76c] ss:$36 sps:$4 sm:$0xff]  }
 0x263   : > { %v20794_v33 = vld [vmem:[#allocation4 + $0x9b0] ss:$36 sps:$4 sm:$0xff]  }
 0x264   : > { %3936 = vmatmul.mubr.bf16.vlgmr.msra.gmra.mxu1 %v23407_v31  ;;  %4042 = vmatmul.mubr.bf16.vlgmr.msra.gmra.mxu0 %v23407_v31 }
 0x265   : > { %3945 = vmatprep.mubr.bf16.mxu1 %v23409_v39  ;;  %4051 = vmatprep.mubr.bf16.mxu0 %v23409_v39 }
 0x266   : > { %4063 = vmatpush1.bf16.msra.mxu1 %v20718_v48  ;;  %4169 = vmatpush1.bf16.msra.mxu0 %v20721_v38  ;;  %v20791_v48 = vld [vmem:[#allocation4 + $0x768] ss:$36 sps:$4 sm:$0xff]   ;;  %v20795_v38 = vld [vmem:[#allocation4 + $0x770] ss:$36 sps:$4 sm:$0xff]  }
 0x267   : > { %4064 = vmatprep.subr.bf16.mxu1 %v20726_v37  ;;  %4170 = vmatprep.subr.bf16.mxu0 %v20729_v16  ;;  %v20798_v37 = vld [vmem:[#allocation4 + $0x724] ss:$36 sps:$4 sm:$0xff]  }
 0x268   : > { %v20799_v16 = vld [vmem:[#allocation4 + $0x968] ss:$36 sps:$4 sm:$0xff]  }
 0x26a   : > { %4065 = vmatpush1.bf16.msra.mxu1 %v20724_v20  ;;  %4171 = vmatpush1.bf16.msra.mxu0 %v20727_v26  ;;  %v20796_v20 = vld [vmem:[#allocation4 + $0x720] ss:$36 sps:$4 sm:$0xff]  }
 0x26b   : > { %4066 = vmatprep.subr.bf16.mxu1 %v20732_v55  ;;  %4172 = vmatprep.subr.bf16.mxu0 %v20735_v56  ;;  %v20803_v26 = vld [vmem:[#allocation4 + $0x6dc] ss:$36 sps:$4 sm:$0xff]  }
 0x26c   : > { %3946 = vmatmul.mubr.bf16.gmra.mxu1 %v23415_v10  ;;  %4052 = vmatmul.mubr.bf16.gmra.mxu0 %v23415_v10  ;;  %v20804_v55 = vld [vmem:[#allocation4 + $0x920] ss:$36 sps:$4 sm:$0xff]   ;;  %v20801_v56 = vld [vmem:[#allocation4 + $0x6d8] ss:$36 sps:$4 sm:$0xff]  }
 0x26d   : > { %4094 = vmatprep.mubr.bf16.mxu1 %v24896_v24  ;;  %4200 = vmatprep.mubr.bf16.mxu0 %v24896_v24 }
 0x26e   : > { %4067 = vmatpush1.bf16.msra.mxu1 %v20730_v49  ;;  %4173 = vmatpush1.bf16.msra.mxu0 %v20733_v50  ;;  %v20805_v49 = vld [vmem:[#allocation4 + $0x6e0] ss:$36 sps:$4 sm:$0xff]   ;;  %v20808_v50 = vld [vmem:[#allocation4 + $0xb14] ss:$36 sps:$4 sm:$0xff]  }
 0x26f   : > { %4068 = vmatprep.subr.bf16.mxu1 %v20738_v6  ;;  %4174 = vmatprep.subr.bf16.mxu0 %v20741_v61  ;;  %v20806_v6 = vld [vmem:[#allocation4 + $0xb10] ss:$36 sps:$4 sm:$0xff]  }
 0x270   : > { %v20811_v61 = vld [vmem:[#allocation4 + $0xacc] ss:$36 sps:$4 sm:$0xff]  }
 0x272   : > { %4069 = vmatpush1.bf16.msra.mxu1 %v20736_v62  ;;  %4175 = vmatpush1.bf16.msra.mxu0 %v20739_v63  ;;  %v20809_v62 = vld [vmem:[#allocation4 + $0xac8] ss:$36 sps:$4 sm:$0xff]  }
 0x273   : > { %4070 = vmatprep.subr.bf16.mxu1 %v20744_v0  ;;  %4176 = vmatprep.subr.bf16.mxu0 %v20747_v58  ;;  %v20814_v63 = vld [vmem:[#allocation4 + $0xa84] ss:$36 sps:$4 sm:$0xff]   ;;  %v20817_v58 = vld [vmem:[#allocation4 + $0xa3c] ss:$36 sps:$4 sm:$0xff]  }
 0x274   : > { %v20812_v0 = vld [vmem:[#allocation4 + $0xa80] ss:$36 sps:$4 sm:$0xff]  }
 0x276   : > { %4071 = vmatpush1.bf16.msra.mxu1 %v20742_v59  ;;  %4177 = vmatpush1.bf16.msra.mxu0 %v20745_v54  ;;  %v20815_v59 = vld [vmem:[#allocation4 + $0xa38] ss:$36 sps:$4 sm:$0xff]  }
 0x277   : > { %4072 = vmatprep.subr.bf16.mxu1 %v20750_v41  ;;  %4178 = vmatprep.subr.bf16.mxu0 %v20753_v52  ;;  %v20820_v54 = vld [vmem:[#allocation4 + $0x9f4] ss:$36 sps:$4 sm:$0xff]   ;;  %v20823_v52 = vld [vmem:[#allocation4 + $0x9ac] ss:$36 sps:$4 sm:$0xff]  }
 0x278   : > { %v20818_v41 = vld [vmem:[#allocation4 + $0x9f0] ss:$36 sps:$4 sm:$0xff]  }
 0x27a   : > { %4073 = vmatpush1.bf16.msra.mxu1 %v20748_v60  ;;  %4179 = vmatpush1.bf16.msra.mxu0 %v20751_v57  ;;  %v20821_v60 = vld [vmem:[#allocation4 + $0x9a8] ss:$36 sps:$4 sm:$0xff]  }
 0x27b   : > { %4074 = vmatprep.subr.bf16.mxu1 %v20756_v53  ;;  %4180 = vmatprep.subr.bf16.mxu0 %v20759_v21  ;;  %v20826_v57 = vld [vmem:[#allocation4 + $0x964] ss:$36 sps:$4 sm:$0xff]   ;;  %v20829_v21 = vld [vmem:[#allocation4 + $0x91c] ss:$36 sps:$4 sm:$0xff]  }
 0x27c   : > { %v20824_v53 = vld [vmem:[#allocation4 + $0x960] ss:$36 sps:$4 sm:$0xff]  }
 0x27e   : > { %4075 = vmatpush1.bf16.msra.mxu1 %v20754_v12  ;;  %4181 = vmatpush1.bf16.msra.mxu0 %v20757_v15  ;;  %v20827_v12 = vld [vmem:[#allocation4 + $0x918] ss:$36 sps:$4 sm:$0xff]  }
 0x27f   : > { %4076 = vmatprep.subr.bf16.mxu1 %v20762_v1  ;;  %4182 = vmatprep.subr.bf16.mxu0 %v20765_v23  ;;  %v20830_v15 = vld [vmem:[#allocation4 + $0xd58] ss:$36 sps:$4 sm:$0xff]   ;;  %v20831_v1 = vld [vmem:[#allocation4 + $0xd10] ss:$36 sps:$4 sm:$0xff]   ;;  %v20832_v23 = vld [vmem:[#allocation4 + $0xcc8] ss:$36 sps:$4 sm:$0xff]  }
 0x282   : > { %4077 = vmatpush1.bf16.msra.mxu1 %v20760_v19  ;;  %4183 = vmatpush1.bf16.msra.mxu0 %v20763_v32  ;;  %v20833_v19 = vld [vmem:[#allocation4 + $0xc80] ss:$36 sps:$4 sm:$0xff]   ;;  %v20834_v32 = vld [vmem:[#allocation4 + $0xc38] ss:$36 sps:$4 sm:$0xff]  }
 0x283   : > { %4115 = vmatprep.subr.bf16.mxu1 %v20768_v42  ;;  %19581 = vmatprep.subr.bf16.mxu0 %v20769_v51  ;;  %v20835_v42 = vld [vmem:[#allocation4 + $0xbf0] ss:$36 sps:$4 sm:$0xff]   ;;  %v20838_v51 = vld [vmem:[#allocation4 + $0xf78] ss:$36 sps:$4 sm:$0xff]  }
 0x285   : > { %4095 = vmatmul.mubr.bf16.vlgmr.msra.gmra.mxu1 %v23444_v27  ;;  %4201 = vmatmul.mubr.bf16.vlgmr.msra.gmra.mxu0 %v23444_v27 }
 0x286   : > { %4116 = vmatpush1.bf16.msra.mxu1 %v20766_v4  ;;  %19582 = vmatpush3.bf16.msra.mxu0 %v20770_v45  ;;  %v20840_v4 = vld [vmem:[#allocation4 + $0xf7c] ss:$36 sps:$4 sm:$0xff]   ;;  %v20843_v45 = vld [vmem:[#allocation4 + $0xf34] ss:$36 sps:$4 sm:$0xff]  }
 0x287   : > { %4117 = vmatprep.subr.bf16.mxu1 %v20773_v5  ;;  %19583 = vmatprep.subr.bf16.mxu0 %v20774_v2  ;;  %v20837_v5 = vld [vmem:[#allocation4 + $0xb60] ss:$36 sps:$4 sm:$0xff]  }
 0x288   : > { %4104 = vmatprep.mubr.bf16.mxu1 %v24896_v24  ;;  %4210 = vmatprep.mubr.bf16.mxu0 %v24896_v24  ;;  %v20849_v2 = vld [vmem:[#allocation4 + $0xea4] ss:$36 sps:$4 sm:$0xff]  }
 0x28a   : > { %4118 = vmatpush1.bf16.msra.mxu1 %v20771_v13  ;;  %19584 = vmatpush3.bf16.msra.mxu0 %v20775_v3  ;;  %v20847_v13 = vld [vmem:[#allocation4 + $0xea0] ss:$36 sps:$4 sm:$0xff]  }
 0x28b   : > { %4119 = vmatprep.subr.bf16.mxu1 %v20778_v30  ;;  %19585 = vmatprep.subr.bf16.mxu0 %v20779_v25  ;;  %v20852_v3 = vld [vmem:[#allocation4 + $0xe5c] ss:$36 sps:$4 sm:$0xff]   ;;  %v20855_v25 = vld [vmem:[#allocation4 + $0xe14] ss:$36 sps:$4 sm:$0xff]  }
 0x28c   : > { %v20850_v30 = vld [vmem:[#allocation4 + $0xe58] ss:$36 sps:$4 sm:$0xff]  }
 0x28d   : > { %4105 = vmatmul.mubr.bf16.gmra.mxu1 %v23442_v9  ;;  %4211 = vmatmul.mubr.bf16.gmra.mxu0 %v23442_v9 }
 0x28e   : > { %4120 = vmatpush1.bf16.msra.mxu1 %v20776_v36  ;;  %4147 = vmatprep.mubr.bf16.mxu1 %v23404_v11  ;;  %v20853_v36 = vld [vmem:[#allocation4 + $0xe10] ss:$36 sps:$4 sm:$0xff]  }
 0x28f   : > { %19586 = vmatpush3.bf16.msra.mxu0 %v20780_v40  ;;  %4253 = vmatprep.mubr.bf16.mxu0 %v23404_v11  ;;  %v20800_v11 = vld [vmem:[#allocation4 + $0x728] ss:$36 sps:$4 sm:$0xff]  }
 0x290   : > { %4121 = vmatprep.subr.bf16.mxu1 %v20783_v35  ;;  %19587 = vmatprep.subr.bf16.mxu0 %v20784_v17  ;;  %v20856_v40 = vld [vmem:[#allocation4 + $0xdc8] ss:$36 sps:$4 sm:$0xff]   ;;  %v20859_v17 = vld [vmem:[#allocation4 + $0xd80] ss:$36 sps:$4 sm:$0xff]  }
 0x291   : > { %v20861_v35 = vld [vmem:[#allocation4 + $0xd84] ss:$36 sps:$4 sm:$0xff]  }
 0x292   : > { %4122 = vmatpush1.bf16.msra.mxu1 %v20781_v14  ;;  %v20864_v14 = vld [vmem:[#allocation4 + $0x11bc] ss:$36 sps:$4 sm:$0xff]  }
 0x293   : > { %19588 = vmatpush3.bf16.msra.mxu0 %v20785_v18  ;;  %4123 = vmatprep.subr.bf16.mxu1 %v20788_v44  ;;  %v20862_v44 = vld [vmem:[#allocation4 + $0x11b8] ss:$36 sps:$4 sm:$0xff]  }
 0x294   : > { %19589 = vmatprep.subr.bf16.mxu0 %v20789_v43  ;;  %v20867_v43 = vld [vmem:[#allocation4 + $0x1174] ss:$36 sps:$4 sm:$0xff]  }
 0x296   : > { %4124 = vmatpush1.bf16.msra.mxu1 %v20786_v34 }
 0x297   : > { %19590 = vmatpush3.bf16.msra.mxu0 %v20790_v46  ;;  %4125 = vmatprep.subr.bf16.mxu1 %v20793_v47  ;;  %v20865_v46 = vld [vmem:[#allocation4 + $0x1170] ss:$36 sps:$4 sm:$0xff]  }
 0x298   : > { %19591 = vmatprep.subr.bf16.mxu0 %v20794_v33  ;;  %v20870_v33 = vld [vmem:[#allocation4 + $0x112c] ss:$36 sps:$4 sm:$0xff]  }
 0x29a   : > { %4126 = vmatpush1.bf16.msra.mxu1 %v20791_v48 }
 0x29b   : > { %19592 = vmatpush3.bf16.msra.mxu0 %v20795_v38  ;;  %4127 = vmatprep.subr.bf16.mxu1 %v20798_v37  ;;  %v20868_v37 = vld [vmem:[#allocation4 + $0x1128] ss:$36 sps:$4 sm:$0xff]  }
 0x29c   : > { %19593 = vmatprep.subr.bf16.mxu0 %v20799_v16  ;;  %v20873_v16 = vld [vmem:[#allocation4 + $0x10e4] ss:$36 sps:$4 sm:$0xff]  }
 0x29e   : > { %4128 = vmatpush1.bf16.msra.mxu1 %v20796_v20 }
 0x29f   : > { %19594 = vmatpush3.bf16.msra.mxu0 %v20800_v11  ;;  %4129 = vmatprep.subr.bf16.mxu1 %v20803_v26  ;;  %v20871_v26 = vld [vmem:[#allocation4 + $0x10e0] ss:$36 sps:$4 sm:$0xff]  }
 0x2a0   : > { %19595 = vmatprep.subr.bf16.mxu0 %v20804_v55  ;;  %v20876_v55 = vld [vmem:[#allocation4 + $0x109c] ss:$36 sps:$4 sm:$0xff]  }
 0x2a2   : > { %4130 = vmatpush1.bf16.msra.mxu1 %v20801_v56 }
 0x2a3   : > { %19596 = vmatpush3.bf16.msra.mxu0 %v20805_v49  ;;  %4131 = vmatprep.subr.bf16.mxu1 %v20808_v50  ;;  %v20874_v50 = vld [vmem:[#allocation4 + $0x1098] ss:$36 sps:$4 sm:$0xff]  }
 0x2a4   : > { %5808 = vmatprep.subr.bf16.mxu0 %v20840_v4 }
 0x2a6   : > { %4254 = vmatmul.mubr.bf16.vlgmr.msra.gmra.mxu0 %v23407_v31  ;;  %4132 = vmatpush2.bf16.msra.mxu1 %v20806_v6  ;;  %v20879_v6 = vld [vmem:[#allocation4 + $0x1054] ss:$36 sps:$4 sm:$0xff]  }
 0x2a7   : > { %4261 = vmatprep.mubr.bf16.mxu0 %v23409_v39  ;;  %4133 = vmatprep.subr.bf16.mxu1 %v20811_v61 }
 0x2a8   : > { %5809 = vmatpush1.bf16.msra.mxu0 %v20838_v51 }
 0x2a9   : > { %5810 = vmatprep.subr.bf16.mxu0 %v20843_v45  ;;  %v20903_v45 = vld [vmem:[#allocation4 + $0x1324] ss:$36 sps:$4 sm:$0xff]  }
 0x2aa   : > { %4134 = vmatpush2.bf16.msra.mxu1 %v20809_v62 }
 0x2ab   : > { %4135 = vmatprep.subr.bf16.mxu1 %v20814_v63  ;;  %v20877_v63 = vld [vmem:[#allocation4 + $0x1050] ss:$36 sps:$4 sm:$0xff]  }
 0x2ae   : > { %4262 = vmatmul.mubr.bf16.gmra.mxu0 %v23415_v10  ;;  %4136 = vmatpush2.bf16.msra.mxu1 %v20812_v0  ;;  %v20882_v0 = vld [vmem:[#allocation4 + $0x100c] ss:$36 sps:$4 sm:$0xff]  }
 0x2af   : > { %4137 = vmatprep.subr.bf16.mxu1 %v20817_v58 }
 0x2b2   : > { %4138 = vmatpush2.bf16.msra.mxu1 %v20815_v59 }
 0x2b3   : > { %4139 = vmatprep.subr.bf16.mxu1 %v20820_v54  ;;  %v20880_v54 = vld [vmem:[#allocation4 + $0x1008] ss:$36 sps:$4 sm:$0xff]  }
 0x2b6   : > { %4140 = vmatpush2.bf16.msra.mxu1 %v20818_v41 }
 0x2b7   : > { %4141 = vmatprep.subr.bf16.mxu1 %v20823_v52  ;;  %v20885_v52 = vld [vmem:[#allocation4 + $0x13fc] ss:$36 sps:$4 sm:$0xff]  }
 0x2ba   : > { %4142 = vmatpush2.bf16.msra.mxu1 %v20821_v60  ;;  %v20883_v60 = vld [vmem:[#allocation4 + $0x13f8] ss:$36 sps:$4 sm:$0xff]  }
 0x2bb   : > { %4143 = vmatprep.subr.bf16.mxu1 %v20826_v57  ;;  %v20888_v57 = vld [vmem:[#allocation4 + $0xfc4] ss:$36 sps:$4 sm:$0xff]  }
 0x2be   : > { %4144 = vmatpush2.bf16.msra.mxu1 %v20824_v53 }
 0x2bf   : > { %4145 = vmatprep.subr.bf16.mxu1 %v20829_v21  ;;  %v20886_v21 = vld [vmem:[#allocation4 + $0xfc0] ss:$36 sps:$4 sm:$0xff]  }
 0x2c2   : > { %4146 = vmatpush2.bf16.msra.mxu1 %v20827_v12 }
 0x2c3   : > { %19961 = vmatprep.subr.bf16.mxu1 %v20830_v15 }
 0x2c4   : > { %v23479_v18 = vpop.f32.mrf.mxu0 }
 0x2c5   : > { %4148 = vmatmul.mubr.bf16.vlgmr.msra.gmra.mxu1 %v23407_v31  ;;  %v20836_v31 = vld [vmem:[#allocation4 + $0xba8] ss:$36 sps:$4 sm:$0xff]  }
 0x2c6   : > { %4157 = vmatprep.mubr.bf16.mxu1 %v23409_v39  ;;  %19962 = vmatpush3.bf16.msra.mxu1 %v20830_v15  ;;  %v20841_v39 = vld [vmem:[#allocation4 + $0xf30] ss:$36 sps:$4 sm:$0xff]   ;;  %v23481_v34 = vpop.f32.mrf.mxu0 }
 0x2c7   : > { %19963 = vmatprep.subr.bf16.mxu1 %v20831_v1  ;;  %5811 = vmatpush1.bf16.msra.mxu0 %v20841_v39  ;;  %v20891_v15 = vld [vmem:[#allocation4 + $0x13b4] ss:$36 sps:$4 sm:$0xff]  }
 0x2c8   : > { %v23483_v47 = vpop.f32.mrf.mxu0 }
 0x2ca   : > { %19964 = vmatpush3.bf16.msra.mxu1 %v20831_v1  ;;  %v23485_v48 = vpop.f32.mrf.mxu0  ;;  %v20889_v1 = vld [vmem:[#allocation4 + $0x13b0] ss:$36 sps:$4 sm:$0xff]  }
 0x2cb   : > { %19965 = vmatprep.subr.bf16.mxu1 %v20832_v23 }
 0x2cc   : > { %v23489_v20 = vpop.f32.mrf.mxu0 }
 0x2cd   : > { %4158 = vmatmul.mubr.bf16.gmra.mxu1 %v23415_v10  ;;  %v20846_v10 = vld [vmem:[#allocation4 + $0xeec] ss:$36 sps:$4 sm:$0xff]  }
 0x2ce   : > { %19966 = vmatpush3.bf16.msra.mxu1 %v20832_v23  ;;  %19977 = vmatprep.mubr.bf16.mxu1 %v23444_v27  ;;  %v20844_v27 = vld [vmem:[#allocation4 + $0xee8] ss:$36 sps:$4 sm:$0xff]   ;;  %v23493_v56 = vpop.f32.mrf.mxu0 }
 0x2cf   : > { %19967 = vmatprep.subr.bf16.mxu1 %v20833_v19  ;;  %5812 = vmatprep.subr.bf16.mxu0 %v20846_v10  ;;  %v20894_v23 = vld [vmem:[#allocation4 + $0x1404] ss:$36 sps:$4 sm:$0xff]  }
 0x2d0   : > { %5813 = vmatpush1.bf16.msra.mxu0 %v20844_v27  ;;  %v23497_v61 = vpop.f32.mrf.mxu0  ;;  %v20901_v10 = vld [vmem:[#allocation4 + $0x1320] ss:$36 sps:$4 sm:$0xff]  }
 0x2d1   : > { %5814 = vmatprep.subr.bf16.mxu0 %v20849_v2 }
 0x2d2   : > { %19968 = vmatpush3.bf16.msra.mxu1 %v20833_v19  ;;  %v23501_v58 = vpop.f32.mrf.mxu0 }
 0x2d3   : > { %19969 = vmatprep.subr.bf16.mxu1 %v20834_v32 }
 0x2d4   : > { %5815 = vmatpush1.bf16.msra.mxu0 %v20847_v13 }
 0x2d5   : > { %5816 = vmatprep.subr.bf16.mxu0 %v20852_v3  ;;  %v20909_v3 = vld [vmem:[#allocation4 + $0x12dc] ss:$36 sps:$4 sm:$0xff]  }
 0x2d6   : > { %19970 = vmatpush3.bf16.msra.mxu1 %v20834_v32 }
 0x2d7   : > { %19971 = vmatprep.subr.bf16.mxu1 %v20835_v42 }
 0x2d8   : > { %5817 = vmatpush1.bf16.msra.mxu0 %v20850_v30 }
 0x2d9   : > { %5818 = vmatprep.subr.bf16.mxu0 %v20855_v25  ;;  %v20907_v25 = vld [vmem:[#allocation4 + $0x12d8] ss:$36 sps:$4 sm:$0xff]  }
 0x2da   : > { %19972 = vmatpush3.bf16.msra.mxu1 %v20835_v42  ;;  %v20895_v42 = vld [vmem:[#allocation4 + $0x1368] ss:$36 sps:$4 sm:$0xff]  }
 0x2db   : > { %19973 = vmatprep.subr.bf16.mxu1 %v20836_v31 }
 0x2dc   : > { %5819 = vmatpush1.bf16.msra.mxu0 %v20853_v36 }
 0x2de   : > { %19974 = vmatpush3.bf16.msra.mxu1 %v20836_v31  ;;  %v20897_v31 = vld [vmem:[#allocation4 + $0x136c] ss:$36 sps:$4 sm:$0xff]  }
 0x2df   : > { %19975 = vmatprep.subr.bf16.mxu1 %v20837_v5 }
 0x2e2   : > { %19976 = vmatpush3.bf16.msra.mxu1 %v20837_v5 }
 0x2e3   : > { %5861 = vmatprep.subr.bf16.mxu1 %v20885_v52 }
 0x2e4   : > { %v23487_v38 = vpop.f32.mrf.mxu1  ;;  %v3990_v41 = vpop.f32.mrf.mxu0 }
 0x2e5   : > { %19978 = vmatmul.mubr.bf16.vlgmr.msra.gmra.mxu1 %v23442_v9  ;;  %v20858_v9 = vld [vmem:[#allocation4 + $0xdcc] ss:$36 sps:$4 sm:$0xff]  }
 0x2e6   : > { %5893 = vmatprep.mubr.bf16.mxu1 %v24896_v24  ;;  %5820 = vmatprep.subr.bf16.mxu0 %v20858_v9  ;;  %v23491_v11 = vpop.f32.mrf.mxu1  ;;  %v23507_v12 = vpop.f32.mrf.mxu0 }
 0x2e7   : > { %5821 = vmatpush1.bf16.msra.mxu0 %v20856_v40  ;;  %5862 = vmatpush1.bf16.msra.mxu1 %v20883_v60  ;;  %v20925_v60 = vld [vmem:[#allocation4 + $0x1200] ss:$36 sps:$4 sm:$0xff]  }
 0x2e8   : > { %5822 = vmatprep.subr.bf16.mxu0 %v20861_v35  ;;  %v23495_v49 = vpop.f32.mrf.mxu1  ;;  %5863 = vmatprep.subr.bf16.mxu1 %v20891_v15  ;;  %v3994_v32 = vpop.f32.mrf.mxu0 }
 0x2ea   : > { %v23499_v62 = vpop.f32.mrf.mxu1  ;;  %v23513_v4 = vpop.f32.mrf.mxu0 }
 0x2eb   : > { %5823 = vmatpush1.bf16.msra.mxu0 %v20859_v17  ;;  %5864 = vmatpush1.bf16.msra.mxu1 %v20889_v1 }
 0x2ec   : > { %5824 = vmatprep.subr.bf16.mxu0 %v20864_v14  ;;  %v23503_v59 = vpop.f32.mrf.mxu1  ;;  %5865 = vmatprep.subr.bf16.mxu1 %v20897_v31  ;;  %v4000_v2 = vpop.f32.mrf.mxu0  ;;  %v20915_v14 = vld [vmem:[#allocation4 + $0x1294] ss:$36 sps:$4 sm:$0xff]  }
 0x2ee   : > { %v23505_v53 = vpop.f32.mrf.mxu1  ;;  %v23522_v35 = vpop.f32.mrf.mxu0 }
 0x2ef   : > { %5825 = vmatpush2.bf16.msra.mxu0 %v20862_v44  ;;  %5866 = vmatpush1.bf16.msra.mxu1 %v20895_v42 }
 0x2f0   : > { %5826 = vmatprep.subr.bf16.mxu0 %v20867_v43  ;;  %v23509_v19 = vpop.f32.mrf.mxu1  ;;  %5867 = vmatprep.subr.bf16.mxu1 %v20903_v45 }
 0x2f2   : > { %v23511_v51 = vpop.f32.mrf.mxu1 }
 0x2f3   : > { %5827 = vmatpush2.bf16.msra.mxu0 %v20865_v46  ;;  %5868 = vmatpush1.bf16.msra.mxu1 %v20901_v10  ;;  %v20913_v46 = vld [vmem:[#allocation4 + $0x1290] ss:$36 sps:$4 sm:$0xff]  }
 0x2f4   : > { %5828 = vmatprep.subr.bf16.mxu0 %v20870_v33  ;;  %5869 = vmatprep.subr.bf16.mxu1 %v20909_v3 }
 0x2f7   : > { %5829 = vmatpush2.bf16.msra.mxu0 %v20868_v37  ;;  %5870 = vmatpush1.bf16.msra.mxu1 %v20907_v25 }
 0x2f8   : > { %5830 = vmatprep.subr.bf16.mxu0 %v20873_v16  ;;  %5871 = vmatprep.subr.bf16.mxu1 %v20915_v14 }
 0x2fb   : > { %5831 = vmatpush2.bf16.msra.mxu0 %v20871_v26  ;;  %5872 = vmatpush1.bf16.msra.mxu1 %v20913_v46  ;;  %v4004_v26 = vpop.f32.mrf.mxu0 }
 0x2fc   : > { %5832 = vmatprep.subr.bf16.mxu0 %v20876_v55 }
 0x2ff   : > { %5833 = vmatpush2.bf16.msra.mxu0 %v20874_v50  ;;  %v20921_v50 = vld [vmem:[#allocation4 + $0x124c] ss:$36 sps:$4 sm:$0xff]  }
 0x300   : > { %5834 = vmatprep.subr.bf16.mxu0 %v20879_v6  ;;  %5873 = vmatprep.subr.bf16.mxu1 %v20921_v50  ;;  %v3885_v50 = vadd.f32 %v23487_v38, %v23479_v18  ;;  %v23583_v18 = vadd.f32 %v23503_v59, %v23489_v20 }
 0x303   : > { %5835 = vmatpush2.bf16.msra.mxu0 %v20877_v63 }
 0x304   : > { %5836 = vmatprep.subr.bf16.mxu0 %v20882_v0  ;;  %v20919_v0 = vld [vmem:[#allocation4 + $0x1248] ss:$36 sps:$4 sm:$0xff]  }
 0x305   : > { %5874 = vmatpush1.bf16.msra.mxu1 %v20919_v0 }
 0x307   : > { %5837 = vmatpush2.bf16.msra.mxu0 %v20880_v54 }
 0x308   : > { %5838 = vmatprep.subr.bf16.mxu0 %v20888_v57  ;;  %v20933_v57 = vld [vmem:[#allocation4 + $0xf84] ss:$36 sps:$4 sm:$0xff]  }
 0x30b   : > { %5839 = vmatpush2.bf16.msra.mxu0 %v20886_v21  ;;  %v23540_v21 = vpop.f32.mrf.mxu0 }
 0x30c   : > { %5967 = vmatprep.subr.bf16.mxu0 %v20894_v23 }
 0x324   : > { %v3937_v39 = vpop.f32.mrf.mxu1  ;;  %v4043_v15 = vpop.f32.mrf.mxu0 }
 0x325   : > { %v23515_v5 = vadd.f32 %v3990_v41, %v3937_v39  ;;  %v20927_v41 = vld [vmem:[#allocation4 + $0x1204] ss:$36 sps:$4 sm:$0xff]  }
 0x326   : > { %v23517_v27 = vpop.f32.mrf.mxu1  ;;  %5875 = vmatprep.subr.bf16.mxu1 %v20927_v41  ;;  %v23542_v1 = vpop.f32.mrf.mxu0 }
 0x327   : > { %24897 = vst [vmem:[#allocation17_spill] sm:$0xff] %v23515_v5  ;;  %v4321_v40 = vrot.slane %v23515_v5, 7  ;;  %5876 = vmatpush1.bf16.msra.mxu1 %v20925_v60  ;;  %v3897_v60 = vadd.f32 %v23505_v53, %v23493_v56  ;;  %v3901_v53 = vadd.f32 %v23511_v51, %v23501_v58 }
 0x328   : > { %v3941_v13 = vpop.f32.mrf.mxu1  ;;  %5914 = vmatprep.subr.bf16.mxu1 %v20933_v57  ;;  %v23544_v23 = vpop.f32.mrf.mxu0  ;;  %v4319_v57 = vrot.slane %v3885_v50, 7 }
 0x329   : > { %v3995_v30 = vadd.f32 %v3994_v32, %v3941_v13  ;;  %v4326_v56 = vrot.slane %v3897_v60, 7  ;;  %v3993_v60 = vadd.f32 %v23507_v12, %v23517_v27 }
 0x32a   : > { %v23519_v36 = vpop.f32.mrf.mxu1  ;;  %v23546_v32 = vpop.f32.mrf.mxu0 }
 0x32b   : > { %v4324_v9 = vrot.slane %v3995_v30, 7  ;;  %24899 = vst [vmem:[#allocation19_spill] sm:$0xff] %v23546_v32 }
 0x32c   : > { %v3947_v17 = vpop.f32.mrf.mxu1  ;;  %v4053_v42 = vpop.f32.mrf.mxu0 }
 0x32d   : > { %v4339_v44 = vsel %vm2303_vm2, %v4321_v40, %v4324_v9  ;;  %v4001_v43 = vadd.f32 %v4000_v2, %v3947_v17 }
 0x32e   : > { %v23528_v33 = vsel %vm373_vm0, %v3995_v30, %v4339_v44  ;;  %v23530_v37 = vpop.f32.mrf.mxu1  ;;  %v23548_v31 = vpop.f32.mrf.mxu0 }
 0x32f   : > { %24898 = vst [vmem:[#allocation18_spill] sm:$0xff] %v23528_v33  ;;  %v4327_v16 = vrot.slane %v4001_v43, 7 }
 0x330   : > { %v3951_v55 = vpop.f32.mrf.mxu1  ;;  %v23550_v39 = vpop.f32.mrf.mxu0 }
 0x331   : > { %v4005_v6 = vadd.f32 %v4004_v26, %v3951_v55  ;;  %v23534_v63 = vsel %vm2303_vm2, %v4324_v9, %v4327_v16  ;;  %v23564_v26 = vadd.f32 %v23495_v49, %v23483_v47  ;;  %v3891_v55 = vadd.f32 %v23499_v62, %v23485_v48 }
 0x332   : > { %v23552_v45 = vpop.f32.mrf.mxu1  ;;  %v23554_v2 = vpop.f32.mrf.mxu0  ;;  %v3899_v48 = vadd.f32 %v23509_v19, %v23497_v61 }
 0x333   : > { %v4330_v54 = vrot.slane %v4005_v6, 7  ;;  %v3887_v6 = vadd.f32 %v23491_v11, %v23481_v34  ;;  %v4322_v41 = vrot.slane %v23564_v26, 7  ;;  %v4323_v47 = vrot.slane %v3891_v55, 7 }
 0x334   : > { %v4328_v59 = vrot.slane %v3899_v48, 7  ;;  %v4329_v48 = vrot.slane %v3901_v53, 7 }
 0x335   : > { %v23538_v52 = vsel %vm2303_vm2, %v4327_v16, %v4330_v54  ;;  %v4320_v62 = vrot.slane %v3887_v6, 7  ;;  %v4337_v11 = vsel %vm2303_vm2, %v4319_v57, %v4322_v41  ;;  %v4325_v57 = vrot.slane %v23583_v18, 7 }
 0x336   : > { %v4346_v32 = vsel %vm373_vm0, %v23564_v26, %v4337_v11 }
 0x337   : > { %v4338_v61 = vsel %vm2303_vm2, %v4320_v62, %v4323_v47 }
 0x338   : > { %v4347_v62 = vsel %vm373_vm0, %v3891_v55, %v4338_v61 }
 0x345   : > { %v4096_v10 = vpop.f32.mrf.mxu1  ;;  %v4202_v13 = vpop.f32.mrf.mxu0 }
 0x346   : > { %v4097_v58 = vadd.f32 %v4096_v10, %v4043_v15  ;;  %v4331_v15 = vsel %vm2303_vm2, %v4325_v57, %v4328_v59 }
 0x347   : > { %v23556_v3 = vpop.f32.mrf.mxu1  ;;  %v4204_v30 = vpop.f32.mrf.mxu0 }
 0x349   : > { %v4100_v25 = vpop.f32.mrf.mxu1  ;;  %v4206_v40 = vpop.f32.mrf.mxu0 }
 0x34b   : > { %v23558_v9 = vpop.f32.mrf.mxu1  ;;  %v4208_v17 = vpop.f32.mrf.mxu0 }
 0x34c   : > { %24900 = vst [vmem:[#allocation20_spill] sm:$0xff] %v23558_v9 }
 0x34d   : > { %v4106_v14 = vpop.f32.mrf.mxu1  ;;  %v4212_v44 = vpop.f32.mrf.mxu0 }
 0x34e   : > { %v4107_v18 = vadd.f32 %v4106_v14, %v4053_v42 }
 0x34f   : > { %v23560_v43 = vpop.f32.mrf.mxu1  ;;  %v4214_v46 = vpop.f32.mrf.mxu0 }
 0x351   : > { %v4110_v16 = vpop.f32.mrf.mxu1  ;;  %v23572_v0 = vpop.f32.mrf.mxu0 }
 0x353   : > { %v23574_v54 = vpop.f32.mrf.mxu1  ;;  %v23585_v34 = vpop.f32.mrf.mxu0 }
 0x366   : > { %v23595_v19 = vpop.f32.mrf.mxu0 }
 0x368   : > { %v23611_v11 = vpop.f32.mrf.mxu0 }
 0x385   : > { %v4149_v49 = vpop.f32.mrf.mxu1 }
 0x386   : > { %v4203_v33 = vadd.f32 %v4202_v13, %v4149_v49  ;;  %v4335_v13 = vsel %vm2303_vm2, %v4323_v47, %v4326_v56  ;;  %v4391_v47 = vadd.f32 %v3993_v60, %v3885_v50  ;;  %v23623_v50 = vpop.f32.mrf.mxu0 }
 0x387   : > { %v4151_v38 = vpop.f32.mrf.mxu1 }
 0x388   : > { %v4205_v5 = vadd.f32 %v4204_v30, %v4151_v38  ;;  %v23607_v30 = vld [vmem:[#allocation6 + $0x3] sm:$0x7]  ;;  %v3997_v38 = vadd.f32 %v23513_v4, %v23519_v36  ;;  %v4355_v12 = vrot.slane %v4203_v33, 1  ;;  %v4101_v36 = vadd.f32 %v4100_v25, %v23544_v23 }
 0x389   : > { %v4153_v20 = vpop.f32.mrf.mxu1  ;;  %v4421_v53 = vrot.slane %v23607_v30, %v23339_v28 }
 0x38a   : > { %v4207_v9 = vadd.f32 %v4206_v40, %v4153_v20  ;;  %v4356_v10 = vrot.slane %v4205_v5, 1  ;;  %v4392_v20 = vadd.f32 %v4097_v58, %v3887_v6  ;;  %v4394_v59 = vadd.f32 %v4346_v32, %v3997_v38 }
 0x38b   : > { %v4155_v51 = vpop.f32.mrf.mxu1  ;;  %v4398_v5 = vadd.f32 %v4335_v13, %v4107_v18  ;;  %v4425_v6 = vrot.slane %v23607_v30, %v23350_v22  ;;  %v4007_v32 = vadd.f32 %v23540_v21, %v23552_v45  ;;  %v4395_v13 = vadd.f32 %v4347_v62, %v4101_v36 }
 0x38c   : > { %v4358_v49 = vrot.slane %v4207_v9, 1  ;;  %v4209_v40 = vadd.f32 %v4208_v17, %v4155_v51 }
 0x38d   : > { %v4159_v27 = vpop.f32.mrf.mxu1  ;;  %v4400_v62 = vadd.f32 %v4331_v15, %v4007_v32  ;;  %v4109_v32 = vadd.f32 %v23560_v43, %v23548_v31  ;;  %v19599_v43 = vadd.f32 %v23611_v11, %v23595_v19  ;;  %v24901_v19 = vld [vmem:[#allocation19_spill] sm:$0xff]  ;;  %v24902_v11 = vld [vmem:[#allocation20_spill] sm:$0xff] }
 0x38e   : > { %v4359_v55 = vrot.slane %v4209_v40, 1  ;;  %v4213_v61 = vadd.f32 %v4212_v44, %v4159_v27  ;;  %v4373_v17 = vsel %vm2348_vm3, %v4355_v12, %v4358_v49  ;;  %v4111_v44 = vadd.f32 %v4110_v16, %v23550_v39 }
 0x38f   : > { %v4161_v4 = vpop.f32.mrf.mxu1  ;;  %v4403_v58 = vadd.f32 %v4391_v47, %v4373_v17  ;;  %v4003_v12 = vadd.f32 %v23522_v35, %v23530_v37  ;;  %v4332_v39 = vsel %vm2303_vm2, %v4326_v56, %v4329_v48 }
 0x390   : > { %v4374_v33 = vsel %vm2348_vm3, %v4356_v10, %v4359_v55  ;;  %v4361_v42 = vrot.slane %v4213_v61, 1  ;;  %v4215_v14 = vadd.f32 %v4214_v46, %v4161_v4  ;;  %v4401_v27 = vadd.f32 %v4332_v39, %v4111_v44  ;;  %v23639_v10 = vpop.f32.mrf.mxu0 }
 0x391   : > { %v4163_v60 = vpop.f32.mrf.mxu1  ;;  %v4404_v51 = vadd.f32 %v4392_v20, %v4374_v33  ;;  %v4433_v45 = vadd.f32 %v4421_v53, %v4403_v58 }
 0x392   : > { %v4370_v23 = vsel %vm2348_vm3, %v4358_v49, %v4361_v42  ;;  %v4362_v25 = vrot.slane %v4215_v14, 1  ;;  %v4410_v49 = vadd.f32 %v4398_v5, %v4215_v14  ;;  %v4217_v37 = vadd.f32 %v23572_v0, %v4163_v60  ;;  %v19603_v36 = vpop.f32.mrf.mxu0  ;;  %v20892_v60 = vld [vmem:[#allocation4 + $0x1400] ss:$36 sps:$4 sm:$0xff]  }
 0x393   : > { %v4382_v46 = vsel %vm378_vm1, %v4207_v9, %v4370_v23  ;;  %v4165_v16 = vpop.f32.mrf.mxu1  ;;  %v4434_v56 = vadd.f32 %v4425_v6, %v4404_v51  ;;  %v4445_v42 = vmax.f32 %v4433_v45, 0.0 }
 0x394   : > { %v4406_v38 = vadd.f32 %v4394_v59, %v4382_v46  ;;  %v4371_v18 = vsel %vm2348_vm3, %v4359_v55, %v4362_v25  ;;  %v4219_v21 = vadd.f32 %v23585_v34, %v4165_v16  ;;  %v4334_v55 = vsel %vm2303_vm2, %v4322_v41, %v4325_v57  ;;  %v19604_v26 = vpop.f32.mrf.mxu0  ;;  %v20900_v41 = vld [vmem:[#allocation4 + $0x13bc] ss:$36 sps:$4 sm:$0xff]   ;;  %v20904_v16 = vld [vmem:[#allocation4 + $0x1370] ss:$36 sps:$4 sm:$0xff]  }
 0x395   : > { %v4383_v35 = vsel %vm378_vm1, %v4209_v40, %v4371_v18  ;;  %v4440_v17 = vadd.f32 %v4425_v6, %v4410_v49  ;;  %v4397_v4 = vadd.f32 %v4334_v55, %v4003_v12  ;;  %v4412_v33 = vadd.f32 %v4400_v62, %v4217_v37  ;;  %v20906_v12 = vld [vmem:[#allocation4 + $0x1374] ss:$36 sps:$4 sm:$0xff]   ;;  %v20912_v18 = vld [vmem:[#allocation4 + $0x132c] ss:$36 sps:$4 sm:$0xff]  }
 0x396   : > { %v4436_v9 = vadd.f32 %v4421_v53, %v4406_v38  ;;  %v4407_v48 = vadd.f32 %v4395_v13, %v4383_v35  ;;  %v4413_v47 = vadd.f32 %v4401_v27, %v4219_v21  ;;  %v4446_v34 = vmax.f32 %v4434_v56, 0.0  ;;  %v20910_v56 = vld [vmem:[#allocation4 + $0x1328] ss:$36 sps:$4 sm:$0xff]  }
 0x397   : > { %v4409_v59 = vadd.f32 %v4397_v4, %v4213_v61  ;;  %v4452_v44 = vmax.f32 %v4440_v17, 0.0  ;;  %v4442_v58 = vadd.f32 %v4421_v53, %v4412_v33  ;;  %v20898_v61 = vld [vmem:[#allocation4 + $0x13b8] ss:$36 sps:$4 sm:$0xff]   ;;  %v19605_v46 = vadd.f32 %v19604_v26, %v19603_v36  ;;  %v20916_v36 = vld [vmem:[#allocation4 + $0x12e0] ss:$36 sps:$4 sm:$0xff]  }
 0x398   : > { %v4437_v20 = vadd.f32 %v4425_v6, %v4407_v48  ;;  %v4448_v40 = vmax.f32 %v4436_v9, 0.0  ;;  %v4443_v0 = vadd.f32 %v4425_v6, %v4413_v47  ;;  %v19606_v6 = vpop.f32.mrf.mxu0  ;;  %v4399_v49 = vadd.f32 %v23534_v63, %v4109_v32  ;;  %v20918_v9 = vld [vmem:[#allocation4 + $0x12e4] ss:$36 sps:$4 sm:$0xff]   ;;  %v20936_v32 = vld [vmem:[#allocation4 + $0x120c] ss:$36 sps:$4 sm:$0xff]  }
 0x399   : > { %v4439_v23 = vadd.f32 %v4421_v53, %v4409_v59  ;;  %v4454_v25 = vmax.f32 %v4442_v58, 0.0  ;;  %v4113_v27 = vadd.f32 %v23574_v54, %v23554_v2  ;;  %v4429_v37 = vrot.slane %v23607_v30, %v23424_v29  ;;  %v20930_v58 = vld [vmem:[#allocation4 + $0x1254] ss:$36 sps:$4 sm:$0xff]  }
 0x39a   : > { %v4449_v14 = vmax.f32 %v4437_v20, 0.0  ;;  %v4455_v5 = vmax.f32 %v4443_v0, 0.0  ;;  %v23651_v51 = vpack.c.bf16 %v4448_v40, %v4445_v42  ;;  %v19607_v13 = vpop.f32.mrf.mxu0  ;;  %v19602_v54 = vadd.f32 %v23639_v10, %v23623_v50  ;;  %v20924_v40 = vld [vmem:[#allocation4 + $0x129c] ss:$36 sps:$4 sm:$0xff]  }
 0x39b   : > { %v4451_v39 = vmax.f32 %v4439_v23, 0.0  ;;  %v19608_v21 = vadd.f32 %v19607_v13, %v19606_v6  ;;  %v4402_v2 = vadd.f32 %v23538_v52, %v4113_v27  ;;  %v4099_v62 = vadd.f32 %v23556_v3, %v23542_v1  ;;  %v24903_v10 = vld [vmem:[#allocation17_spill] sm:$0xff]  ;;  %v20934_v13 = vld [vmem:[#allocation4 + $0x1208] ss:$36 sps:$4 sm:$0xff]  }
 0x39c   : > { %v23649_v15 = vpack.c.bf16 %v4449_v14, %v4446_v34  ;;  %v23653_v57 = vpack.c.bf16 %v4455_v5, %v4452_v44  ;;  %v4103_v47 = vadd.f32 %v24902_v11, %v24901_v19  ;;  %v24904_v34 = vld [vmem:[#allocation18_spill] sm:$0xff]  ;;  %v20922_v44 = vld [vmem:[#allocation4 + $0x1298] ss:$36 sps:$4 sm:$0xff]  }
 0x39d   : > { %v23660_v38 = vpack.c.bf16 %v4454_v25, %v4451_v39  ;;  %v4393_v42 = vadd.f32 %v4099_v62, %v24903_v10  ;;  %v20928_v25 = vld [vmem:[#allocation4 + $0x1250] ss:$36 sps:$4 sm:$0xff]   ;;  %v20940_v27 = vld [vmem:[#allocation4 + $0xf88] ss:$36 sps:$4 sm:$0xff]   ;;  %v20961_v19 = vld [vmem:[#allocation4 + $0xe18] ss:$36 sps:$4 sm:$0xff]  }
 0x39e   : > { %5840 = vmatprep.mubr.bf16.mxu0 %v23649_v15  ;;  %v4396_v14 = vadd.f32 %v24904_v34, %v4103_v47  ;;  %v20966_v62 = vld [vmem:[#allocation4 + $0xe6c] ss:$36 sps:$4 sm:$0xff]   ;;  %v20969_v47 = vld [vmem:[#allocation4 + $0xdd4] ss:$36 sps:$4 sm:$0xff]  }
 0x39f   : > { %5841 = vmatmul.mubr.bf16.vlgmr.msra.gmra.mxu0 %v23651_v51  ;;  %v20964_v11 = vld [vmem:[#allocation4 + $0xe68] ss:$36 sps:$4 sm:$0xff]   ;;  %v20982_v10 = vld [vmem:[#allocation4 + $0xd90] ss:$36 sps:$4 sm:$0xff]  }
 0x3a0   : > { %5968 = vmatpush1.bf16.msra.mxu0 %v20892_v60  ;;  %5850 = vmatprep.mubr.bf16.mxu0 %v23653_v57  ;;  %v20990_v34 = vld [vmem:[#allocation4 + $0x11cc] ss:$36 sps:$4 sm:$0xff]  }
 0x3a1   : > { %5969 = vmatprep.subr.bf16.mxu0 %v20900_v41 }
 0x3a4   : > { %5970 = vmatpush1.bf16.msra.mxu0 %v20898_v61 }
 0x3a5   : > { %v19979_v53 = vpop.f32.mrf.mxu1  ;;  %5971 = vmatprep.subr.bf16.mxu0 %v20906_v12 }
 0x3a6   : > { %v4313_v35 = vadd.f32 %v19979_v53, %v19605_v46  ;;  %v20931_v46 = vld [vmem:[#allocation4 + $0xf80] ss:$36 sps:$4 sm:$0xff]  }
 0x3a7   : > { %v4304_v31 = vpop.f32.mrf.mxu1  ;;  %5851 = vmatmul.mubr.bf16.gmra.mxu0 %v23660_v38  ;;  %v20939_v53 = vld [vmem:[#allocation4 + $0xf3c] ss:$36 sps:$4 sm:$0xff]  }
 0x3a8   : > { %v4411_v45 = vadd.f32 %v4399_v49, %v4313_v35  ;;  %5972 = vmatpush1.bf16.msra.mxu0 %v20904_v16  ;;  %5999 = vmatprep.mubr.bf16.mxu0 %v24896_v24  ;;  %v4305_v30 = vadd.f32 %v19599_v43, %v4304_v31  ;;  %v4363_v52 = vrot.slane %v4313_v35, 1  ;;  %v20942_v49 = vld [vmem:[#allocation4 + $0xf8c] ss:$36 sps:$4 sm:$0xff]   ;;  %v20945_v35 = vld [vmem:[#allocation4 + $0xef4] ss:$36 sps:$4 sm:$0xff]  }
 0x3a9   : > { %v19980_v63 = vpop.f32.mrf.mxu1  ;;  %5973 = vmatprep.subr.bf16.mxu0 %v20912_v18  ;;  %v20937_v18 = vld [vmem:[#allocation4 + $0xf38] ss:$36 sps:$4 sm:$0xff]   ;;  %v20943_v31 = vld [vmem:[#allocation4 + $0xef0] ss:$36 sps:$4 sm:$0xff]   ;;  %v20946_v43 = vld [vmem:[#allocation4 + $0xf40] ss:$36 sps:$4 sm:$0xff]  }
 0x3aa   : > { %v4316_v48 = vadd.f32 %v19980_v63, %v19608_v21  ;;  %v4441_v20 = vadd.f32 %v4429_v37, %v4411_v45  ;;  %v4357_v33 = vrot.slane %v4305_v30, 1  ;;  %v20951_v21 = vld [vmem:[#allocation4 + $0xeac] ss:$36 sps:$4 sm:$0xff]   ;;  %v20954_v45 = vld [vmem:[#allocation4 + $0xefc] ss:$36 sps:$4 sm:$0xff]  }
 0x3ab   : > { %v4307_v55 = vpop.f32.mrf.mxu1  ;;  %v20952_v63 = vld [vmem:[#allocation4 + $0xef8] ss:$36 sps:$4 sm:$0xff]   ;;  %v20958_v30 = vld [vmem:[#allocation4 + $0xeb0] ss:$36 sps:$4 sm:$0xff]  }
 0x3ac   : > { %v4414_v17 = vadd.f32 %v4402_v2, %v4316_v48  ;;  %v4308_v4 = vadd.f32 %v19602_v54, %v4307_v55  ;;  %5974 = vmatpush1.bf16.msra.mxu0 %v20910_v56  ;;  %v4453_v1 = vmax.f32 %v4441_v20, 0.0  ;;  %v20949_v56 = vld [vmem:[#allocation4 + $0xea8] ss:$36 sps:$4 sm:$0xff]   ;;  %v20960_v2 = vld [vmem:[#allocation4 + $0xeb4] ss:$36 sps:$4 sm:$0xff]  }
 0x3ad   : > { %5975 = vmatprep.subr.bf16.mxu0 %v20918_v9  ;;  %v20957_v9 = vld [vmem:[#allocation4 + $0xe64] ss:$36 sps:$4 sm:$0xff]   ;;  %v20963_v48 = vld [vmem:[#allocation4 + $0xe1c] ss:$36 sps:$4 sm:$0xff]   ;;  %v20967_v20 = vld [vmem:[#allocation4 + $0xdd0] ss:$36 sps:$4 sm:$0xff]  }
 0x3ae   : > { %v4444_v0 = vadd.f32 %v4429_v37, %v4414_v17  ;;  %v4360_v50 = vrot.slane %v4308_v4, 1  ;;  %v20955_v54 = vld [vmem:[#allocation4 + $0xe60] ss:$36 sps:$4 sm:$0xff]  }
 0x3af   : > { %v20972_v55 = vld [vmem:[#allocation4 + $0xe24] ss:$36 sps:$4 sm:$0xff]  }
 0x3b0   : > { %v4456_v3 = vmax.f32 %v4444_v0, 0.0  ;;  %v4372_v59 = vsel %vm2348_vm3, %v4360_v50, %v4363_v52  ;;  %v4375_v5 = vsel %vm2348_vm3, %v4357_v33, %v4360_v50  ;;  %5976 = vmatpush1.bf16.msra.mxu0 %v20916_v36  ;;  %v20970_v17 = vld [vmem:[#allocation4 + $0xe20] ss:$36 sps:$4 sm:$0xff]   ;;  %v20976_v52 = vld [vmem:[#allocation4 + $0xdd8] ss:$36 sps:$4 sm:$0xff]  }
 0x3b1   : > { %v4384_v60 = vsel %vm378_vm1, %v4308_v4, %v4372_v59  ;;  %v4405_v26 = vadd.f32 %v4393_v42, %v4375_v5  ;;  %5977 = vmatprep.subr.bf16.mxu0 %v20924_v40  ;;  %v20975_v4 = vld [vmem:[#allocation4 + $0xd8c] ss:$36 sps:$4 sm:$0xff]   ;;  %v20978_v36 = vld [vmem:[#allocation4 + $0xddc] ss:$36 sps:$4 sm:$0xff]   ;;  %v20981_v33 = vld [vmem:[#allocation4 + $0x11c4] ss:$36 sps:$4 sm:$0xff]  }
 0x3b2   : > { %v23686_v41 = vpack.c.bf16 %v4456_v3, %v4453_v1  ;;  %v4408_v23 = vadd.f32 %v4396_v14, %v4384_v60  ;;  %v20973_v40 = vld [vmem:[#allocation4 + $0xd88] ss:$36 sps:$4 sm:$0xff]   ;;  %v20984_v0 = vld [vmem:[#allocation4 + $0xd94] ss:$36 sps:$4 sm:$0xff]   ;;  %v20979_v50 = vld [vmem:[#allocation4 + $0x11c0] ss:$36 sps:$4 sm:$0xff]  }
 0x3b3   : > { %v4435_v61 = vadd.f32 %v4429_v37, %v4405_v26  ;;  %v20987_v42 = vld [vmem:[#allocation4 + $0x117c] ss:$36 sps:$4 sm:$0xff]   ;;  %v20988_v1 = vld [vmem:[#allocation4 + $0x11c8] ss:$36 sps:$4 sm:$0xff]   ;;  %v20993_v3 = vld [vmem:[#allocation4 + $0x1134] ss:$36 sps:$4 sm:$0xff]  }
 0x3b4   : > { %v4438_v6 = vadd.f32 %v4429_v37, %v4408_v23  ;;  %5978 = vmatpush1.bf16.msra.mxu0 %v20922_v44  ;;  %v20948_v37 = vld [vmem:[#allocation4 + $0xf44] ss:$36 sps:$4 sm:$0xff]   ;;  %v20985_v14 = vld [vmem:[#allocation4 + $0x1178] ss:$36 sps:$4 sm:$0xff]   ;;  %v20991_v5 = vld [vmem:[#allocation4 + $0x1130] ss:$36 sps:$4 sm:$0xff]  }
 0x3b5   : > { %v4447_v12 = vmax.f32 %v4435_v61, 0.0  ;;  %5979 = vmatprep.subr.bf16.mxu0 %v20930_v58  ;;  %v20996_v59 = vld [vmem:[#allocation4 + $0x1184] ss:$36 sps:$4 sm:$0xff]   ;;  %v20999_v60 = vld [vmem:[#allocation4 + $0x10ec] ss:$36 sps:$4 sm:$0xff]  }
 0x3b6   : > { %v4450_v39 = vmax.f32 %v4438_v6, 0.0  ;;  %v20994_v44 = vld [vmem:[#allocation4 + $0x1180] ss:$36 sps:$4 sm:$0xff]   ;;  %v20997_v58 = vld [vmem:[#allocation4 + $0x10e8] ss:$36 sps:$4 sm:$0xff]  }
 0x3b7   : > { %v21002_v26 = vld [vmem:[#allocation4 + $0x113c] ss:$36 sps:$4 sm:$0xff]   ;;  %v21005_v61 = vld [vmem:[#allocation4 + $0x10a4] ss:$36 sps:$4 sm:$0xff]   ;;  %v21008_v6 = vld [vmem:[#allocation4 + $0x10f4] ss:$36 sps:$4 sm:$0xff]  }
 0x3b8   : > { %v23688_v16 = vpack.c.bf16 %v4450_v39, %v4447_v12  ;;  %5980 = vmatpush1.bf16.msra.mxu0 %v20928_v25  ;;  %v21000_v23 = vld [vmem:[#allocation4 + $0x1138] ss:$36 sps:$4 sm:$0xff]   ;;  %v21003_v25 = vld [vmem:[#allocation4 + $0x10a0] ss:$36 sps:$4 sm:$0xff]   ;;  %v21006_v12 = vld [vmem:[#allocation4 + $0x10f0] ss:$36 sps:$4 sm:$0xff]  }
 0x3b9   : > { %5981 = vmatprep.subr.bf16.mxu0 %v20936_v32  ;;  %v21011_v32 = vld [vmem:[#allocation4 + $0x105c] ss:$36 sps:$4 sm:$0xff]   ;;  %v21014_v39 = vld [vmem:[#allocation4 + $0x10ac] ss:$36 sps:$4 sm:$0xff]  }
 0x3ba   : > { %5894 = vmatmul.mubr.bf16.vlgmr.msra.gmra.mxu1 %v23688_v16 }
 0x3bb   : > { %5915 = vmatpush1.bf16.msra.mxu1 %v20931_v46  ;;  %5903 = vmatprep.mubr.bf16.mxu1 %v24896_v24  ;;  %v21009_v46 = vld [vmem:[#allocation4 + $0x1058] ss:$36 sps:$4 sm:$0xff]  }
 0x3bc   : > { %5982 = vmatpush1.bf16.msra.mxu0 %v20934_v13  ;;  %5916 = vmatprep.subr.bf16.mxu1 %v20939_v53  ;;  %v21012_v13 = vld [vmem:[#allocation4 + $0x10a8] ss:$36 sps:$4 sm:$0xff]   ;;  %v21017_v53 = vld [vmem:[#allocation4 + $0x1014] ss:$36 sps:$4 sm:$0xff]  }
 0x3bd   : > { %6020 = vmatprep.subr.bf16.mxu0 %v20942_v49  ;;  %v21015_v49 = vld [vmem:[#allocation4 + $0x1010] ss:$36 sps:$4 sm:$0xff]  }
 0x3bf   : > { %5917 = vmatpush1.bf16.msra.mxu1 %v20937_v18  ;;  %6000 = vmatmul.mubr.bf16.vlgmr.msra.gmra.mxu0 %v23688_v16  ;;  %v21020_v18 = vld [vmem:[#allocation4 + $0x1064] ss:$36 sps:$4 sm:$0xff]  }
 0x3c0   : > { %6021 = vmatpush1.bf16.msra.mxu0 %v20940_v27  ;;  %5918 = vmatprep.subr.bf16.mxu1 %v20945_v35  ;;  %v21018_v27 = vld [vmem:[#allocation4 + $0x1060] ss:$36 sps:$4 sm:$0xff]   ;;  %v21023_v35 = vld [vmem:[#allocation4 + $0xfcc] ss:$36 sps:$4 sm:$0xff]  }
 0x3c1   : > { %6022 = vmatprep.subr.bf16.mxu0 %v20948_v37  ;;  %6009 = vmatprep.mubr.bf16.mxu0 %v24896_v24  ;;  %v21026_v37 = vld [vmem:[#allocation4 + $0x101c] ss:$36 sps:$4 sm:$0xff]  }
 0x3c2   : > { %5904 = vmatmul.mubr.bf16.gmra.mxu1 %v23686_v41 }
 0x3c3   : > { %5919 = vmatpush1.bf16.msra.mxu1 %v20943_v31  ;;  %5946 = vmatprep.mubr.bf16.mxu1 %v23649_v15  ;;  %v21021_v31 = vld [vmem:[#allocation4 + $0xfc8] ss:$36 sps:$4 sm:$0xff]  }
 0x3c4   : > { %6023 = vmatpush1.bf16.msra.mxu0 %v20946_v43  ;;  %5920 = vmatprep.subr.bf16.mxu1 %v20951_v21  ;;  %v21024_v43 = vld [vmem:[#allocation4 + $0x1018] ss:$36 sps:$4 sm:$0xff]   ;;  %v21029_v21 = vld [vmem:[#allocation4 + $0x140c] ss:$36 sps:$4 sm:$0xff]  }
 0x3c5   : > { %6024 = vmatprep.subr.bf16.mxu0 %v20954_v45  ;;  %v21032_v45 = vld [vmem:[#allocation4 + $0xfd4] ss:$36 sps:$4 sm:$0xff]  }
 0x3c7   : > { %5921 = vmatpush1.bf16.msra.mxu1 %v20949_v56  ;;  %6010 = vmatmul.mubr.bf16.gmra.mxu0 %v23686_v41  ;;  %v21027_v56 = vld [vmem:[#allocation4 + $0x1408] ss:$36 sps:$4 sm:$0xff]  }
 0x3c8   : > { %6025 = vmatpush1.bf16.msra.mxu0 %v20952_v63  ;;  %6052 = vmatprep.mubr.bf16.mxu0 %v23649_v15  ;;  %v21030_v63 = vld [vmem:[#allocation4 + $0xfd0] ss:$36 sps:$4 sm:$0xff]  }
 0x3c9   : > { %5922 = vmatprep.subr.bf16.mxu1 %v20957_v9  ;;  %6026 = vmatprep.subr.bf16.mxu0 %v20960_v2  ;;  %v21035_v9 = vld [vmem:[#allocation4 + $0x13c4] ss:$36 sps:$4 sm:$0xff]   ;;  %v21038_v2 = vld [vmem:[#allocation4 + $0x1414] ss:$36 sps:$4 sm:$0xff]  }
 0x3cb   : > { %5923 = vmatpush1.bf16.msra.mxu1 %v20955_v54  ;;  %v21033_v54 = vld [vmem:[#allocation4 + $0x13c0] ss:$36 sps:$4 sm:$0xff]  }
 0x3cc   : > { %6027 = vmatpush1.bf16.msra.mxu0 %v20958_v30  ;;  %5924 = vmatprep.subr.bf16.mxu1 %v20963_v48  ;;  %v21036_v30 = vld [vmem:[#allocation4 + $0x1410] ss:$36 sps:$4 sm:$0xff]   ;;  %v21041_v48 = vld [vmem:[#allocation4 + $0x137c] ss:$36 sps:$4 sm:$0xff]  }
 0x3cd   : > { %6028 = vmatprep.subr.bf16.mxu0 %v20966_v62  ;;  %v21044_v62 = vld [vmem:[#allocation4 + $0x13cc] ss:$36 sps:$4 sm:$0xff]  }
 0x3cf   : > { %5925 = vmatpush1.bf16.msra.mxu1 %v20961_v19  ;;  %v21039_v19 = vld [vmem:[#allocation4 + $0x1378] ss:$36 sps:$4 sm:$0xff]  }
 0x3d0   : > { %6029 = vmatpush1.bf16.msra.mxu0 %v20964_v11  ;;  %5926 = vmatprep.subr.bf16.mxu1 %v20969_v47  ;;  %v21042_v11 = vld [vmem:[#allocation4 + $0x13c8] ss:$36 sps:$4 sm:$0xff]   ;;  %v21047_v47 = vld [vmem:[#allocation4 + $0x1334] ss:$36 sps:$4 sm:$0xff]  }
 0x3d1   : > { %6030 = vmatprep.subr.bf16.mxu0 %v20972_v55  ;;  %v21050_v55 = vld [vmem:[#allocation4 + $0x1384] ss:$36 sps:$4 sm:$0xff]  }
 0x3d3   : > { %5927 = vmatpush1.bf16.msra.mxu1 %v20967_v20  ;;  %v21045_v20 = vld [vmem:[#allocation4 + $0x1330] ss:$36 sps:$4 sm:$0xff]  }
 0x3d4   : > { %6031 = vmatpush1.bf16.msra.mxu0 %v20970_v17  ;;  %5928 = vmatprep.subr.bf16.mxu1 %v20975_v4  ;;  %v21048_v17 = vld [vmem:[#allocation4 + $0x1380] ss:$36 sps:$4 sm:$0xff]   ;;  %v21053_v4 = vld [vmem:[#allocation4 + $0x12ec] ss:$36 sps:$4 sm:$0xff]  }
 0x3d5   : > { %6032 = vmatprep.subr.bf16.mxu0 %v20978_v36  ;;  %v21056_v36 = vld [vmem:[#allocation4 + $0x133c] ss:$36 sps:$4 sm:$0xff]  }
 0x3d7   : > { %5929 = vmatpush1.bf16.msra.mxu1 %v20973_v40  ;;  %v21051_v40 = vld [vmem:[#allocation4 + $0x12e8] ss:$36 sps:$4 sm:$0xff]  }
 0x3d8   : > { %6033 = vmatpush1.bf16.msra.mxu0 %v20976_v52  ;;  %5930 = vmatprep.subr.bf16.mxu1 %v20981_v33  ;;  %v21054_v52 = vld [vmem:[#allocation4 + $0x1338] ss:$36 sps:$4 sm:$0xff]   ;;  %v21059_v33 = vld [vmem:[#allocation4 + $0x12a4] ss:$36 sps:$4 sm:$0xff]  }
 0x3d9   : > { %6034 = vmatprep.subr.bf16.mxu0 %v20984_v0  ;;  %v21062_v0 = vld [vmem:[#allocation4 + $0x12f4] ss:$36 sps:$4 sm:$0xff]  }
 0x3db   : > { %5931 = vmatpush2.bf16.msra.mxu1 %v20979_v50  ;;  %v21057_v50 = vld [vmem:[#allocation4 + $0x12a0] ss:$36 sps:$4 sm:$0xff]  }
 0x3dc   : > { %6035 = vmatpush1.bf16.msra.mxu0 %v20982_v10  ;;  %5932 = vmatprep.subr.bf16.mxu1 %v20987_v42  ;;  %v21060_v10 = vld [vmem:[#allocation4 + $0x12f0] ss:$36 sps:$4 sm:$0xff]   ;;  %v21065_v42 = vld [vmem:[#allocation4 + $0x125c] ss:$36 sps:$4 sm:$0xff]  }
 0x3dd   : > { %6036 = vmatprep.subr.bf16.mxu0 %v20990_v34  ;;  %v21068_v34 = vld [vmem:[#allocation4 + $0x12ac] ss:$36 sps:$4 sm:$0xff]  }
 0x3df   : > { %5933 = vmatpush2.bf16.msra.mxu1 %v20985_v14  ;;  %v21063_v14 = vld [vmem:[#allocation4 + $0x1258] ss:$36 sps:$4 sm:$0xff]  }
 0x3e0   : > { %6037 = vmatpush2.bf16.msra.mxu0 %v20988_v1  ;;  %5934 = vmatprep.subr.bf16.mxu1 %v20993_v3  ;;  %v21066_v1 = vld [vmem:[#allocation4 + $0x12a8] ss:$36 sps:$4 sm:$0xff]   ;;  %v21071_v3 = vld [vmem:[#allocation4 + $0x1214] ss:$36 sps:$4 sm:$0xff]  }
 0x3e1   : > { %6038 = vmatprep.subr.bf16.mxu0 %v20996_v59  ;;  %v21074_v59 = vld [vmem:[#allocation4 + $0x1264] ss:$36 sps:$4 sm:$0xff]  }
 0x3e3   : > { %5935 = vmatpush2.bf16.msra.mxu1 %v20991_v5  ;;  %v21069_v5 = vld [vmem:[#allocation4 + $0x1210] ss:$36 sps:$4 sm:$0xff]  }
 0x3e4   : > { %6039 = vmatpush2.bf16.msra.mxu0 %v20994_v44  ;;  %5936 = vmatprep.subr.bf16.mxu1 %v20999_v60  ;;  %v21072_v44 = vld [vmem:[#allocation4 + $0x1260] ss:$36 sps:$4 sm:$0xff]   ;;  %v21077_v60 = vld [vmem:[#allocation4 + $0xf94] ss:$36 sps:$4 sm:$0xff]  }
 0x3e5   : > { %6040 = vmatprep.subr.bf16.mxu0 %v21002_v26  ;;  %v21080_v26 = vld [vmem:[#allocation4 + $0x121c] ss:$36 sps:$4 sm:$0xff]  }
 0x3e7   : > { %5937 = vmatpush2.bf16.msra.mxu1 %v20997_v58  ;;  %v21075_v58 = vld [vmem:[#allocation4 + $0xf90] ss:$36 sps:$4 sm:$0xff]  }
 0x3e8   : > { %6041 = vmatpush2.bf16.msra.mxu0 %v21000_v23  ;;  %5938 = vmatprep.subr.bf16.mxu1 %v21005_v61  ;;  %v21078_v23 = vld [vmem:[#allocation4 + $0x1218] ss:$36 sps:$4 sm:$0xff]   ;;  %v21083_v61 = vld [vmem:[#allocation4 + $0xf4c] ss:$36 sps:$4 sm:$0xff]  }
 0x3e9   : > { %6042 = vmatprep.subr.bf16.mxu0 %v21008_v6  ;;  %v21084_v6 = vld [vmem:[#allocation4 + $0x11d8] ss:$36 sps:$4 sm:$0xff]  }
 0x3eb   : > { %5939 = vmatpush2.bf16.msra.mxu1 %v21003_v25  ;;  %v21081_v25 = vld [vmem:[#allocation4 + $0xf48] ss:$36 sps:$4 sm:$0xff]  }
 0x3ec   : > { %6043 = vmatpush2.bf16.msra.mxu0 %v21006_v12  ;;  %5940 = vmatprep.subr.bf16.mxu1 %v21011_v32  ;;  %v21085_v12 = vld [vmem:[#allocation4 + $0xf98] ss:$36 sps:$4 sm:$0xff]   ;;  %v21088_v32 = vld [vmem:[#allocation4 + $0xf04] ss:$36 sps:$4 sm:$0xff]  }
 0x3ed   : > { %6044 = vmatprep.subr.bf16.mxu0 %v21014_v39  ;;  %v21089_v39 = vld [vmem:[#allocation4 + $0x1190] ss:$36 sps:$4 sm:$0xff]  }
 0x3ef   : > { %5941 = vmatpush2.bf16.msra.mxu1 %v21009_v46  ;;  %v21086_v46 = vld [vmem:[#allocation4 + $0xf00] ss:$36 sps:$4 sm:$0xff]  }
 0x3f0   : > { %6045 = vmatpush2.bf16.msra.mxu0 %v21012_v13  ;;  %5942 = vmatprep.subr.bf16.mxu1 %v21017_v53  ;;  %v21090_v13 = vld [vmem:[#allocation4 + $0xf50] ss:$36 sps:$4 sm:$0xff]   ;;  %v21093_v53 = vld [vmem:[#allocation4 + $0xebc] ss:$36 sps:$4 sm:$0xff]  }
 0x3f1   : > { %6046 = vmatprep.subr.bf16.mxu0 %v21020_v18  ;;  %v21094_v18 = vld [vmem:[#allocation4 + $0x1148] ss:$36 sps:$4 sm:$0xff]  }
 0x3f3   : > { %5943 = vmatpush2.bf16.msra.mxu1 %v21015_v49  ;;  %v21091_v49 = vld [vmem:[#allocation4 + $0xeb8] ss:$36 sps:$4 sm:$0xff]  }
 0x3f4   : > { %6047 = vmatpush2.bf16.msra.mxu0 %v21018_v27  ;;  %5944 = vmatprep.subr.bf16.mxu1 %v21023_v35  ;;  %v21095_v27 = vld [vmem:[#allocation4 + $0xf08] ss:$36 sps:$4 sm:$0xff]   ;;  %v21098_v35 = vld [vmem:[#allocation4 + $0xe74] ss:$36 sps:$4 sm:$0xff]  }
 0x3f5   : > { %6048 = vmatprep.subr.bf16.mxu0 %v21026_v37  ;;  %v21099_v37 = vld [vmem:[#allocation4 + $0x1100] ss:$36 sps:$4 sm:$0xff]  }
 0x3f7   : > { %5945 = vmatpush2.bf16.msra.mxu1 %v21021_v31  ;;  %v21096_v31 = vld [vmem:[#allocation4 + $0xe70] ss:$36 sps:$4 sm:$0xff]  }
 0x3f8   : > { %6049 = vmatpush2.bf16.msra.mxu0 %v21024_v43  ;;  %6073 = vmatprep.subr.bf16.mxu1 %v21029_v21  ;;  %v21100_v43 = vld [vmem:[#allocation4 + $0xec0] ss:$36 sps:$4 sm:$0xff]   ;;  %v21103_v21 = vld [vmem:[#allocation4 + $0xe2c] ss:$36 sps:$4 sm:$0xff]  }
 0x3f9   : > { %6050 = vmatprep.subr.bf16.mxu0 %v21032_v45  ;;  %v21104_v45 = vld [vmem:[#allocation4 + $0x10b8] ss:$36 sps:$4 sm:$0xff]  }
 0x3fa   : > { %5947 = vmatmul.mubr.bf16.vlgmr.msra.gmra.mxu1 %v23651_v51 }
 0x3fb   : > { %5956 = vmatprep.mubr.bf16.mxu1 %v23653_v57  ;;  %6074 = vmatpush1.bf16.msra.mxu1 %v21027_v56  ;;  %v21101_v56 = vld [vmem:[#allocation4 + $0xe28] ss:$36 sps:$4 sm:$0xff]  }
 0x3fc   : > { %6051 = vmatpush2.bf16.msra.mxu0 %v21030_v63  ;;  %6075 = vmatprep.subr.bf16.mxu1 %v21035_v9  ;;  %v21105_v63 = vld [vmem:[#allocation4 + $0xe78] ss:$36 sps:$4 sm:$0xff]   ;;  %v21108_v9 = vld [vmem:[#allocation4 + $0xde4] ss:$36 sps:$4 sm:$0xff]  }
 0x3fd   : > { %6179 = vmatprep.subr.bf16.mxu0 %v21038_v2  ;;  %v21109_v2 = vld [vmem:[#allocation4 + $0x1070] ss:$36 sps:$4 sm:$0xff]  }
 0x3ff   : > { %6053 = vmatmul.mubr.bf16.vlgmr.msra.gmra.mxu0 %v23651_v51  ;;  %6076 = vmatpush1.bf16.msra.mxu1 %v21033_v54  ;;  %v21106_v54 = vld [vmem:[#allocation4 + $0xde0] ss:$36 sps:$4 sm:$0xff]  }
 0x400   : > { %6062 = vmatprep.mubr.bf16.mxu0 %v23653_v57  ;;  %6180 = vmatpush1.bf16.msra.mxu0 %v21036_v30  ;;  %v21110_v30 = vld [vmem:[#allocation4 + $0xe30] ss:$36 sps:$4 sm:$0xff]  }
 0x401   : > { %6077 = vmatprep.subr.bf16.mxu1 %v21041_v48  ;;  %6181 = vmatprep.subr.bf16.mxu0 %v21044_v62  ;;  %v21113_v48 = vld [vmem:[#allocation4 + $0xd9c] ss:$36 sps:$4 sm:$0xff]  }
 0x402   : > { %5957 = vmatmul.mubr.bf16.gmra.mxu1 %v23660_v38  ;;  %v21111_v62 = vld [vmem:[#allocation4 + $0xd98] ss:$36 sps:$4 sm:$0xff]  }
 0x403   : > { %6078 = vmatpush1.bf16.msra.mxu1 %v21039_v19  ;;  %6105 = vmatprep.mubr.bf16.mxu1 %v24896_v24  ;;  %v21115_v19 = vld [vmem:[#allocation4 + $0xde8] ss:$36 sps:$4 sm:$0xff]  }
 0x404   : > { %6182 = vmatpush1.bf16.msra.mxu0 %v21042_v11  ;;  %6079 = vmatprep.subr.bf16.mxu1 %v21047_v47  ;;  %v21118_v11 = vld [vmem:[#allocation4 + $0x11d4] ss:$36 sps:$4 sm:$0xff]   ;;  %v21119_v47 = vld [vmem:[#allocation4 + $0xfe0] ss:$36 sps:$4 sm:$0xff]  }
 0x405   : > { %6183 = vmatprep.subr.bf16.mxu0 %v21050_v55  ;;  %v21116_v55 = vld [vmem:[#allocation4 + $0x11d0] ss:$36 sps:$4 sm:$0xff]  }
 0x407   : > { %6063 = vmatmul.mubr.bf16.gmra.mxu0 %v23660_v38  ;;  %6080 = vmatpush1.bf16.msra.mxu1 %v21045_v20  ;;  %v21120_v20 = vld [vmem:[#allocation4 + $0xda0] ss:$36 sps:$4 sm:$0xff]  }
 0x408   : > { %6184 = vmatpush1.bf16.msra.mxu0 %v21048_v17  ;;  %6081 = vmatprep.subr.bf16.mxu1 %v21053_v4  ;;  %v21123_v17 = vld [vmem:[#allocation4 + $0x118c] ss:$36 sps:$4 sm:$0xff]  }
 0x409   : > { %6185 = vmatprep.subr.bf16.mxu0 %v21056_v36  ;;  %6211 = vmatprep.mubr.bf16.mxu0 %v24896_v24  ;;  %v21121_v4 = vld [vmem:[#allocation4 + $0x1188] ss:$36 sps:$4 sm:$0xff]  }
 0x40a   : > { %v21126_v36 = vld [vmem:[#allocation4 + $0x1144] ss:$36 sps:$4 sm:$0xff]  }
 0x40b   : > { %6082 = vmatpush1.bf16.msra.mxu1 %v21051_v40  ;;  %v21124_v40 = vld [vmem:[#allocation4 + $0x1140] ss:$36 sps:$4 sm:$0xff]  }
 0x40c   : > { %6186 = vmatpush1.bf16.msra.mxu0 %v21054_v52  ;;  %6083 = vmatprep.subr.bf16.mxu1 %v21059_v33  ;;  %v21129_v52 = vld [vmem:[#allocation4 + $0x10fc] ss:$36 sps:$4 sm:$0xff]  }
 0x40d   : > { %6187 = vmatprep.subr.bf16.mxu0 %v21062_v0  ;;  %v21127_v33 = vld [vmem:[#allocation4 + $0x10f8] ss:$36 sps:$4 sm:$0xff]  }
 0x40e   : > { %v21132_v0 = vld [vmem:[#allocation4 + $0x10b4] ss:$36 sps:$4 sm:$0xff]  }
 0x40f   : > { %6084 = vmatpush1.bf16.msra.mxu1 %v21057_v50  ;;  %v21130_v50 = vld [vmem:[#allocation4 + $0x10b0] ss:$36 sps:$4 sm:$0xff]  }
 0x410   : > { %6188 = vmatpush1.bf16.msra.mxu0 %v21060_v10  ;;  %6085 = vmatprep.subr.bf16.mxu1 %v21065_v42  ;;  %v21135_v10 = vld [vmem:[#allocation4 + $0x106c] ss:$36 sps:$4 sm:$0xff]  }
 0x411   : > { %6189 = vmatprep.subr.bf16.mxu0 %v21068_v34  ;;  %v21133_v42 = vld [vmem:[#allocation4 + $0x1068] ss:$36 sps:$4 sm:$0xff]  }
 0x412   : > { %v21138_v34 = vld [vmem:[#allocation4 + $0x1024] ss:$36 sps:$4 sm:$0xff]  }
 0x413   : > { %6086 = vmatpush1.bf16.msra.mxu1 %v21063_v14  ;;  %v21136_v14 = vld [vmem:[#allocation4 + $0x1020] ss:$36 sps:$4 sm:$0xff]  }
 0x414   : > { %6190 = vmatpush1.bf16.msra.mxu0 %v21066_v1  ;;  %6087 = vmatprep.subr.bf16.mxu1 %v21071_v3  ;;  %v21141_v1 = vld [vmem:[#allocation4 + $0xfdc] ss:$36 sps:$4 sm:$0xff]  }
 0x415   : > { %6191 = vmatprep.subr.bf16.mxu0 %v21074_v59  ;;  %v21139_v3 = vld [vmem:[#allocation4 + $0xfd8] ss:$36 sps:$4 sm:$0xff]  }
 0x416   : > { %v21142_v59 = vld [vmem:[#allocation4 + $0x1418] ss:$36 sps:$4 sm:$0xff]  }
 0x417   : > { %6088 = vmatpush1.bf16.msra.mxu1 %v21069_v5  ;;  %v21143_v5 = vld [vmem:[#allocation4 + $0x13d0] ss:$36 sps:$4 sm:$0xff]  }
 0x418   : > { %6192 = vmatpush1.bf16.msra.mxu0 %v21072_v44  ;;  %6126 = vmatprep.subr.bf16.mxu1 %v21077_v60  ;;  %v21144_v44 = vld [vmem:[#allocation4 + $0x1388] ss:$36 sps:$4 sm:$0xff]   ;;  %v21145_v60 = vld [vmem:[#allocation4 + $0x1340] ss:$36 sps:$4 sm:$0xff]  }
 0x419   : > { %6193 = vmatprep.subr.bf16.mxu0 %v21080_v26  ;;  %v21146_v26 = vld [vmem:[#allocation4 + $0x12f8] ss:$36 sps:$4 sm:$0xff]  }
 0x41a   : > { %6106 = vmatmul.mubr.bf16.vlgmr.msra.gmra.mxu1 %v23688_v16 }
 0x41b   : > { %6127 = vmatpush1.bf16.msra.mxu1 %v21075_v58  ;;  %6115 = vmatprep.mubr.bf16.mxu1 %v24896_v24  ;;  %v21147_v58 = vld [vmem:[#allocation4 + $0x12b0] ss:$36 sps:$4 sm:$0xff]  }
 0x41c   : > { %6194 = vmatpush1.bf16.msra.mxu0 %v21078_v23  ;;  %6128 = vmatprep.subr.bf16.mxu1 %v21083_v61  ;;  %v21152_v23 = vld [vmem:[#allocation8 + $0x18c] ss:$28 sps:$4 sm:$0xff]   ;;  %v21155_v61 = vld [vmem:[#allocation8 + $0x154] ss:$28 sps:$4 sm:$0xff]  }
 0x41d   : > { %19619 = vmatprep.subr.bf16.mxu0 %v21084_v6  ;;  %v21149_v6 = vld [vmem:[#allocation4 + $0x1220] ss:$36 sps:$4 sm:$0xff]  }
 0x41f   : > { %6129 = vmatpush1.bf16.msra.mxu1 %v21081_v25  ;;  %6212 = vmatmul.mubr.bf16.vlgmr.msra.gmra.mxu0 %v23688_v16  ;;  %v21158_v25 = vld [vmem:[#allocation8 + $0x11c] ss:$28 sps:$4 sm:$0xff]  }
 0x420   : > { %19620 = vmatpush3.bf16.msra.mxu0 %v21085_v12  ;;  %6130 = vmatprep.subr.bf16.mxu1 %v21088_v32  ;;  %v21161_v12 = vld [vmem:[#allocation8 + $0xe4] ss:$28 sps:$4 sm:$0xff]  }
 0x421   : > { %19621 = vmatprep.subr.bf16.mxu0 %v21089_v39  ;;  %6221 = vmatprep.mubr.bf16.mxu0 %v24896_v24  ;;  %v21159_v32 = vld [vmem:[#allocation8 + $0xe0] ss:$28 sps:$4 sm:$0xff]   ;;  %v21164_v39 = vld [vmem:[#allocation8 + $0xac] ss:$28 sps:$4 sm:$0xff]  }
 0x422   : > { %6116 = vmatmul.mubr.bf16.gmra.mxu1 %v23686_v41 }
 0x423   : > { %6131 = vmatpush1.bf16.msra.mxu1 %v21086_v46  ;;  %6158 = vmatprep.mubr.bf16.mxu1 %v23649_v15  ;;  %v21162_v46 = vld [vmem:[#allocation8 + $0xa8] ss:$28 sps:$4 sm:$0xff]  }
 0x424   : > { %19622 = vmatpush3.bf16.msra.mxu0 %v21090_v13  ;;  %6132 = vmatprep.subr.bf16.mxu1 %v21093_v53  ;;  %v21167_v13 = vld [vmem:[#allocation8 + $0x74] ss:$28 sps:$4 sm:$0xff]  }
 0x425   : > { %19623 = vmatprep.subr.bf16.mxu0 %v21094_v18  ;;  %v21165_v53 = vld [vmem:[#allocation8 + $0x70] ss:$28 sps:$4 sm:$0xff]   ;;  %v21170_v18 = vld [vmem:[#allocation8 + $0x3c] ss:$28 sps:$4 sm:$0xff]  }
 0x427   : > { %6133 = vmatpush1.bf16.msra.mxu1 %v21091_v49  ;;  %6222 = vmatmul.mubr.bf16.gmra.mxu0 %v23686_v41  ;;  %v21168_v49 = vld [vmem:[#allocation8 + $0x38] ss:$28 sps:$4 sm:$0xff]  }
 0x428   : > { %19624 = vmatpush3.bf16.msra.mxu0 %v21095_v27  ;;  %6264 = vmatprep.mubr.bf16.mxu0 %v23649_v15  ;;  %v21114_v15 = vld [vmem:[#allocation4 + $0x1028] ss:$36 sps:$4 sm:$0xff]   ;;  %v21173_v27 = vld [vmem:[#allocation8 + $0x4] ss:$28 sps:$4 sm:$0xff]  }
 0x429   : > { %6134 = vmatprep.subr.bf16.mxu1 %v21098_v35  ;;  %19625 = vmatprep.subr.bf16.mxu0 %v21099_v37  ;;  %v21176_v35 = vld [vmem:[#allocation8 + $0x34c] ss:$28 sps:$4 sm:$0xff]  }
 0x42b   : > { %6135 = vmatpush1.bf16.msra.mxu1 %v21096_v31  ;;  %v21174_v31 = vld [vmem:[#allocation8 + $0x348] ss:$28 sps:$4 sm:$0xff]  }
 0x42c   : > { %19626 = vmatpush3.bf16.msra.mxu0 %v21100_v43  ;;  %6136 = vmatprep.subr.bf16.mxu1 %v21103_v21  ;;  %v21179_v43 = vld [vmem:[#allocation8 + $0x314] ss:$28 sps:$4 sm:$0xff]  }
 0x42d   : > { %19627 = vmatprep.subr.bf16.mxu0 %v21104_v45  ;;  %v21177_v45 = vld [vmem:[#allocation8 + $0x310] ss:$28 sps:$4 sm:$0xff]  }
 0x42f   : > { %6137 = vmatpush1.bf16.msra.mxu1 %v21101_v56 }
 0x430   : > { %19628 = vmatpush3.bf16.msra.mxu0 %v21105_v63  ;;  %6138 = vmatprep.subr.bf16.mxu1 %v21108_v9  ;;  %v21182_v63 = vld [vmem:[#allocation8 + $0x2dc] ss:$28 sps:$4 sm:$0xff]  }
 0x431   : > { %19629 = vmatprep.subr.bf16.mxu0 %v21109_v2  ;;  %v21180_v9 = vld [vmem:[#allocation8 + $0x2d8] ss:$28 sps:$4 sm:$0xff]  }
 0x433   : > { %6139 = vmatpush1.bf16.msra.mxu1 %v21106_v54 }
 0x434   : > { %19630 = vmatpush3.bf16.msra.mxu0 %v21110_v30  ;;  %6140 = vmatprep.subr.bf16.mxu1 %v21113_v48  ;;  %v21185_v30 = vld [vmem:[#allocation8 + $0x2a4] ss:$28 sps:$4 sm:$0xff]  }
 0x435   : > { %19631 = vmatprep.subr.bf16.mxu0 %v21114_v15  ;;  %v21183_v48 = vld [vmem:[#allocation8 + $0x2a0] ss:$28 sps:$4 sm:$0xff]  }
 0x437   : > { %6141 = vmatpush1.bf16.msra.mxu1 %v21111_v62 }
 0x438   : > { %19632 = vmatpush3.bf16.msra.mxu0 %v21115_v19  ;;  %6142 = vmatprep.subr.bf16.mxu1 %v21118_v11  ;;  %v21188_v19 = vld [vmem:[#allocation8 + $0x26c] ss:$28 sps:$4 sm:$0xff]  }
 0x439   : > { %19633 = vmatprep.subr.bf16.mxu0 %v21119_v47  ;;  %v21186_v11 = vld [vmem:[#allocation8 + $0x268] ss:$28 sps:$4 sm:$0xff]  }
 0x43b   : > { %6143 = vmatpush2.bf16.msra.mxu1 %v21116_v55 }
 0x43c   : > { %19634 = vmatpush3.bf16.msra.mxu0 %v21120_v20  ;;  %6144 = vmatprep.subr.bf16.mxu1 %v21123_v17  ;;  %v21191_v20 = vld [vmem:[#allocation8 + $0x234] ss:$28 sps:$4 sm:$0xff]  }
 0x43d   : > { %7567 = vmatprep.subr.bf16.mxu0 %v21152_v23  ;;  %v21189_v17 = vld [vmem:[#allocation8 + $0x230] ss:$28 sps:$4 sm:$0xff]   ;;  %v21215_v23 = vld [vmem:[#allocation8 + $0x464] ss:$28 sps:$4 sm:$0xff]  }
 0x43f   : > { %6145 = vmatpush2.bf16.msra.mxu1 %v21121_v4  ;;  %6265 = vmatmul.mubr.bf16.vlgmr.msra.gmra.mxu0 %v23651_v51 }
 0x440   : > { %6272 = vmatprep.mubr.bf16.mxu0 %v23653_v57  ;;  %6146 = vmatprep.subr.bf16.mxu1 %v21126_v36 }
 0x443   : > { %6147 = vmatpush2.bf16.msra.mxu1 %v21124_v40  ;;  %v21194_v40 = vld [vmem:[#allocation8 + $0x1fc] ss:$28 sps:$4 sm:$0xff]  }
 0x444   : > { %6148 = vmatprep.subr.bf16.mxu1 %v21129_v52  ;;  %v21192_v52 = vld [vmem:[#allocation8 + $0x1f8] ss:$28 sps:$4 sm:$0xff]  }
 0x447   : > { %6149 = vmatpush2.bf16.msra.mxu1 %v21127_v33  ;;  %6273 = vmatmul.mubr.bf16.gmra.mxu0 %v23660_v38 }
 0x448   : > { %6150 = vmatprep.subr.bf16.mxu1 %v21132_v0 }
 0x44b   : > { %6151 = vmatpush2.bf16.msra.mxu1 %v21130_v50  ;;  %v21197_v50 = vld [vmem:[#allocation8 + $0x50c] ss:$28 sps:$4 sm:$0xff]  }
 0x44c   : > { %6152 = vmatprep.subr.bf16.mxu1 %v21135_v10 }
 0x44f   : > { %6153 = vmatpush2.bf16.msra.mxu1 %v21133_v42  ;;  %v21195_v42 = vld [vmem:[#allocation8 + $0x508] ss:$28 sps:$4 sm:$0xff]  }
 0x450   : > { %6154 = vmatprep.subr.bf16.mxu1 %v21138_v34  ;;  %v21200_v34 = vld [vmem:[#allocation8 + $0x1c4] ss:$28 sps:$4 sm:$0xff]  }
 0x453   : > { %6155 = vmatpush2.bf16.msra.mxu1 %v21136_v14  ;;  %v21198_v14 = vld [vmem:[#allocation8 + $0x1c0] ss:$28 sps:$4 sm:$0xff]  }
 0x454   : > { %6156 = vmatprep.subr.bf16.mxu1 %v21141_v1 }
 0x457   : > { %6157 = vmatpush2.bf16.msra.mxu1 %v21139_v3  ;;  %v21201_v3 = vld [vmem:[#allocation8 + $0x4d0] ss:$28 sps:$4 sm:$0xff]  }
 0x458   : > { %19981 = vmatprep.subr.bf16.mxu1 %v21142_v59 }
 0x45a   : > { %6159 = vmatmul.mubr.bf16.vlgmr.msra.gmra.mxu1 %v23651_v51  ;;  %v21148_v51 = vld [vmem:[#allocation4 + $0x1268] ss:$36 sps:$4 sm:$0xff]  }
 0x45b   : > { %6168 = vmatprep.mubr.bf16.mxu1 %v23653_v57  ;;  %19982 = vmatpush3.bf16.msra.mxu1 %v21142_v59  ;;  %v21150_v57 = vld [vmem:[#allocation8 + $0x188] ss:$28 sps:$4 sm:$0xff]   ;;  %v21203_v59 = vld [vmem:[#allocation8 + $0x4d4] ss:$28 sps:$4 sm:$0xff]  }
 0x45c   : > { %19983 = vmatprep.subr.bf16.mxu1 %v21143_v5  ;;  %7568 = vmatpush1.bf16.msra.mxu0 %v21150_v57 }
 0x45d   : > { %7569 = vmatprep.subr.bf16.mxu0 %v21155_v61 }
 0x45f   : > { %19984 = vmatpush3.bf16.msra.mxu1 %v21143_v5  ;;  %v23723_v37 = vpop.f32.mrf.mxu0 }
 0x460   : > { %19985 = vmatprep.subr.bf16.mxu1 %v21144_v44 }
 0x461   : > { %v23725_v21 = vpop.f32.mrf.mxu0 }
 0x462   : > { %6169 = vmatmul.mubr.bf16.gmra.mxu1 %v23660_v38  ;;  %v21153_v38 = vld [vmem:[#allocation8 + $0x150] ss:$28 sps:$4 sm:$0xff]  }
 0x463   : > { %19986 = vmatpush3.bf16.msra.mxu1 %v21144_v44  ;;  %19997 = vmatprep.mubr.bf16.mxu1 %v23688_v16  ;;  %v21156_v16 = vld [vmem:[#allocation8 + $0x118] ss:$28 sps:$4 sm:$0xff]   ;;  %v23727_v56 = vpop.f32.mrf.mxu0 }
 0x464   : > { %19987 = vmatprep.subr.bf16.mxu1 %v21145_v60  ;;  %7570 = vmatpush1.bf16.msra.mxu0 %v21153_v38  ;;  %v21206_v44 = vld [vmem:[#allocation8 + $0x514] ss:$28 sps:$4 sm:$0xff]   ;;  %v21213_v38 = vld [vmem:[#allocation8 + $0x460] ss:$28 sps:$4 sm:$0xff]  }
 0x465   : > { %7571 = vmatprep.subr.bf16.mxu0 %v21158_v25  ;;  %v23729_v2 = vpop.f32.mrf.mxu0 }
 0x467   : > { %19988 = vmatpush3.bf16.msra.mxu1 %v21145_v60  ;;  %v23733_v15 = vpop.f32.mrf.mxu0 }
 0x468   : > { %19989 = vmatprep.subr.bf16.mxu1 %v21146_v26  ;;  %7572 = vmatpush1.bf16.msra.mxu0 %v21156_v16 }
 0x469   : > { %7573 = vmatprep.subr.bf16.mxu0 %v21161_v12  ;;  %v23737_v47 = vpop.f32.mrf.mxu0  ;;  %v21221_v12 = vld [vmem:[#allocation8 + $0x42c] ss:$28 sps:$4 sm:$0xff]  }
 0x46b   : > { %19990 = vmatpush3.bf16.msra.mxu1 %v21146_v26  ;;  %v23741_v4 = vpop.f32.mrf.mxu0  ;;  %v21207_v26 = vld [vmem:[#allocation8 + $0x498] ss:$28 sps:$4 sm:$0xff]  }
 0x46c   : > { %19991 = vmatprep.subr.bf16.mxu1 %v21147_v58  ;;  %7574 = vmatpush1.bf16.msra.mxu0 %v21159_v32 }
 0x46d   : > { %7575 = vmatprep.subr.bf16.mxu0 %v21164_v39  ;;  %v23745_v33 = vpop.f32.mrf.mxu0 }
 0x46f   : > { %19992 = vmatpush3.bf16.msra.mxu1 %v21147_v58  ;;  %v21209_v58 = vld [vmem:[#allocation8 + $0x49c] ss:$28 sps:$4 sm:$0xff]  }
 0x470   : > { %19993 = vmatprep.subr.bf16.mxu1 %v21148_v51  ;;  %7576 = vmatpush1.bf16.msra.mxu0 %v21162_v46  ;;  %v21219_v46 = vld [vmem:[#allocation8 + $0x428] ss:$28 sps:$4 sm:$0xff]  }
 0x471   : > { %7577 = vmatprep.subr.bf16.mxu0 %v21167_v13 }
 0x473   : > { %19994 = vmatpush3.bf16.msra.mxu1 %v21148_v51 }
 0x474   : > { %19995 = vmatprep.subr.bf16.mxu1 %v21149_v6  ;;  %7578 = vmatpush1.bf16.msra.mxu0 %v21165_v53 }
 0x475   : > { %7579 = vmatprep.subr.bf16.mxu0 %v21170_v18 }
 0x477   : > { %19996 = vmatpush3.bf16.msra.mxu1 %v21149_v6 }
 0x478   : > { %7580 = vmatpush1.bf16.msra.mxu0 %v21168_v49  ;;  %7620 = vmatprep.subr.bf16.mxu1 %v21197_v50  ;;  %v21239_v50 = vld [vmem:[#allocation8 + $0x384] ss:$28 sps:$4 sm:$0xff]  }
 0x479   : > { %7581 = vmatprep.subr.bf16.mxu0 %v21173_v27  ;;  %v21227_v27 = vld [vmem:[#allocation8 + $0x3f4] ss:$28 sps:$4 sm:$0xff]  }
 0x47a   : > { %19998 = vmatmul.mubr.bf16.vlgmr.msra.gmra.mxu1 %v23686_v41  ;;  %v21171_v41 = vld [vmem:[#allocation8] ss:$28 sps:$4 sm:$0xff]   ;;  %v23731_v54 = vpop.f32.mrf.mxu1 }
 0x47b   : > { %7652 = vmatprep.mubr.bf16.mxu1 %v24896_v24  ;;  %7621 = vmatpush1.bf16.msra.mxu1 %v21195_v42 }
 0x47c   : > { %7582 = vmatpush1.bf16.msra.mxu0 %v21171_v41  ;;  %v23735_v62 = vpop.f32.mrf.mxu1  ;;  %7622 = vmatprep.subr.bf16.mxu1 %v21203_v59 }
 0x47d   : > { %7583 = vmatprep.subr.bf16.mxu0 %v21176_v35 }
 0x47e   : > { %v23739_v55 = vpop.f32.mrf.mxu1 }
 0x47f   : > { %v6001_v10 = vpop.f32.mrf.mxu0  ;;  %7623 = vmatpush1.bf16.msra.mxu1 %v21201_v3 }
 0x480   : > { %7584 = vmatpush2.bf16.msra.mxu0 %v21174_v31  ;;  %v23743_v36 = vpop.f32.mrf.mxu1  ;;  %7624 = vmatprep.subr.bf16.mxu1 %v21209_v58  ;;  %v21225_v31 = vld [vmem:[#allocation8 + $0x3f0] ss:$28 sps:$4 sm:$0xff]  }
 0x481   : > { %7585 = vmatprep.subr.bf16.mxu0 %v21179_v43  ;;  %v23751_v5 = vpop.f32.mrf.mxu0 }
 0x482   : > { %v23747_v0 = vpop.f32.mrf.mxu1 }
 0x483   : > { %v6005_v51 = vpop.f32.mrf.mxu0  ;;  %7625 = vmatpush1.bf16.msra.mxu1 %v21207_v26 }
 0x484   : > { %7586 = vmatpush2.bf16.msra.mxu0 %v21177_v45  ;;  %v23749_v1 = vpop.f32.mrf.mxu1  ;;  %7626 = vmatprep.subr.bf16.mxu1 %v21215_v23 }
 0x485   : > { %7587 = vmatprep.subr.bf16.mxu0 %v21182_v63  ;;  %v23757_v61 = vpop.f32.mrf.mxu0 }
 0x486   : > { %v23753_v60 = vpop.f32.mrf.mxu1 }
 0x487   : > { %7627 = vmatpush1.bf16.msra.mxu1 %v21213_v38  ;;  %v6011_v32 = vpop.f32.mrf.mxu0 }
 0x488   : > { %7588 = vmatpush2.bf16.msra.mxu0 %v21180_v9  ;;  %v23755_v57 = vpop.f32.mrf.mxu1  ;;  %7628 = vmatprep.subr.bf16.mxu1 %v21221_v12 }
 0x489   : > { %7589 = vmatprep.subr.bf16.mxu0 %v21185_v30  ;;  %v23766_v41 = vpop.f32.mrf.mxu0 }
 0x48b   : > { %7629 = vmatpush1.bf16.msra.mxu1 %v21219_v46 }
 0x48c   : > { %7590 = vmatpush2.bf16.msra.mxu0 %v21183_v48  ;;  %7630 = vmatprep.subr.bf16.mxu1 %v21227_v27  ;;  %v21233_v48 = vld [vmem:[#allocation8 + $0x3bc] ss:$28 sps:$4 sm:$0xff]  }
 0x48d   : > { %7591 = vmatprep.subr.bf16.mxu0 %v21188_v19  ;;  %v6015_v19 = vpop.f32.mrf.mxu0 }
 0x48f   : > { %7631 = vmatpush1.bf16.msra.mxu1 %v21225_v31 }
 0x490   : > { %7592 = vmatpush2.bf16.msra.mxu0 %v21186_v11  ;;  %7632 = vmatprep.subr.bf16.mxu1 %v21233_v48  ;;  %v23808_v48 = vadd.f32 %v23739_v55, %v23727_v56  ;;  %v5908_v56 = vadd.f32 %v23749_v1, %v23737_v47  ;;  %v23837_v47 = vadd.f32 %v23753_v60, %v23741_v4 }
 0x491   : > { %7593 = vmatprep.subr.bf16.mxu0 %v21191_v20  ;;  %v21231_v20 = vld [vmem:[#allocation8 + $0x3b8] ss:$28 sps:$4 sm:$0xff]  }
 0x492   : > { %v6339_v60 = vrot.slane %v23837_v47, 7 }
 0x493   : > { %7633 = vmatpush1.bf16.msra.mxu1 %v21231_v20  ;;  %v5898_v20 = vadd.f32 %v23735_v62, %v23725_v21 }
 0x494   : > { %7594 = vmatpush2.bf16.msra.mxu0 %v21189_v17  ;;  %7634 = vmatprep.subr.bf16.mxu1 %v21239_v50  ;;  %v24884_v50 = vrot.slane %v23808_v48, 7 }
 0x495   : > { %7595 = vmatprep.subr.bf16.mxu0 %v21194_v40 }
 0x498   : > { %7596 = vmatpush2.bf16.msra.mxu0 %v21192_v52 }
 0x499   : > { %7597 = vmatprep.subr.bf16.mxu0 %v21200_v34  ;;  %v21245_v34 = vld [vmem:[#allocation8 + $0x194] ss:$28 sps:$4 sm:$0xff]  }
 0x49c   : > { %7598 = vmatpush2.bf16.msra.mxu0 %v21198_v14  ;;  %v23784_v14 = vpop.f32.mrf.mxu0 }
 0x49d   : > { %7726 = vmatprep.subr.bf16.mxu0 %v21206_v44 }
 0x4ba   : > { %v5948_v6 = vpop.f32.mrf.mxu1 }
 0x4bb   : > { %v23759_v25 = vadd.f32 %v6001_v10, %v5948_v6  ;;  %v21237_v10 = vld [vmem:[#allocation8 + $0x380] ss:$28 sps:$4 sm:$0xff]  }
 0x4bc   : > { %v23761_v16 = vpop.f32.mrf.mxu1  ;;  %7635 = vmatpush1.bf16.msra.mxu1 %v21237_v10 }
 0x4bd   : > { %24905 = vst [vmem:[#allocation19_spill] sm:$0xff] %v23759_v25  ;;  %v6332_v18 = vrot.slane %v23759_v25, 7  ;;  %7673 = vmatprep.subr.bf16.mxu1 %v21245_v34 }
 0x4be   : > { %v5952_v39 = vpop.f32.mrf.mxu1 }
 0x4bf   : > { %v6006_v13 = vadd.f32 %v6005_v51, %v5952_v39  ;;  %v6054_v3 = vpop.f32.mrf.mxu0 }
 0x4c0   : > { %v23763_v53 = vpop.f32.mrf.mxu1 }
 0x4c1   : > { %v6335_v49 = vrot.slane %v6006_v13, 7  ;;  %v23786_v59 = vpop.f32.mrf.mxu0 }
 0x4c2   : > { %v5958_v35 = vpop.f32.mrf.mxu1 }
 0x4c3   : > { %v6350_v43 = vsel %vm2303_vm2, %v6332_v18, %v6335_v49  ;;  %v6012_v45 = vadd.f32 %v6011_v32, %v5958_v35  ;;  %v23788_v44 = vpop.f32.mrf.mxu0 }
 0x4c4   : > { %v23772_v63 = vsel %vm373_vm0, %v6006_v13, %v6350_v43  ;;  %v23774_v9 = vpop.f32.mrf.mxu1 }
 0x4c5   : > { %24906 = vst [vmem:[#allocation20_spill] sm:$0xff] %v23772_v63  ;;  %v6338_v30 = vrot.slane %v6012_v45, 7  ;;  %v23790_v26 = vpop.f32.mrf.mxu0  ;;  %v6331_v63 = vrot.slane %v5898_v20, 7 }
 0x4c6   : > { %v5962_v11 = vpop.f32.mrf.mxu1  ;;  %24907 = vst [vmem:[#allocation17_spill] sm:$0xff] %v23790_v26 }
 0x4c7   : > { %v6016_v17 = vadd.f32 %v6015_v19, %v5962_v11  ;;  %v23778_v40 = vsel %vm2303_vm2, %v6335_v49, %v6338_v30  ;;  %v6064_v58 = vpop.f32.mrf.mxu0  ;;  %v5902_v19 = vadd.f32 %v23743_v36, %v23729_v2  ;;  %v5896_v11 = vadd.f32 %v23731_v54, %v23723_v37 }
 0x4c8   : > { %v23794_v23 = vpop.f32.mrf.mxu1  ;;  %v23825_v2 = vadd.f32 %v23747_v0, %v23733_v15  ;;  %v5912_v37 = vadd.f32 %v23755_v57, %v23745_v33  ;;  %v6337_v36 = vrot.slane %v5908_v56, 7 }
 0x4c9   : > { %v6341_v52 = vrot.slane %v6016_v17, 7  ;;  %v23792_v51 = vpop.f32.mrf.mxu0  ;;  %v6334_v10 = vrot.slane %v5902_v19, 7  ;;  %v6330_v34 = vrot.slane %v5896_v11, 7 }
 0x4cb   : > { %v23782_v42 = vsel %vm2303_vm2, %v6338_v30, %v6341_v52  ;;  %v23796_v6 = vpop.f32.mrf.mxu0  ;;  %v6348_v62 = vsel %vm2303_vm2, %v6330_v34, %v24884_v50  ;;  %v6349_v15 = vsel %vm2303_vm2, %v6331_v63, %v6334_v10  ;;  %v6336_v34 = vrot.slane %v23825_v2, 7 }
 0x4cc   : > { %v6340_v50 = vrot.slane %v5912_v37, 7  ;;  %v6358_v63 = vsel %vm373_vm0, %v5902_v19, %v6349_v15 }
 0x4cd   : > { %v23798_v12 = vpop.f32.mrf.mxu0 }
 0x4da   : > { %v6107_v38 = vpop.f32.mrf.mxu1 }
 0x4db   : > { %v6108_v26 = vadd.f32 %v6107_v38, %v6054_v3  ;;  %v6346_v3 = vsel %vm2303_vm2, %v6334_v10, %v6337_v36 }
 0x4dc   : > { %v23800_v32 = vpop.f32.mrf.mxu1 }
 0x4dd   : > { %24908 = vst [vmem:[#allocation18_spill] sm:$0xff] %v23800_v32  ;;  %v23850_v32 = vld [vmem:[#allocation6 + $0x6] sm:$0x7]  ;;  %v6403_v47 = vadd.f32 %v6108_v26, %v5898_v20 }
 0x4de   : > { %v6111_v46 = vpop.f32.mrf.mxu1 }
 0x4df   : > { %v6213_v39 = vpop.f32.mrf.mxu0 }
 0x4e0   : > { %v23802_v18 = vpop.f32.mrf.mxu1 }
 0x4e1   : > { %v6215_v13 = vpop.f32.mrf.mxu0  ;;  %24909 = vst [vmem:[#allocation21_spill] sm:$0xff] %v23802_v18  ;;  %v6357_v18 = vsel %vm373_vm0, %v23808_v48, %v6348_v62 }
 0x4e2   : > { %v6117_v27 = vpop.f32.mrf.mxu1 }
 0x4e3   : > { %v6217_v49 = vpop.f32.mrf.mxu0 }
 0x4e4   : > { %v23804_v31 = vpop.f32.mrf.mxu1 }
 0x4e5   : > { %v6219_v35 = vpop.f32.mrf.mxu0 }
 0x4e6   : > { %v6121_v45 = vpop.f32.mrf.mxu1 }
 0x4e7   : > { %v6223_v43 = vpop.f32.mrf.mxu0  ;;  %v6122_v26 = vadd.f32 %v6121_v45, %v23796_v6 }
 0x4e8   : > { %v23816_v17 = vpop.f32.mrf.mxu1 }
 0x4e9   : > { %v6225_v30 = vpop.f32.mrf.mxu0 }
 0x4eb   : > { %v23818_v52 = vpop.f32.mrf.mxu0 }
 0x4ed   : > { %v23829_v21 = vpop.f32.mrf.mxu0 }
 0x4ff   : > { %v23841_v0 = vpop.f32.mrf.mxu0 }
 0x501   : > { %v23858_v38 = vpop.f32.mrf.mxu0 }
 0x51a   : > { %v6160_v55 = vpop.f32.mrf.mxu1 }
 0x51b   : > { %v6214_v33 = vadd.f32 %v6213_v39, %v6160_v55  ;;  %v6118_v55 = vadd.f32 %v6117_v27, %v6064_v58 }
 0x51c   : > { %v6162_v54 = vpop.f32.mrf.mxu1 }
 0x51d   : > { %v6216_v57 = vadd.f32 %v6215_v13, %v6162_v54  ;;  %v6004_v13 = vadd.f32 %v23751_v5, %v23761_v16  ;;  %v6366_v37 = vrot.slane %v6214_v33, 1  ;;  %v6343_v5 = vsel %vm2303_vm2, %v6337_v36, %v6340_v50 }
 0x51e   : > { %v6164_v1 = vpop.f32.mrf.mxu1  ;;  %v6409_v50 = vadd.f32 %v6346_v3, %v6118_v55  ;;  %v6412_v55 = vadd.f32 %v6343_v5, %v6122_v26 }
 0x51f   : > { %v6218_v25 = vadd.f32 %v6217_v49, %v6164_v1  ;;  %v6008_v49 = vadd.f32 %v23757_v61, %v23763_v53  ;;  %v6367_v54 = vrot.slane %v6216_v57, 1  ;;  %v6432_v61 = vrot.slane %v23850_v32, %v23339_v28 }
 0x520   : > { %v6166_v4 = vpop.f32.mrf.mxu1  ;;  %v6402_v15 = vadd.f32 %v6004_v13, %v5896_v11  ;;  %v6014_v57 = vadd.f32 %v23766_v41, %v23774_v9 }
 0x521   : > { %v6369_v56 = vrot.slane %v6218_v25, 1  ;;  %v6220_v39 = vadd.f32 %v6219_v35, %v6166_v4  ;;  %v6112_v35 = vadd.f32 %v6111_v46, %v23788_v44  ;;  %v23870_v44 = vpop.f32.mrf.mxu0  ;;  %v6436_v46 = vrot.slane %v23850_v32, %v23350_v22 }
 0x522   : > { %v6170_v2 = vpop.f32.mrf.mxu1 }
 0x523   : > { %v6370_v19 = vrot.slane %v6220_v39, 1  ;;  %v6224_v62 = vadd.f32 %v6223_v43, %v6170_v2  ;;  %v6384_v53 = vsel %vm2348_vm3, %v6366_v37, %v6369_v56  ;;  %v6405_v43 = vadd.f32 %v6357_v18, %v6008_v49 }
 0x524   : > { %v6172_v16 = vpop.f32.mrf.mxu1  ;;  %v6018_v18 = vadd.f32 %v23784_v14, %v23794_v23  ;;  %v6406_v11 = vadd.f32 %v6358_v63, %v6112_v35 }
 0x525   : > { %v6385_v58 = vsel %vm2348_vm3, %v6367_v54, %v6370_v19  ;;  %v6372_v27 = vrot.slane %v6224_v62, 1  ;;  %v6226_v10 = vadd.f32 %v6225_v30, %v6172_v16  ;;  %v6414_v30 = vadd.f32 %v6402_v15, %v6384_v53 }
 0x526   : > { %v6174_v20 = vpop.f32.mrf.mxu1  ;;  %v6415_v36 = vadd.f32 %v6403_v47, %v6385_v58 }
 0x527   : > { %v6381_v1 = vsel %vm2348_vm3, %v6369_v56, %v6372_v27  ;;  %v6373_v33 = vrot.slane %v6226_v10, 1  ;;  %v6421_v49 = vadd.f32 %v6409_v50, %v6226_v10  ;;  %v23884_v56 = vpop.f32.mrf.mxu0  ;;  %v6228_v9 = vadd.f32 %v23818_v52, %v6174_v20  ;;  %v21204_v20 = vld [vmem:[#allocation8 + $0x510] ss:$28 sps:$4 sm:$0xff]  }
 0x528   : > { %v6393_v6 = vsel %vm378_vm1, %v6218_v25, %v6381_v1  ;;  %v6176_v45 = vpop.f32.mrf.mxu1  ;;  %v6342_v25 = vsel %vm2303_vm2, %v6336_v34, %v6339_v60  ;;  %v6445_v3 = vadd.f32 %v6436_v46, %v6415_v36  ;;  %v6444_v37 = vadd.f32 %v6432_v61, %v6414_v30  ;;  %v21212_v36 = vld [vmem:[#allocation8 + $0x4dc] ss:$28 sps:$4 sm:$0xff]  }
 0x529   : > { %v6417_v4 = vadd.f32 %v6405_v43, %v6393_v6  ;;  %v6382_v13 = vsel %vm2348_vm3, %v6370_v19, %v6373_v33  ;;  %v6230_v14 = vadd.f32 %v23829_v21, %v6176_v45  ;;  %v6411_v2 = vadd.f32 %v6342_v25, %v6018_v18  ;;  %v19641_v52 = vpop.f32.mrf.mxu0  ;;  %v21218_v18 = vld [vmem:[#allocation8 + $0x4a4] ss:$28 sps:$4 sm:$0xff]  }
 0x52a   : > { %v6394_v41 = vsel %vm378_vm1, %v6220_v39, %v6382_v13  ;;  %v24910_v19 = vrot.slane %v23808_v48, 7  ;;  %v6451_v35 = vadd.f32 %v6436_v46, %v6421_v49  ;;  %v6457_v58 = vmax.f32 %v6445_v3, 0.0  ;;  %v21224_v49 = vld [vmem:[#allocation8 + $0x46c] ss:$28 sps:$4 sm:$0xff]   ;;  %v21230_v3 = vld [vmem:[#allocation8 + $0x434] ss:$28 sps:$4 sm:$0xff]  }
 0x52b   : > { %v6447_v23 = vadd.f32 %v6432_v61, %v6417_v4  ;;  %v6418_v63 = vadd.f32 %v6406_v11, %v6394_v41  ;;  %v6424_v54 = vadd.f32 %v6412_v55, %v6230_v14  ;;  %v6423_v21 = vadd.f32 %v6411_v2, %v6228_v9  ;;  %v19642_v48 = vpop.f32.mrf.mxu0  ;;  %v21216_v11 = vld [vmem:[#allocation8 + $0x4a0] ss:$28 sps:$4 sm:$0xff]  }
 0x52c   : > { %v6345_v47 = vsel %vm2303_vm2, %v24910_v19, %v6336_v34  ;;  %v6456_v27 = vmax.f32 %v6444_v37, 0.0  ;;  %v6463_v43 = vmax.f32 %v6451_v35, 0.0  ;;  %v6120_v30 = vadd.f32 %v23804_v31, %v23792_v51  ;;  %v24911_v37 = vld [vmem:[#allocation18_spill] sm:$0xff] }
 0x52d   : > { %v6448_v39 = vadd.f32 %v6436_v46, %v6418_v63  ;;  %v6408_v5 = vadd.f32 %v6345_v47, %v6014_v57  ;;  %v6459_v16 = vmax.f32 %v6447_v23, 0.0  ;;  %v6454_v53 = vadd.f32 %v6436_v46, %v6424_v54  ;;  %v19644_v46 = vpop.f32.mrf.mxu0  ;;  %v21222_v63 = vld [vmem:[#allocation8 + $0x468] ss:$28 sps:$4 sm:$0xff]  }
 0x52e   : > { %v6453_v34 = vadd.f32 %v6432_v61, %v6423_v21  ;;  %v19643_v45 = vadd.f32 %v19642_v48, %v19641_v52  ;;  %v6410_v55 = vadd.f32 %v23778_v40, %v6120_v30  ;;  %v6124_v41 = vadd.f32 %v23816_v17, %v23798_v12  ;;  %v21228_v52 = vld [vmem:[#allocation8 + $0x430] ss:$28 sps:$4 sm:$0xff]  }
 0x52f   : > { %v6460_v60 = vmax.f32 %v6448_v39, 0.0  ;;  %v6420_v10 = vadd.f32 %v6408_v5, %v6224_v62  ;;  %v6466_v15 = vmax.f32 %v6454_v53, 0.0  ;;  %v23898_v50 = vpack.c.bf16 %v6459_v16, %v6456_v27  ;;  %v21210_v62 = vld [vmem:[#allocation8 + $0x4d8] ss:$28 sps:$4 sm:$0xff]   ;;  %v19645_v4 = vpop.f32.mrf.mxu0 }
 0x530   : > { %v6465_v57 = vmax.f32 %v6453_v34, 0.0  ;;  %v6440_v14 = vrot.slane %v23850_v32, %v23424_v29  ;;  %v19637_v31 = vadd.f32 %v23858_v38, %v23841_v0  ;;  %v19646_v25 = vadd.f32 %v19645_v4, %v19644_v46  ;;  %v24912_v0 = vld [vmem:[#allocation17_spill] sm:$0xff]  ;;  %v21236_v16 = vld [vmem:[#allocation8 + $0x3fc] ss:$28 sps:$4 sm:$0xff]  }
 0x531   : > { %v23896_v26 = vpack.c.bf16 %v6460_v60, %v6457_v58  ;;  %v23901_v1 = vpack.c.bf16 %v6466_v15, %v6463_v43  ;;  %v6450_v33 = vadd.f32 %v6432_v61, %v6420_v10  ;;  %v6413_v12 = vadd.f32 %v23782_v42, %v6124_v41  ;;  %v24913_v38 = vld [vmem:[#allocation21_spill] sm:$0xff]  ;;  %v24915_v60 = vld [vmem:[#allocation20_spill] sm:$0xff]  ;;  %v21249_v41 = vld [vmem:[#allocation8 + $0x158] ss:$28 sps:$4 sm:$0xff]  }
 0x532   : > { %v19640_v32 = vadd.f32 %v23884_v56, %v23870_v44  ;;  %v6110_v54 = vadd.f32 %v24911_v37, %v23786_v59  ;;  %v6114_v19 = vadd.f32 %v24913_v38, %v24912_v0  ;;  %v24914_v56 = vld [vmem:[#allocation19_spill] sm:$0xff] }
 0x533   : > { %7599 = vmatprep.mubr.bf16.mxu0 %v23896_v26  ;;  %v6462_v6 = vmax.f32 %v6450_v33, 0.0  ;;  %v21275_v37 = vld [vmem:[#allocation8 + $0x7c] ss:$28 sps:$4 sm:$0xff]  }
 0x534   : > { %7600 = vmatmul.mubr.bf16.vlgmr.msra.gmra.mxu0 %v23898_v50  ;;  %v6404_v58 = vadd.f32 %v6110_v54, %v24914_v56  ;;  %v6407_v27 = vadd.f32 %v24915_v60, %v6114_v19  ;;  %v21278_v54 = vld [vmem:[#allocation8 + $0xbc] ss:$28 sps:$4 sm:$0xff]   ;;  %v21281_v19 = vld [vmem:[#allocation8 + $0x44] ss:$28 sps:$4 sm:$0xff]   ;;  %v21294_v56 = vld [vmem:[#allocation8 + $0x10] ss:$28 sps:$4 sm:$0xff]  }
 0x535   : > { %7727 = vmatpush1.bf16.msra.mxu0 %v21204_v20  ;;  %7609 = vmatprep.mubr.bf16.mxu0 %v23901_v1  ;;  %v23907_v13 = vpack.c.bf16 %v6465_v57, %v6462_v6  ;;  %v21234_v20 = vld [vmem:[#allocation8 + $0x3f8] ss:$28 sps:$4 sm:$0xff]   ;;  %v21248_v6 = vld [vmem:[#allocation8 + $0x38c] ss:$28 sps:$4 sm:$0xff]  }
 0x536   : > { %7728 = vmatprep.subr.bf16.mxu0 %v21212_v36  ;;  %v21242_v36 = vld [vmem:[#allocation8 + $0x3c4] ss:$28 sps:$4 sm:$0xff]   ;;  %v21273_v0 = vld [vmem:[#allocation8 + $0x78] ss:$28 sps:$4 sm:$0xff]  }
 0x537   : > { %v21276_v38 = vld [vmem:[#allocation8 + $0xb8] ss:$28 sps:$4 sm:$0xff]  }
 0x538   : > { %v21302_v60 = vld [vmem:[#allocation8 + $0x35c] ss:$28 sps:$4 sm:$0xff]  }
 0x539   : > { %7729 = vmatpush1.bf16.msra.mxu0 %v21210_v62 }
 0x53a   : > { %v19999_v61 = vpop.f32.mrf.mxu1  ;;  %7730 = vmatprep.subr.bf16.mxu0 %v21218_v18  ;;  %v21240_v18 = vld [vmem:[#allocation8 + $0x3c0] ss:$28 sps:$4 sm:$0xff]  }
 0x53b   : > { %v6324_v9 = vadd.f32 %v19999_v61, %v19643_v45  ;;  %v21246_v61 = vld [vmem:[#allocation8 + $0x388] ss:$28 sps:$4 sm:$0xff]  }
 0x53c   : > { %v6315_v51 = vpop.f32.mrf.mxu1  ;;  %7610 = vmatmul.mubr.bf16.gmra.mxu0 %v23907_v13 }
 0x53d   : > { %v6422_v23 = vadd.f32 %v6410_v55, %v6324_v9  ;;  %7731 = vmatpush1.bf16.msra.mxu0 %v21216_v11  ;;  %7758 = vmatprep.mubr.bf16.mxu0 %v24896_v24  ;;  %v6316_v17 = vadd.f32 %v19637_v31, %v6315_v51  ;;  %v6374_v42 = vrot.slane %v6324_v9, 1  ;;  %v21243_v11 = vld [vmem:[#allocation8 + $0x190] ss:$28 sps:$4 sm:$0xff]   ;;  %v21254_v55 = vld [vmem:[#allocation8 + $0x19c] ss:$28 sps:$4 sm:$0xff]  }
 0x53e   : > { %v20000_v40 = vpop.f32.mrf.mxu1  ;;  %7732 = vmatprep.subr.bf16.mxu0 %v21224_v49  ;;  %v21251_v49 = vld [vmem:[#allocation8 + $0x15c] ss:$28 sps:$4 sm:$0xff]   ;;  %v21260_v51 = vld [vmem:[#allocation8 + $0x164] ss:$28 sps:$4 sm:$0xff]  }
 0x53f   : > { %v6327_v2 = vadd.f32 %v20000_v40, %v19646_v25  ;;  %v6452_v35 = vadd.f32 %v6440_v14, %v6422_v23  ;;  %v6368_v21 = vrot.slane %v6316_v17, 1  ;;  %v21252_v9 = vld [vmem:[#allocation8 + $0x198] ss:$28 sps:$4 sm:$0xff]   ;;  %v21255_v31 = vld [vmem:[#allocation8 + $0x120] ss:$28 sps:$4 sm:$0xff]  }
 0x540   : > { %v6318_v47 = vpop.f32.mrf.mxu1  ;;  %v21258_v25 = vld [vmem:[#allocation8 + $0x160] ss:$28 sps:$4 sm:$0xff]   ;;  %v21263_v23 = vld [vmem:[#allocation8 + $0xec] ss:$28 sps:$4 sm:$0xff]  }
 0x541   : > { %v6425_v39 = vadd.f32 %v6413_v12, %v6327_v2  ;;  %v6319_v5 = vadd.f32 %v19640_v32, %v6318_v47  ;;  %7733 = vmatpush1.bf16.msra.mxu0 %v21222_v63  ;;  %v6464_v59 = vmax.f32 %v6452_v35, 0.0  ;;  %v21266_v63 = vld [vmem:[#allocation8 + $0x12c] ss:$28 sps:$4 sm:$0xff]   ;;  %v21269_v12 = vld [vmem:[#allocation8 + $0xb4] ss:$28 sps:$4 sm:$0xff]  }
 0x542   : > { %7734 = vmatprep.subr.bf16.mxu0 %v21230_v3  ;;  %v21261_v40 = vld [vmem:[#allocation8 + $0xe8] ss:$28 sps:$4 sm:$0xff]   ;;  %v21272_v32 = vld [vmem:[#allocation8 + $0xf4] ss:$28 sps:$4 sm:$0xff]   ;;  %v21279_v35 = vld [vmem:[#allocation8 + $0x40] ss:$28 sps:$4 sm:$0xff]  }
 0x543   : > { %v6455_v53 = vadd.f32 %v6440_v14, %v6425_v39  ;;  %v6371_v44 = vrot.slane %v6319_v5, 1  ;;  %v21264_v3 = vld [vmem:[#allocation8 + $0x128] ss:$28 sps:$4 sm:$0xff]   ;;  %v21267_v17 = vld [vmem:[#allocation8 + $0xb0] ss:$28 sps:$4 sm:$0xff]  }
 0x544   : > { %v21270_v2 = vld [vmem:[#allocation8 + $0xf0] ss:$28 sps:$4 sm:$0xff]   ;;  %v21284_v47 = vld [vmem:[#allocation8 + $0x84] ss:$28 sps:$4 sm:$0xff]  }
 0x545   : > { %v6467_v10 = vmax.f32 %v6455_v53, 0.0  ;;  %v6383_v15 = vsel %vm2348_vm3, %v6371_v44, %v6374_v42  ;;  %v6386_v43 = vsel %vm2348_vm3, %v6368_v21, %v6371_v44  ;;  %7735 = vmatpush1.bf16.msra.mxu0 %v21228_v52  ;;  %v21282_v39 = vld [vmem:[#allocation8 + $0x80] ss:$28 sps:$4 sm:$0xff]   ;;  %v21290_v52 = vld [vmem:[#allocation8 + $0x4c] ss:$28 sps:$4 sm:$0xff]  }
 0x546   : > { %v6395_v48 = vsel %vm378_vm1, %v6319_v5, %v6383_v15  ;;  %v6416_v34 = vadd.f32 %v6404_v58, %v6386_v43  ;;  %7736 = vmatprep.subr.bf16.mxu0 %v21236_v16  ;;  %v21287_v5 = vld [vmem:[#allocation8 + $0xc] ss:$28 sps:$4 sm:$0xff]   ;;  %v21293_v21 = vld [vmem:[#allocation8 + $0x354] ss:$28 sps:$4 sm:$0xff]   ;;  %v21299_v58 = vld [vmem:[#allocation8 + $0x31c] ss:$28 sps:$4 sm:$0xff]  }
 0x547   : > { %v23933_v33 = vpack.c.bf16 %v6467_v10, %v6464_v59  ;;  %v6419_v62 = vadd.f32 %v6407_v27, %v6395_v48  ;;  %v21285_v16 = vld [vmem:[#allocation8 + $0x8] ss:$28 sps:$4 sm:$0xff]   ;;  %v21296_v53 = vld [vmem:[#allocation8 + $0x14] ss:$28 sps:$4 sm:$0xff]   ;;  %v21303_v43 = vld [vmem:[#allocation8 + $0x2e0] ss:$28 sps:$4 sm:$0xff]  }
 0x548   : > { %v6446_v46 = vadd.f32 %v6440_v14, %v6416_v34  ;;  %v21288_v42 = vld [vmem:[#allocation8 + $0x48] ss:$28 sps:$4 sm:$0xff]   ;;  %v21291_v44 = vld [vmem:[#allocation8 + $0x350] ss:$28 sps:$4 sm:$0xff]   ;;  %v21297_v27 = vld [vmem:[#allocation8 + $0x318] ss:$28 sps:$4 sm:$0xff]  }
 0x549   : > { %v6449_v57 = vadd.f32 %v6440_v14, %v6419_v62  ;;  %7737 = vmatpush1.bf16.msra.mxu0 %v21234_v20  ;;  %v21257_v14 = vld [vmem:[#allocation8 + $0x124] ss:$28 sps:$4 sm:$0xff]   ;;  %v21300_v59 = vld [vmem:[#allocation8 + $0x358] ss:$28 sps:$4 sm:$0xff]   ;;  %v21311_v48 = vld [vmem:[#allocation8 + $0x2ac] ss:$28 sps:$4 sm:$0xff]  }
 0x54a   : > { %7738 = vmatprep.subr.bf16.mxu0 %v21242_v36  ;;  %v6458_v30 = vmax.f32 %v6446_v46, 0.0  ;;  %v21305_v10 = vld [vmem:[#allocation8 + $0x2e4] ss:$28 sps:$4 sm:$0xff]   ;;  %v21314_v34 = vld [vmem:[#allocation8 + $0x2ec] ss:$28 sps:$4 sm:$0xff]  }
 0x54b   : > { %v6461_v45 = vmax.f32 %v6449_v57, 0.0  ;;  %v21308_v15 = vld [vmem:[#allocation8 + $0x324] ss:$28 sps:$4 sm:$0xff]   ;;  %v21317_v46 = vld [vmem:[#allocation8 + $0x274] ss:$28 sps:$4 sm:$0xff]  }
 0x54c   : > { %v21306_v20 = vld [vmem:[#allocation8 + $0x320] ss:$28 sps:$4 sm:$0xff]   ;;  %v21309_v36 = vld [vmem:[#allocation8 + $0x2a8] ss:$28 sps:$4 sm:$0xff]   ;;  %v21320_v57 = vld [vmem:[#allocation8 + $0x2b4] ss:$28 sps:$4 sm:$0xff]  }
 0x54d   : > { %7739 = vmatpush1.bf16.msra.mxu0 %v21240_v18  ;;  %v23935_v4 = vpack.c.bf16 %v6461_v45, %v6458_v30  ;;  %v21312_v62 = vld [vmem:[#allocation8 + $0x2e8] ss:$28 sps:$4 sm:$0xff]   ;;  %v21315_v18 = vld [vmem:[#allocation8 + $0x270] ss:$28 sps:$4 sm:$0xff]   ;;  %v21326_v45 = vld [vmem:[#allocation8 + $0x27c] ss:$28 sps:$4 sm:$0xff]  }
 0x54e   : > { %7740 = vmatprep.subr.bf16.mxu0 %v21248_v6  ;;  %v21318_v30 = vld [vmem:[#allocation8 + $0x2b0] ss:$28 sps:$4 sm:$0xff]   ;;  %v21323_v6 = vld [vmem:[#allocation8 + $0x23c] ss:$28 sps:$4 sm:$0xff]  }
 0x54f   : > { %7653 = vmatmul.mubr.bf16.vlgmr.msra.gmra.mxu1 %v23935_v4 }
 0x550   : > { %7674 = vmatpush1.bf16.msra.mxu1 %v21243_v11  ;;  %7662 = vmatprep.mubr.bf16.mxu1 %v24896_v24  ;;  %v21321_v11 = vld [vmem:[#allocation8 + $0x238] ss:$28 sps:$4 sm:$0xff]  }
 0x551   : > { %7741 = vmatpush1.bf16.msra.mxu0 %v21246_v61  ;;  %7675 = vmatprep.subr.bf16.mxu1 %v21251_v49  ;;  %v21324_v61 = vld [vmem:[#allocation8 + $0x278] ss:$28 sps:$4 sm:$0xff]   ;;  %v21329_v49 = vld [vmem:[#allocation8 + $0x204] ss:$28 sps:$4 sm:$0xff]  }
 0x552   : > { %7779 = vmatprep.subr.bf16.mxu0 %v21254_v55  ;;  %v21332_v55 = vld [vmem:[#allocation8 + $0x244] ss:$28 sps:$4 sm:$0xff]  }
 0x554   : > { %7676 = vmatpush1.bf16.msra.mxu1 %v21249_v41  ;;  %7759 = vmatmul.mubr.bf16.vlgmr.msra.gmra.mxu0 %v23935_v4  ;;  %v21327_v41 = vld [vmem:[#allocation8 + $0x200] ss:$28 sps:$4 sm:$0xff]  }
 0x555   : > { %7780 = vmatpush1.bf16.msra.mxu0 %v21252_v9  ;;  %7677 = vmatprep.subr.bf16.mxu1 %v21257_v14  ;;  %v21330_v9 = vld [vmem:[#allocation8 + $0x240] ss:$28 sps:$4 sm:$0xff]   ;;  %v21335_v14 = vld [vmem:[#allocation8 + $0x1cc] ss:$28 sps:$4 sm:$0xff]  }
 0x556   : > { %7781 = vmatprep.subr.bf16.mxu0 %v21260_v51  ;;  %7768 = vmatprep.mubr.bf16.mxu0 %v24896_v24  ;;  %v21338_v51 = vld [vmem:[#allocation8 + $0x20c] ss:$28 sps:$4 sm:$0xff]  }
 0x557   : > { %7663 = vmatmul.mubr.bf16.gmra.mxu1 %v23933_v33 }
 0x558   : > { %7678 = vmatpush1.bf16.msra.mxu1 %v21255_v31  ;;  %7705 = vmatprep.mubr.bf16.mxu1 %v23896_v26  ;;  %v21333_v31 = vld [vmem:[#allocation8 + $0x1c8] ss:$28 sps:$4 sm:$0xff]  }
 0x559   : > { %7782 = vmatpush1.bf16.msra.mxu0 %v21258_v25  ;;  %7679 = vmatprep.subr.bf16.mxu1 %v21263_v23  ;;  %v21336_v25 = vld [vmem:[#allocation8 + $0x208] ss:$28 sps:$4 sm:$0xff]   ;;  %v21341_v23 = vld [vmem:[#allocation8 + $0x51c] ss:$28 sps:$4 sm:$0xff]  }
 0x55a   : > { %7783 = vmatprep.subr.bf16.mxu0 %v21266_v63  ;;  %v21344_v63 = vld [vmem:[#allocation8 + $0x1d4] ss:$28 sps:$4 sm:$0xff]  }
 0x55c   : > { %7680 = vmatpush1.bf16.msra.mxu1 %v21261_v40  ;;  %7769 = vmatmul.mubr.bf16.gmra.mxu0 %v23933_v33  ;;  %v21339_v40 = vld [vmem:[#allocation8 + $0x518] ss:$28 sps:$4 sm:$0xff]  }
 0x55d   : > { %7784 = vmatpush1.bf16.msra.mxu0 %v21264_v3  ;;  %7811 = vmatprep.mubr.bf16.mxu0 %v23896_v26  ;;  %v21342_v3 = vld [vmem:[#allocation8 + $0x1d0] ss:$28 sps:$4 sm:$0xff]  }
 0x55e   : > { %7681 = vmatprep.subr.bf16.mxu1 %v21269_v12  ;;  %7785 = vmatprep.subr.bf16.mxu0 %v21272_v32  ;;  %v21347_v12 = vld [vmem:[#allocation8 + $0x4e4] ss:$28 sps:$4 sm:$0xff]  }
 0x55f   : > { %v21348_v32 = vld [vmem:[#allocation8 + $0x520] ss:$28 sps:$4 sm:$0xff]  }
 0x560   : > { %7682 = vmatpush1.bf16.msra.mxu1 %v21267_v17  ;;  %v21345_v17 = vld [vmem:[#allocation8 + $0x4e0] ss:$28 sps:$4 sm:$0xff]  }
 0x561   : > { %7786 = vmatpush1.bf16.msra.mxu0 %v21270_v2  ;;  %7683 = vmatprep.subr.bf16.mxu1 %v21275_v37  ;;  %v21351_v2 = vld [vmem:[#allocation8 + $0x4ac] ss:$28 sps:$4 sm:$0xff]  }
 0x562   : > { %7787 = vmatprep.subr.bf16.mxu0 %v21278_v54  ;;  %v21352_v37 = vld [vmem:[#allocation8 + $0x4e8] ss:$28 sps:$4 sm:$0xff]  }
 0x563   : > { %v21349_v54 = vld [vmem:[#allocation8 + $0x4a8] ss:$28 sps:$4 sm:$0xff]  }
 0x564   : > { %7684 = vmatpush1.bf16.msra.mxu1 %v21273_v0  ;;  %v21355_v0 = vld [vmem:[#allocation8 + $0x474] ss:$28 sps:$4 sm:$0xff]  }
 0x565   : > { %7788 = vmatpush1.bf16.msra.mxu0 %v21276_v38  ;;  %7685 = vmatprep.subr.bf16.mxu1 %v21281_v19  ;;  %v21356_v38 = vld [vmem:[#allocation8 + $0x4b0] ss:$28 sps:$4 sm:$0xff]  }
 0x566   : > { %7789 = vmatprep.subr.bf16.mxu0 %v21284_v47  ;;  %v21353_v19 = vld [vmem:[#allocation8 + $0x470] ss:$28 sps:$4 sm:$0xff]   ;;  %v21359_v47 = vld [vmem:[#allocation8 + $0x43c] ss:$28 sps:$4 sm:$0xff]  }
 0x568   : > { %7686 = vmatpush1.bf16.msra.mxu1 %v21279_v35  ;;  %v21360_v35 = vld [vmem:[#allocation8 + $0x478] ss:$28 sps:$4 sm:$0xff]  }
 0x569   : > { %7790 = vmatpush1.bf16.msra.mxu0 %v21282_v39  ;;  %7687 = vmatprep.subr.bf16.mxu1 %v21287_v5  ;;  %v21357_v39 = vld [vmem:[#allocation8 + $0x438] ss:$28 sps:$4 sm:$0xff]   ;;  %v21363_v5 = vld [vmem:[#allocation8 + $0x404] ss:$28 sps:$4 sm:$0xff]  }
 0x56a   : > { %7791 = vmatprep.subr.bf16.mxu0 %v21290_v52  ;;  %v21364_v52 = vld [vmem:[#allocation8 + $0x440] ss:$28 sps:$4 sm:$0xff]  }
 0x56c   : > { %7688 = vmatpush1.bf16.msra.mxu1 %v21285_v16  ;;  %v21361_v16 = vld [vmem:[#allocation8 + $0x400] ss:$28 sps:$4 sm:$0xff]  }
 0x56d   : > { %7792 = vmatpush1.bf16.msra.mxu0 %v21288_v42  ;;  %7689 = vmatprep.subr.bf16.mxu1 %v21293_v21  ;;  %v21367_v42 = vld [vmem:[#allocation8 + $0x3cc] ss:$28 sps:$4 sm:$0xff]  }
 0x56e   : > { %7793 = vmatprep.subr.bf16.mxu0 %v21296_v53  ;;  %v21368_v21 = vld [vmem:[#allocation8 + $0x408] ss:$28 sps:$4 sm:$0xff]  }
 0x56f   : > { %v21365_v53 = vld [vmem:[#allocation8 + $0x3c8] ss:$28 sps:$4 sm:$0xff]  }
 0x570   : > { %7690 = vmatpush2.bf16.msra.mxu1 %v21291_v44  ;;  %v21371_v44 = vld [vmem:[#allocation8 + $0x394] ss:$28 sps:$4 sm:$0xff]  }
 0x571   : > { %7794 = vmatpush1.bf16.msra.mxu0 %v21294_v56  ;;  %7691 = vmatprep.subr.bf16.mxu1 %v21299_v58  ;;  %v21372_v56 = vld [vmem:[#allocation8 + $0x3d0] ss:$28 sps:$4 sm:$0xff]  }
 0x572   : > { %7795 = vmatprep.subr.bf16.mxu0 %v21302_v60  ;;  %v21369_v58 = vld [vmem:[#allocation8 + $0x390] ss:$28 sps:$4 sm:$0xff]   ;;  %v21373_v60 = vld [vmem:[#allocation8 + $0x360] ss:$28 sps:$4 sm:$0xff]  }
 0x574   : > { %7692 = vmatpush2.bf16.msra.mxu1 %v21297_v27  ;;  %v21375_v27 = vld [vmem:[#allocation8 + $0x398] ss:$28 sps:$4 sm:$0xff]  }
 0x575   : > { %7796 = vmatpush2.bf16.msra.mxu0 %v21300_v59  ;;  %7693 = vmatprep.subr.bf16.mxu1 %v21305_v10  ;;  %v21374_v59 = vld [vmem:[#allocation8 + $0x1a0] ss:$28 sps:$4 sm:$0xff]   ;;  %v21376_v10 = vld [vmem:[#allocation8 + $0x328] ss:$28 sps:$4 sm:$0xff]  }
 0x576   : > { %7797 = vmatprep.subr.bf16.mxu0 %v21308_v15  ;;  %v21440_v15 = vld [vmem:[#allocation11 + $0x22c] ss:$12 sps:$4 sm:$0xff]  }
 0x578   : > { %7694 = vmatpush2.bf16.msra.mxu1 %v21303_v43  ;;  %v21377_v43 = vld [vmem:[#allocation8 + $0x168] ss:$28 sps:$4 sm:$0xff]  }
 0x579   : > { %7798 = vmatpush2.bf16.msra.mxu0 %v21306_v20  ;;  %7695 = vmatprep.subr.bf16.mxu1 %v21311_v48  ;;  %v21378_v20 = vld [vmem:[#allocation8 + $0x2f0] ss:$28 sps:$4 sm:$0xff]  }
 0x57a   : > { %7799 = vmatprep.subr.bf16.mxu0 %v21314_v34  ;;  %v21438_v48 = vld [vmem:[#allocation11 + $0x228] ss:$12 sps:$4 sm:$0xff]  }
 0x57b   : > { %v21443_v34 = vld [vmem:[#allocation11 + $0x214] ss:$12 sps:$4 sm:$0xff]  }
 0x57c   : > { %7696 = vmatpush2.bf16.msra.mxu1 %v21309_v36  ;;  %v21379_v36 = vld [vmem:[#allocation8 + $0x130] ss:$28 sps:$4 sm:$0xff]  }
 0x57d   : > { %7800 = vmatpush2.bf16.msra.mxu0 %v21312_v62  ;;  %7697 = vmatprep.subr.bf16.mxu1 %v21317_v46  ;;  %v21380_v62 = vld [vmem:[#allocation8 + $0x2b8] ss:$28 sps:$4 sm:$0xff]  }
 0x57e   : > { %7801 = vmatprep.subr.bf16.mxu0 %v21320_v57  ;;  %v21441_v46 = vld [vmem:[#allocation11 + $0x210] ss:$12 sps:$4 sm:$0xff]  }
 0x57f   : > { %v21381_v57 = vld [vmem:[#allocation8 + $0xf8] ss:$28 sps:$4 sm:$0xff]  }
 0x580   : > { %7698 = vmatpush2.bf16.msra.mxu1 %v21315_v18  ;;  %v21382_v18 = vld [vmem:[#allocation8 + $0x280] ss:$28 sps:$4 sm:$0xff]  }
 0x581   : > { %7802 = vmatpush2.bf16.msra.mxu0 %v21318_v30  ;;  %7699 = vmatprep.subr.bf16.mxu1 %v21323_v6  ;;  %v21444_v30 = vld [vmem:[#allocation11 + $0x1f8] ss:$12 sps:$4 sm:$0xff]  }
 0x582   : > { %7803 = vmatprep.subr.bf16.mxu0 %v21326_v45  ;;  %v21449_v6 = vld [vmem:[#allocation11 + $0x1e4] ss:$12 sps:$4 sm:$0xff]   ;;  %v21383_v45 = vld [vmem:[#allocation8 + $0xc0] ss:$28 sps:$4 sm:$0xff]  }
 0x584   : > { %7700 = vmatpush2.bf16.msra.mxu1 %v21321_v11  ;;  %v21384_v11 = vld [vmem:[#allocation8 + $0x248] ss:$28 sps:$4 sm:$0xff]  }
 0x585   : > { %7804 = vmatpush2.bf16.msra.mxu0 %v21324_v61  ;;  %7701 = vmatprep.subr.bf16.mxu1 %v21329_v49  ;;  %v21447_v61 = vld [vmem:[#allocation11 + $0x1e0] ss:$12 sps:$4 sm:$0xff]  }
 0x586   : > { %7805 = vmatprep.subr.bf16.mxu0 %v21332_v55  ;;  %v21452_v49 = vld [vmem:[#allocation11 + $0x1cc] ss:$12 sps:$4 sm:$0xff]   ;;  %v21386_v55 = vld [vmem:[#allocation8 + $0x210] ss:$28 sps:$4 sm:$0xff]  }
 0x588   : > { %7702 = vmatpush2.bf16.msra.mxu1 %v21327_v41  ;;  %v21455_v41 = vld [vmem:[#allocation11 + $0x1b4] ss:$12 sps:$4 sm:$0xff]  }
 0x589   : > { %7806 = vmatpush2.bf16.msra.mxu0 %v21330_v9  ;;  %7703 = vmatprep.subr.bf16.mxu1 %v21335_v14  ;;  %v21387_v9 = vld [vmem:[#allocation8 + $0x50] ss:$28 sps:$4 sm:$0xff]   ;;  %v21388_v14 = vld [vmem:[#allocation8 + $0x1d8] ss:$28 sps:$4 sm:$0xff]  }
 0x58a   : > { %7807 = vmatprep.subr.bf16.mxu0 %v21338_v51  ;;  %v21453_v51 = vld [vmem:[#allocation11 + $0x1b0] ss:$12 sps:$4 sm:$0xff]  }
 0x58c   : > { %7704 = vmatpush2.bf16.msra.mxu1 %v21333_v31  ;;  %v21458_v31 = vld [vmem:[#allocation11 + $0x19c] ss:$12 sps:$4 sm:$0xff]  }
 0x58d   : > { %7808 = vmatpush2.bf16.msra.mxu0 %v21336_v25  ;;  %7832 = vmatprep.subr.bf16.mxu1 %v21341_v23  ;;  %v21389_v25 = vld [vmem:[#allocation8 + $0x18] ss:$28 sps:$4 sm:$0xff]  }
 0x58e   : > { %7809 = vmatprep.subr.bf16.mxu0 %v21344_v63  ;;  %v21392_v23 = vld [vmem:[#allocation11 + $0xac] ss:$12 sps:$4 sm:$0xff]  }
 0x58f   : > { %7706 = vmatmul.mubr.bf16.vlgmr.msra.gmra.mxu1 %v23898_v50  ;;  %v21456_v63 = vld [vmem:[#allocation11 + $0x198] ss:$12 sps:$4 sm:$0xff]  }
 0x590   : > { %7715 = vmatprep.mubr.bf16.mxu1 %v23901_v1  ;;  %7833 = vmatpush1.bf16.msra.mxu1 %v21339_v40  ;;  %v21461_v40 = vld [vmem:[#allocation11 + $0x184] ss:$12 sps:$4 sm:$0xff]  }
 0x591   : > { %7810 = vmatpush2.bf16.msra.mxu0 %v21342_v3  ;;  %7834 = vmatprep.subr.bf16.mxu1 %v21347_v12  ;;  %v21390_v3 = vld [vmem:[#allocation11 + $0xa8] ss:$12 sps:$4 sm:$0xff]  }
 0x592   : > { %20001 = vmatprep.subr.bf16.mxu0 %v21348_v32  ;;  %v21395_v12 = vld [vmem:[#allocation11 + $0x94] ss:$12 sps:$4 sm:$0xff]  }
 0x594   : > { %7812 = vmatmul.mubr.bf16.vlgmr.msra.gmra.mxu0 %v23898_v50  ;;  %7835 = vmatpush1.bf16.msra.mxu1 %v21345_v17  ;;  %v21467_v17 = vld [vmem:[#allocation11 + $0x2ec] ss:$12 sps:$4 sm:$0xff]  }
 0x595   : > { %7821 = vmatprep.mubr.bf16.mxu0 %v23901_v1  ;;  %20002 = vmatpush3.bf16.msra.mxu0 %v21348_v32  ;;  %v21459_v32 = vld [vmem:[#allocation11 + $0x180] ss:$12 sps:$4 sm:$0xff]  }
 0x596   : > { %7836 = vmatprep.subr.bf16.mxu1 %v21351_v2  ;;  %20003 = vmatprep.subr.bf16.mxu0 %v21352_v37  ;;  %v21393_v2 = vld [vmem:[#allocation11 + $0x90] ss:$12 sps:$4 sm:$0xff]  }
 0x597   : > { %7716 = vmatmul.mubr.bf16.gmra.mxu1 %v23907_v13 }
 0x598   : > { %7837 = vmatpush1.bf16.msra.mxu1 %v21349_v54  ;;  %7864 = vmatprep.mubr.bf16.mxu1 %v24896_v24  ;;  %v21465_v54 = vld [vmem:[#allocation11 + $0x2e8] ss:$12 sps:$4 sm:$0xff]  }
 0x599   : > { %20004 = vmatpush3.bf16.msra.mxu0 %v21352_v37  ;;  %7838 = vmatprep.subr.bf16.mxu1 %v21355_v0  ;;  %v21398_v37 = vld [vmem:[#allocation11 + $0x7c] ss:$12 sps:$4 sm:$0xff]   ;;  %v21473_v0 = vld [vmem:[#allocation11 + $0x2d4] ss:$12 sps:$4 sm:$0xff]  }
 0x59a   : > { %20005 = vmatprep.subr.bf16.mxu0 %v21356_v38 }
 0x59c   : > { %7822 = vmatmul.mubr.bf16.gmra.mxu0 %v23907_v13  ;;  %7839 = vmatpush1.bf16.msra.mxu1 %v21353_v19  ;;  %v21401_v19 = vld [vmem:[#allocation11 + $0x64] ss:$12 sps:$4 sm:$0xff]  }
 0x59d   : > { %20006 = vmatpush3.bf16.msra.mxu0 %v21356_v38  ;;  %20017 = vmatprep.mubr.bf16.mxu0 %v23935_v4  ;;  %v21396_v38 = vld [vmem:[#allocation11 + $0x78] ss:$12 sps:$4 sm:$0xff]  }
 0x59e   : > { %7840 = vmatprep.subr.bf16.mxu1 %v21359_v47  ;;  %20007 = vmatprep.subr.bf16.mxu0 %v21360_v35  ;;  %v21471_v47 = vld [vmem:[#allocation11 + $0x2d0] ss:$12 sps:$4 sm:$0xff]  }
 0x5a0   : > { %7841 = vmatpush1.bf16.msra.mxu1 %v21357_v39  ;;  %v21477_v39 = vld [vmem:[#allocation11 + $0x2b8] ss:$12 sps:$4 sm:$0xff]  }
 0x5a1   : > { %20008 = vmatpush3.bf16.msra.mxu0 %v21360_v35  ;;  %7842 = vmatprep.subr.bf16.mxu1 %v21363_v5  ;;  %v21479_v35 = vld [vmem:[#allocation11 + $0x2bc] ss:$12 sps:$4 sm:$0xff]   ;;  %v21485_v5 = vld [vmem:[#allocation11 + $0x2a4] ss:$12 sps:$4 sm:$0xff]  }
 0x5a2   : > { %20009 = vmatprep.subr.bf16.mxu0 %v21364_v52 }
 0x5a4   : > { %7843 = vmatpush1.bf16.msra.mxu1 %v21361_v16  ;;  %v21407_v16 = vld [vmem:[#allocation11 + $0x34] ss:$12 sps:$4 sm:$0xff]  }
 0x5a5   : > { %20010 = vmatpush3.bf16.msra.mxu0 %v21364_v52  ;;  %7844 = vmatprep.subr.bf16.mxu1 %v21367_v42  ;;  %v21402_v52 = vld [vmem:[#allocation11 + $0x48] ss:$12 sps:$4 sm:$0xff]   ;;  %v21483_v42 = vld [vmem:[#allocation11 + $0x2a0] ss:$12 sps:$4 sm:$0xff]  }
 0x5a6   : > { %20011 = vmatprep.subr.bf16.mxu0 %v21368_v21 }
 0x5a8   : > { %7845 = vmatpush1.bf16.msra.mxu1 %v21365_v53  ;;  %v21405_v53 = vld [vmem:[#allocation11 + $0x30] ss:$12 sps:$4 sm:$0xff]  }
 0x5a9   : > { %20012 = vmatpush3.bf16.msra.mxu0 %v21368_v21  ;;  %7846 = vmatprep.subr.bf16.mxu1 %v21371_v44  ;;  %v21491_v21 = vld [vmem:[#allocation11 + $0x28c] ss:$12 sps:$4 sm:$0xff]   ;;  %v21489_v44 = vld [vmem:[#allocation11 + $0x288] ss:$12 sps:$4 sm:$0xff]  }
 0x5aa   : > { %20013 = vmatprep.subr.bf16.mxu0 %v21372_v56 }
 0x5ac   : > { %7847 = vmatpush1.bf16.msra.mxu1 %v21369_v58  ;;  %v21408_v58 = vld [vmem:[#allocation11 + $0x18] ss:$12 sps:$4 sm:$0xff]  }
 0x5ad   : > { %20014 = vmatpush3.bf16.msra.mxu0 %v21372_v56  ;;  %19657 = vmatprep.subr.bf16.mxu1 %v21373_v60  ;;  %v21497_v56 = vld [vmem:[#allocation11 + $0x274] ss:$12 sps:$4 sm:$0xff]   ;;  %v21413_v60 = vld [vmem:[#allocation11 + $0x4] ss:$12 sps:$4 sm:$0xff]  }
 0x5ae   : > { %20015 = vmatprep.subr.bf16.mxu0 %v21375_v27 }
 0x5af   : > { %7865 = vmatmul.mubr.bf16.vlgmr.msra.gmra.mxu1 %v23935_v4  ;;  %v21446_v4 = vld [vmem:[#allocation11 + $0x1fc] ss:$12 sps:$4 sm:$0xff]  }
 0x5b0   : > { %19658 = vmatpush3.bf16.msra.mxu1 %v21374_v59  ;;  %7874 = vmatprep.mubr.bf16.mxu1 %v24896_v24  ;;  %v21503_v59 = vld [vmem:[#allocation11 + $0x25c] ss:$12 sps:$4 sm:$0xff]  }
 0x5b1   : > { %20016 = vmatpush3.bf16.msra.mxu0 %v21375_v27  ;;  %19659 = vmatprep.subr.bf16.mxu1 %v21376_v10  ;;  %v21495_v27 = vld [vmem:[#allocation11 + $0x270] ss:$12 sps:$4 sm:$0xff]   ;;  %v21411_v10 = vld [vmem:[#allocation11] ss:$12 sps:$4 sm:$0xff]  }
 0x5b2   : > { %9198 = vmatprep.subr.bf16.mxu0 %v21440_v15  ;;  %v21416_v15 = vld [vmem:[#allocation11 + $0x16c] ss:$12 sps:$4 sm:$0xff]  }
 0x5b4   : > { %19660 = vmatpush3.bf16.msra.mxu1 %v21377_v43  ;;  %20018 = vmatmul.mubr.bf16.vlgmr.msra.gmra.mxu0 %v23933_v33  ;;  %v21501_v43 = vld [vmem:[#allocation11 + $0x258] ss:$12 sps:$4 sm:$0xff]  }
 0x5b5   : > { %19661 = vmatprep.subr.bf16.mxu1 %v21378_v20  ;;  %9199 = vmatpush1.bf16.msra.mxu0 %v21438_v48  ;;  %v21509_v20 = vld [vmem:[#allocation11 + $0x244] ss:$12 sps:$4 sm:$0xff]   ;;  %v21414_v48 = vld [vmem:[#allocation11 + $0x168] ss:$12 sps:$4 sm:$0xff]  }
 0x5b6   : > { %9200 = vmatprep.subr.bf16.mxu0 %v21443_v34  ;;  %v21419_v34 = vld [vmem:[#allocation11 + $0x154] ss:$12 sps:$4 sm:$0xff]  }
 0x5b7   : > { %7875 = vmatmul.mubr.bf16.gmra.mxu1 %v23933_v33  ;;  %v21385_v33 = vld [vmem:[#allocation8 + $0x88] ss:$28 sps:$4 sm:$0xff]  }
 0x5b8   : > { %19662 = vmatpush3.bf16.msra.mxu1 %v21379_v36  ;;  %7917 = vmatprep.mubr.bf16.mxu1 %v23896_v26  ;;  %v21450_v26 = vld [vmem:[#allocation11 + $0x1c8] ss:$12 sps:$4 sm:$0xff]   ;;  %v21507_v36 = vld [vmem:[#allocation11 + $0x240] ss:$12 sps:$4 sm:$0xff]  }
 0x5b9   : > { %19663 = vmatprep.subr.bf16.mxu1 %v21380_v62  ;;  %9201 = vmatpush1.bf16.msra.mxu0 %v21441_v46  ;;  %v21417_v62 = vld [vmem:[#allocation11 + $0x150] ss:$12 sps:$4 sm:$0xff]  }
 0x5ba   : > { %9202 = vmatprep.subr.bf16.mxu0 %v21446_v4  ;;  %v21422_v46 = vld [vmem:[#allocation11 + $0x13c] ss:$12 sps:$4 sm:$0xff]   ;;  %v21420_v4 = vld [vmem:[#allocation11 + $0x138] ss:$12 sps:$4 sm:$0xff]  }
 0x5bc   : > { %19664 = vmatpush3.bf16.msra.mxu1 %v21381_v57  ;;  %v21425_v57 = vld [vmem:[#allocation11 + $0x124] ss:$12 sps:$4 sm:$0xff]  }
 0x5bd   : > { %19665 = vmatprep.subr.bf16.mxu1 %v21382_v18  ;;  %9203 = vmatpush1.bf16.msra.mxu0 %v21444_v30  ;;  %v21423_v18 = vld [vmem:[#allocation11 + $0x120] ss:$12 sps:$4 sm:$0xff]  }
 0x5be   : > { %9204 = vmatprep.subr.bf16.mxu0 %v21449_v6  ;;  %v21428_v30 = vld [vmem:[#allocation11 + $0x10c] ss:$12 sps:$4 sm:$0xff]   ;;  %v21426_v6 = vld [vmem:[#allocation11 + $0x108] ss:$12 sps:$4 sm:$0xff]  }
 0x5c0   : > { %19666 = vmatpush3.bf16.msra.mxu1 %v21383_v45 }
 0x5c1   : > { %19667 = vmatprep.subr.bf16.mxu1 %v21384_v11  ;;  %9205 = vmatpush1.bf16.msra.mxu0 %v21447_v61  ;;  %v21431_v11 = vld [vmem:[#allocation11 + $0xf4] ss:$12 sps:$4 sm:$0xff]   ;;  %v21538_v61 = vld [vmem:[#allocation11 + $0x52c] ss:$12 sps:$4 sm:$0xff]  }
 0x5c2   : > { %9206 = vmatprep.subr.bf16.mxu0 %v21452_v49  ;;  %v21429_v49 = vld [vmem:[#allocation11 + $0xf0] ss:$12 sps:$4 sm:$0xff]  }
 0x5c4   : > { %19668 = vmatpush3.bf16.msra.mxu1 %v21385_v33 }
 0x5c5   : > { %19669 = vmatprep.subr.bf16.mxu1 %v21386_v55  ;;  %9207 = vmatpush1.bf16.msra.mxu0 %v21450_v26  ;;  %v21434_v55 = vld [vmem:[#allocation11 + $0xdc] ss:$12 sps:$4 sm:$0xff]   ;;  %v21432_v26 = vld [vmem:[#allocation11 + $0xd8] ss:$12 sps:$4 sm:$0xff]  }
 0x5c6   : > { %9208 = vmatprep.subr.bf16.mxu0 %v21455_v41 }
 0x5c8   : > { %19670 = vmatpush3.bf16.msra.mxu1 %v21387_v9  ;;  %v21437_v9 = vld [vmem:[#allocation11 + $0xc4] ss:$12 sps:$4 sm:$0xff]  }
 0x5c9   : > { %19671 = vmatprep.subr.bf16.mxu1 %v21388_v14  ;;  %9209 = vmatpush1.bf16.msra.mxu0 %v21453_v51  ;;  %v21435_v14 = vld [vmem:[#allocation11 + $0xc0] ss:$12 sps:$4 sm:$0xff]  }
 0x5ca   : > { %9210 = vmatprep.subr.bf16.mxu0 %v21458_v31  ;;  %v21464_v31 = vld [vmem:[#allocation11 + $0x3ac] ss:$12 sps:$4 sm:$0xff]  }
 0x5cc   : > { %19672 = vmatpush3.bf16.msra.mxu1 %v21389_v25  ;;  %v23961_v25 = vld [vmem:[#allocation9] sm:$0xff] }
 0x5cd   : > { %9145 = vmatprep.subr.bf16.mxu1 %v21392_v23  ;;  %9211 = vmatpush1.bf16.msra.mxu0 %v21456_v63  ;;  %v6675_v63 = vrot.slane %v23961_v25, %v23350_v22 }
 0x5ce   : > { %9212 = vmatprep.subr.bf16.mxu0 %v21461_v40  ;;  %v6671_v40 = vrot.slane %v23961_v25, %v23339_v28 }
 0x5cf   : > { %7918 = vmatmul.mubr.bf16.vlgmr.msra.gmra.mxu1 %v23898_v50  ;;  %v21399_v50 = vld [vmem:[#allocation11 + $0x60] ss:$12 sps:$4 sm:$0xff]  }
 0x5d0   : > { %7925 = vmatprep.mubr.bf16.mxu1 %v23901_v1  ;;  %9146 = vmatpush1.bf16.msra.mxu1 %v21390_v3  ;;  %v21404_v1 = vld [vmem:[#allocation11 + $0x4c] ss:$12 sps:$4 sm:$0xff]  }
 0x5d1   : > { %9147 = vmatprep.subr.bf16.mxu1 %v21395_v12  ;;  %9213 = vmatpush1.bf16.msra.mxu0 %v21459_v32 }
 0x5d2   : > { %9214 = vmatprep.subr.bf16.mxu0 %v21467_v17 }
 0x5d4   : > { %9148 = vmatpush1.bf16.msra.mxu1 %v21393_v2 }
 0x5d5   : > { %9149 = vmatprep.subr.bf16.mxu1 %v21398_v37  ;;  %9215 = vmatpush2.bf16.msra.mxu0 %v21465_v54 }
 0x5d6   : > { %9216 = vmatprep.subr.bf16.mxu0 %v21473_v0 }
 0x5d7   : > { %7926 = vmatmul.mubr.bf16.gmra.mxu1 %v23907_v13  ;;  %v21410_v13 = vld [vmem:[#allocation11 + $0x1c] ss:$12 sps:$4 sm:$0xff]  }
 0x5d8   : > { %9150 = vmatpush1.bf16.msra.mxu1 %v21396_v38 }
 0x5d9   : > { %9151 = vmatprep.subr.bf16.mxu1 %v21401_v19  ;;  %9217 = vmatpush2.bf16.msra.mxu0 %v21471_v47 }
 0x5da   : > { %9218 = vmatprep.subr.bf16.mxu0 %v21479_v35 }
 0x5dc   : > { %9152 = vmatpush1.bf16.msra.mxu1 %v21399_v50 }
 0x5dd   : > { %9153 = vmatprep.subr.bf16.mxu1 %v21404_v1  ;;  %9219 = vmatpush2.bf16.msra.mxu0 %v21477_v39 }
 0x5de   : > { %9220 = vmatprep.subr.bf16.mxu0 %v21485_v5 }
 0x5e0   : > { %9154 = vmatpush1.bf16.msra.mxu1 %v21402_v52 }
 0x5e1   : > { %9155 = vmatprep.subr.bf16.mxu1 %v21407_v16  ;;  %9221 = vmatpush2.bf16.msra.mxu0 %v21483_v42 }
 0x5e2   : > { %9222 = vmatprep.subr.bf16.mxu0 %v21491_v21 }
 0x5e4   : > { %9156 = vmatpush1.bf16.msra.mxu1 %v21405_v53 }
 0x5e5   : > { %9157 = vmatprep.subr.bf16.mxu1 %v21410_v13  ;;  %9223 = vmatpush2.bf16.msra.mxu0 %v21489_v44 }
 0x5e6   : > { %9224 = vmatprep.subr.bf16.mxu0 %v21497_v56 }
 0x5e8   : > { %9158 = vmatpush1.bf16.msra.mxu1 %v21408_v58  ;;  %v21462_v58 = vld [vmem:[#allocation11 + $0x3a8] ss:$12 sps:$4 sm:$0xff]  }
 0x5e9   : > { %9159 = vmatprep.subr.bf16.mxu1 %v21413_v60  ;;  %9225 = vmatpush2.bf16.msra.mxu0 %v21495_v27 }
 0x5ea   : > { %9226 = vmatprep.subr.bf16.mxu0 %v21503_v59 }
 0x5ec   : > { %9160 = vmatpush1.bf16.msra.mxu1 %v21411_v10  ;;  %v21470_v10 = vld [vmem:[#allocation11 + $0x394] ss:$12 sps:$4 sm:$0xff]  }
 0x5ed   : > { %9161 = vmatprep.subr.bf16.mxu1 %v21416_v15  ;;  %9227 = vmatpush2.bf16.msra.mxu0 %v21501_v43 }
 0x5ee   : > { %9228 = vmatprep.subr.bf16.mxu0 %v21509_v20 }
 0x5f0   : > { %9162 = vmatpush2.bf16.msra.mxu1 %v21414_v48 }
 0x5f1   : > { %9163 = vmatprep.subr.bf16.mxu1 %v21419_v34  ;;  %9229 = vmatpush2.bf16.msra.mxu0 %v21507_v36 }
 0x5f2   : > { %9304 = vmatprep.subr.bf16.mxu0 %v21538_v61  ;;  %v21482_v61 = vld [vmem:[#allocation11 + $0x364] ss:$12 sps:$4 sm:$0xff]  }
 0x5f4   : > { %9164 = vmatpush2.bf16.msra.mxu1 %v21417_v62  ;;  %v7601_v45 = vpop.f32.mrf.mxu0  ;;  %v21468_v62 = vld [vmem:[#allocation11 + $0x390] ss:$12 sps:$4 sm:$0xff]  }
 0x5f5   : > { %9165 = vmatprep.subr.bf16.mxu1 %v21422_v46  ;;  %v7602_v37 = vadd.f32 %v7601_v45, %v6671_v40  ;;  %v21474_v45 = vld [vmem:[#allocation11 + $0x378] ss:$12 sps:$4 sm:$0xff]  }
 0x5f6   : > { %v7603_v33 = vpop.f32.mrf.mxu0 }
 0x5f7   : > { %v7604_v17 = vadd.f32 %v7603_v33, %v6675_v63  ;;  %v21488_v33 = vld [vmem:[#allocation11 + $0x34c] ss:$12 sps:$4 sm:$0xff]  }
 0x5f8   : > { %9166 = vmatpush2.bf16.msra.mxu1 %v21420_v4  ;;  %v7605_v41 = vpop.f32.mrf.mxu0  ;;  %v21476_v4 = vld [vmem:[#allocation11 + $0x37c] ss:$12 sps:$4 sm:$0xff]  }
 0x5f9   : > { %9167 = vmatprep.subr.bf16.mxu1 %v21425_v57  ;;  %v7606_v2 = vadd.f32 %v7605_v41, %v6671_v40  ;;  %v21492_v41 = vld [vmem:[#allocation11 + $0x330] ss:$12 sps:$4 sm:$0xff]  }
 0x5fa   : > { %v7607_v51 = vpop.f32.mrf.mxu0 }
 0x5fb   : > { %v7608_v0 = vadd.f32 %v7607_v51, %v6675_v63  ;;  %v21506_v51 = vld [vmem:[#allocation11 + $0x304] ss:$12 sps:$4 sm:$0xff]  }
 0x5fc   : > { %9168 = vmatpush2.bf16.msra.mxu1 %v21423_v18  ;;  %v7611_v23 = vpop.f32.mrf.mxu0 }
 0x5fd   : > { %9169 = vmatprep.subr.bf16.mxu1 %v21428_v30  ;;  %v7612_v60 = vadd.f32 %v7611_v23, %v6671_v40  ;;  %v21512_v23 = vld [vmem:[#allocation11 + $0x46c] ss:$12 sps:$4 sm:$0xff]  }
 0x5fe   : > { %v7613_v12 = vpop.f32.mrf.mxu0 }
 0x5ff   : > { %v7614_v13 = vadd.f32 %v7613_v12, %v6675_v63 }
 0x600   : > { %9170 = vmatpush2.bf16.msra.mxu1 %v21426_v6  ;;  %v7615_v47 = vpop.f32.mrf.mxu0 }
 0x601   : > { %9171 = vmatprep.subr.bf16.mxu1 %v21431_v11  ;;  %v7616_v44 = vadd.f32 %v7615_v47, %v6671_v40  ;;  %v21515_v40 = vld [vmem:[#allocation11 + $0x454] ss:$12 sps:$4 sm:$0xff]  }
 0x602   : > { %v7617_v42 = vpop.f32.mrf.mxu0  ;;  %v21522_v47 = vld [vmem:[#allocation11 + $0x408] ss:$12 sps:$4 sm:$0xff]  }
 0x603   : > { %v7618_v15 = vadd.f32 %v7617_v42, %v6675_v63  ;;  %v21510_v63 = vld [vmem:[#allocation11 + $0x468] ss:$12 sps:$4 sm:$0xff]  }
 0x604   : > { %9172 = vmatpush2.bf16.msra.mxu1 %v21429_v49  ;;  %v21480_v49 = vld [vmem:[#allocation11 + $0x360] ss:$12 sps:$4 sm:$0xff]   ;;  %v21530_v42 = vld [vmem:[#allocation11 + $0x3dc] ss:$12 sps:$4 sm:$0xff]  }
 0x605   : > { %9173 = vmatprep.subr.bf16.mxu1 %v21434_v55  ;;  %v21486_v55 = vld [vmem:[#allocation11 + $0x348] ss:$12 sps:$4 sm:$0xff]  }
 0x608   : > { %9174 = vmatpush2.bf16.msra.mxu1 %v21432_v26  ;;  %v21494_v26 = vld [vmem:[#allocation11 + $0x334] ss:$12 sps:$4 sm:$0xff]  }
 0x609   : > { %9175 = vmatprep.subr.bf16.mxu1 %v21437_v9  ;;  %v21500_v9 = vld [vmem:[#allocation11 + $0x31c] ss:$12 sps:$4 sm:$0xff]  }
 0x60c   : > { %9176 = vmatpush2.bf16.msra.mxu1 %v21435_v14  ;;  %v21498_v14 = vld [vmem:[#allocation11 + $0x318] ss:$12 sps:$4 sm:$0xff]  }
 0x60d   : > { %9251 = vmatprep.subr.bf16.mxu1 %v21464_v31  ;;  %v21504_v31 = vld [vmem:[#allocation11 + $0x300] ss:$12 sps:$4 sm:$0xff]  }
 0x60f   : > { %v7654_v3 = vpop.f32.mrf.mxu1 }
 0x610   : > { %v7655_v35 = vadd.f32 %v7654_v3, %v7602_v37  ;;  %v21513_v3 = vld [vmem:[#allocation11 + $0x450] ss:$12 sps:$4 sm:$0xff]  }
 0x611   : > { %v7656_v32 = vpop.f32.mrf.mxu1  ;;  %v21521_v37 = vld [vmem:[#allocation11 + $0x424] ss:$12 sps:$4 sm:$0xff]  }
 0x612   : > { %v7657_v38 = vadd.f32 %v7656_v32, %v7604_v17  ;;  %v7983_v21 = vmax.f32 %v7655_v35, 0.0  ;;  %v21518_v32 = vld [vmem:[#allocation11 + $0x43c] ss:$12 sps:$4 sm:$0xff]   ;;  %v21516_v17 = vld [vmem:[#allocation11 + $0x438] ss:$12 sps:$4 sm:$0xff]  }
 0x613   : > { %v7658_v54 = vpop.f32.mrf.mxu1 }
 0x614   : > { %v7659_v19 = vadd.f32 %v7658_v54, %v7606_v2  ;;  %v7984_v52 = vmax.f32 %v7657_v38, 0.0  ;;  %v7760_v12 = vpop.f32.mrf.mxu0  ;;  %v21519_v54 = vld [vmem:[#allocation11 + $0x420] ss:$12 sps:$4 sm:$0xff]  }
 0x615   : > { %v7660_v50 = vpop.f32.mrf.mxu1  ;;  %v21524_v38 = vld [vmem:[#allocation11 + $0x40c] ss:$12 sps:$4 sm:$0xff]  }
 0x616   : > { %v7661_v1 = vadd.f32 %v7660_v50, %v7608_v0  ;;  %v7990_v39 = vmax.f32 %v7659_v19, 0.0  ;;  %v7762_v2 = vpop.f32.mrf.mxu0  ;;  %v6682_v19 = vsub.s32 3, %v23188_v7  ;;  %v21527_v50 = vld [vmem:[#allocation11 + $0x3f4] ss:$12 sps:$4 sm:$0xff]  }
 0x617   : > { %v7664_v5 = vpop.f32.mrf.mxu1 }
 0x618   : > { %v7991_v16 = vmax.f32 %v7661_v1, 0.0  ;;  %v23969_v27 = vpack.c.bf16 %v7990_v39, %v7983_v21  ;;  %v7665_v48 = vadd.f32 %v7664_v5, %v7612_v60  ;;  %v7764_v0 = vpop.f32.mrf.mxu0  ;;  %v6683_v1 = vrot.slane %v23961_v25, %v6682_v19  ;;  %v21525_v39 = vld [vmem:[#allocation11 + $0x3f0] ss:$12 sps:$4 sm:$0xff]  }
 0x619   : > { %v7666_v53 = vpop.f32.mrf.mxu1 }
 0x61a   : > { %v23967_v56 = vpack.c.bf16 %v7991_v16, %v7984_v52  ;;  %v7667_v43 = vadd.f32 %v7666_v53, %v7614_v13  ;;  %v7997_v30 = vmax.f32 %v7665_v48, 0.0  ;;  %v7766_v35 = vpop.f32.mrf.mxu0  ;;  %v6679_v52 = vrot.slane %v23961_v25, %v23424_v29  ;;  %v21528_v13 = vld [vmem:[#allocation11 + $0x3d8] ss:$12 sps:$4 sm:$0xff]  }
 0x61b   : > { %v7668_v59 = vpop.f32.mrf.mxu1 }
 0x61c   : > { %v7669_v20 = vadd.f32 %v7668_v59, %v7616_v44  ;;  %9177 = vmatprep.mubr.bf16.mxu1 %v23967_v56  ;;  %v7998_v57 = vmax.f32 %v7667_v43, 0.0  ;;  %v7770_v5 = vpop.f32.mrf.mxu0  ;;  %v21533_v59 = vld [vmem:[#allocation11 + $0x3c4] ss:$12 sps:$4 sm:$0xff]  }
 0x61d   : > { %v7670_v34 = vpop.f32.mrf.mxu1  ;;  %9178 = vmatmul.mubr.bf16.vlgmr.msra.gmra.mxu1 %v23969_v27 }
 0x61e   : > { %v7671_v36 = vadd.f32 %v7670_v34, %v7618_v15  ;;  %9252 = vmatpush1.bf16.msra.mxu1 %v21462_v58  ;;  %v8004_v46 = vmax.f32 %v7669_v20, 0.0  ;;  %v7772_v44 = vpop.f32.mrf.mxu0  ;;  %v21531_v34 = vld [vmem:[#allocation11 + $0x3c0] ss:$12 sps:$4 sm:$0xff]  }
 0x61f   : > { %9253 = vmatprep.subr.bf16.mxu1 %v21470_v10 }
 0x620   : > { %v8005_v18 = vmax.f32 %v7671_v36, 0.0  ;;  %v23975_v11 = vpack.c.bf16 %v8004_v46, %v7997_v30  ;;  %v7774_v36 = vpop.f32.mrf.mxu0 }
 0x622   : > { %v23973_v6 = vpack.c.bf16 %v8005_v18, %v7998_v57  ;;  %9254 = vmatpush1.bf16.msra.mxu1 %v21468_v62 }
 0x623   : > { %9255 = vmatprep.subr.bf16.mxu1 %v21476_v4  ;;  %v21534_v4 = vld [vmem:[#allocation11 + $0x2f0] ss:$12 sps:$4 sm:$0xff]  }
 0x624   : > { %9187 = vmatprep.mubr.bf16.mxu1 %v23973_v6 }
 0x625   : > { %9188 = vmatmul.mubr.bf16.gmra.mxu1 %v23975_v11 }
 0x626   : > { %9256 = vmatpush1.bf16.msra.mxu1 %v21474_v45 }
 0x627   : > { %9257 = vmatprep.subr.bf16.mxu1 %v21482_v61 }
 0x62a   : > { %9258 = vmatpush1.bf16.msra.mxu1 %v21480_v49 }
 0x62b   : > { %9259 = vmatprep.subr.bf16.mxu1 %v21488_v33  ;;  %v7776_v33 = vpop.f32.mrf.mxu0 }
 0x62e   : > { %9260 = vmatpush1.bf16.msra.mxu1 %v21486_v55 }
 0x62f   : > { %9261 = vmatprep.subr.bf16.mxu1 %v21494_v26 }
 0x632   : > { %9262 = vmatpush1.bf16.msra.mxu1 %v21492_v41 }
 0x633   : > { %9263 = vmatprep.subr.bf16.mxu1 %v21500_v9 }
 0x636   : > { %9264 = vmatpush1.bf16.msra.mxu1 %v21498_v14 }
 0x637   : > { %9265 = vmatprep.subr.bf16.mxu1 %v21506_v51  ;;  %v21536_v51 = vld [vmem:[#allocation11 + $0x528] ss:$12 sps:$4 sm:$0xff]  }
 0x63a   : > { %9266 = vmatpush1.bf16.msra.mxu1 %v21504_v31 }
 0x63b   : > { %9267 = vmatprep.subr.bf16.mxu1 %v21512_v23 }
 0x63e   : > { %9268 = vmatpush2.bf16.msra.mxu1 %v21510_v63 }
 0x63f   : > { %9269 = vmatprep.subr.bf16.mxu1 %v21515_v40  ;;  %v21543_v40 = vld [vmem:[#allocation11 + $0x514] ss:$12 sps:$4 sm:$0xff]  }
 0x642   : > { %9270 = vmatpush2.bf16.msra.mxu1 %v21513_v3 }
 0x643   : > { %9271 = vmatprep.subr.bf16.mxu1 %v21518_v32 }
 0x646   : > { %9272 = vmatpush2.bf16.msra.mxu1 %v21516_v17 }
 0x647   : > { %9273 = vmatprep.subr.bf16.mxu1 %v21521_v37  ;;  %v21541_v37 = vld [vmem:[#allocation11 + $0x510] ss:$12 sps:$4 sm:$0xff]  }
 0x64a   : > { %9274 = vmatpush2.bf16.msra.mxu1 %v21519_v54 }
 0x64b   : > { %9275 = vmatprep.subr.bf16.mxu1 %v21524_v38  ;;  %v21548_v38 = vld [vmem:[#allocation11 + $0x4fc] ss:$12 sps:$4 sm:$0xff]  }
 0x64e   : > { %9276 = vmatpush2.bf16.msra.mxu1 %v21522_v47 }
 0x64f   : > { %v7707_v16 = vpop.f32.mrf.mxu1  ;;  %9277 = vmatprep.subr.bf16.mxu1 %v21527_v50 }
 0x650   : > { %v7708_v58 = vadd.f32 %v7707_v16, %v6679_v52  ;;  %v21551_v16 = vld [vmem:[#allocation11 + $0x4e0] ss:$12 sps:$4 sm:$0xff]  }
 0x651   : > { %v7709_v21 = vpop.f32.mrf.mxu1 }
 0x652   : > { %v7710_v53 = vadd.f32 %v7709_v21, %v6683_v1  ;;  %9278 = vmatpush2.bf16.msra.mxu1 %v21525_v39  ;;  %v7761_v62 = vadd.f32 %v7760_v12, %v7708_v58  ;;  %v21546_v39 = vld [vmem:[#allocation11 + $0x4f8] ss:$12 sps:$4 sm:$0xff]  }
 0x653   : > { %v7711_v60 = vpop.f32.mrf.mxu1  ;;  %9279 = vmatprep.subr.bf16.mxu1 %v21530_v42  ;;  %v21558_v21 = vld [vmem:[#allocation11 + $0x4cc] ss:$12 sps:$4 sm:$0xff]  }
 0x654   : > { %v7712_v10 = vadd.f32 %v7711_v60, %v6679_v52  ;;  %v7763_v43 = vadd.f32 %v7762_v2, %v7710_v53  ;;  %v7985_v55 = vmax.f32 %v7761_v62, 0.0  ;;  %v7813_v23 = vpop.f32.mrf.mxu0  ;;  %v6690_v53 = vsub.s32 5, %v23188_v7  ;;  %v21563_v60 = vld [vmem:[#allocation11 + $0x4b4] ss:$12 sps:$4 sm:$0xff]  }
 0x655   : > { %v7713_v15 = vpop.f32.mrf.mxu1 }
 0x656   : > { %v7765_v20 = vadd.f32 %v7764_v0, %v7712_v10  ;;  %v7714_v48 = vadd.f32 %v7713_v15, %v6683_v1  ;;  %9280 = vmatpush2.bf16.msra.mxu1 %v21528_v13  ;;  %v7986_v45 = vmax.f32 %v7763_v43, 0.0  ;;  %v7815_v54 = vpop.f32.mrf.mxu0  ;;  %v6686_v13 = vsub.s32 4, %v23188_v7  ;;  %v21561_v43 = vld [vmem:[#allocation11 + $0x4b0] ss:$12 sps:$4 sm:$0xff]  }
 0x657   : > { %v7717_v46 = vpop.f32.mrf.mxu1  ;;  %9281 = vmatprep.subr.bf16.mxu1 %v21533_v59  ;;  %v6691_v59 = vrot.slane %v23961_v25, %v6690_v53 }
 0x658   : > { %v7767_v57 = vadd.f32 %v7766_v35, %v7714_v48  ;;  %v7992_v18 = vmax.f32 %v7765_v20, 0.0  ;;  %v7718_v26 = vadd.f32 %v7717_v46, %v6679_v52  ;;  %v6687_v10 = vrot.slane %v23961_v25, %v6686_v13  ;;  %v21544_v13 = vld [vmem:[#allocation11 + $0x2c0] ss:$12 sps:$4 sm:$0xff]  }
 0x659   : > { %v7719_v30 = vpop.f32.mrf.mxu1 }
 0x65a   : > { %v7993_v61 = vmax.f32 %v7767_v57, 0.0  ;;  %v7720_v49 = vadd.f32 %v7719_v30, %v6683_v1  ;;  %9282 = vmatpush2.bf16.msra.mxu1 %v21531_v34  ;;  %v23985_v31 = vpack.c.bf16 %v7992_v18, %v7985_v55  ;;  %v7771_v17 = vadd.f32 %v7770_v5, %v7718_v26  ;;  %v21553_v5 = vld [vmem:[#allocation11 + $0x4e4] ss:$12 sps:$4 sm:$0xff]   ;;  %v21568_v34 = vld [vmem:[#allocation11 + $0x49c] ss:$12 sps:$4 sm:$0xff]  }
 0x65b   : > { %v7721_v41 = vpop.f32.mrf.mxu1  ;;  %19723 = vmatprep.subr.bf16.mxu1 %v21534_v4  ;;  %v7814_v46 = vadd.f32 %v7813_v23, %v6687_v10  ;;  %v21573_v55 = vld [vmem:[#allocation11 + $0x484] ss:$12 sps:$4 sm:$0xff]  }
 0x65c   : > { %v7722_v9 = vadd.f32 %v7721_v41, %v6679_v52  ;;  %v23983_v14 = vpack.c.bf16 %v7993_v61, %v7986_v45  ;;  %v7773_v3 = vadd.f32 %v7772_v44, %v7720_v49  ;;  %v7999_v35 = vmax.f32 %v7771_v17, 0.0  ;;  %v21556_v44 = vld [vmem:[#allocation11 + $0x4c8] ss:$12 sps:$4 sm:$0xff]   ;;  %v21566_v45 = vld [vmem:[#allocation11 + $0x498] ss:$12 sps:$4 sm:$0xff]  }
 0x65d   : > { %v7723_v63 = vpop.f32.mrf.mxu1 }
 0x65e   : > { %v7775_v12 = vadd.f32 %v7774_v36, %v7722_v9  ;;  %v7724_v32 = vadd.f32 %v7723_v63, %v6683_v1  ;;  %9230 = vmatprep.mubr.bf16.mxu0 %v23983_v14  ;;  %v8000_v19 = vmax.f32 %v7773_v3, 0.0  ;;  %v7817_v1 = vpop.f32.mrf.mxu0  ;;  %v7816_v36 = vadd.f32 %v7815_v54, %v6691_v59  ;;  %v21535_v54 = vld [vmem:[#allocation11 + $0x230] ss:$12 sps:$4 sm:$0xff]  }
 0x65f   : > { %9231 = vmatmul.mubr.bf16.vlgmr.msra.gmra.mxu0 %v23985_v31  ;;  %v7818_v62 = vadd.f32 %v7817_v1, %v6687_v10 }
 0x660   : > { %v7777_v2 = vadd.f32 %v7776_v33, %v7724_v32  ;;  %9305 = vmatpush1.bf16.msra.mxu0 %v21536_v51  ;;  %v8006_v0 = vmax.f32 %v7775_v12, 0.0  ;;  %v7819_v42 = vpop.f32.mrf.mxu0  ;;  %v21575_v32 = vld [vmem:[#allocation11 + $0x170] ss:$12 sps:$4 sm:$0xff]  }
 0x661   : > { %9306 = vmatprep.subr.bf16.mxu0 %v21543_v40  ;;  %v7820_v57 = vadd.f32 %v7819_v42, %v6691_v59  ;;  %v21571_v40 = vld [vmem:[#allocation11 + $0x480] ss:$12 sps:$4 sm:$0xff]  }
 0x662   : > { %v8007_v47 = vmax.f32 %v7777_v2, 0.0  ;;  %v23991_v52 = vpack.c.bf16 %v8006_v0, %v7999_v35  ;;  %v7823_v58 = vpop.f32.mrf.mxu0 }
 0x663   : > { %v7824_v0 = vadd.f32 %v7823_v58, %v6687_v10 }
 0x664   : > { %v23989_v50 = vpack.c.bf16 %v8007_v47, %v8000_v19  ;;  %9307 = vmatpush1.bf16.msra.mxu0 %v21541_v37  ;;  %v7825_v20 = vpop.f32.mrf.mxu0  ;;  %v21539_v47 = vld [vmem:[#allocation11 + $0x2d8] ss:$12 sps:$4 sm:$0xff]  }
 0x665   : > { %9308 = vmatprep.subr.bf16.mxu0 %v21548_v38  ;;  %v7826_v17 = vadd.f32 %v7825_v20, %v6691_v59  ;;  %v21550_v20 = vld [vmem:[#allocation11 + $0x1e8] ss:$12 sps:$4 sm:$0xff]  }
 0x666   : > { %9240 = vmatprep.mubr.bf16.mxu0 %v23989_v50  ;;  %v7827_v61 = vpop.f32.mrf.mxu0 }
 0x667   : > { %9241 = vmatmul.mubr.bf16.gmra.mxu0 %v23991_v52  ;;  %v7828_v2 = vadd.f32 %v7827_v61, %v6687_v10  ;;  %v21545_v10 = vld [vmem:[#allocation11 + $0x200] ss:$12 sps:$4 sm:$0xff]  }
 0x668   : > { %9309 = vmatpush1.bf16.msra.mxu0 %v21546_v39  ;;  %9336 = vmatprep.mubr.bf16.mxu0 %v24896_v24  ;;  %v7829_v3 = vpop.f32.mrf.mxu0 }
 0x669   : > { %9310 = vmatprep.subr.bf16.mxu0 %v21553_v5  ;;  %v7830_v35 = vadd.f32 %v7829_v3, %v6691_v59  ;;  %v21574_v3 = vld [vmem:[#allocation11 + $0x530] ss:$12 sps:$4 sm:$0xff]  }
 0x66c   : > { %9311 = vmatpush1.bf16.msra.mxu0 %v21551_v16 }
 0x66d   : > { %9312 = vmatprep.subr.bf16.mxu0 %v21558_v21  ;;  %v21540_v21 = vld [vmem:[#allocation11 + $0x218] ss:$12 sps:$4 sm:$0xff]  }
 0x66f   : > { %v7866_v15 = vpop.f32.mrf.mxu1 }
 0x670   : > { %9313 = vmatpush1.bf16.msra.mxu0 %v21556_v44  ;;  %v7867_v49 = vadd.f32 %v7866_v15, %v7814_v46 }
 0x671   : > { %v7868_v48 = vpop.f32.mrf.mxu1  ;;  %9314 = vmatprep.subr.bf16.mxu0 %v21563_v60 }
 0x672   : > { %v7869_v18 = vadd.f32 %v7868_v48, %v7816_v36  ;;  %v7987_v23 = vmax.f32 %v7867_v49, 0.0  ;;  %v21554_v48 = vld [vmem:[#allocation11 + $0x290] ss:$12 sps:$4 sm:$0xff]   ;;  %v21559_v36 = vld [vmem:[#allocation11 + $0x278] ss:$12 sps:$4 sm:$0xff]  }
 0x673   : > { %v7870_v4 = vpop.f32.mrf.mxu1  ;;  %v21565_v49 = vld [vmem:[#allocation11 + $0x1a0] ss:$12 sps:$4 sm:$0xff]  }
 0x674   : > { %v7871_v30 = vadd.f32 %v7870_v4, %v7818_v62  ;;  %9315 = vmatpush1.bf16.msra.mxu0 %v21561_v43  ;;  %v7988_v51 = vmax.f32 %v7869_v18, 0.0  ;;  %v21549_v43 = vld [vmem:[#allocation11 + $0x2a8] ss:$12 sps:$4 sm:$0xff]   ;;  %v6694_v62 = vsub.s32 6, %v23188_v7  ;;  %v20019_v46 = vpop.f32.mrf.mxu0  ;;  %v21560_v4 = vld [vmem:[#allocation11 + $0x1b8] ss:$12 sps:$4 sm:$0xff]  }
 0x675   : > { %v7872_v33 = vpop.f32.mrf.mxu1  ;;  %9316 = vmatprep.subr.bf16.mxu0 %v21568_v34  ;;  %v21555_v34 = vld [vmem:[#allocation11 + $0x1d0] ss:$12 sps:$4 sm:$0xff]   ;;  %v21564_v18 = vld [vmem:[#allocation11 + $0x260] ss:$12 sps:$4 sm:$0xff]  }
 0x676   : > { %v7873_v26 = vadd.f32 %v7872_v33, %v7820_v57  ;;  %v7994_v41 = vmax.f32 %v7871_v30, 0.0  ;;  %v6695_v30 = vrot.slane %v23961_v25, %v6694_v62  ;;  %v21587_v62 = vld [vmem:[#allocation11 + $0x110] ss:$12 sps:$4 sm:$0xff]  }
 0x677   : > { %v7876_v9 = vpop.f32.mrf.mxu1 }
 0x678   : > { %v7995_v63 = vmax.f32 %v7873_v26, 0.0  ;;  %9317 = vmatpush1.bf16.msra.mxu0 %v21566_v45  ;;  %v24002_v38 = vpack.c.bf16 %v7994_v41, %v7987_v23  ;;  %v7877_v5 = vadd.f32 %v7876_v9, %v7824_v0  ;;  %v7968_v45 = vpop.f32.mrf.mxu0  ;;  %v21577_v0 = vld [vmem:[#allocation11 + $0x518] ss:$12 sps:$4 sm:$0xff]  }
 0x679   : > { %v7878_v12 = vpop.f32.mrf.mxu1  ;;  %9318 = vmatprep.subr.bf16.mxu0 %v21573_v55  ;;  %v21569_v55 = vld [vmem:[#allocation11 + $0x248] ss:$12 sps:$4 sm:$0xff]  }
 0x67a   : > { %v24000_v37 = vpack.c.bf16 %v7995_v63, %v7988_v51  ;;  %v7879_v39 = vadd.f32 %v7878_v12, %v7826_v17  ;;  %v8001_v60 = vmax.f32 %v7877_v5, 0.0  ;;  %v20020_v41 = vpop.f32.mrf.mxu0  ;;  %v21570_v63 = vld [vmem:[#allocation11 + $0x188] ss:$12 sps:$4 sm:$0xff]  }
 0x67b   : > { %v7880_v19 = vpop.f32.mrf.mxu1 }
 0x67c   : > { %v7881_v1 = vadd.f32 %v7880_v19, %v7828_v2  ;;  %9283 = vmatprep.mubr.bf16.mxu1 %v24000_v37  ;;  %9319 = vmatpush1.bf16.msra.mxu0 %v21571_v40  ;;  %v8002_v44 = vmax.f32 %v7879_v39, 0.0  ;;  %v7971_v25 = vpop.f32.mrf.mxu0 }
 0x67d   : > { %v7882_v16 = vpop.f32.mrf.mxu1  ;;  %9284 = vmatmul.mubr.bf16.vlgmr.msra.gmra.mxu1 %v24002_v38  ;;  %19695 = vmatprep.subr.bf16.mxu0 %v21575_v32 }
 0x67e   : > { %v7883_v42 = vadd.f32 %v7882_v16, %v7830_v35  ;;  %19724 = vmatpush3.bf16.msra.mxu1 %v21535_v54  ;;  %v8008_v53 = vmax.f32 %v7881_v1, 0.0  ;;  %v21576_v1 = vld [vmem:[#allocation11 + $0xb0] ss:$12 sps:$4 sm:$0xff]  }
 0x67f   : > { %19725 = vmatprep.subr.bf16.mxu1 %v21539_v47 }
 0x680   : > { %v8009_v58 = vmax.f32 %v7883_v42, 0.0  ;;  %v24008_v15 = vpack.c.bf16 %v8008_v53, %v8001_v60  ;;  %v21578_v42 = vld [vmem:[#allocation11 + $0x158] ss:$12 sps:$4 sm:$0xff]   ;;  %v21583_v60 = vld [vmem:[#allocation11 + $0x4e8] ss:$12 sps:$4 sm:$0xff]  }
 0x682   : > { %19726 = vmatpush3.bf16.msra.mxu1 %v21540_v21  ;;  %v24006_v59 = vpack.c.bf16 %v8009_v58, %v8002_v44  ;;  %v21580_v21 = vld [vmem:[#allocation11 + $0x500] ss:$12 sps:$4 sm:$0xff]   ;;  %v21579_v44 = vld [vmem:[#allocation11 + $0x98] ss:$12 sps:$4 sm:$0xff]  }
 0x683   : > { %19727 = vmatprep.subr.bf16.mxu1 %v21544_v13 }
 0x684   : > { %9293 = vmatprep.mubr.bf16.mxu1 %v24006_v59 }
 0x685   : > { %9294 = vmatmul.mubr.bf16.gmra.mxu1 %v24008_v15 }
 0x686   : > { %19728 = vmatpush3.bf16.msra.mxu1 %v21545_v10  ;;  %9438 = vmatprep.mubr.bf16.mxu1 %v23983_v14 }
 0x687   : > { %19729 = vmatprep.subr.bf16.mxu1 %v21549_v43 }
 0x68a   : > { %19730 = vmatpush3.bf16.msra.mxu1 %v21550_v20 }
 0x68b   : > { %19731 = vmatprep.subr.bf16.mxu1 %v21554_v48  ;;  %v21584_v48 = vld [vmem:[#allocation11 + $0x128] ss:$12 sps:$4 sm:$0xff]  }
 0x68e   : > { %19732 = vmatpush3.bf16.msra.mxu1 %v21555_v34  ;;  %v21586_v34 = vld [vmem:[#allocation11 + $0x4d0] ss:$12 sps:$4 sm:$0xff]  }
 0x68f   : > { %v19673_v57 = vpop.f32.mrf.mxu1  ;;  %19733 = vmatprep.subr.bf16.mxu1 %v21559_v36  ;;  %v21585_v36 = vld [vmem:[#allocation11 + $0x68] ss:$12 sps:$4 sm:$0xff]  }
 0x691   : > { %v19674_v61 = vpop.f32.mrf.mxu1 }
 0x692   : > { %v19675_v14 = vadd.f32 %v19674_v61, %v19673_v57  ;;  %19734 = vmatpush3.bf16.msra.mxu1 %v21560_v4  ;;  %v21590_v4 = vld [vmem:[#allocation11 + $0xf8] ss:$12 sps:$4 sm:$0xff]   ;;  %v21592_v57 = vld [vmem:[#allocation11 + $0x4a0] ss:$12 sps:$4 sm:$0xff]   ;;  %v21596_v61 = vld [vmem:[#allocation11 + $0xc8] ss:$12 sps:$4 sm:$0xff]  }
 0x693   : > { %v19676_v33 = vpop.f32.mrf.mxu1  ;;  %19735 = vmatprep.subr.bf16.mxu1 %v21564_v18  ;;  %v21591_v18 = vld [vmem:[#allocation11 + $0x38] ss:$12 sps:$4 sm:$0xff]  }
 0x694   : > { %v7920_v26 = vadd.f32 %v19675_v14, %v6695_v30  ;;  %v21597_v14 = vld [vmem:[#allocation11 + $0x8] ss:$12 sps:$4 sm:$0xff]  }
 0x695   : > { %v19677_v9 = vpop.f32.mrf.mxu1 }
 0x696   : > { %v19678_v51 = vadd.f32 %v19677_v9, %v19676_v33  ;;  %19736 = vmatpush3.bf16.msra.mxu1 %v21565_v49  ;;  %v7969_v23 = vadd.f32 %v7968_v45, %v7920_v26  ;;  %v21594_v45 = vld [vmem:[#allocation11 + $0x20] ss:$12 sps:$4 sm:$0xff]   ;;  %v21598_v49 = vld [vmem:[#allocation11 + $0x470] ss:$12 sps:$4 sm:$0xff]   ;;  %v21601_v26 = vld [vmem:[#allocation11 + $0x398] ss:$12 sps:$4 sm:$0xff]  }
 0x697   : > { %v19679_v40 = vpop.f32.mrf.mxu1  ;;  %19737 = vmatprep.subr.bf16.mxu1 %v21569_v55  ;;  %v21599_v33 = vld [vmem:[#allocation11 + $0x3b0] ss:$12 sps:$4 sm:$0xff]   ;;  %v21600_v55 = vld [vmem:[#allocation11 + $0x458] ss:$12 sps:$4 sm:$0xff]   ;;  %v21603_v9 = vld [vmem:[#allocation11 + $0x380] ss:$12 sps:$4 sm:$0xff]  }
 0x698   : > { %v7923_v12 = vadd.f32 %v19678_v51, %v6695_v30  ;;  %v7989_v19 = vmax.f32 %v7969_v23, 0.0  ;;  %v21604_v51 = vld [vmem:[#allocation11 + $0x428] ss:$12 sps:$4 sm:$0xff]   ;;  %v21610_v23 = vld [vmem:[#allocation11 + $0x3e0] ss:$12 sps:$4 sm:$0xff]  }
 0x699   : > { %v19680_v32 = vpop.f32.mrf.mxu1 }
 0x69a   : > { %v7972_v17 = vadd.f32 %v7971_v25, %v7923_v12  ;;  %v19681_v2 = vadd.f32 %v19680_v32, %v19679_v40  ;;  %19738 = vmatpush3.bf16.msra.mxu1 %v21570_v63  ;;  %v21605_v63 = vld [vmem:[#allocation11 + $0x368] ss:$12 sps:$4 sm:$0xff]   ;;  %v21606_v40 = vld [vmem:[#allocation11 + $0x410] ss:$12 sps:$4 sm:$0xff]   ;;  %v21611_v12 = vld [vmem:[#allocation11 + $0x320] ss:$12 sps:$4 sm:$0xff]  }
 0x69b   : > { %v19682_v54 = vpop.f32.mrf.mxu1  ;;  %20021 = vmatprep.subr.bf16.mxu1 %v21574_v3  ;;  %v21612_v25 = vld [vmem:[#allocation11 + $0x3c8] ss:$12 sps:$4 sm:$0xff]   ;;  %v21616_v32 = vld [vmem:[#allocation4 + $0x163c] ss:$36 sps:$4 sm:$0xff]  }
 0x69c   : > { %v7996_v47 = vmax.f32 %v7972_v17, 0.0  ;;  %v7928_v35 = vadd.f32 %v19681_v2, %v6695_v30  ;;  %v21619_v17 = vld [vmem:[#allocation4 + $0x15f4] ss:$36 sps:$4 sm:$0xff]  }
 0x69d   : > { %9439 = vmatmul.mubr.bf16.vlgmr.msra.gmra.mxu1 %v23985_v31  ;;  %v19683_v39 = vpop.f32.mrf.mxu1  ;;  %v21581_v31 = vld [vmem:[#allocation11 + $0x140] ss:$12 sps:$4 sm:$0xff]   ;;  %v21617_v2 = vld [vmem:[#allocation4 + $0x15f0] ss:$36 sps:$4 sm:$0xff]  }
 0x69e   : > { %v8017_v5 = vpack.c.bf16 %v7996_v47, %v7989_v19  ;;  %v19684_v16 = vadd.f32 %v19683_v39, %v19682_v54  ;;  %9446 = vmatprep.mubr.bf16.mxu1 %v23989_v50  ;;  %20022 = vmatpush3.bf16.msra.mxu1 %v21574_v3  ;;  %v7977_v53 = vadd.f32 %v20019_v46, %v7928_v35  ;;  %v21582_v50 = vld [vmem:[#allocation11 + $0x80] ss:$12 sps:$4 sm:$0xff]   ;;  %v21589_v46 = vld [vmem:[#allocation11 + $0x4b8] ss:$12 sps:$4 sm:$0xff]  }
 0x69f   : > { %20023 = vmatprep.subr.bf16.mxu1 %v21577_v0  ;;  %v21609_v3 = vld [vmem:[#allocation11 + $0x338] ss:$12 sps:$4 sm:$0xff]   ;;  %v21622_v54 = vld [vmem:[#allocation4 + $0x15ac] ss:$36 sps:$4 sm:$0xff]  }
 0x6a0   : > { %v7931_v13 = vadd.f32 %v19684_v16, %v6695_v30  ;;  %9337 = vmatmul.mubr.bf16.vlgmr.msra.gmra.mxu0 %v8017_v5  ;;  %v8003_v10 = vmax.f32 %v7977_v53, 0.0  ;;  %v21593_v30 = vld [vmem:[#allocation11 + $0xe0] ss:$12 sps:$4 sm:$0xff]   ;;  %v21643_v53 = vld [vmem:[#allocation4 + $0x1834] ss:$36 sps:$4 sm:$0xff]  }
 0x6a1   : > { %19696 = vmatpush3.bf16.msra.mxu0 %v21576_v1  ;;  %9346 = vmatprep.mubr.bf16.mxu0 %v24896_v24  ;;  %v21625_v19 = vld [vmem:[#allocation4 + $0x1564] ss:$36 sps:$4 sm:$0xff]   ;;  %v21628_v35 = vld [vmem:[#allocation4 + $0x151c] ss:$36 sps:$4 sm:$0xff]   ;;  %v21634_v1 = vld [vmem:[#allocation4 + $0x148c] ss:$36 sps:$4 sm:$0xff]  }
 0x6a2   : > { %v7980_v58 = vadd.f32 %v20020_v41, %v7931_v13  ;;  %20024 = vmatpush3.bf16.msra.mxu1 %v21577_v0  ;;  %19697 = vmatprep.subr.bf16.mxu0 %v21578_v42  ;;  %v21602_v41 = vld [vmem:[#allocation11 + $0x440] ss:$12 sps:$4 sm:$0xff]   ;;  %v21641_v13 = vld [vmem:[#allocation4 + $0x1830] ss:$36 sps:$4 sm:$0xff]  }
 0x6a3   : > { %20025 = vmatprep.subr.bf16.mxu1 %v21580_v21  ;;  %v21620_v0 = vld [vmem:[#allocation4 + $0x15a8] ss:$36 sps:$4 sm:$0xff]   ;;  %v21623_v47 = vld [vmem:[#allocation4 + $0x1560] ss:$36 sps:$4 sm:$0xff]   ;;  %v21626_v39 = vld [vmem:[#allocation4 + $0x1518] ss:$36 sps:$4 sm:$0xff]  }
 0x6a4   : > { %v8010_v43 = vmax.f32 %v7980_v58, 0.0  ;;  %v21637_v16 = vld [vmem:[#allocation4 + $0x1444] ss:$36 sps:$4 sm:$0xff]  }
 0x6a5   : > { %19698 = vmatpush3.bf16.msra.mxu0 %v21579_v44  ;;  %9447 = vmatmul.mubr.bf16.gmra.mxu1 %v23991_v52  ;;  %v21588_v52 = vld [vmem:[#allocation11 + $0x50] ss:$12 sps:$4 sm:$0xff]   ;;  %v21635_v42 = vld [vmem:[#allocation4 + $0x1440] ss:$36 sps:$4 sm:$0xff]  }
 0x6a6   : > { %20026 = vmatpush3.bf16.msra.mxu1 %v21580_v21  ;;  %20037 = vmatprep.mubr.bf16.mxu1 %v8017_v5  ;;  %v8024_v20 = vpack.c.bf16 %v8010_v43, %v8003_v10  ;;  %v21632_v5 = vld [vmem:[#allocation4 + $0x1488] ss:$36 sps:$4 sm:$0xff]   ;;  %v21638_v21 = vld [vmem:[#allocation4 + $0x1878] ss:$36 sps:$4 sm:$0xff]  }
 0x6a7   : > { %19699 = vmatprep.subr.bf16.mxu0 %v21581_v31  ;;  %20027 = vmatprep.subr.bf16.mxu1 %v21583_v60  ;;  %v21646_v44 = vld [vmem:[#allocation4 + $0x17ec] ss:$36 sps:$4 sm:$0xff]   ;;  %v21649_v31 = vld [vmem:[#allocation4 + $0x17a4] ss:$36 sps:$4 sm:$0xff]   ;;  %v21652_v10 = vld [vmem:[#allocation4 + $0x175c] ss:$36 sps:$4 sm:$0xff]  }
 0x6a8   : > { %9347 = vmatmul.mubr.bf16.gmra.mxu0 %v8024_v20  ;;  %v21644_v58 = vld [vmem:[#allocation4 + $0x17e8] ss:$36 sps:$4 sm:$0xff]   ;;  %v21664_v43 = vld [vmem:[#allocation4 + $0x1abc] ss:$36 sps:$4 sm:$0xff]  }
 0x6a9   : > { %19700 = vmatpush3.bf16.msra.mxu0 %v21582_v50  ;;  %9389 = vmatprep.mubr.bf16.mxu0 %v23967_v56  ;;  %v21595_v56 = vld [vmem:[#allocation11 + $0x488] ss:$12 sps:$4 sm:$0xff]   ;;  %v21650_v50 = vld [vmem:[#allocation4 + $0x1758] ss:$36 sps:$4 sm:$0xff]  }
 0x6aa   : > { %20028 = vmatpush3.bf16.msra.mxu1 %v21583_v60  ;;  %19701 = vmatprep.subr.bf16.mxu0 %v21584_v48  ;;  %v21647_v60 = vld [vmem:[#allocation4 + $0x17a0] ss:$36 sps:$4 sm:$0xff]   ;;  %v21655_v48 = vld [vmem:[#allocation4 + $0x1714] ss:$36 sps:$4 sm:$0xff]  }
 0x6ab   : > { %20029 = vmatprep.subr.bf16.mxu1 %v21586_v34 }
 0x6ad   : > { %19702 = vmatpush3.bf16.msra.mxu0 %v21585_v36  ;;  %v21653_v36 = vld [vmem:[#allocation4 + $0x1710] ss:$36 sps:$4 sm:$0xff]  }
 0x6ae   : > { %20030 = vmatpush3.bf16.msra.mxu1 %v21586_v34  ;;  %19703 = vmatprep.subr.bf16.mxu0 %v21587_v62  ;;  %v21670_v34 = vld [vmem:[#allocation4 + $0x1a74] ss:$36 sps:$4 sm:$0xff]  }
 0x6af   : > { %20031 = vmatprep.subr.bf16.mxu1 %v21589_v46  ;;  %v21668_v62 = vld [vmem:[#allocation4 + $0x1a70] ss:$36 sps:$4 sm:$0xff]  }
 0x6b1   : > { %19704 = vmatpush3.bf16.msra.mxu0 %v21588_v52  ;;  %v21676_v52 = vld [vmem:[#allocation4 + $0x1a2c] ss:$36 sps:$4 sm:$0xff]  }
 0x6b2   : > { %20032 = vmatpush3.bf16.msra.mxu1 %v21589_v46  ;;  %19705 = vmatprep.subr.bf16.mxu0 %v21590_v4  ;;  %v21658_v46 = vld [vmem:[#allocation4 + $0x16cc] ss:$36 sps:$4 sm:$0xff]  }
 0x6b3   : > { %20033 = vmatprep.subr.bf16.mxu1 %v21592_v57  ;;  %v21674_v4 = vld [vmem:[#allocation4 + $0x1a28] ss:$36 sps:$4 sm:$0xff]  }
 0x6b5   : > { %19706 = vmatpush3.bf16.msra.mxu0 %v21591_v18  ;;  %v21656_v18 = vld [vmem:[#allocation4 + $0x16c8] ss:$36 sps:$4 sm:$0xff]  }
 0x6b6   : > { %20034 = vmatpush3.bf16.msra.mxu1 %v21592_v57  ;;  %19707 = vmatprep.subr.bf16.mxu0 %v21593_v30  ;;  %v21682_v57 = vld [vmem:[#allocation4 + $0x19e4] ss:$36 sps:$4 sm:$0xff]  }
 0x6b7   : > { %20035 = vmatprep.subr.bf16.mxu1 %v21595_v56  ;;  %v21661_v30 = vld [vmem:[#allocation4 + $0x1684] ss:$36 sps:$4 sm:$0xff]  }
 0x6b9   : > { %19708 = vmatpush3.bf16.msra.mxu0 %v21594_v45  ;;  %v21688_v45 = vld [vmem:[#allocation4 + $0x199c] ss:$36 sps:$4 sm:$0xff]  }
 0x6ba   : > { %20036 = vmatpush3.bf16.msra.mxu1 %v21595_v56  ;;  %19709 = vmatprep.subr.bf16.mxu0 %v21596_v61  ;;  %v21680_v56 = vld [vmem:[#allocation4 + $0x19e0] ss:$36 sps:$4 sm:$0xff]  }
 0x6bb   : > { %10957 = vmatprep.subr.bf16.mxu1 %v21664_v43  ;;  %v21659_v61 = vld [vmem:[#allocation4 + $0x1680] ss:$36 sps:$4 sm:$0xff]  }
 0x6bd   : > { %19710 = vmatpush3.bf16.msra.mxu0 %v21597_v14  ;;  %20038 = vmatmul.mubr.bf16.vlgmr.msra.gmra.mxu1 %v8024_v20  ;;  %v21662_v20 = vld [vmem:[#allocation4 + $0x1ab8] ss:$36 sps:$4 sm:$0xff]   ;;  %v21667_v14 = vld [vmem:[#allocation4 + $0x1ac4] ss:$36 sps:$4 sm:$0xff]  }
 0x6be   : > { %19751 = vmatprep.subr.bf16.mxu0 %v21598_v49  ;;  %10989 = vmatprep.mubr.bf16.mxu1 %v24896_v24  ;;  %v21686_v49 = vld [vmem:[#allocation4 + $0x1998] ss:$36 sps:$4 sm:$0xff]  }
 0x6bf   : > { %10958 = vmatpush1.bf16.msra.mxu1 %v21662_v20 }
 0x6c0   : > { %9390 = vmatmul.mubr.bf16.vlgmr.msra.gmra.mxu0 %v23969_v27  ;;  %v21607_v27 = vld [vmem:[#allocation11 + $0x350] ss:$12 sps:$4 sm:$0xff]   ;;  %10959 = vmatprep.subr.bf16.mxu1 %v21670_v34 }
 0x6c1   : > { %9397 = vmatprep.mubr.bf16.mxu0 %v23973_v6  ;;  %19752 = vmatpush3.bf16.msra.mxu0 %v21599_v33  ;;  %v21608_v6 = vld [vmem:[#allocation11 + $0x3f8] ss:$12 sps:$4 sm:$0xff]  }
 0x6c2   : > { %19753 = vmatprep.subr.bf16.mxu0 %v21600_v55  ;;  %v21694_v33 = vld [vmem:[#allocation4 + $0x1954] ss:$36 sps:$4 sm:$0xff]  }
 0x6c3   : > { %10960 = vmatpush1.bf16.msra.mxu1 %v21668_v62  ;;  %v21692_v55 = vld [vmem:[#allocation4 + $0x1950] ss:$36 sps:$4 sm:$0xff]  }
 0x6c4   : > { %10961 = vmatprep.subr.bf16.mxu1 %v21676_v52  ;;  %v21665_v52 = vld [vmem:[#allocation4 + $0x1ac0] ss:$36 sps:$4 sm:$0xff]  }
 0x6c5   : > { %19754 = vmatpush3.bf16.msra.mxu0 %v21601_v26  ;;  %v21700_v26 = vld [vmem:[#allocation4 + $0x190c] ss:$36 sps:$4 sm:$0xff]  }
 0x6c6   : > { %19755 = vmatprep.subr.bf16.mxu0 %v21602_v41  ;;  %v21698_v41 = vld [vmem:[#allocation4 + $0x1908] ss:$36 sps:$4 sm:$0xff]  }
 0x6c7   : > { %10962 = vmatpush1.bf16.msra.mxu1 %v21674_v4 }
 0x6c8   : > { %9398 = vmatmul.mubr.bf16.gmra.mxu0 %v23975_v11  ;;  %v21613_v11 = vld [vmem:[#allocation11 + $0x308] ss:$12 sps:$4 sm:$0xff]   ;;  %10963 = vmatprep.subr.bf16.mxu1 %v21682_v57 }
 0x6c9   : > { %19756 = vmatpush3.bf16.msra.mxu0 %v21603_v9  ;;  %9487 = vmatprep.mubr.bf16.mxu0 %v24000_v37  ;;  %v21614_v37 = vld [vmem:[#allocation4 + $0x1638] ss:$36 sps:$4 sm:$0xff]   ;;  %v21706_v9 = vld [vmem:[#allocation4 + $0x18c4] ss:$36 sps:$4 sm:$0xff]  }
 0x6ca   : > { %19757 = vmatprep.subr.bf16.mxu0 %v21604_v51  ;;  %v21704_v51 = vld [vmem:[#allocation4 + $0x18c0] ss:$36 sps:$4 sm:$0xff]  }
 0x6cb   : > { %10964 = vmatpush1.bf16.msra.mxu1 %v21680_v56  ;;  %v21673_v56 = vld [vmem:[#allocation4 + $0x1a7c] ss:$36 sps:$4 sm:$0xff]  }
 0x6cc   : > { %10965 = vmatprep.subr.bf16.mxu1 %v21688_v45 }
 0x6cd   : > { %19758 = vmatpush3.bf16.msra.mxu0 %v21605_v63  ;;  %v21712_v63 = vld [vmem:[#allocation4 + $0x1644] ss:$36 sps:$4 sm:$0xff]  }
 0x6ce   : > { %19759 = vmatprep.subr.bf16.mxu0 %v21606_v40 }
 0x6cf   : > { %10966 = vmatpush1.bf16.msra.mxu1 %v21686_v49 }
 0x6d0   : > { %10967 = vmatprep.subr.bf16.mxu1 %v21694_v33 }
 0x6d1   : > { %19760 = vmatpush3.bf16.msra.mxu0 %v21607_v27 }
 0x6d2   : > { %19761 = vmatprep.subr.bf16.mxu0 %v21608_v6 }
 0x6d3   : > { %10968 = vmatpush1.bf16.msra.mxu1 %v21692_v55 }
 0x6d4   : > { %10969 = vmatprep.subr.bf16.mxu1 %v21700_v26 }
 0x6d5   : > { %19762 = vmatpush3.bf16.msra.mxu0 %v21609_v3 }
 0x6d6   : > { %19763 = vmatprep.subr.bf16.mxu0 %v21610_v23 }
 0x6d7   : > { %10970 = vmatpush1.bf16.msra.mxu1 %v21698_v41  ;;  %v21671_v41 = vld [vmem:[#allocation4 + $0x1a78] ss:$36 sps:$4 sm:$0xff]  }
 0x6d8   : > { %10971 = vmatprep.subr.bf16.mxu1 %v21706_v9 }
 0x6d9   : > { %19764 = vmatpush3.bf16.msra.mxu0 %v21611_v12 }
 0x6da   : > { %19765 = vmatprep.subr.bf16.mxu0 %v21612_v25 }
 0x6db   : > { %10972 = vmatpush1.bf16.msra.mxu1 %v21704_v51 }
 0x6dc   : > { %11010 = vmatprep.subr.bf16.mxu1 %v21712_v63 }
 0x6dd   : > { %19766 = vmatpush3.bf16.msra.mxu0 %v21613_v11  ;;  %v9179_v40 = vpop.f32.mrf.mxu1 }
 0x6de   : > { %10904 = vmatprep.subr.bf16.mxu0 %v21616_v32 }
 0x6df   : > { %v9181_v27 = vpop.f32.mrf.mxu1 }
 0x6e0   : > { %9488 = vmatmul.mubr.bf16.vlgmr.msra.gmra.mxu0 %v24002_v38  ;;  %v21631_v38 = vld [vmem:[#allocation4 + $0x14d4] ss:$36 sps:$4 sm:$0xff]  }
 0x6e1   : > { %9495 = vmatprep.mubr.bf16.mxu0 %v24006_v59  ;;  %10905 = vmatpush1.bf16.msra.mxu0 %v21614_v37  ;;  %v21629_v59 = vld [vmem:[#allocation4 + $0x14d0] ss:$36 sps:$4 sm:$0xff]   ;;  %v9183_v6 = vpop.f32.mrf.mxu1 }
 0x6e2   : > { %10906 = vmatprep.subr.bf16.mxu0 %v21619_v17 }
 0x6e3   : > { %v9185_v3 = vpop.f32.mrf.mxu1 }
 0x6e5   : > { %10907 = vmatpush1.bf16.msra.mxu0 %v21617_v2  ;;  %v9189_v23 = vpop.f32.mrf.mxu1 }
 0x6e6   : > { %10908 = vmatprep.subr.bf16.mxu0 %v21622_v54 }
 0x6e7   : > { %v9191_v25 = vpop.f32.mrf.mxu1 }
 0x6e8   : > { %9496 = vmatmul.mubr.bf16.gmra.mxu0 %v24008_v15  ;;  %v21640_v15 = vld [vmem:[#allocation4 + $0x187c] ss:$36 sps:$4 sm:$0xff]  }
 0x6e9   : > { %10909 = vmatpush1.bf16.msra.mxu0 %v21620_v0  ;;  %v9193_v32 = vpop.f32.mrf.mxu1 }
 0x6ea   : > { %10910 = vmatprep.subr.bf16.mxu0 %v21625_v19 }
 0x6eb   : > { %v9195_v17 = vpop.f32.mrf.mxu1 }
 0x6ed   : > { %10911 = vmatpush1.bf16.msra.mxu0 %v21623_v47 }
 0x6ee   : > { %10912 = vmatprep.subr.bf16.mxu0 %v21628_v35 }
 0x6f1   : > { %10913 = vmatpush1.bf16.msra.mxu0 %v21626_v39 }
 0x6f2   : > { %10914 = vmatprep.subr.bf16.mxu0 %v21631_v38 }
 0x6f5   : > { %10915 = vmatpush1.bf16.msra.mxu0 %v21629_v59 }
 0x6f6   : > { %10916 = vmatprep.subr.bf16.mxu0 %v21634_v1 }
 0x6f9   : > { %10917 = vmatpush1.bf16.msra.mxu0 %v21632_v5 }
 0x6fa   : > { %10918 = vmatprep.subr.bf16.mxu0 %v21637_v16 }
 0x6fd   : > { %10919 = vmatpush1.bf16.msra.mxu0 %v21635_v42 }
 0x6fe   : > { %10920 = vmatprep.subr.bf16.mxu0 %v21640_v15 }
 0x701   : > { %10921 = vmatpush2.bf16.msra.mxu0 %v21638_v21 }
 0x702   : > { %10922 = vmatprep.subr.bf16.mxu0 %v21643_v53 }
 0x705   : > { %10923 = vmatpush2.bf16.msra.mxu0 %v21641_v13 }
 0x706   : > { %10924 = vmatprep.subr.bf16.mxu0 %v21646_v44 }
 0x709   : > { %10925 = vmatpush2.bf16.msra.mxu0 %v21644_v58 }
 0x70a   : > { %10926 = vmatprep.subr.bf16.mxu0 %v21649_v31 }
 0x70d   : > { %10927 = vmatpush2.bf16.msra.mxu0 %v21647_v60 }
 0x70e   : > { %10928 = vmatprep.subr.bf16.mxu0 %v21652_v10 }
 0x711   : > { %10929 = vmatpush2.bf16.msra.mxu0 %v21650_v50 }
 0x712   : > { %10930 = vmatprep.subr.bf16.mxu0 %v21655_v48 }
 0x715   : > { %10931 = vmatpush2.bf16.msra.mxu0 %v21653_v36 }
 0x716   : > { %10932 = vmatprep.subr.bf16.mxu0 %v21658_v46 }
 0x719   : > { %10933 = vmatpush2.bf16.msra.mxu0 %v21656_v18 }
 0x71a   : > { %10934 = vmatprep.subr.bf16.mxu0 %v21661_v30 }
 0x71d   : > { %10935 = vmatpush2.bf16.msra.mxu0 %v21659_v61 }
 0x71e   : > { %11063 = vmatprep.subr.bf16.mxu0 %v21667_v14 }
 0x71f   : > { %v9232_v12 = vpop.f32.mrf.mxu0 }
 0x720   : > { %v9233_v13 = vadd.f32 %v9232_v12, %v9179_v40  ;;  %v21679_v40 = vld [vmem:[#allocation4 + $0x1a34] ss:$36 sps:$4 sm:$0xff]  }
 0x721   : > { %v9234_v11 = vpop.f32.mrf.mxu0 }
 0x722   : > { %v9235_v21 = vadd.f32 %v9234_v11, %v9181_v27  ;;  %v21685_v11 = vld [vmem:[#allocation4 + $0x19ec] ss:$36 sps:$4 sm:$0xff]  }
 0x723   : > { %v9236_v37 = vpop.f32.mrf.mxu0 }
 0x724   : > { %v9237_v16 = vadd.f32 %v9236_v37, %v9183_v6  ;;  %v21691_v37 = vld [vmem:[#allocation4 + $0x19a4] ss:$36 sps:$4 sm:$0xff]  }
 0x725   : > { %v9238_v2 = vpop.f32.mrf.mxu0 }
 0x726   : > { %v9239_v53 = vadd.f32 %v9238_v2, %v9185_v3  ;;  %v21697_v2 = vld [vmem:[#allocation4 + $0x195c] ss:$36 sps:$4 sm:$0xff]  }
 0x727   : > { %v9242_v0 = vpop.f32.mrf.mxu0 }
 0x728   : > { %v9243_v14 = vadd.f32 %v9242_v0, %v9189_v23  ;;  %v21677_v23 = vld [vmem:[#allocation4 + $0x1a30] ss:$36 sps:$4 sm:$0xff]  }
 0x729   : > { %v9244_v47 = vpop.f32.mrf.mxu0  ;;  %v21703_v0 = vld [vmem:[#allocation4 + $0x1914] ss:$36 sps:$4 sm:$0xff]  }
 0x72a   : > { %v9245_v45 = vadd.f32 %v9244_v47, %v9191_v25  ;;  %v21701_v47 = vld [vmem:[#allocation4 + $0x1910] ss:$36 sps:$4 sm:$0xff]  }
 0x72b   : > { %v9246_v39 = vpop.f32.mrf.mxu0 }
 0x72c   : > { %v9247_v4 = vadd.f32 %v9246_v39, %v9193_v32  ;;  %v21683_v32 = vld [vmem:[#allocation4 + $0x19e8] ss:$36 sps:$4 sm:$0xff]  }
 0x72d   : > { %v9248_v59 = vpop.f32.mrf.mxu0  ;;  %v21709_v39 = vld [vmem:[#allocation4 + $0x18cc] ss:$36 sps:$4 sm:$0xff]  }
 0x72e   : > { %v9249_v61 = vadd.f32 %v9248_v59, %v9195_v17  ;;  %v21689_v17 = vld [vmem:[#allocation4 + $0x19a0] ss:$36 sps:$4 sm:$0xff]   ;;  %v21707_v59 = vld [vmem:[#allocation4 + $0x18c8] ss:$36 sps:$4 sm:$0xff]  }
 0x73d   : > { %v9285_v54 = vpop.f32.mrf.mxu1 }
 0x73e   : > { %v9286_v10 = vadd.f32 %v9285_v54, %v9233_v13  ;;  %v21695_v54 = vld [vmem:[#allocation4 + $0x1958] ss:$36 sps:$4 sm:$0xff]  }
 0x73f   : > { %v9287_v19 = vpop.f32.mrf.mxu1 }
 0x740   : > { %v9288_v31 = vadd.f32 %v9287_v19, %v9235_v21 }
 0x741   : > { %v9289_v35 = vpop.f32.mrf.mxu1 }
 0x742   : > { %v9290_v44 = vadd.f32 %v9289_v35, %v9237_v16 }
 0x743   : > { %v9291_v38 = vpop.f32.mrf.mxu1 }
 0x744   : > { %v9292_v60 = vadd.f32 %v9291_v38, %v9239_v53 }
 0x745   : > { %v9295_v1 = vpop.f32.mrf.mxu1 }
 0x746   : > { %v9296_v9 = vadd.f32 %v9295_v1, %v9243_v14 }
 0x747   : > { %v9297_v42 = vpop.f32.mrf.mxu1 }
 0x748   : > { %v9298_v55 = vadd.f32 %v9297_v42, %v9245_v45 }
 0x749   : > { %v9299_v43 = vpop.f32.mrf.mxu1 }
 0x74a   : > { %v9300_v49 = vadd.f32 %v9299_v43, %v9247_v4 }
 0x74b   : > { %v9301_v57 = vpop.f32.mrf.mxu1 }
 0x74c   : > { %v9302_v26 = vadd.f32 %v9301_v57, %v9249_v61 }
 0x75d   : > { %v19739_v19 = vpop.f32.mrf.mxu1 }
 0x75f   : > { %v19740_v38 = vpop.f32.mrf.mxu1 }
 0x760   : > { %v9338_v5 = vpop.f32.mrf.mxu0 }
 0x761   : > { %v9339_v36 = vadd.f32 %v9338_v5, %v9286_v10  ;;  %v21715_v5 = vld [vmem:[#allocation4 + $0x164c] ss:$36 sps:$4 sm:$0xff]   ;;  %v19742_v16 = vpop.f32.mrf.mxu1 }
 0x762   : > { %v9340_v15 = vpop.f32.mrf.mxu0 }
 0x763   : > { %v9341_v48 = vadd.f32 %v9340_v15, %v9288_v31  ;;  %v19743_v15 = vpop.f32.mrf.mxu1 }
 0x764   : > { %v9342_v58 = vpop.f32.mrf.mxu0 }
 0x765   : > { %v9343_v50 = vadd.f32 %v9342_v58, %v9290_v44  ;;  %v19745_v53 = vpop.f32.mrf.mxu1 }
 0x766   : > { %v9344_v20 = vpop.f32.mrf.mxu0 }
 0x767   : > { %v9345_v34 = vadd.f32 %v9344_v20, %v9292_v60  ;;  %v24030_v18 = vpack.c.bf16 %v9343_v50, %v9339_v36  ;;  %v19746_v44 = vpop.f32.mrf.mxu1 }
 0x768   : > { %v9348_v62 = vpop.f32.mrf.mxu0 }
 0x769   : > { %v24028_v46 = vpack.c.bf16 %v9345_v34, %v9341_v48  ;;  %v9349_v3 = vadd.f32 %v9348_v62, %v9296_v9  ;;  %v19748_v31 = vpop.f32.mrf.mxu1  ;;  %v19741_v62 = vadd.f32 %v19740_v38, %v19739_v19  ;;  %v19747_v9 = vadd.f32 %v19746_v44, %v19745_v53  ;;  %v21716_v38 = vld [vmem:[#allocation4 + $0x15f8] ss:$36 sps:$4 sm:$0xff]   ;;  %v21730_v44 = vld [vmem:[#allocation4 + $0x156c] ss:$36 sps:$4 sm:$0xff]  }
 0x76a   : > { %v9350_v30 = vpop.f32.mrf.mxu0  ;;  %v21725_v53 = vld [vmem:[#allocation4 + $0x15b8] ss:$36 sps:$4 sm:$0xff]  }
 0x76b   : > { %10936 = vmatprep.mubr.bf16.mxu0 %v24028_v46  ;;  %v9351_v27 = vadd.f32 %v9350_v30, %v9298_v55  ;;  %v19749_v10 = vpop.f32.mrf.mxu1  ;;  %v19744_v30 = vadd.f32 %v19743_v15, %v19742_v16  ;;  %v21727_v16 = vld [vmem:[#allocation4 + $0x15bc] ss:$36 sps:$4 sm:$0xff]  }
 0x76c   : > { %v9352_v33 = vpop.f32.mrf.mxu0  ;;  %10937 = vmatmul.mubr.bf16.vlgmr.msra.gmra.mxu0 %v24030_v18 }
 0x76d   : > { %11064 = vmatpush1.bf16.msra.mxu0 %v21665_v52  ;;  %v9353_v51 = vadd.f32 %v9352_v33, %v9300_v49 }
 0x76e   : > { %v9354_v63 = vpop.f32.mrf.mxu0  ;;  %11065 = vmatprep.subr.bf16.mxu0 %v21673_v56 }
 0x76f   : > { %v9355_v6 = vadd.f32 %v9354_v63, %v9302_v26  ;;  %v24036_v25 = vpack.c.bf16 %v9353_v51, %v9349_v3 }
 0x771   : > { %v24034_v12 = vpack.c.bf16 %v9355_v6, %v9351_v27  ;;  %11066 = vmatpush1.bf16.msra.mxu0 %v21671_v41 }
 0x772   : > { %11067 = vmatprep.subr.bf16.mxu0 %v21679_v40 }
 0x773   : > { %10946 = vmatprep.mubr.bf16.mxu0 %v24034_v12 }
 0x774   : > { %10947 = vmatmul.mubr.bf16.gmra.mxu0 %v24036_v25 }
 0x775   : > { %11068 = vmatpush1.bf16.msra.mxu0 %v21677_v23  ;;  %11095 = vmatprep.mubr.bf16.mxu0 %v24896_v24 }
 0x776   : > { %11069 = vmatprep.subr.bf16.mxu0 %v21685_v11  ;;  %v21710_v11 = vld [vmem:[#allocation4 + $0x1640] ss:$36 sps:$4 sm:$0xff]  }
 0x779   : > { %11070 = vmatpush1.bf16.msra.mxu0 %v21683_v32  ;;  %v21713_v32 = vld [vmem:[#allocation4 + $0x1648] ss:$36 sps:$4 sm:$0xff]  }
 0x77a   : > { %11071 = vmatprep.subr.bf16.mxu0 %v21691_v37  ;;  %v19750_v37 = vadd.f32 %v19749_v10, %v19748_v31  ;;  %v21728_v31 = vld [vmem:[#allocation4 + $0x1568] ss:$36 sps:$4 sm:$0xff]  }
 0x77b   : > { %v21736_v10 = vld [vmem:[#allocation4 + $0x1524] ss:$36 sps:$4 sm:$0xff]  }
 0x77d   : > { %11072 = vmatpush1.bf16.msra.mxu0 %v21689_v17  ;;  %v20039_v43 = vpop.f32.mrf.mxu1 }
 0x77e   : > { %11073 = vmatprep.subr.bf16.mxu0 %v21697_v2 }
 0x77f   : > { %v9538_v34 = vpop.f32.mrf.mxu1 }
 0x780   : > { %v19711_v35 = vpop.f32.mrf.mxu0 }
 0x781   : > { %11074 = vmatpush1.bf16.msra.mxu0 %v21695_v54  ;;  %v20040_v45 = vpop.f32.mrf.mxu1  ;;  %v21718_v54 = vld [vmem:[#allocation4 + $0x15fc] ss:$36 sps:$4 sm:$0xff]  }
 0x782   : > { %11075 = vmatprep.subr.bf16.mxu0 %v21703_v0  ;;  %v19712_v1 = vpop.f32.mrf.mxu0  ;;  %v21721_v0 = vld [vmem:[#allocation4 + $0x1604] ss:$36 sps:$4 sm:$0xff]  }
 0x783   : > { %v19713_v48 = vadd.f32 %v19712_v1, %v19711_v35  ;;  %v9541_v51 = vpop.f32.mrf.mxu1 }
 0x784   : > { %v19714_v42 = vpop.f32.mrf.mxu0 }
 0x785   : > { %11076 = vmatpush1.bf16.msra.mxu0 %v21701_v47  ;;  %v9441_v56 = vadd.f32 %v19741_v62, %v19713_v48  ;;  %v21742_v48 = vld [vmem:[#allocation4 + $0x14dc] ss:$36 sps:$4 sm:$0xff]  }
 0x786   : > { %11077 = vmatprep.subr.bf16.mxu0 %v21709_v39  ;;  %v19715_v21 = vpop.f32.mrf.mxu0  ;;  %v21743_v62 = vld [vmem:[#allocation4 + $0x14e0] ss:$36 sps:$4 sm:$0xff]  }
 0x787   : > { %v19716_v52 = vadd.f32 %v19715_v21, %v19714_v42  ;;  %v21722_v21 = vld [vmem:[#allocation4 + $0x15b0] ss:$36 sps:$4 sm:$0xff]  }
 0x788   : > { %v19717_v13 = vpop.f32.mrf.mxu0 }
 0x789   : > { %11078 = vmatpush1.bf16.msra.mxu0 %v21707_v59  ;;  %v9444_v14 = vadd.f32 %v19744_v30, %v19716_v52  ;;  %v21719_v59 = vld [vmem:[#allocation4 + $0x1600] ss:$36 sps:$4 sm:$0xff]   ;;  %v21748_v52 = vld [vmem:[#allocation4 + $0x1494] ss:$36 sps:$4 sm:$0xff]  }
 0x78a   : > { %11116 = vmatprep.subr.bf16.mxu0 %v21715_v5  ;;  %v19718_v58 = vpop.f32.mrf.mxu0  ;;  %v21724_v5 = vld [vmem:[#allocation4 + $0x15b4] ss:$36 sps:$4 sm:$0xff]  }
 0x78b   : > { %v19719_v26 = vadd.f32 %v19718_v58, %v19717_v13  ;;  %v21733_v58 = vld [vmem:[#allocation4 + $0x1574] ss:$36 sps:$4 sm:$0xff]  }
 0x78c   : > { %v19720_v60 = vpop.f32.mrf.mxu0  ;;  %v21749_v30 = vld [vmem:[#allocation4 + $0x1498] ss:$36 sps:$4 sm:$0xff]  }
 0x78d   : > { %v9449_v17 = vadd.f32 %v19747_v9, %v19719_v26  ;;  %v21761_v26 = vld [vmem:[#allocation4 + $0x1888] ss:$36 sps:$4 sm:$0xff]  }
 0x78e   : > { %v19721_v50 = vpop.f32.mrf.mxu0  ;;  %v21769_v9 = vld [vmem:[#allocation4 + $0x1844] ss:$36 sps:$4 sm:$0xff]  }
 0x78f   : > { %v19722_v40 = vadd.f32 %v19721_v50, %v19720_v60  ;;  %v21731_v60 = vld [vmem:[#allocation4 + $0x1570] ss:$36 sps:$4 sm:$0xff]   ;;  %v21734_v50 = vld [vmem:[#allocation4 + $0x1520] ss:$36 sps:$4 sm:$0xff]  }
 0x791   : > { %v9452_v47 = vadd.f32 %v19750_v37, %v19722_v40  ;;  %v21772_v40 = vld [vmem:[#allocation4 + $0x17f4] ss:$36 sps:$4 sm:$0xff]  }
 0x792   : > { %v21779_v37 = vld [vmem:[#allocation4 + $0x17b0] ss:$36 sps:$4 sm:$0xff]  }
 0x7a0   : > { %v19767_v20 = vpop.f32.mrf.mxu0 }
 0x7a2   : > { %v19768_v36 = vpop.f32.mrf.mxu0 }
 0x7a3   : > { %v19769_v4 = vadd.f32 %v19768_v36, %v19767_v20  ;;  %v21737_v20 = vld [vmem:[#allocation4 + $0x1528] ss:$36 sps:$4 sm:$0xff]   ;;  %v21740_v36 = vld [vmem:[#allocation4 + $0x14d8] ss:$36 sps:$4 sm:$0xff]  }
 0x7a4   : > { %v19770_v57 = vpop.f32.mrf.mxu0 }
 0x7a5   : > { %v9490_v49 = vadd.f32 %v19769_v4, %v9441_v56  ;;  %v21751_v4 = vld [vmem:[#allocation4 + $0x149c] ss:$36 sps:$4 sm:$0xff]   ;;  %v21754_v56 = vld [vmem:[#allocation4 + $0x144c] ss:$36 sps:$4 sm:$0xff]  }
 0x7a6   : > { %v19771_v61 = vpop.f32.mrf.mxu0 }
 0x7a7   : > { %v19772_v33 = vadd.f32 %v19771_v61, %v19770_v57  ;;  %v9539_v27 = vadd.f32 %v9538_v34, %v9490_v49  ;;  %v21745_v34 = vld [vmem:[#allocation4 + $0x14e4] ss:$36 sps:$4 sm:$0xff]   ;;  %v21746_v57 = vld [vmem:[#allocation4 + $0x1490] ss:$36 sps:$4 sm:$0xff]  }
 0x7a8   : > { %v19773_v55 = vpop.f32.mrf.mxu0  ;;  %v21752_v61 = vld [vmem:[#allocation4 + $0x1448] ss:$36 sps:$4 sm:$0xff]  }
 0x7a9   : > { %v9493_v41 = vadd.f32 %v19772_v33, %v9444_v14  ;;  %v21755_v14 = vld [vmem:[#allocation4 + $0x1450] ss:$36 sps:$4 sm:$0xff]   ;;  %v21760_v49 = vld [vmem:[#allocation4 + $0x1884] ss:$36 sps:$4 sm:$0xff]  }
 0x7aa   : > { %v19774_v63 = vpop.f32.mrf.mxu0  ;;  %v21763_v33 = vld [vmem:[#allocation4 + $0x188c] ss:$36 sps:$4 sm:$0xff]  }
 0x7ab   : > { %v9542_v6 = vadd.f32 %v9541_v51, %v9493_v41  ;;  %v19775_v3 = vadd.f32 %v19774_v63, %v19773_v55  ;;  %v21758_v55 = vld [vmem:[#allocation4 + $0x1880] ss:$36 sps:$4 sm:$0xff]   ;;  %v21764_v51 = vld [vmem:[#allocation4 + $0x1838] ss:$36 sps:$4 sm:$0xff]  }
 0x7ac   : > { %v19776_v23 = vpop.f32.mrf.mxu0  ;;  %v21766_v41 = vld [vmem:[#allocation4 + $0x183c] ss:$36 sps:$4 sm:$0xff]  }
 0x7ad   : > { %v24041_v2 = vpack.c.bf16 %v9542_v6, %v9539_v27  ;;  %v9498_v35 = vadd.f32 %v19775_v3, %v9449_v17  ;;  %v21767_v63 = vld [vmem:[#allocation4 + $0x1840] ss:$36 sps:$4 sm:$0xff]   ;;  %v21770_v6 = vld [vmem:[#allocation4 + $0x17f0] ss:$36 sps:$4 sm:$0xff]   ;;  %v21773_v3 = vld [vmem:[#allocation4 + $0x17f8] ss:$36 sps:$4 sm:$0xff]  }
 0x7ae   : > { %v19777_v19 = vpop.f32.mrf.mxu0  ;;  %v21775_v27 = vld [vmem:[#allocation4 + $0x17fc] ss:$36 sps:$4 sm:$0xff]   ;;  %v21784_v17 = vld [vmem:[#allocation4 + $0x1764] ss:$36 sps:$4 sm:$0xff]  }
 0x7af   : > { %v19778_v39 = vadd.f32 %v19777_v19, %v19776_v23  ;;  %10990 = vmatmul.mubr.bf16.vlgmr.msra.gmra.mxu1 %v24041_v2  ;;  %11096 = vmatmul.mubr.bf16.vlgmr.msra.gmra.mxu0 %v24041_v2  ;;  %v9547_v42 = vadd.f32 %v20039_v43, %v9498_v35  ;;  %v21739_v43 = vld [vmem:[#allocation4 + $0x152c] ss:$36 sps:$4 sm:$0xff]   ;;  %v21793_v35 = vld [vmem:[#allocation4 + $0x1724] ss:$36 sps:$4 sm:$0xff]  }
 0x7b0   : > { %11011 = vmatpush1.bf16.msra.mxu1 %v21710_v11  ;;  %11117 = vmatpush1.bf16.msra.mxu0 %v21713_v32  ;;  %v21778_v23 = vld [vmem:[#allocation4 + $0x17ac] ss:$36 sps:$4 sm:$0xff]   ;;  %v21781_v11 = vld [vmem:[#allocation4 + $0x17b4] ss:$36 sps:$4 sm:$0xff]  }
 0x7b1   : > { %v9501_v1 = vadd.f32 %v19778_v39, %v9452_v47  ;;  %11012 = vmatprep.subr.bf16.mxu1 %v21718_v54  ;;  %11118 = vmatprep.subr.bf16.mxu0 %v21721_v0  ;;  %v21776_v32 = vld [vmem:[#allocation4 + $0x17a8] ss:$36 sps:$4 sm:$0xff]   ;;  %v21782_v0 = vld [vmem:[#allocation4 + $0x1760] ss:$36 sps:$4 sm:$0xff]   ;;  %v21788_v39 = vld [vmem:[#allocation4 + $0x1718] ss:$36 sps:$4 sm:$0xff]  }
 0x7b2   : > { %10999 = vmatprep.mubr.bf16.mxu1 %v24896_v24  ;;  %11105 = vmatprep.mubr.bf16.mxu0 %v24896_v24  ;;  %v21787_v54 = vld [vmem:[#allocation4 + $0x176c] ss:$36 sps:$4 sm:$0xff]   ;;  %v21790_v47 = vld [vmem:[#allocation4 + $0x171c] ss:$36 sps:$4 sm:$0xff]  }
 0x7b3   : > { %v9550_v15 = vadd.f32 %v20040_v45, %v9501_v1  ;;  %v21757_v45 = vld [vmem:[#allocation4 + $0x1454] ss:$36 sps:$4 sm:$0xff]   ;;  %v21785_v19 = vld [vmem:[#allocation4 + $0x1768] ss:$36 sps:$4 sm:$0xff]   ;;  %v21799_v1 = vld [vmem:[#allocation4 + $0x16dc] ss:$36 sps:$4 sm:$0xff]  }
 0x7b4   : > { %11013 = vmatpush1.bf16.msra.mxu1 %v21716_v38  ;;  %11119 = vmatpush1.bf16.msra.mxu0 %v21719_v59  ;;  %v21791_v38 = vld [vmem:[#allocation4 + $0x1720] ss:$36 sps:$4 sm:$0xff]   ;;  %v21796_v59 = vld [vmem:[#allocation4 + $0x16d4] ss:$36 sps:$4 sm:$0xff]  }
 0x7b5   : > { %v24047_v13 = vpack.c.bf16 %v9550_v15, %v9547_v42  ;;  %11014 = vmatprep.subr.bf16.mxu1 %v21724_v5  ;;  %11120 = vmatprep.subr.bf16.mxu0 %v21727_v16  ;;  %v21794_v5 = vld [vmem:[#allocation4 + $0x16d0] ss:$36 sps:$4 sm:$0xff]   ;;  %v21797_v16 = vld [vmem:[#allocation4 + $0x16d8] ss:$36 sps:$4 sm:$0xff]  }
 0x7b6   : > { %v21802_v42 = vld [vmem:[#allocation4 + $0x168c] ss:$36 sps:$4 sm:$0xff]   ;;  %v21805_v15 = vld [vmem:[#allocation4 + $0x1694] ss:$36 sps:$4 sm:$0xff]  }
 0x7b7   : > { %11000 = vmatmul.mubr.bf16.gmra.mxu1 %v24047_v13  ;;  %11106 = vmatmul.mubr.bf16.gmra.mxu0 %v24047_v13 }
 0x7b8   : > { %11015 = vmatpush1.bf16.msra.mxu1 %v21722_v21  ;;  %11121 = vmatpush1.bf16.msra.mxu0 %v21725_v53  ;;  %v21800_v21 = vld [vmem:[#allocation4 + $0x1688] ss:$36 sps:$4 sm:$0xff]   ;;  %v21803_v53 = vld [vmem:[#allocation4 + $0x1690] ss:$36 sps:$4 sm:$0xff]  }
 0x7b9   : > { %11042 = vmatprep.mubr.bf16.mxu1 %v24028_v46  ;;  %11148 = vmatprep.mubr.bf16.mxu0 %v24028_v46 }
 0x7ba   : > { %11016 = vmatprep.subr.bf16.mxu1 %v21730_v44  ;;  %11122 = vmatprep.subr.bf16.mxu0 %v21733_v58  ;;  %v21808_v44 = vld [vmem:[#allocation4 + $0x1acc] ss:$36 sps:$4 sm:$0xff]   ;;  %v21811_v58 = vld [vmem:[#allocation4 + $0x1ad4] ss:$36 sps:$4 sm:$0xff]  }
 0x7bc   : > { %11017 = vmatpush1.bf16.msra.mxu1 %v21728_v31  ;;  %11123 = vmatpush1.bf16.msra.mxu0 %v21731_v60  ;;  %v21806_v31 = vld [vmem:[#allocation4 + $0x1ac8] ss:$36 sps:$4 sm:$0xff]   ;;  %v21809_v60 = vld [vmem:[#allocation4 + $0x1ad0] ss:$36 sps:$4 sm:$0xff]  }
 0x7bd   : > { %11018 = vmatprep.subr.bf16.mxu1 %v21736_v10  ;;  %11124 = vmatprep.subr.bf16.mxu0 %v21739_v43  ;;  %v21814_v10 = vld [vmem:[#allocation4 + $0x1a84] ss:$36 sps:$4 sm:$0xff]   ;;  %v21817_v43 = vld [vmem:[#allocation4 + $0x1a8c] ss:$36 sps:$4 sm:$0xff]  }
 0x7c0   : > { %11019 = vmatpush1.bf16.msra.mxu1 %v21734_v50  ;;  %11125 = vmatpush1.bf16.msra.mxu0 %v21737_v20  ;;  %v21812_v50 = vld [vmem:[#allocation4 + $0x1a80] ss:$36 sps:$4 sm:$0xff]   ;;  %v21815_v20 = vld [vmem:[#allocation4 + $0x1a88] ss:$36 sps:$4 sm:$0xff]  }
 0x7c1   : > { %11020 = vmatprep.subr.bf16.mxu1 %v21742_v48  ;;  %11126 = vmatprep.subr.bf16.mxu0 %v21745_v34  ;;  %v21820_v48 = vld [vmem:[#allocation4 + $0x1a3c] ss:$36 sps:$4 sm:$0xff]   ;;  %v21823_v34 = vld [vmem:[#allocation4 + $0x1a44] ss:$36 sps:$4 sm:$0xff]  }
 0x7c4   : > { %11021 = vmatpush1.bf16.msra.mxu1 %v21740_v36  ;;  %11127 = vmatpush1.bf16.msra.mxu0 %v21743_v62  ;;  %v21818_v36 = vld [vmem:[#allocation4 + $0x1a38] ss:$36 sps:$4 sm:$0xff]   ;;  %v21821_v62 = vld [vmem:[#allocation4 + $0x1a40] ss:$36 sps:$4 sm:$0xff]  }
 0x7c5   : > { %11022 = vmatprep.subr.bf16.mxu1 %v21748_v52  ;;  %11128 = vmatprep.subr.bf16.mxu0 %v21751_v4  ;;  %v21826_v52 = vld [vmem:[#allocation4 + $0x19f4] ss:$36 sps:$4 sm:$0xff]   ;;  %v21829_v4 = vld [vmem:[#allocation4 + $0x19fc] ss:$36 sps:$4 sm:$0xff]  }
 0x7c8   : > { %11023 = vmatpush1.bf16.msra.mxu1 %v21746_v57  ;;  %11129 = vmatpush1.bf16.msra.mxu0 %v21749_v30  ;;  %v21824_v57 = vld [vmem:[#allocation4 + $0x19f0] ss:$36 sps:$4 sm:$0xff]   ;;  %v21827_v30 = vld [vmem:[#allocation4 + $0x19f8] ss:$36 sps:$4 sm:$0xff]  }
 0x7c9   : > { %11024 = vmatprep.subr.bf16.mxu1 %v21754_v56  ;;  %11130 = vmatprep.subr.bf16.mxu0 %v21757_v45  ;;  %v21832_v56 = vld [vmem:[#allocation4 + $0x19ac] ss:$36 sps:$4 sm:$0xff]   ;;  %v21835_v45 = vld [vmem:[#allocation4 + $0x19b4] ss:$36 sps:$4 sm:$0xff]  }
 0x7cc   : > { %11025 = vmatpush1.bf16.msra.mxu1 %v21752_v61  ;;  %11131 = vmatpush1.bf16.msra.mxu0 %v21755_v14  ;;  %v21830_v61 = vld [vmem:[#allocation4 + $0x19a8] ss:$36 sps:$4 sm:$0xff]   ;;  %v21833_v14 = vld [vmem:[#allocation4 + $0x19b0] ss:$36 sps:$4 sm:$0xff]  }
 0x7cd   : > { %11026 = vmatprep.subr.bf16.mxu1 %v21760_v49  ;;  %11132 = vmatprep.subr.bf16.mxu0 %v21763_v33  ;;  %v21838_v49 = vld [vmem:[#allocation4 + $0x1964] ss:$36 sps:$4 sm:$0xff]   ;;  %v21841_v33 = vld [vmem:[#allocation4 + $0x196c] ss:$36 sps:$4 sm:$0xff]  }
 0x7d0   : > { %11027 = vmatpush2.bf16.msra.mxu1 %v21758_v55  ;;  %11133 = vmatpush2.bf16.msra.mxu0 %v21761_v26  ;;  %v21836_v55 = vld [vmem:[#allocation4 + $0x1960] ss:$36 sps:$4 sm:$0xff]   ;;  %v21839_v26 = vld [vmem:[#allocation4 + $0x1968] ss:$36 sps:$4 sm:$0xff]  }
 0x7d1   : > { %11028 = vmatprep.subr.bf16.mxu1 %v21766_v41  ;;  %11134 = vmatprep.subr.bf16.mxu0 %v21769_v9  ;;  %v21844_v41 = vld [vmem:[#allocation4 + $0x191c] ss:$36 sps:$4 sm:$0xff]   ;;  %v21847_v9 = vld [vmem:[#allocation4 + $0x1924] ss:$36 sps:$4 sm:$0xff]  }
 0x7d4   : > { %11029 = vmatpush2.bf16.msra.mxu1 %v21764_v51  ;;  %11135 = vmatpush2.bf16.msra.mxu0 %v21767_v63  ;;  %v21842_v51 = vld [vmem:[#allocation4 + $0x1918] ss:$36 sps:$4 sm:$0xff]   ;;  %v21845_v63 = vld [vmem:[#allocation4 + $0x1920] ss:$36 sps:$4 sm:$0xff]  }
 0x7d5   : > { %11030 = vmatprep.subr.bf16.mxu1 %v21772_v40  ;;  %11136 = vmatprep.subr.bf16.mxu0 %v21775_v27  ;;  %v21850_v40 = vld [vmem:[#allocation4 + $0x18d4] ss:$36 sps:$4 sm:$0xff]   ;;  %v21853_v27 = vld [vmem:[#allocation4 + $0x18dc] ss:$36 sps:$4 sm:$0xff]  }
 0x7d8   : > { %11031 = vmatpush2.bf16.msra.mxu1 %v21770_v6  ;;  %11137 = vmatpush2.bf16.msra.mxu0 %v21773_v3  ;;  %v21848_v6 = vld [vmem:[#allocation4 + $0x18d0] ss:$36 sps:$4 sm:$0xff]   ;;  %v21851_v3 = vld [vmem:[#allocation4 + $0x18d8] ss:$36 sps:$4 sm:$0xff]  }
 0x7d9   : > { %11032 = vmatprep.subr.bf16.mxu1 %v21778_v23  ;;  %11138 = vmatprep.subr.bf16.mxu0 %v21781_v11  ;;  %v21856_v23 = vld [vmem:[#allocation4 + $0x1654] ss:$36 sps:$4 sm:$0xff]  }
 0x7da   : > { %v21857_v11 = vld [vmem:[#allocation4 + $0x1898] ss:$36 sps:$4 sm:$0xff]  }
 0x7dc   : > { %11033 = vmatpush2.bf16.msra.mxu1 %v21776_v32  ;;  %11139 = vmatpush2.bf16.msra.mxu0 %v21779_v37  ;;  %v21854_v32 = vld [vmem:[#allocation4 + $0x1650] ss:$36 sps:$4 sm:$0xff]   ;;  %v21858_v37 = vld [vmem:[#allocation4 + $0x1658] ss:$36 sps:$4 sm:$0xff]  }
 0x7dd   : > { %11034 = vmatprep.subr.bf16.mxu1 %v21784_v17  ;;  %11140 = vmatprep.subr.bf16.mxu0 %v21787_v54  ;;  %v21861_v17 = vld [vmem:[#allocation4 + $0x160c] ss:$36 sps:$4 sm:$0xff]  }
 0x7de   : > { %v21862_v54 = vld [vmem:[#allocation4 + $0x1850] ss:$36 sps:$4 sm:$0xff]  }
 0x7e0   : > { %11035 = vmatpush2.bf16.msra.mxu1 %v21782_v0  ;;  %11141 = vmatpush2.bf16.msra.mxu0 %v21785_v19  ;;  %v21859_v0 = vld [vmem:[#allocation4 + $0x1608] ss:$36 sps:$4 sm:$0xff]   ;;  %v21863_v19 = vld [vmem:[#allocation4 + $0x1610] ss:$36 sps:$4 sm:$0xff]  }
 0x7e1   : > { %11036 = vmatprep.subr.bf16.mxu1 %v21790_v47  ;;  %11142 = vmatprep.subr.bf16.mxu0 %v21793_v35  ;;  %v21866_v47 = vld [vmem:[#allocation4 + $0x15c4] ss:$36 sps:$4 sm:$0xff]  }
 0x7e2   : > { %v21867_v35 = vld [vmem:[#allocation4 + $0x1808] ss:$36 sps:$4 sm:$0xff]  }
 0x7e4   : > { %11037 = vmatpush2.bf16.msra.mxu1 %v21788_v39  ;;  %11143 = vmatpush2.bf16.msra.mxu0 %v21791_v38  ;;  %v21864_v39 = vld [vmem:[#allocation4 + $0x15c0] ss:$36 sps:$4 sm:$0xff]   ;;  %v21868_v38 = vld [vmem:[#allocation4 + $0x15c8] ss:$36 sps:$4 sm:$0xff]  }
 0x7e5   : > { %11038 = vmatprep.subr.bf16.mxu1 %v21796_v59  ;;  %11144 = vmatprep.subr.bf16.mxu0 %v21799_v1  ;;  %v21871_v59 = vld [vmem:[#allocation4 + $0x157c] ss:$36 sps:$4 sm:$0xff]  }
 0x7e6   : > { %v21872_v1 = vld [vmem:[#allocation4 + $0x17c0] ss:$36 sps:$4 sm:$0xff]  }
 0x7e8   : > { %11039 = vmatpush2.bf16.msra.mxu1 %v21794_v5  ;;  %11145 = vmatpush2.bf16.msra.mxu0 %v21797_v16  ;;  %v21869_v5 = vld [vmem:[#allocation4 + $0x1578] ss:$36 sps:$4 sm:$0xff]   ;;  %v21873_v16 = vld [vmem:[#allocation4 + $0x1580] ss:$36 sps:$4 sm:$0xff]  }
 0x7e9   : > { %11040 = vmatprep.subr.bf16.mxu1 %v21802_v42  ;;  %11146 = vmatprep.subr.bf16.mxu0 %v21805_v15  ;;  %v21876_v42 = vld [vmem:[#allocation4 + $0x1534] ss:$36 sps:$4 sm:$0xff]  }
 0x7ea   : > { %v21877_v15 = vld [vmem:[#allocation4 + $0x1778] ss:$36 sps:$4 sm:$0xff]  }
 0x7ec   : > { %11041 = vmatpush2.bf16.msra.mxu1 %v21800_v21  ;;  %11147 = vmatpush2.bf16.msra.mxu0 %v21803_v53  ;;  %v21874_v21 = vld [vmem:[#allocation4 + $0x1530] ss:$36 sps:$4 sm:$0xff]   ;;  %v21878_v53 = vld [vmem:[#allocation4 + $0x1538] ss:$36 sps:$4 sm:$0xff]  }
 0x7ed   : > { %11169 = vmatprep.subr.bf16.mxu1 %v21808_v44  ;;  %11275 = vmatprep.subr.bf16.mxu0 %v21811_v58  ;;  %v21881_v44 = vld [vmem:[#allocation4 + $0x14ec] ss:$36 sps:$4 sm:$0xff]  }
 0x7ee   : > { %v21882_v58 = vld [vmem:[#allocation4 + $0x1730] ss:$36 sps:$4 sm:$0xff]  }
 0x7ef   : > { %11043 = vmatmul.mubr.bf16.vlgmr.msra.gmra.mxu1 %v24030_v18  ;;  %11149 = vmatmul.mubr.bf16.vlgmr.msra.gmra.mxu0 %v24030_v18 }
 0x7f0   : > { %11052 = vmatprep.mubr.bf16.mxu1 %v24034_v12  ;;  %11158 = vmatprep.mubr.bf16.mxu0 %v24034_v12 }
 0x7f1   : > { %11170 = vmatpush1.bf16.msra.mxu1 %v21806_v31  ;;  %11276 = vmatpush1.bf16.msra.mxu0 %v21809_v60  ;;  %v21879_v31 = vld [vmem:[#allocation4 + $0x14e8] ss:$36 sps:$4 sm:$0xff]   ;;  %v21883_v60 = vld [vmem:[#allocation4 + $0x14f0] ss:$36 sps:$4 sm:$0xff]  }
 0x7f2   : > { %11171 = vmatprep.subr.bf16.mxu1 %v21814_v10  ;;  %11277 = vmatprep.subr.bf16.mxu0 %v21817_v43  ;;  %v21886_v10 = vld [vmem:[#allocation4 + $0x14a4] ss:$36 sps:$4 sm:$0xff]  }
 0x7f3   : > { %v21884_v43 = vld [vmem:[#allocation4 + $0x14a0] ss:$36 sps:$4 sm:$0xff]  }
 0x7f5   : > { %11172 = vmatpush1.bf16.msra.mxu1 %v21812_v50  ;;  %11278 = vmatpush1.bf16.msra.mxu0 %v21815_v20  ;;  %v21888_v50 = vld [vmem:[#allocation4 + $0x14a8] ss:$36 sps:$4 sm:$0xff]   ;;  %v21891_v20 = vld [vmem:[#allocation4 + $0x145c] ss:$36 sps:$4 sm:$0xff]  }
 0x7f6   : > { %11173 = vmatprep.subr.bf16.mxu1 %v21820_v48  ;;  %11279 = vmatprep.subr.bf16.mxu0 %v21823_v34  ;;  %v21892_v48 = vld [vmem:[#allocation4 + $0x16a0] ss:$36 sps:$4 sm:$0xff]   ;;  %v21889_v34 = vld [vmem:[#allocation4 + $0x1458] ss:$36 sps:$4 sm:$0xff]  }
 0x7f7   : > { %11053 = vmatmul.mubr.bf16.gmra.mxu1 %v24036_v25  ;;  %11159 = vmatmul.mubr.bf16.gmra.mxu0 %v24036_v25 }
 0x7f8   : > { %11201 = vmatprep.mubr.bf16.mxu1 %v24896_v24  ;;  %11307 = vmatprep.mubr.bf16.mxu0 %v24896_v24 }
 0x7f9   : > { %11174 = vmatpush1.bf16.msra.mxu1 %v21818_v36  ;;  %11280 = vmatpush1.bf16.msra.mxu0 %v21821_v62  ;;  %v21893_v36 = vld [vmem:[#allocation4 + $0x1460] ss:$36 sps:$4 sm:$0xff]   ;;  %v21896_v62 = vld [vmem:[#allocation4 + $0x1894] ss:$36 sps:$4 sm:$0xff]  }
 0x7fa   : > { %11175 = vmatprep.subr.bf16.mxu1 %v21826_v52  ;;  %11281 = vmatprep.subr.bf16.mxu0 %v21829_v4  ;;  %v21894_v52 = vld [vmem:[#allocation4 + $0x1890] ss:$36 sps:$4 sm:$0xff]  }
 0x7fb   : > { %v21899_v4 = vld [vmem:[#allocation4 + $0x184c] ss:$36 sps:$4 sm:$0xff]  }
 0x7fd   : > { %11176 = vmatpush1.bf16.msra.mxu1 %v21824_v57  ;;  %11282 = vmatpush1.bf16.msra.mxu0 %v21827_v30  ;;  %v21897_v57 = vld [vmem:[#allocation4 + $0x1848] ss:$36 sps:$4 sm:$0xff]  }
 0x7fe   : > { %11177 = vmatprep.subr.bf16.mxu1 %v21832_v56  ;;  %11283 = vmatprep.subr.bf16.mxu0 %v21835_v45  ;;  %v21902_v30 = vld [vmem:[#allocation4 + $0x1804] ss:$36 sps:$4 sm:$0xff]   ;;  %v21905_v45 = vld [vmem:[#allocation4 + $0x17bc] ss:$36 sps:$4 sm:$0xff]  }
 0x7ff   : > { %v21900_v56 = vld [vmem:[#allocation4 + $0x1800] ss:$36 sps:$4 sm:$0xff]  }
 0x801   : > { %11178 = vmatpush1.bf16.msra.mxu1 %v21830_v61  ;;  %11284 = vmatpush1.bf16.msra.mxu0 %v21833_v14  ;;  %v21903_v61 = vld [vmem:[#allocation4 + $0x17b8] ss:$36 sps:$4 sm:$0xff]  }
 0x802   : > { %11179 = vmatprep.subr.bf16.mxu1 %v21838_v49  ;;  %11285 = vmatprep.subr.bf16.mxu0 %v21841_v33  ;;  %v21908_v14 = vld [vmem:[#allocation4 + $0x1774] ss:$36 sps:$4 sm:$0xff]   ;;  %v21911_v33 = vld [vmem:[#allocation4 + $0x172c] ss:$36 sps:$4 sm:$0xff]  }
 0x803   : > { %v21906_v49 = vld [vmem:[#allocation4 + $0x1770] ss:$36 sps:$4 sm:$0xff]  }
 0x805   : > { %11180 = vmatpush1.bf16.msra.mxu1 %v21836_v55  ;;  %11286 = vmatpush1.bf16.msra.mxu0 %v21839_v26  ;;  %v21909_v55 = vld [vmem:[#allocation4 + $0x1728] ss:$36 sps:$4 sm:$0xff]  }
 0x806   : > { %11181 = vmatprep.subr.bf16.mxu1 %v21844_v41  ;;  %11287 = vmatprep.subr.bf16.mxu0 %v21847_v9  ;;  %v21914_v26 = vld [vmem:[#allocation4 + $0x16e4] ss:$36 sps:$4 sm:$0xff]   ;;  %v21917_v9 = vld [vmem:[#allocation4 + $0x169c] ss:$36 sps:$4 sm:$0xff]  }
 0x807   : > { %v21912_v41 = vld [vmem:[#allocation4 + $0x16e0] ss:$36 sps:$4 sm:$0xff]  }
 0x809   : > { %11182 = vmatpush1.bf16.msra.mxu1 %v21842_v51  ;;  %11288 = vmatpush1.bf16.msra.mxu0 %v21845_v63  ;;  %v21915_v51 = vld [vmem:[#allocation4 + $0x1698] ss:$36 sps:$4 sm:$0xff]  }
 0x80a   : > { %11183 = vmatprep.subr.bf16.mxu1 %v21850_v40  ;;  %11289 = vmatprep.subr.bf16.mxu0 %v21853_v27  ;;  %v21918_v63 = vld [vmem:[#allocation4 + $0x1ad8] ss:$36 sps:$4 sm:$0xff]   ;;  %v21919_v40 = vld [vmem:[#allocation4 + $0x1a90] ss:$36 sps:$4 sm:$0xff]   ;;  %v21920_v27 = vld [vmem:[#allocation4 + $0x1a48] ss:$36 sps:$4 sm:$0xff]  }
 0x80d   : > { %11184 = vmatpush1.bf16.msra.mxu1 %v21848_v6  ;;  %11290 = vmatpush1.bf16.msra.mxu0 %v21851_v3  ;;  %v21921_v6 = vld [vmem:[#allocation4 + $0x1a00] ss:$36 sps:$4 sm:$0xff]   ;;  %v21922_v3 = vld [vmem:[#allocation4 + $0x19b8] ss:$36 sps:$4 sm:$0xff]  }
 0x80e   : > { %11222 = vmatprep.subr.bf16.mxu1 %v21856_v23  ;;  %19789 = vmatprep.subr.bf16.mxu0 %v21857_v11  ;;  %v21923_v23 = vld [vmem:[#allocation4 + $0x1970] ss:$36 sps:$4 sm:$0xff]   ;;  %v21928_v11 = vld [vmem:[#allocation4 + $0x1cfc] ss:$36 sps:$4 sm:$0xff]  }
 0x810   : > { %11202 = vmatmul.mubr.bf16.vlgmr.msra.gmra.mxu1 %v24041_v2  ;;  %11308 = vmatmul.mubr.bf16.vlgmr.msra.gmra.mxu0 %v24041_v2 }
 0x811   : > { %11223 = vmatpush1.bf16.msra.mxu1 %v21854_v32  ;;  %19790 = vmatpush3.bf16.msra.mxu0 %v21858_v37  ;;  %v21931_v32 = vld [vmem:[#allocation4 + $0x1cb4] ss:$36 sps:$4 sm:$0xff]  }
 0x812   : > { %11224 = vmatprep.subr.bf16.mxu1 %v21861_v17  ;;  %19791 = vmatprep.subr.bf16.mxu0 %v21862_v54  ;;  %v21929_v37 = vld [vmem:[#allocation4 + $0x1cb0] ss:$36 sps:$4 sm:$0xff]   ;;  %v21932_v17 = vld [vmem:[#allocation4 + $0x1c68] ss:$36 sps:$4 sm:$0xff]  }
 0x813   : > { %11211 = vmatprep.mubr.bf16.mxu1 %v24896_v24  ;;  %11317 = vmatprep.mubr.bf16.mxu0 %v24896_v24  ;;  %v21937_v54 = vld [vmem:[#allocation4 + $0x1c24] ss:$36 sps:$4 sm:$0xff]  }
 0x815   : > { %11225 = vmatpush1.bf16.msra.mxu1 %v21859_v0  ;;  %19792 = vmatpush3.bf16.msra.mxu0 %v21863_v19  ;;  %v21935_v0 = vld [vmem:[#allocation4 + $0x1c20] ss:$36 sps:$4 sm:$0xff]  }
 0x816   : > { %11226 = vmatprep.subr.bf16.mxu1 %v21866_v47  ;;  %19793 = vmatprep.subr.bf16.mxu0 %v21867_v35  ;;  %v21940_v19 = vld [vmem:[#allocation4 + $0x1bdc] ss:$36 sps:$4 sm:$0xff]   ;;  %v21943_v35 = vld [vmem:[#allocation4 + $0x1b94] ss:$36 sps:$4 sm:$0xff]  }
 0x817   : > { %v21938_v47 = vld [vmem:[#allocation4 + $0x1bd8] ss:$36 sps:$4 sm:$0xff]  }
 0x818   : > { %11212 = vmatmul.mubr.bf16.gmra.mxu1 %v24047_v13  ;;  %11318 = vmatmul.mubr.bf16.gmra.mxu0 %v24047_v13 }
 0x819   : > { %11227 = vmatpush1.bf16.msra.mxu1 %v21864_v39  ;;  %11254 = vmatprep.mubr.bf16.mxu1 %v24028_v46  ;;  %v21941_v39 = vld [vmem:[#allocation4 + $0x1b90] ss:$36 sps:$4 sm:$0xff]  }
 0x81a   : > { %19794 = vmatpush3.bf16.msra.mxu0 %v21868_v38  ;;  %11360 = vmatprep.mubr.bf16.mxu0 %v24028_v46  ;;  %v21887_v46 = vld [vmem:[#allocation4 + $0x16e8] ss:$36 sps:$4 sm:$0xff]  }
 0x81b   : > { %11228 = vmatprep.subr.bf16.mxu1 %v21871_v59  ;;  %19795 = vmatprep.subr.bf16.mxu0 %v21872_v1  ;;  %v21944_v38 = vld [vmem:[#allocation4 + $0x1b48] ss:$36 sps:$4 sm:$0xff]   ;;  %v21947_v1 = vld [vmem:[#allocation4 + $0x1b00] ss:$36 sps:$4 sm:$0xff]  }
 0x81c   : > { %v21949_v59 = vld [vmem:[#allocation4 + $0x1b04] ss:$36 sps:$4 sm:$0xff]  }
 0x81d   : > { %11229 = vmatpush1.bf16.msra.mxu1 %v21869_v5  ;;  %v21952_v5 = vld [vmem:[#allocation4 + $0x1f3c] ss:$36 sps:$4 sm:$0xff]  }
 0x81e   : > { %19796 = vmatpush3.bf16.msra.mxu0 %v21873_v16  ;;  %11230 = vmatprep.subr.bf16.mxu1 %v21876_v42  ;;  %v21950_v42 = vld [vmem:[#allocation4 + $0x1f38] ss:$36 sps:$4 sm:$0xff]  }
 0x81f   : > { %19797 = vmatprep.subr.bf16.mxu0 %v21877_v15  ;;  %v21955_v15 = vld [vmem:[#allocation4 + $0x1ef4] ss:$36 sps:$4 sm:$0xff]  }
 0x821   : > { %11231 = vmatpush1.bf16.msra.mxu1 %v21874_v21 }
 0x822   : > { %19798 = vmatpush3.bf16.msra.mxu0 %v21878_v53  ;;  %11232 = vmatprep.subr.bf16.mxu1 %v21881_v44  ;;  %v21953_v53 = vld [vmem:[#allocation4 + $0x1ef0] ss:$36 sps:$4 sm:$0xff]  }
 0x823   : > { %19799 = vmatprep.subr.bf16.mxu0 %v21882_v58  ;;  %v21958_v58 = vld [vmem:[#allocation4 + $0x1eac] ss:$36 sps:$4 sm:$0xff]  }
 0x825   : > { %11233 = vmatpush1.bf16.msra.mxu1 %v21879_v31 }
 0x826   : > { %19800 = vmatpush3.bf16.msra.mxu0 %v21883_v60  ;;  %11234 = vmatprep.subr.bf16.mxu1 %v21886_v10  ;;  %v21956_v10 = vld [vmem:[#allocation4 + $0x1ea8] ss:$36 sps:$4 sm:$0xff]  }
 0x827   : > { %19801 = vmatprep.subr.bf16.mxu0 %v21887_v46  ;;  %v21961_v46 = vld [vmem:[#allocation4 + $0x1e64] ss:$36 sps:$4 sm:$0xff]  }
 0x829   : > { %11235 = vmatpush1.bf16.msra.mxu1 %v21884_v43 }
 0x82a   : > { %19802 = vmatpush3.bf16.msra.mxu0 %v21888_v50  ;;  %11236 = vmatprep.subr.bf16.mxu1 %v21891_v20  ;;  %v21959_v20 = vld [vmem:[#allocation4 + $0x1e60] ss:$36 sps:$4 sm:$0xff]  }
 0x82b   : > { %19803 = vmatprep.subr.bf16.mxu0 %v21892_v48  ;;  %v21964_v48 = vld [vmem:[#allocation4 + $0x1e1c] ss:$36 sps:$4 sm:$0xff]  }
 0x82c   : > { %v24078_v16 = vpop.f32.mrf.mxu0 }
 0x82d   : > { %11237 = vmatpush1.bf16.msra.mxu1 %v21889_v34 }
 0x82e   : > { %19804 = vmatpush3.bf16.msra.mxu0 %v21893_v36  ;;  %11238 = vmatprep.subr.bf16.mxu1 %v21896_v62  ;;  %v24080_v21 = vpop.f32.mrf.mxu0  ;;  %v21962_v62 = vld [vmem:[#allocation4 + $0x1e18] ss:$36 sps:$4 sm:$0xff]  }
 0x82f   : > { %12915 = vmatprep.subr.bf16.mxu0 %v21928_v11 }
 0x830   : > { %v24082_v44 = vpop.f32.mrf.mxu0 }
 0x831   : > { %11361 = vmatmul.mubr.bf16.vlgmr.msra.gmra.mxu0 %v24030_v18  ;;  %11239 = vmatpush2.bf16.msra.mxu1 %v21894_v52  ;;  %v21967_v52 = vld [vmem:[#allocation4 + $0x1dd4] ss:$36 sps:$4 sm:$0xff]  }
 0x832   : > { %11368 = vmatprep.mubr.bf16.mxu0 %v24034_v12  ;;  %11240 = vmatprep.subr.bf16.mxu1 %v21899_v4  ;;  %v24084_v31 = vpop.f32.mrf.mxu0 }
 0x834   : > { %v24088_v43 = vpop.f32.mrf.mxu0 }
 0x835   : > { %11241 = vmatpush2.bf16.msra.mxu1 %v21897_v57 }
 0x836   : > { %11242 = vmatprep.subr.bf16.mxu1 %v21902_v30  ;;  %v24092_v34 = vpop.f32.mrf.mxu0  ;;  %v21965_v30 = vld [vmem:[#allocation4 + $0x1dd0] ss:$36 sps:$4 sm:$0xff]  }
 0x838   : > { %v24096_v4 = vpop.f32.mrf.mxu0 }
 0x839   : > { %11369 = vmatmul.mubr.bf16.gmra.mxu0 %v24036_v25  ;;  %11243 = vmatpush2.bf16.msra.mxu1 %v21900_v56  ;;  %v21970_v56 = vld [vmem:[#allocation4 + $0x1d8c] ss:$36 sps:$4 sm:$0xff]  }
 0x83a   : > { %11244 = vmatprep.subr.bf16.mxu1 %v21905_v45  ;;  %v24100_v45 = vpop.f32.mrf.mxu0 }
 0x83d   : > { %11245 = vmatpush2.bf16.msra.mxu1 %v21903_v61 }
 0x83e   : > { %11246 = vmatprep.subr.bf16.mxu1 %v21908_v14  ;;  %v21968_v14 = vld [vmem:[#allocation4 + $0x1d88] ss:$36 sps:$4 sm:$0xff]  }
 0x841   : > { %11247 = vmatpush2.bf16.msra.mxu1 %v21906_v49 }
 0x842   : > { %11248 = vmatprep.subr.bf16.mxu1 %v21911_v33  ;;  %v21973_v33 = vld [vmem:[#allocation4 + $0x217c] ss:$36 sps:$4 sm:$0xff]  }
 0x845   : > { %11249 = vmatpush2.bf16.msra.mxu1 %v21909_v55  ;;  %v21971_v55 = vld [vmem:[#allocation4 + $0x2178] ss:$36 sps:$4 sm:$0xff]  }
 0x846   : > { %11250 = vmatprep.subr.bf16.mxu1 %v21914_v26  ;;  %v21976_v26 = vld [vmem:[#allocation4 + $0x1d44] ss:$36 sps:$4 sm:$0xff]  }
 0x849   : > { %11251 = vmatpush2.bf16.msra.mxu1 %v21912_v41 }
 0x84a   : > { %11252 = vmatprep.subr.bf16.mxu1 %v21917_v9  ;;  %v21974_v9 = vld [vmem:[#allocation4 + $0x1d40] ss:$36 sps:$4 sm:$0xff]  }
 0x84d   : > { %11253 = vmatpush2.bf16.msra.mxu1 %v21915_v51 }
 0x84e   : > { %20041 = vmatprep.subr.bf16.mxu1 %v21918_v63 }
 0x850   : > { %11255 = vmatmul.mubr.bf16.vlgmr.msra.gmra.mxu1 %v24030_v18  ;;  %v21926_v18 = vld [vmem:[#allocation4 + $0x1cf8] ss:$36 sps:$4 sm:$0xff]  }
 0x851   : > { %11264 = vmatprep.mubr.bf16.mxu1 %v24034_v12  ;;  %20042 = vmatpush3.bf16.msra.mxu1 %v21918_v63  ;;  %v21924_v12 = vld [vmem:[#allocation4 + $0x1928] ss:$36 sps:$4 sm:$0xff]   ;;  %v21979_v63 = vld [vmem:[#allocation4 + $0x2134] ss:$36 sps:$4 sm:$0xff]  }
 0x852   : > { %20043 = vmatprep.subr.bf16.mxu1 %v21919_v40  ;;  %12916 = vmatpush1.bf16.msra.mxu0 %v21926_v18  ;;  %v21985_v18 = vld [vmem:[#allocation4 + $0x20ec] ss:$36 sps:$4 sm:$0xff]  }
 0x853   : > { %12917 = vmatprep.subr.bf16.mxu0 %v21931_v32 }
 0x855   : > { %20044 = vmatpush3.bf16.msra.mxu1 %v21919_v40  ;;  %v21977_v40 = vld [vmem:[#allocation4 + $0x2130] ss:$36 sps:$4 sm:$0xff]  }
 0x856   : > { %20045 = vmatprep.subr.bf16.mxu1 %v21920_v27  ;;  %12918 = vmatpush1.bf16.msra.mxu0 %v21929_v37  ;;  %v21991_v37 = vld [vmem:[#allocation4 + $0x20a4] ss:$36 sps:$4 sm:$0xff]  }
 0x858   : > { %11265 = vmatmul.mubr.bf16.gmra.mxu1 %v24036_v25  ;;  %v21925_v25 = vld [vmem:[#allocation4 + $0x18e0] ss:$36 sps:$4 sm:$0xff]  }
 0x859   : > { %20046 = vmatpush3.bf16.msra.mxu1 %v21920_v27  ;;  %20057 = vmatprep.mubr.bf16.mxu1 %v24041_v2  ;;  %v21934_v2 = vld [vmem:[#allocation4 + $0x1c6c] ss:$36 sps:$4 sm:$0xff]   ;;  %v21982_v27 = vld [vmem:[#allocation4 + $0x2184] ss:$36 sps:$4 sm:$0xff]  }
 0x85a   : > { %20047 = vmatprep.subr.bf16.mxu1 %v21921_v6  ;;  %12919 = vmatprep.subr.bf16.mxu0 %v21934_v2  ;;  %v21989_v2 = vld [vmem:[#allocation4 + $0x20a0] ss:$36 sps:$4 sm:$0xff]  }
 0x85b   : > { %12920 = vmatpush1.bf16.msra.mxu0 %v21932_v17 }
 0x85c   : > { %12921 = vmatprep.subr.bf16.mxu0 %v21937_v54 }
 0x85d   : > { %20048 = vmatpush3.bf16.msra.mxu1 %v21921_v6 }
 0x85e   : > { %20049 = vmatprep.subr.bf16.mxu1 %v21922_v3 }
 0x85f   : > { %12922 = vmatpush1.bf16.msra.mxu0 %v21935_v0 }
 0x860   : > { %12923 = vmatprep.subr.bf16.mxu0 %v21940_v19  ;;  %v21997_v19 = vld [vmem:[#allocation4 + $0x205c] ss:$36 sps:$4 sm:$0xff]  }
 0x861   : > { %20050 = vmatpush3.bf16.msra.mxu1 %v21922_v3 }
 0x862   : > { %20051 = vmatprep.subr.bf16.mxu1 %v21923_v23 }
 0x863   : > { %12924 = vmatpush1.bf16.msra.mxu0 %v21938_v47 }
 0x864   : > { %12925 = vmatprep.subr.bf16.mxu0 %v21943_v35  ;;  %v21995_v35 = vld [vmem:[#allocation4 + $0x2058] ss:$36 sps:$4 sm:$0xff]  }
 0x865   : > { %20052 = vmatpush3.bf16.msra.mxu1 %v21923_v23  ;;  %v21983_v23 = vld [vmem:[#allocation4 + $0x20e8] ss:$36 sps:$4 sm:$0xff]  }
 0x866   : > { %20053 = vmatprep.subr.bf16.mxu1 %v21924_v12 }
 0x867   : > { %12926 = vmatpush1.bf16.msra.mxu0 %v21941_v39 }
 0x869   : > { %20054 = vmatpush3.bf16.msra.mxu1 %v21924_v12 }
 0x86a   : > { %20055 = vmatprep.subr.bf16.mxu1 %v21925_v25 }
 0x86d   : > { %20056 = vmatpush3.bf16.msra.mxu1 %v21925_v25 }
 0x86e   : > { %12968 = vmatprep.subr.bf16.mxu1 %v21973_v33 }
 0x86f   : > { %v24086_v60 = vpop.f32.mrf.mxu1  ;;  %v11097_v49 = vpop.f32.mrf.mxu0 }
 0x870   : > { %20058 = vmatmul.mubr.bf16.vlgmr.msra.gmra.mxu1 %v24047_v13  ;;  %v21946_v13 = vld [vmem:[#allocation4 + $0x1b4c] ss:$36 sps:$4 sm:$0xff]  }
 0x871   : > { %13000 = vmatprep.mubr.bf16.mxu1 %v24896_v24  ;;  %12927 = vmatprep.subr.bf16.mxu0 %v21946_v13  ;;  %v24090_v50 = vpop.f32.mrf.mxu1  ;;  %v24106_v51 = vpop.f32.mrf.mxu0 }
 0x872   : > { %12928 = vmatpush1.bf16.msra.mxu0 %v21944_v38  ;;  %12969 = vmatpush1.bf16.msra.mxu1 %v21971_v55  ;;  %v22013_v55 = vld [vmem:[#allocation4 + $0x1f80] ss:$36 sps:$4 sm:$0xff]  }
 0x873   : > { %12929 = vmatprep.subr.bf16.mxu0 %v21949_v59  ;;  %v24094_v36 = vpop.f32.mrf.mxu1  ;;  %12970 = vmatprep.subr.bf16.mxu1 %v21979_v63  ;;  %v11101_v3 = vpop.f32.mrf.mxu0 }
 0x875   : > { %v24098_v57 = vpop.f32.mrf.mxu1  ;;  %v24112_v12 = vpop.f32.mrf.mxu0 }
 0x876   : > { %12930 = vmatpush1.bf16.msra.mxu0 %v21947_v1  ;;  %12971 = vmatpush1.bf16.msra.mxu1 %v21977_v40 }
 0x877   : > { %12931 = vmatprep.subr.bf16.mxu0 %v21952_v5  ;;  %v24102_v61 = vpop.f32.mrf.mxu1  ;;  %12972 = vmatprep.subr.bf16.mxu1 %v21985_v18  ;;  %v11107_v54 = vpop.f32.mrf.mxu0  ;;  %v22003_v5 = vld [vmem:[#allocation4 + $0x2014] ss:$36 sps:$4 sm:$0xff]  }
 0x879   : > { %v24104_v41 = vpop.f32.mrf.mxu1  ;;  %v24121_v59 = vpop.f32.mrf.mxu0 }
 0x87a   : > { %12932 = vmatpush2.bf16.msra.mxu0 %v21950_v42  ;;  %12973 = vmatpush1.bf16.msra.mxu1 %v21983_v23 }
 0x87b   : > { %12933 = vmatprep.subr.bf16.mxu0 %v21955_v15  ;;  %v24108_v6 = vpop.f32.mrf.mxu1  ;;  %12974 = vmatprep.subr.bf16.mxu1 %v21991_v37 }
 0x87d   : > { %v24110_v11 = vpop.f32.mrf.mxu1 }
 0x87e   : > { %12934 = vmatpush2.bf16.msra.mxu0 %v21953_v53  ;;  %12975 = vmatpush1.bf16.msra.mxu1 %v21989_v2  ;;  %v22001_v53 = vld [vmem:[#allocation4 + $0x2010] ss:$36 sps:$4 sm:$0xff]  }
 0x87f   : > { %12935 = vmatprep.subr.bf16.mxu0 %v21958_v58  ;;  %12976 = vmatprep.subr.bf16.mxu1 %v21997_v19 }
 0x882   : > { %12936 = vmatpush2.bf16.msra.mxu0 %v21956_v10  ;;  %12977 = vmatpush1.bf16.msra.mxu1 %v21995_v35 }
 0x883   : > { %12937 = vmatprep.subr.bf16.mxu0 %v21961_v46  ;;  %12978 = vmatprep.subr.bf16.mxu1 %v22003_v5 }
 0x886   : > { %12938 = vmatpush2.bf16.msra.mxu0 %v21959_v20  ;;  %12979 = vmatpush1.bf16.msra.mxu1 %v22001_v53  ;;  %v11111_v20 = vpop.f32.mrf.mxu0 }
 0x887   : > { %12939 = vmatprep.subr.bf16.mxu0 %v21964_v48 }
 0x88a   : > { %12940 = vmatpush2.bf16.msra.mxu0 %v21962_v62  ;;  %v22009_v62 = vld [vmem:[#allocation4 + $0x1fcc] ss:$36 sps:$4 sm:$0xff]  }
 0x88b   : > { %12941 = vmatprep.subr.bf16.mxu0 %v21967_v52  ;;  %12980 = vmatprep.subr.bf16.mxu1 %v22009_v62  ;;  %v10992_v62 = vadd.f32 %v24086_v60, %v24078_v16  ;;  %v11008_v16 = vadd.f32 %v24110_v11, %v24100_v45 }
 0x88e   : > { %12942 = vmatpush2.bf16.msra.mxu0 %v21965_v30 }
 0x88f   : > { %12943 = vmatprep.subr.bf16.mxu0 %v21970_v56  ;;  %v22007_v56 = vld [vmem:[#allocation4 + $0x1fc8] ss:$36 sps:$4 sm:$0xff]  }
 0x890   : > { %12981 = vmatpush1.bf16.msra.mxu1 %v22007_v56 }
 0x892   : > { %12944 = vmatpush2.bf16.msra.mxu0 %v21968_v14 }
 0x893   : > { %12945 = vmatprep.subr.bf16.mxu0 %v21976_v26  ;;  %v22021_v26 = vld [vmem:[#allocation4 + $0x1d04] ss:$36 sps:$4 sm:$0xff]  }
 0x896   : > { %12946 = vmatpush2.bf16.msra.mxu0 %v21974_v9  ;;  %v24139_v9 = vpop.f32.mrf.mxu0 }
 0x897   : > { %13074 = vmatprep.subr.bf16.mxu0 %v21982_v27 }
 0x8af   : > { %v11044_v32 = vpop.f32.mrf.mxu1  ;;  %v11150_v63 = vpop.f32.mrf.mxu0 }
 0x8b0   : > { %v24114_v25 = vadd.f32 %v11097_v49, %v11044_v32  ;;  %v22015_v49 = vld [vmem:[#allocation4 + $0x1f84] ss:$36 sps:$4 sm:$0xff]  }
 0x8b1   : > { %v24116_v17 = vpop.f32.mrf.mxu1  ;;  %12982 = vmatprep.subr.bf16.mxu1 %v22015_v49  ;;  %v24141_v40 = vpop.f32.mrf.mxu0 }
 0x8b2   : > { %24916 = vst [vmem:[#allocation18_spill] sm:$0xff] %v24114_v25  ;;  %v11428_v38 = vrot.slane %v24114_v25, 7  ;;  %12983 = vmatpush1.bf16.msra.mxu1 %v22013_v55 }
 0x8b3   : > { %v11048_v0 = vpop.f32.mrf.mxu1  ;;  %13021 = vmatprep.subr.bf16.mxu1 %v22021_v26  ;;  %v24143_v27 = vpop.f32.mrf.mxu0  ;;  %v11426_v26 = vrot.slane %v10992_v62, 7 }
 0x8b4   : > { %v11102_v47 = vadd.f32 %v11101_v3, %v11048_v0 }
 0x8b5   : > { %v24118_v39 = vpop.f32.mrf.mxu1  ;;  %v24145_v3 = vpop.f32.mrf.mxu0 }
 0x8b6   : > { %v11431_v13 = vrot.slane %v11102_v47, 7  ;;  %24918 = vst [vmem:[#allocation21_spill] sm:$0xff] %v24145_v3 }
 0x8b7   : > { %v11054_v1 = vpop.f32.mrf.mxu1  ;;  %v11160_v23 = vpop.f32.mrf.mxu0 }
 0x8b8   : > { %v11446_v42 = vsel %vm2303_vm2, %v11428_v38, %v11431_v13  ;;  %v11108_v15 = vadd.f32 %v11107_v54, %v11054_v1 }
 0x8b9   : > { %v24127_v58 = vsel %vm373_vm0, %v11102_v47, %v11446_v42  ;;  %v24129_v10 = vpop.f32.mrf.mxu1  ;;  %v24147_v18 = vpop.f32.mrf.mxu0 }
 0x8ba   : > { %24917 = vst [vmem:[#allocation17_spill] sm:$0xff] %v24127_v58  ;;  %v11434_v46 = vrot.slane %v11108_v15, 7 }
 0x8bb   : > { %v11058_v48 = vpop.f32.mrf.mxu1  ;;  %v24149_v32 = vpop.f32.mrf.mxu0 }
 0x8bc   : > { %v11112_v52 = vadd.f32 %v11111_v20, %v11058_v48  ;;  %v24133_v30 = vsel %vm2303_vm2, %v11431_v13, %v11434_v46  ;;  %v24163_v20 = vadd.f32 %v24094_v36, %v24082_v44  ;;  %v10998_v48 = vadd.f32 %v24098_v57, %v24084_v31 }
 0x8bd   : > { %v24151_v37 = vpop.f32.mrf.mxu1  ;;  %v24153_v54 = vpop.f32.mrf.mxu0  ;;  %v11004_v44 = vadd.f32 %v24104_v41, %v24092_v34  ;;  %v24180_v31 = vadd.f32 %v24102_v61, %v24088_v43  ;;  %v24192_v34 = vadd.f32 %v24108_v6, %v24096_v4 }
 0x8be   : > { %v11437_v14 = vrot.slane %v11112_v52, 7  ;;  %v10994_v52 = vadd.f32 %v24090_v50, %v24080_v21  ;;  %v24886_v49 = vrot.slane %v24163_v20, 7  ;;  %v11430_v55 = vrot.slane %v10998_v48, 7 }
 0x8bf   : > { %v11433_v57 = vrot.slane %v11004_v44, 7  ;;  %v11435_v6 = vrot.slane %v24192_v34, 7 }
 0x8c0   : > { %v24137_v33 = vsel %vm2303_vm2, %v11434_v46, %v11437_v14  ;;  %v11427_v58 = vrot.slane %v10994_v52, 7  ;;  %v11444_v50 = vsel %vm2303_vm2, %v11426_v26, %v24886_v49  ;;  %v11432_v26 = vrot.slane %v24180_v31, 7 }
 0x8c1   : > { %v11436_v49 = vrot.slane %v11008_v16, 7 }
 0x8c2   : > { %v11445_v43 = vsel %vm2303_vm2, %v11427_v58, %v11430_v55 }
 0x8c3   : > { %v11454_v58 = vsel %vm373_vm0, %v10998_v48, %v11445_v43 }
 0x8d0   : > { %v11203_v2 = vpop.f32.mrf.mxu1  ;;  %v11309_v0 = vpop.f32.mrf.mxu0 }
 0x8d1   : > { %v11204_v3 = vadd.f32 %v11203_v2, %v11150_v63  ;;  %v11442_v63 = vsel %vm2303_vm2, %v11430_v55, %v11433_v57 }
 0x8d2   : > { %v24155_v19 = vpop.f32.mrf.mxu1  ;;  %v11311_v47 = vpop.f32.mrf.mxu0 }
 0x8d3   : > { %24919 = vst [vmem:[#allocation19_spill] sm:$0xff] %v24155_v19  ;;  %v24205_v19 = vld [vmem:[#allocation6 + $0x9] sm:$0x7]  ;;  %v11499_v34 = vadd.f32 %v11204_v3, %v10994_v52 }
 0x8d4   : > { %v11207_v35 = vpop.f32.mrf.mxu1  ;;  %v11313_v38 = vpop.f32.mrf.mxu0 }
 0x8d6   : > { %v24157_v13 = vpop.f32.mrf.mxu1  ;;  %v11315_v1 = vpop.f32.mrf.mxu0 }
 0x8d7   : > { %24920 = vst [vmem:[#allocation20_spill] sm:$0xff] %v24157_v13  ;;  %v11453_v13 = vsel %vm373_vm0, %v24163_v20, %v11444_v50 }
 0x8d8   : > { %v11213_v5 = vpop.f32.mrf.mxu1  ;;  %v11319_v42 = vpop.f32.mrf.mxu0 }
 0x8da   : > { %v24159_v15 = vpop.f32.mrf.mxu1  ;;  %v11321_v53 = vpop.f32.mrf.mxu0 }
 0x8dc   : > { %v11217_v46 = vpop.f32.mrf.mxu1  ;;  %v24171_v56 = vpop.f32.mrf.mxu0 }
 0x8dd   : > { %v11218_v3 = vadd.f32 %v11217_v46, %v24149_v32 }
 0x8de   : > { %v24173_v14 = vpop.f32.mrf.mxu1  ;;  %v24184_v21 = vpop.f32.mrf.mxu0 }
 0x8f1   : > { %v24196_v61 = vpop.f32.mrf.mxu0 }
 0x8f3   : > { %v24213_v2 = vpop.f32.mrf.mxu0 }
 0x910   : > { %v11256_v36 = vpop.f32.mrf.mxu1 }
 0x911   : > { %v11310_v45 = vadd.f32 %v11309_v0, %v11256_v36  ;;  %v11214_v36 = vadd.f32 %v11213_v5, %v11160_v23 }
 0x912   : > { %v11258_v60 = vpop.f32.mrf.mxu1 }
 0x913   : > { %v11312_v11 = vadd.f32 %v11311_v47, %v11258_v60  ;;  %v11100_v47 = vadd.f32 %v24106_v51, %v24116_v17  ;;  %v11462_v16 = vrot.slane %v11310_v45, 1  ;;  %v11439_v51 = vsel %vm2303_vm2, %v11433_v57, %v11436_v49 }
 0x914   : > { %v11260_v41 = vpop.f32.mrf.mxu1  ;;  %v11505_v49 = vadd.f32 %v11442_v63, %v11214_v36  ;;  %v11508_v36 = vadd.f32 %v11439_v51, %v11218_v3 }
 0x915   : > { %v11314_v25 = vadd.f32 %v11313_v38, %v11260_v41  ;;  %v11104_v38 = vadd.f32 %v24112_v12, %v24118_v39  ;;  %v11463_v60 = vrot.slane %v11312_v11, 1  ;;  %v11528_v12 = vrot.slane %v24205_v19, %v23339_v28 }
 0x916   : > { %v11262_v4 = vpop.f32.mrf.mxu1  ;;  %v11498_v43 = vadd.f32 %v11100_v47, %v10992_v62  ;;  %v11110_v11 = vadd.f32 %v24121_v59, %v24129_v10 }
 0x917   : > { %v11465_v44 = vrot.slane %v11314_v25, 1  ;;  %v11316_v0 = vadd.f32 %v11315_v1, %v11262_v4  ;;  %v11208_v1 = vadd.f32 %v11207_v35, %v24143_v27  ;;  %v24225_v27 = vpop.f32.mrf.mxu0  ;;  %v11532_v35 = vrot.slane %v24205_v19, %v23350_v22 }
 0x918   : > { %v11266_v31 = vpop.f32.mrf.mxu1 }
 0x919   : > { %v11466_v48 = vrot.slane %v11316_v0, 1  ;;  %v11320_v50 = vadd.f32 %v11319_v42, %v11266_v31  ;;  %v11480_v39 = vsel %vm2348_vm3, %v11462_v16, %v11465_v44  ;;  %v11501_v42 = vadd.f32 %v11453_v13, %v11104_v38 }
 0x91a   : > { %v11268_v17 = vpop.f32.mrf.mxu1  ;;  %v11114_v13 = vadd.f32 %v24139_v9, %v24151_v37  ;;  %v11502_v62 = vadd.f32 %v11454_v58, %v11208_v1 }
 0x91b   : > { %v11481_v23 = vsel %vm2348_vm3, %v11463_v60, %v11466_v48  ;;  %v11468_v5 = vrot.slane %v11320_v50, 1  ;;  %v11322_v55 = vadd.f32 %v11321_v53, %v11268_v17  ;;  %v11510_v53 = vadd.f32 %v11498_v43, %v11480_v39 }
 0x91c   : > { %v11270_v52 = vpop.f32.mrf.mxu1  ;;  %v11511_v57 = vadd.f32 %v11499_v34, %v11481_v23 }
 0x91d   : > { %v11477_v41 = vsel %vm2348_vm3, %v11465_v44, %v11468_v5  ;;  %v11469_v45 = vrot.slane %v11322_v55, 1  ;;  %v11517_v38 = vadd.f32 %v11505_v49, %v11322_v55  ;;  %v24239_v44 = vpop.f32.mrf.mxu0  ;;  %v11324_v10 = vadd.f32 %v24171_v56, %v11270_v52  ;;  %v21980_v52 = vld [vmem:[#allocation4 + $0x2180] ss:$36 sps:$4 sm:$0xff]  }
 0x91e   : > { %v11489_v32 = vsel %vm378_vm1, %v11314_v25, %v11477_v41  ;;  %v11272_v46 = vpop.f32.mrf.mxu1  ;;  %v11438_v25 = vsel %vm2303_vm2, %v11432_v26, %v11435_v6  ;;  %v11541_v37 = vadd.f32 %v11532_v35, %v11511_v57  ;;  %v11540_v16 = vadd.f32 %v11528_v12, %v11510_v53  ;;  %v21988_v57 = vld [vmem:[#allocation4 + $0x213c] ss:$36 sps:$4 sm:$0xff]  }
 0x91f   : > { %v11513_v4 = vadd.f32 %v11501_v42, %v11489_v32  ;;  %v11478_v47 = vsel %vm2348_vm3, %v11466_v48, %v11469_v45  ;;  %v11326_v9 = vadd.f32 %v24184_v21, %v11272_v46  ;;  %v11507_v31 = vadd.f32 %v11438_v25, %v11114_v13  ;;  %v19811_v56 = vpop.f32.mrf.mxu0  ;;  %v21994_v13 = vld [vmem:[#allocation4 + $0x20f4] ss:$36 sps:$4 sm:$0xff]  }
 0x920   : > { %v11490_v59 = vsel %vm378_vm1, %v11316_v0, %v11478_v47  ;;  %v24921_v48 = vrot.slane %v24163_v20, 7  ;;  %v11547_v0 = vadd.f32 %v11532_v35, %v11517_v38  ;;  %v11553_v23 = vmax.f32 %v11541_v37, 0.0  ;;  %v22000_v38 = vld [vmem:[#allocation4 + $0x20ac] ss:$36 sps:$4 sm:$0xff]  }
 0x921   : > { %v11543_v58 = vadd.f32 %v11528_v12, %v11513_v4  ;;  %v11514_v63 = vadd.f32 %v11502_v62, %v11490_v59  ;;  %v11520_v60 = vadd.f32 %v11508_v36, %v11326_v9  ;;  %v11519_v21 = vadd.f32 %v11507_v31, %v11324_v10  ;;  %v19812_v20 = vpop.f32.mrf.mxu0  ;;  %v21992_v62 = vld [vmem:[#allocation4 + $0x20f0] ss:$36 sps:$4 sm:$0xff]  }
 0x922   : > { %v11441_v34 = vsel %vm2303_vm2, %v24921_v48, %v11432_v26  ;;  %v11552_v5 = vmax.f32 %v11540_v16, 0.0  ;;  %v11559_v42 = vmax.f32 %v11547_v0, 0.0  ;;  %v11216_v53 = vadd.f32 %v24159_v15, %v24147_v18  ;;  %v24922_v16 = vld [vmem:[#allocation19_spill] sm:$0xff] }
 0x923   : > { %v11544_v1 = vadd.f32 %v11532_v35, %v11514_v63  ;;  %v11504_v51 = vadd.f32 %v11441_v34, %v11110_v11  ;;  %v11555_v17 = vmax.f32 %v11543_v58, 0.0  ;;  %v11550_v39 = vadd.f32 %v11532_v35, %v11520_v60  ;;  %v19814_v35 = vpop.f32.mrf.mxu0  ;;  %v21998_v58 = vld [vmem:[#allocation4 + $0x20a8] ss:$36 sps:$4 sm:$0xff]  }
 0x924   : > { %v11549_v26 = vadd.f32 %v11528_v12, %v11519_v21  ;;  %v19813_v46 = vadd.f32 %v19812_v20, %v19811_v56  ;;  %v11506_v36 = vadd.f32 %v24133_v30, %v11216_v53  ;;  %v11220_v59 = vadd.f32 %v24173_v14, %v24153_v54  ;;  %v22006_v63 = vld [vmem:[#allocation4 + $0x2064] ss:$36 sps:$4 sm:$0xff]  }
 0x925   : > { %v11556_v6 = vmax.f32 %v11544_v1, 0.0  ;;  %v11516_v55 = vadd.f32 %v11504_v51, %v11320_v50  ;;  %v11562_v43 = vmax.f32 %v11550_v39, 0.0  ;;  %v24253_v49 = vpack.c.bf16 %v11555_v17, %v11552_v5  ;;  %v21986_v50 = vld [vmem:[#allocation4 + $0x2138] ss:$36 sps:$4 sm:$0xff]   ;;  %v19815_v4 = vpop.f32.mrf.mxu0  ;;  %v22004_v56 = vld [vmem:[#allocation4 + $0x2060] ss:$36 sps:$4 sm:$0xff]  }
 0x926   : > { %v11561_v11 = vmax.f32 %v11549_v26, 0.0  ;;  %v11536_v9 = vrot.slane %v24205_v19, %v23424_v29  ;;  %v19807_v15 = vadd.f32 %v24213_v2, %v24196_v61  ;;  %v19816_v25 = vadd.f32 %v19815_v4, %v19814_v35  ;;  %v24923_v61 = vld [vmem:[#allocation21_spill] sm:$0xff]  ;;  %v24924_v2 = vld [vmem:[#allocation20_spill] sm:$0xff] }
 0x927   : > { %v24251_v3 = vpack.c.bf16 %v11556_v6, %v11553_v23  ;;  %v24255_v41 = vpack.c.bf16 %v11562_v43, %v11559_v42  ;;  %v11546_v45 = vadd.f32 %v11528_v12, %v11516_v55  ;;  %v11509_v54 = vadd.f32 %v24137_v33, %v11220_v59  ;;  %v22012_v17 = vld [vmem:[#allocation4 + $0x201c] ss:$36 sps:$4 sm:$0xff]  }
 0x928   : > { %v19810_v19 = vadd.f32 %v24239_v44, %v24225_v27  ;;  %v11206_v60 = vadd.f32 %v24922_v16, %v24141_v40  ;;  %v11210_v48 = vadd.f32 %v24924_v2, %v24923_v61  ;;  %v24925_v44 = vld [vmem:[#allocation18_spill] sm:$0xff]  ;;  %v24926_v6 = vld [vmem:[#allocation17_spill] sm:$0xff] }
 0x929   : > { %12947 = vmatprep.mubr.bf16.mxu0 %v24251_v3  ;;  %v11558_v32 = vmax.f32 %v11546_v45, 0.0  ;;  %v22025_v59 = vld [vmem:[#allocation4 + $0x1cb8] ss:$36 sps:$4 sm:$0xff]   ;;  %v22052_v2 = vld [vmem:[#allocation4 + $0x1be8] ss:$36 sps:$4 sm:$0xff]  }
 0x92a   : > { %12948 = vmatmul.mubr.bf16.vlgmr.msra.gmra.mxu0 %v24253_v49  ;;  %v11500_v23 = vadd.f32 %v11206_v60, %v24925_v44  ;;  %v11503_v5 = vadd.f32 %v24926_v6, %v11210_v48  ;;  %v22051_v16 = vld [vmem:[#allocation4 + $0x1b9c] ss:$36 sps:$4 sm:$0xff]   ;;  %v22054_v60 = vld [vmem:[#allocation4 + $0x1bec] ss:$36 sps:$4 sm:$0xff]   ;;  %v22057_v48 = vld [vmem:[#allocation4 + $0x1b54] ss:$36 sps:$4 sm:$0xff]  }
 0x92b   : > { %13075 = vmatpush1.bf16.msra.mxu0 %v21980_v52  ;;  %12957 = vmatprep.mubr.bf16.mxu0 %v24255_v41  ;;  %v24262_v47 = vpack.c.bf16 %v11561_v11, %v11558_v32  ;;  %v22010_v52 = vld [vmem:[#allocation4 + $0x2018] ss:$36 sps:$4 sm:$0xff]   ;;  %v22024_v32 = vld [vmem:[#allocation4 + $0x1f8c] ss:$36 sps:$4 sm:$0xff]  }
 0x92c   : > { %13076 = vmatprep.subr.bf16.mxu0 %v21988_v57  ;;  %v22018_v57 = vld [vmem:[#allocation4 + $0x1fd4] ss:$36 sps:$4 sm:$0xff]   ;;  %v22078_v6 = vld [vmem:[#allocation4 + $0x1f4c] ss:$36 sps:$4 sm:$0xff]  }
 0x92d   : > { %v22049_v61 = vld [vmem:[#allocation4 + $0x1b98] ss:$36 sps:$4 sm:$0xff]   ;;  %v22070_v44 = vld [vmem:[#allocation4 + $0x1b10] ss:$36 sps:$4 sm:$0xff]  }
 0x92f   : > { %13077 = vmatpush1.bf16.msra.mxu0 %v21986_v50 }
 0x930   : > { %v20059_v12 = vpop.f32.mrf.mxu1  ;;  %13078 = vmatprep.subr.bf16.mxu0 %v21994_v13  ;;  %v22016_v13 = vld [vmem:[#allocation4 + $0x1fd0] ss:$36 sps:$4 sm:$0xff]  }
 0x931   : > { %v11420_v10 = vadd.f32 %v20059_v12, %v19813_v46  ;;  %v22022_v12 = vld [vmem:[#allocation4 + $0x1f88] ss:$36 sps:$4 sm:$0xff]  }
 0x932   : > { %v11411_v18 = vpop.f32.mrf.mxu1  ;;  %12958 = vmatmul.mubr.bf16.gmra.mxu0 %v24262_v47 }
 0x933   : > { %v11518_v37 = vadd.f32 %v11506_v36, %v11420_v10  ;;  %13079 = vmatpush1.bf16.msra.mxu0 %v21992_v62  ;;  %13106 = vmatprep.mubr.bf16.mxu0 %v24896_v24  ;;  %v11412_v14 = vadd.f32 %v19807_v15, %v11411_v18  ;;  %v11470_v33 = vrot.slane %v11420_v10, 1  ;;  %v22019_v62 = vld [vmem:[#allocation4 + $0x1d00] ss:$36 sps:$4 sm:$0xff]   ;;  %v22030_v36 = vld [vmem:[#allocation4 + $0x1d0c] ss:$36 sps:$4 sm:$0xff]  }
 0x934   : > { %v20060_v30 = vpop.f32.mrf.mxu1  ;;  %13080 = vmatprep.subr.bf16.mxu0 %v22000_v38  ;;  %v22027_v38 = vld [vmem:[#allocation4 + $0x1cbc] ss:$36 sps:$4 sm:$0xff]   ;;  %v22028_v10 = vld [vmem:[#allocation4 + $0x1d08] ss:$36 sps:$4 sm:$0xff]   ;;  %v22031_v15 = vld [vmem:[#allocation4 + $0x1c70] ss:$36 sps:$4 sm:$0xff]  }
 0x935   : > { %v11423_v31 = vadd.f32 %v20060_v30, %v19816_v25  ;;  %v11548_v1 = vadd.f32 %v11536_v9, %v11518_v37  ;;  %v11464_v21 = vrot.slane %v11412_v14, 1  ;;  %v22036_v18 = vld [vmem:[#allocation4 + $0x1cc4] ss:$36 sps:$4 sm:$0xff]   ;;  %v22039_v37 = vld [vmem:[#allocation4 + $0x1c2c] ss:$36 sps:$4 sm:$0xff]  }
 0x936   : > { %v11414_v34 = vpop.f32.mrf.mxu1  ;;  %v22034_v25 = vld [vmem:[#allocation4 + $0x1cc0] ss:$36 sps:$4 sm:$0xff]   ;;  %v22037_v30 = vld [vmem:[#allocation4 + $0x1c28] ss:$36 sps:$4 sm:$0xff]  }
 0x937   : > { %v11521_v0 = vadd.f32 %v11509_v54, %v11423_v31  ;;  %v11415_v51 = vadd.f32 %v19810_v19, %v11414_v34  ;;  %13081 = vmatpush1.bf16.msra.mxu0 %v21998_v58  ;;  %v11560_v40 = vmax.f32 %v11548_v1, 0.0  ;;  %v22042_v58 = vld [vmem:[#allocation4 + $0x1c7c] ss:$36 sps:$4 sm:$0xff]   ;;  %v22045_v54 = vld [vmem:[#allocation4 + $0x1be4] ss:$36 sps:$4 sm:$0xff]  }
 0x938   : > { %13082 = vmatprep.subr.bf16.mxu0 %v22006_v63  ;;  %v22040_v63 = vld [vmem:[#allocation4 + $0x1c78] ss:$36 sps:$4 sm:$0xff]   ;;  %v22043_v14 = vld [vmem:[#allocation4 + $0x1be0] ss:$36 sps:$4 sm:$0xff]   ;;  %v22046_v31 = vld [vmem:[#allocation4 + $0x1c30] ss:$36 sps:$4 sm:$0xff]  }
 0x939   : > { %v11551_v39 = vadd.f32 %v11536_v9, %v11521_v0  ;;  %v11467_v27 = vrot.slane %v11415_v51, 1  ;;  %v22048_v19 = vld [vmem:[#allocation4 + $0x1c34] ss:$36 sps:$4 sm:$0xff]   ;;  %v22060_v34 = vld [vmem:[#allocation4 + $0x1ba4] ss:$36 sps:$4 sm:$0xff]  }
 0x93a   : > { %v22055_v1 = vld [vmem:[#allocation4 + $0x1b50] ss:$36 sps:$4 sm:$0xff]   ;;  %v22058_v0 = vld [vmem:[#allocation4 + $0x1ba0] ss:$36 sps:$4 sm:$0xff]  }
 0x93b   : > { %v11563_v55 = vmax.f32 %v11551_v39, 0.0  ;;  %v11479_v43 = vsel %vm2348_vm3, %v11467_v27, %v11470_v33  ;;  %v11482_v42 = vsel %vm2348_vm3, %v11464_v21, %v11467_v27  ;;  %13083 = vmatpush1.bf16.msra.mxu0 %v22004_v56  ;;  %v22066_v56 = vld [vmem:[#allocation4 + $0x1b5c] ss:$36 sps:$4 sm:$0xff]   ;;  %v22069_v21 = vld [vmem:[#allocation4 + $0x1f44] ss:$36 sps:$4 sm:$0xff]  }
 0x93c   : > { %v11491_v20 = vsel %vm378_vm1, %v11415_v51, %v11479_v43  ;;  %v11512_v26 = vadd.f32 %v11500_v23, %v11482_v42  ;;  %13084 = vmatprep.subr.bf16.mxu0 %v22012_v17  ;;  %v22063_v51 = vld [vmem:[#allocation4 + $0x1b0c] ss:$36 sps:$4 sm:$0xff]   ;;  %v22064_v33 = vld [vmem:[#allocation4 + $0x1b58] ss:$36 sps:$4 sm:$0xff]   ;;  %v22067_v27 = vld [vmem:[#allocation4 + $0x1f40] ss:$36 sps:$4 sm:$0xff]  }
 0x93d   : > { %v24288_v45 = vpack.c.bf16 %v11563_v55, %v11560_v40  ;;  %v11515_v50 = vadd.f32 %v11503_v5, %v11491_v20  ;;  %v22061_v17 = vld [vmem:[#allocation4 + $0x1b08] ss:$36 sps:$4 sm:$0xff]   ;;  %v22072_v39 = vld [vmem:[#allocation4 + $0x1b14] ss:$36 sps:$4 sm:$0xff]   ;;  %v22075_v23 = vld [vmem:[#allocation4 + $0x1efc] ss:$36 sps:$4 sm:$0xff]  }
 0x93e   : > { %v11542_v35 = vadd.f32 %v11536_v9, %v11512_v26  ;;  %v22073_v5 = vld [vmem:[#allocation4 + $0x1ef8] ss:$36 sps:$4 sm:$0xff]   ;;  %v22076_v40 = vld [vmem:[#allocation4 + $0x1f48] ss:$36 sps:$4 sm:$0xff]   ;;  %v22079_v42 = vld [vmem:[#allocation4 + $0x1eb0] ss:$36 sps:$4 sm:$0xff]  }
 0x93f   : > { %v11545_v11 = vadd.f32 %v11536_v9, %v11515_v50  ;;  %13085 = vmatpush1.bf16.msra.mxu0 %v22010_v52  ;;  %v22033_v9 = vld [vmem:[#allocation4 + $0x1c74] ss:$36 sps:$4 sm:$0xff]   ;;  %v22084_v43 = vld [vmem:[#allocation4 + $0x1f04] ss:$36 sps:$4 sm:$0xff]   ;;  %v22087_v20 = vld [vmem:[#allocation4 + $0x1e6c] ss:$36 sps:$4 sm:$0xff]  }
 0x940   : > { %v11554_v53 = vmax.f32 %v11542_v35, 0.0  ;;  %13086 = vmatprep.subr.bf16.mxu0 %v22018_v57  ;;  %v22081_v55 = vld [vmem:[#allocation4 + $0x1eb4] ss:$36 sps:$4 sm:$0xff]   ;;  %v22082_v52 = vld [vmem:[#allocation4 + $0x1f00] ss:$36 sps:$4 sm:$0xff]  }
 0x941   : > { %v11557_v46 = vmax.f32 %v11545_v11, 0.0  ;;  %v22090_v26 = vld [vmem:[#allocation4 + $0x1ebc] ss:$36 sps:$4 sm:$0xff]   ;;  %v22085_v57 = vld [vmem:[#allocation4 + $0x1e68] ss:$36 sps:$4 sm:$0xff]  }
 0x942   : > { %v22088_v50 = vld [vmem:[#allocation4 + $0x1eb8] ss:$36 sps:$4 sm:$0xff]   ;;  %v22093_v35 = vld [vmem:[#allocation4 + $0x1e24] ss:$36 sps:$4 sm:$0xff]  }
 0x943   : > { %v24290_v4 = vpack.c.bf16 %v11557_v46, %v11554_v53  ;;  %13087 = vmatpush1.bf16.msra.mxu0 %v22016_v13  ;;  %v22096_v11 = vld [vmem:[#allocation4 + $0x1e74] ss:$36 sps:$4 sm:$0xff]   ;;  %v22091_v13 = vld [vmem:[#allocation4 + $0x1e20] ss:$36 sps:$4 sm:$0xff]   ;;  %v22102_v46 = vld [vmem:[#allocation4 + $0x1e2c] ss:$36 sps:$4 sm:$0xff]  }
 0x944   : > { %13088 = vmatprep.subr.bf16.mxu0 %v22024_v32  ;;  %v22094_v53 = vld [vmem:[#allocation4 + $0x1e70] ss:$36 sps:$4 sm:$0xff]   ;;  %v22099_v32 = vld [vmem:[#allocation4 + $0x1ddc] ss:$36 sps:$4 sm:$0xff]  }
 0x945   : > { %13001 = vmatmul.mubr.bf16.vlgmr.msra.gmra.mxu1 %v24290_v4 }
 0x946   : > { %13022 = vmatpush1.bf16.msra.mxu1 %v22019_v62  ;;  %13010 = vmatprep.mubr.bf16.mxu1 %v24896_v24  ;;  %v22097_v62 = vld [vmem:[#allocation4 + $0x1dd8] ss:$36 sps:$4 sm:$0xff]  }
 0x947   : > { %13089 = vmatpush1.bf16.msra.mxu0 %v22022_v12  ;;  %13023 = vmatprep.subr.bf16.mxu1 %v22027_v38  ;;  %v22100_v12 = vld [vmem:[#allocation4 + $0x1e28] ss:$36 sps:$4 sm:$0xff]   ;;  %v22105_v38 = vld [vmem:[#allocation4 + $0x1d94] ss:$36 sps:$4 sm:$0xff]  }
 0x948   : > { %13127 = vmatprep.subr.bf16.mxu0 %v22030_v36  ;;  %v22108_v36 = vld [vmem:[#allocation4 + $0x1de4] ss:$36 sps:$4 sm:$0xff]  }
 0x94a   : > { %13024 = vmatpush1.bf16.msra.mxu1 %v22025_v59  ;;  %13107 = vmatmul.mubr.bf16.vlgmr.msra.gmra.mxu0 %v24290_v4  ;;  %v22103_v59 = vld [vmem:[#allocation4 + $0x1d90] ss:$36 sps:$4 sm:$0xff]  }
 0x94b   : > { %13128 = vmatpush1.bf16.msra.mxu0 %v22028_v10  ;;  %13025 = vmatprep.subr.bf16.mxu1 %v22033_v9  ;;  %v22106_v10 = vld [vmem:[#allocation4 + $0x1de0] ss:$36 sps:$4 sm:$0xff]   ;;  %v22111_v9 = vld [vmem:[#allocation4 + $0x1d4c] ss:$36 sps:$4 sm:$0xff]  }
 0x94c   : > { %13129 = vmatprep.subr.bf16.mxu0 %v22036_v18  ;;  %13116 = vmatprep.mubr.bf16.mxu0 %v24896_v24  ;;  %v22114_v18 = vld [vmem:[#allocation4 + $0x1d9c] ss:$36 sps:$4 sm:$0xff]  }
 0x94d   : > { %13011 = vmatmul.mubr.bf16.gmra.mxu1 %v24288_v45 }
 0x94e   : > { %13026 = vmatpush1.bf16.msra.mxu1 %v22031_v15  ;;  %13053 = vmatprep.mubr.bf16.mxu1 %v24251_v3  ;;  %v22109_v15 = vld [vmem:[#allocation4 + $0x1d48] ss:$36 sps:$4 sm:$0xff]  }
 0x94f   : > { %13130 = vmatpush1.bf16.msra.mxu0 %v22034_v25  ;;  %13027 = vmatprep.subr.bf16.mxu1 %v22039_v37  ;;  %v22112_v25 = vld [vmem:[#allocation4 + $0x1d98] ss:$36 sps:$4 sm:$0xff]   ;;  %v22117_v37 = vld [vmem:[#allocation4 + $0x218c] ss:$36 sps:$4 sm:$0xff]  }
 0x950   : > { %13131 = vmatprep.subr.bf16.mxu0 %v22042_v58  ;;  %v22120_v58 = vld [vmem:[#allocation4 + $0x1d54] ss:$36 sps:$4 sm:$0xff]  }
 0x952   : > { %13028 = vmatpush1.bf16.msra.mxu1 %v22037_v30  ;;  %13117 = vmatmul.mubr.bf16.gmra.mxu0 %v24288_v45  ;;  %v22115_v30 = vld [vmem:[#allocation4 + $0x2188] ss:$36 sps:$4 sm:$0xff]  }
 0x953   : > { %13132 = vmatpush1.bf16.msra.mxu0 %v22040_v63  ;;  %13159 = vmatprep.mubr.bf16.mxu0 %v24251_v3  ;;  %v22118_v63 = vld [vmem:[#allocation4 + $0x1d50] ss:$36 sps:$4 sm:$0xff]  }
 0x954   : > { %13029 = vmatprep.subr.bf16.mxu1 %v22045_v54  ;;  %13133 = vmatprep.subr.bf16.mxu0 %v22048_v19  ;;  %v22123_v54 = vld [vmem:[#allocation4 + $0x2144] ss:$36 sps:$4 sm:$0xff]   ;;  %v22126_v19 = vld [vmem:[#allocation4 + $0x2194] ss:$36 sps:$4 sm:$0xff]  }
 0x956   : > { %13030 = vmatpush1.bf16.msra.mxu1 %v22043_v14  ;;  %v22121_v14 = vld [vmem:[#allocation4 + $0x2140] ss:$36 sps:$4 sm:$0xff]  }
 0x957   : > { %13134 = vmatpush1.bf16.msra.mxu0 %v22046_v31  ;;  %13031 = vmatprep.subr.bf16.mxu1 %v22051_v16  ;;  %v22124_v31 = vld [vmem:[#allocation4 + $0x2190] ss:$36 sps:$4 sm:$0xff]   ;;  %v22129_v16 = vld [vmem:[#allocation4 + $0x20fc] ss:$36 sps:$4 sm:$0xff]  }
 0x958   : > { %13135 = vmatprep.subr.bf16.mxu0 %v22054_v60  ;;  %v22132_v60 = vld [vmem:[#allocation4 + $0x214c] ss:$36 sps:$4 sm:$0xff]  }
 0x95a   : > { %13032 = vmatpush1.bf16.msra.mxu1 %v22049_v61  ;;  %v22127_v61 = vld [vmem:[#allocation4 + $0x20f8] ss:$36 sps:$4 sm:$0xff]  }
 0x95b   : > { %13136 = vmatpush1.bf16.msra.mxu0 %v22052_v2  ;;  %13033 = vmatprep.subr.bf16.mxu1 %v22057_v48  ;;  %v22130_v2 = vld [vmem:[#allocation4 + $0x2148] ss:$36 sps:$4 sm:$0xff]   ;;  %v22135_v48 = vld [vmem:[#allocation4 + $0x20b4] ss:$36 sps:$4 sm:$0xff]  }
 0x95c   : > { %13137 = vmatprep.subr.bf16.mxu0 %v22060_v34  ;;  %v22138_v34 = vld [vmem:[#allocation4 + $0x2104] ss:$36 sps:$4 sm:$0xff]  }
 0x95e   : > { %13034 = vmatpush1.bf16.msra.mxu1 %v22055_v1  ;;  %v22133_v1 = vld [vmem:[#allocation4 + $0x20b0] ss:$36 sps:$4 sm:$0xff]  }
 0x95f   : > { %13138 = vmatpush1.bf16.msra.mxu0 %v22058_v0  ;;  %13035 = vmatprep.subr.bf16.mxu1 %v22063_v51  ;;  %v22136_v0 = vld [vmem:[#allocation4 + $0x2100] ss:$36 sps:$4 sm:$0xff]   ;;  %v22141_v51 = vld [vmem:[#allocation4 + $0x206c] ss:$36 sps:$4 sm:$0xff]  }
 0x960   : > { %13139 = vmatprep.subr.bf16.mxu0 %v22066_v56  ;;  %v22144_v56 = vld [vmem:[#allocation4 + $0x20bc] ss:$36 sps:$4 sm:$0xff]  }
 0x962   : > { %13036 = vmatpush1.bf16.msra.mxu1 %v22061_v17  ;;  %v22139_v17 = vld [vmem:[#allocation4 + $0x2068] ss:$36 sps:$4 sm:$0xff]  }
 0x963   : > { %13140 = vmatpush1.bf16.msra.mxu0 %v22064_v33  ;;  %13037 = vmatprep.subr.bf16.mxu1 %v22069_v21  ;;  %v22142_v33 = vld [vmem:[#allocation4 + $0x20b8] ss:$36 sps:$4 sm:$0xff]   ;;  %v22147_v21 = vld [vmem:[#allocation4 + $0x2024] ss:$36 sps:$4 sm:$0xff]  }
 0x964   : > { %13141 = vmatprep.subr.bf16.mxu0 %v22072_v39  ;;  %v22150_v39 = vld [vmem:[#allocation4 + $0x2074] ss:$36 sps:$4 sm:$0xff]  }
 0x966   : > { %13038 = vmatpush2.bf16.msra.mxu1 %v22067_v27  ;;  %v22145_v27 = vld [vmem:[#allocation4 + $0x2020] ss:$36 sps:$4 sm:$0xff]  }
 0x967   : > { %13142 = vmatpush1.bf16.msra.mxu0 %v22070_v44  ;;  %13039 = vmatprep.subr.bf16.mxu1 %v22075_v23  ;;  %v22148_v44 = vld [vmem:[#allocation4 + $0x2070] ss:$36 sps:$4 sm:$0xff]   ;;  %v22153_v23 = vld [vmem:[#allocation4 + $0x1fdc] ss:$36 sps:$4 sm:$0xff]  }
 0x968   : > { %13143 = vmatprep.subr.bf16.mxu0 %v22078_v6  ;;  %v22156_v6 = vld [vmem:[#allocation4 + $0x202c] ss:$36 sps:$4 sm:$0xff]  }
 0x96a   : > { %13040 = vmatpush2.bf16.msra.mxu1 %v22073_v5  ;;  %v22151_v5 = vld [vmem:[#allocation4 + $0x1fd8] ss:$36 sps:$4 sm:$0xff]  }
 0x96b   : > { %13144 = vmatpush2.bf16.msra.mxu0 %v22076_v40  ;;  %13041 = vmatprep.subr.bf16.mxu1 %v22081_v55  ;;  %v22154_v40 = vld [vmem:[#allocation4 + $0x2028] ss:$36 sps:$4 sm:$0xff]   ;;  %v22159_v55 = vld [vmem:[#allocation4 + $0x1f94] ss:$36 sps:$4 sm:$0xff]  }
 0x96c   : > { %13145 = vmatprep.subr.bf16.mxu0 %v22084_v43  ;;  %v22162_v43 = vld [vmem:[#allocation4 + $0x1fe4] ss:$36 sps:$4 sm:$0xff]  }
 0x96e   : > { %13042 = vmatpush2.bf16.msra.mxu1 %v22079_v42  ;;  %v22157_v42 = vld [vmem:[#allocation4 + $0x1f90] ss:$36 sps:$4 sm:$0xff]  }
 0x96f   : > { %13146 = vmatpush2.bf16.msra.mxu0 %v22082_v52  ;;  %13043 = vmatprep.subr.bf16.mxu1 %v22087_v20  ;;  %v22160_v52 = vld [vmem:[#allocation4 + $0x1fe0] ss:$36 sps:$4 sm:$0xff]   ;;  %v22165_v20 = vld [vmem:[#allocation4 + $0x1d14] ss:$36 sps:$4 sm:$0xff]  }
 0x970   : > { %13147 = vmatprep.subr.bf16.mxu0 %v22090_v26  ;;  %v22168_v26 = vld [vmem:[#allocation4 + $0x1f9c] ss:$36 sps:$4 sm:$0xff]  }
 0x972   : > { %13044 = vmatpush2.bf16.msra.mxu1 %v22085_v57  ;;  %v22163_v57 = vld [vmem:[#allocation4 + $0x1d10] ss:$36 sps:$4 sm:$0xff]  }
 0x973   : > { %13148 = vmatpush2.bf16.msra.mxu0 %v22088_v50  ;;  %13045 = vmatprep.subr.bf16.mxu1 %v22093_v35  ;;  %v22166_v50 = vld [vmem:[#allocation4 + $0x1f98] ss:$36 sps:$4 sm:$0xff]   ;;  %v22171_v35 = vld [vmem:[#allocation4 + $0x1ccc] ss:$36 sps:$4 sm:$0xff]  }
 0x974   : > { %13149 = vmatprep.subr.bf16.mxu0 %v22096_v11  ;;  %v22172_v11 = vld [vmem:[#allocation4 + $0x1f58] ss:$36 sps:$4 sm:$0xff]  }
 0x976   : > { %13046 = vmatpush2.bf16.msra.mxu1 %v22091_v13  ;;  %v22169_v13 = vld [vmem:[#allocation4 + $0x1cc8] ss:$36 sps:$4 sm:$0xff]  }
 0x977   : > { %13150 = vmatpush2.bf16.msra.mxu0 %v22094_v53  ;;  %13047 = vmatprep.subr.bf16.mxu1 %v22099_v32  ;;  %v22173_v53 = vld [vmem:[#allocation4 + $0x1d18] ss:$36 sps:$4 sm:$0xff]   ;;  %v22176_v32 = vld [vmem:[#allocation4 + $0x1c84] ss:$36 sps:$4 sm:$0xff]  }
 0x978   : > { %13151 = vmatprep.subr.bf16.mxu0 %v22102_v46  ;;  %v22177_v46 = vld [vmem:[#allocation4 + $0x1f10] ss:$36 sps:$4 sm:$0xff]  }
 0x97a   : > { %13048 = vmatpush2.bf16.msra.mxu1 %v22097_v62  ;;  %v22174_v62 = vld [vmem:[#allocation4 + $0x1c80] ss:$36 sps:$4 sm:$0xff]  }
 0x97b   : > { %13152 = vmatpush2.bf16.msra.mxu0 %v22100_v12  ;;  %13049 = vmatprep.subr.bf16.mxu1 %v22105_v38  ;;  %v22178_v12 = vld [vmem:[#allocation4 + $0x1cd0] ss:$36 sps:$4 sm:$0xff]   ;;  %v22181_v38 = vld [vmem:[#allocation4 + $0x1c3c] ss:$36 sps:$4 sm:$0xff]  }
 0x97c   : > { %13153 = vmatprep.subr.bf16.mxu0 %v22108_v36  ;;  %v22182_v36 = vld [vmem:[#allocation4 + $0x1ec8] ss:$36 sps:$4 sm:$0xff]  }
 0x97e   : > { %13050 = vmatpush2.bf16.msra.mxu1 %v22103_v59  ;;  %v22179_v59 = vld [vmem:[#allocation4 + $0x1c38] ss:$36 sps:$4 sm:$0xff]  }
 0x97f   : > { %13154 = vmatpush2.bf16.msra.mxu0 %v22106_v10  ;;  %13051 = vmatprep.subr.bf16.mxu1 %v22111_v9  ;;  %v22183_v10 = vld [vmem:[#allocation4 + $0x1c88] ss:$36 sps:$4 sm:$0xff]   ;;  %v22186_v9 = vld [vmem:[#allocation4 + $0x1bf4] ss:$36 sps:$4 sm:$0xff]  }
 0x980   : > { %13155 = vmatprep.subr.bf16.mxu0 %v22114_v18  ;;  %v22187_v18 = vld [vmem:[#allocation4 + $0x1e80] ss:$36 sps:$4 sm:$0xff]  }
 0x982   : > { %13052 = vmatpush2.bf16.msra.mxu1 %v22109_v15  ;;  %v22184_v15 = vld [vmem:[#allocation4 + $0x1bf0] ss:$36 sps:$4 sm:$0xff]  }
 0x983   : > { %13156 = vmatpush2.bf16.msra.mxu0 %v22112_v25  ;;  %13180 = vmatprep.subr.bf16.mxu1 %v22117_v37  ;;  %v22188_v25 = vld [vmem:[#allocation4 + $0x1c40] ss:$36 sps:$4 sm:$0xff]   ;;  %v22191_v37 = vld [vmem:[#allocation4 + $0x1bac] ss:$36 sps:$4 sm:$0xff]  }
 0x984   : > { %13157 = vmatprep.subr.bf16.mxu0 %v22120_v58  ;;  %v22192_v58 = vld [vmem:[#allocation4 + $0x1e38] ss:$36 sps:$4 sm:$0xff]  }
 0x985   : > { %13054 = vmatmul.mubr.bf16.vlgmr.msra.gmra.mxu1 %v24253_v49 }
 0x986   : > { %13063 = vmatprep.mubr.bf16.mxu1 %v24255_v41  ;;  %13181 = vmatpush1.bf16.msra.mxu1 %v22115_v30  ;;  %v22189_v30 = vld [vmem:[#allocation4 + $0x1ba8] ss:$36 sps:$4 sm:$0xff]  }
 0x987   : > { %13158 = vmatpush2.bf16.msra.mxu0 %v22118_v63  ;;  %13182 = vmatprep.subr.bf16.mxu1 %v22123_v54  ;;  %v22193_v63 = vld [vmem:[#allocation4 + $0x1bf8] ss:$36 sps:$4 sm:$0xff]   ;;  %v22196_v54 = vld [vmem:[#allocation4 + $0x1b64] ss:$36 sps:$4 sm:$0xff]  }
 0x988   : > { %13286 = vmatprep.subr.bf16.mxu0 %v22126_v19  ;;  %v22197_v19 = vld [vmem:[#allocation4 + $0x1df0] ss:$36 sps:$4 sm:$0xff]  }
 0x98a   : > { %13160 = vmatmul.mubr.bf16.vlgmr.msra.gmra.mxu0 %v24253_v49  ;;  %13183 = vmatpush1.bf16.msra.mxu1 %v22121_v14  ;;  %v22194_v14 = vld [vmem:[#allocation4 + $0x1b60] ss:$36 sps:$4 sm:$0xff]  }
 0x98b   : > { %13169 = vmatprep.mubr.bf16.mxu0 %v24255_v41  ;;  %13287 = vmatpush1.bf16.msra.mxu0 %v22124_v31  ;;  %v22198_v31 = vld [vmem:[#allocation4 + $0x1bb0] ss:$36 sps:$4 sm:$0xff]  }
 0x98c   : > { %13184 = vmatprep.subr.bf16.mxu1 %v22129_v16  ;;  %13288 = vmatprep.subr.bf16.mxu0 %v22132_v60  ;;  %v22201_v16 = vld [vmem:[#allocation4 + $0x1b1c] ss:$36 sps:$4 sm:$0xff]  }
 0x98d   : > { %13064 = vmatmul.mubr.bf16.gmra.mxu1 %v24262_v47  ;;  %v22199_v60 = vld [vmem:[#allocation4 + $0x1b18] ss:$36 sps:$4 sm:$0xff]  }
 0x98e   : > { %13185 = vmatpush1.bf16.msra.mxu1 %v22127_v61  ;;  %13212 = vmatprep.mubr.bf16.mxu1 %v24896_v24  ;;  %v22203_v61 = vld [vmem:[#allocation4 + $0x1b68] ss:$36 sps:$4 sm:$0xff]  }
 0x98f   : > { %13289 = vmatpush1.bf16.msra.mxu0 %v22130_v2  ;;  %13186 = vmatprep.subr.bf16.mxu1 %v22135_v48  ;;  %v22206_v2 = vld [vmem:[#allocation4 + $0x1f54] ss:$36 sps:$4 sm:$0xff]   ;;  %v22207_v48 = vld [vmem:[#allocation4 + $0x1d60] ss:$36 sps:$4 sm:$0xff]  }
 0x990   : > { %13290 = vmatprep.subr.bf16.mxu0 %v22138_v34  ;;  %v22204_v34 = vld [vmem:[#allocation4 + $0x1f50] ss:$36 sps:$4 sm:$0xff]  }
 0x992   : > { %13170 = vmatmul.mubr.bf16.gmra.mxu0 %v24262_v47  ;;  %13187 = vmatpush1.bf16.msra.mxu1 %v22133_v1  ;;  %v22208_v1 = vld [vmem:[#allocation4 + $0x1b20] ss:$36 sps:$4 sm:$0xff]  }
 0x993   : > { %13291 = vmatpush1.bf16.msra.mxu0 %v22136_v0  ;;  %13188 = vmatprep.subr.bf16.mxu1 %v22141_v51  ;;  %v22211_v0 = vld [vmem:[#allocation4 + $0x1f0c] ss:$36 sps:$4 sm:$0xff]  }
 0x994   : > { %13292 = vmatprep.subr.bf16.mxu0 %v22144_v56  ;;  %13318 = vmatprep.mubr.bf16.mxu0 %v24896_v24  ;;  %v22209_v51 = vld [vmem:[#allocation4 + $0x1f08] ss:$36 sps:$4 sm:$0xff]  }
 0x995   : > { %v22214_v56 = vld [vmem:[#allocation4 + $0x1ec4] ss:$36 sps:$4 sm:$0xff]  }
 0x996   : > { %13189 = vmatpush1.bf16.msra.mxu1 %v22139_v17  ;;  %v22212_v17 = vld [vmem:[#allocation4 + $0x1ec0] ss:$36 sps:$4 sm:$0xff]  }
 0x997   : > { %13293 = vmatpush1.bf16.msra.mxu0 %v22142_v33  ;;  %13190 = vmatprep.subr.bf16.mxu1 %v22147_v21  ;;  %v22217_v33 = vld [vmem:[#allocation4 + $0x1e7c] ss:$36 sps:$4 sm:$0xff]  }
 0x998   : > { %13294 = vmatprep.subr.bf16.mxu0 %v22150_v39  ;;  %v22215_v21 = vld [vmem:[#allocation4 + $0x1e78] ss:$36 sps:$4 sm:$0xff]  }
 0x999   : > { %v22220_v39 = vld [vmem:[#allocation4 + $0x1e34] ss:$36 sps:$4 sm:$0xff]  }
 0x99a   : > { %13191 = vmatpush1.bf16.msra.mxu1 %v22145_v27  ;;  %v22218_v27 = vld [vmem:[#allocation4 + $0x1e30] ss:$36 sps:$4 sm:$0xff]  }
 0x99b   : > { %13295 = vmatpush1.bf16.msra.mxu0 %v22148_v44  ;;  %13192 = vmatprep.subr.bf16.mxu1 %v22153_v23  ;;  %v22223_v44 = vld [vmem:[#allocation4 + $0x1dec] ss:$36 sps:$4 sm:$0xff]  }
 0x99c   : > { %13296 = vmatprep.subr.bf16.mxu0 %v22156_v6  ;;  %v22221_v23 = vld [vmem:[#allocation4 + $0x1de8] ss:$36 sps:$4 sm:$0xff]  }
 0x99d   : > { %v22226_v6 = vld [vmem:[#allocation4 + $0x1da4] ss:$36 sps:$4 sm:$0xff]  }
 0x99e   : > { %13193 = vmatpush1.bf16.msra.mxu1 %v22151_v5  ;;  %v22224_v5 = vld [vmem:[#allocation4 + $0x1da0] ss:$36 sps:$4 sm:$0xff]  }
 0x99f   : > { %13297 = vmatpush1.bf16.msra.mxu0 %v22154_v40  ;;  %13194 = vmatprep.subr.bf16.mxu1 %v22159_v55  ;;  %v22229_v40 = vld [vmem:[#allocation4 + $0x1d5c] ss:$36 sps:$4 sm:$0xff]  }
 0x9a0   : > { %13298 = vmatprep.subr.bf16.mxu0 %v22162_v43  ;;  %v22227_v55 = vld [vmem:[#allocation4 + $0x1d58] ss:$36 sps:$4 sm:$0xff]  }
 0x9a1   : > { %v22230_v43 = vld [vmem:[#allocation4 + $0x2198] ss:$36 sps:$4 sm:$0xff]  }
 0x9a2   : > { %13195 = vmatpush1.bf16.msra.mxu1 %v22157_v42  ;;  %v22231_v42 = vld [vmem:[#allocation4 + $0x2150] ss:$36 sps:$4 sm:$0xff]  }
 0x9a3   : > { %13299 = vmatpush1.bf16.msra.mxu0 %v22160_v52  ;;  %13233 = vmatprep.subr.bf16.mxu1 %v22165_v20  ;;  %v22232_v52 = vld [vmem:[#allocation4 + $0x2108] ss:$36 sps:$4 sm:$0xff]   ;;  %v22233_v20 = vld [vmem:[#allocation4 + $0x20c0] ss:$36 sps:$4 sm:$0xff]  }
 0x9a4   : > { %13300 = vmatprep.subr.bf16.mxu0 %v22168_v26  ;;  %v22234_v26 = vld [vmem:[#allocation4 + $0x2078] ss:$36 sps:$4 sm:$0xff]  }
 0x9a5   : > { %13213 = vmatmul.mubr.bf16.vlgmr.msra.gmra.mxu1 %v24290_v4 }
 0x9a6   : > { %13234 = vmatpush1.bf16.msra.mxu1 %v22163_v57  ;;  %13222 = vmatprep.mubr.bf16.mxu1 %v24896_v24  ;;  %v22235_v57 = vld [vmem:[#allocation4 + $0x2030] ss:$36 sps:$4 sm:$0xff]  }
 0x9a7   : > { %13301 = vmatpush1.bf16.msra.mxu0 %v22166_v50  ;;  %13235 = vmatprep.subr.bf16.mxu1 %v22171_v35  ;;  %v22240_v50 = vld [vmem:[#allocation4 + $0x23bc] ss:$36 sps:$4 sm:$0xff]   ;;  %v22243_v35 = vld [vmem:[#allocation4 + $0x2374] ss:$36 sps:$4 sm:$0xff]  }
 0x9a8   : > { %19827 = vmatprep.subr.bf16.mxu0 %v22172_v11  ;;  %v22237_v11 = vld [vmem:[#allocation4 + $0x1fa0] ss:$36 sps:$4 sm:$0xff]  }
 0x9aa   : > { %13236 = vmatpush1.bf16.msra.mxu1 %v22169_v13  ;;  %13319 = vmatmul.mubr.bf16.vlgmr.msra.gmra.mxu0 %v24290_v4  ;;  %v22246_v13 = vld [vmem:[#allocation4 + $0x232c] ss:$36 sps:$4 sm:$0xff]  }
 0x9ab   : > { %19828 = vmatpush3.bf16.msra.mxu0 %v22173_v53  ;;  %13237 = vmatprep.subr.bf16.mxu1 %v22176_v32  ;;  %v22249_v53 = vld [vmem:[#allocation4 + $0x22e4] ss:$36 sps:$4 sm:$0xff]  }
 0x9ac   : > { %19829 = vmatprep.subr.bf16.mxu0 %v22177_v46  ;;  %13328 = vmatprep.mubr.bf16.mxu0 %v24896_v24  ;;  %v22247_v32 = vld [vmem:[#allocation4 + $0x22e0] ss:$36 sps:$4 sm:$0xff]  }
 0x9ad   : > { %13223 = vmatmul.mubr.bf16.gmra.mxu1 %v24288_v45  ;;  %v22252_v46 = vld [vmem:[#allocation4 + $0x229c] ss:$36 sps:$4 sm:$0xff]  }
 0x9ae   : > { %13238 = vmatpush1.bf16.msra.mxu1 %v22174_v62  ;;  %13265 = vmatprep.mubr.bf16.mxu1 %v24251_v3  ;;  %v22250_v62 = vld [vmem:[#allocation4 + $0x2298] ss:$36 sps:$4 sm:$0xff]  }
 0x9af   : > { %19830 = vmatpush3.bf16.msra.mxu0 %v22178_v12  ;;  %13239 = vmatprep.subr.bf16.mxu1 %v22181_v38  ;;  %v22255_v12 = vld [vmem:[#allocation4 + $0x2254] ss:$36 sps:$4 sm:$0xff]  }
 0x9b0   : > { %19831 = vmatprep.subr.bf16.mxu0 %v22182_v36  ;;  %v22253_v38 = vld [vmem:[#allocation4 + $0x2250] ss:$36 sps:$4 sm:$0xff]  }
 0x9b1   : > { %v22258_v36 = vld [vmem:[#allocation4 + $0x220c] ss:$36 sps:$4 sm:$0xff]  }
 0x9b2   : > { %13240 = vmatpush1.bf16.msra.mxu1 %v22179_v59  ;;  %13329 = vmatmul.mubr.bf16.gmra.mxu0 %v24288_v45  ;;  %v22256_v59 = vld [vmem:[#allocation4 + $0x2208] ss:$36 sps:$4 sm:$0xff]  }
 0x9b3   : > { %19832 = vmatpush3.bf16.msra.mxu0 %v22183_v10  ;;  %13371 = vmatprep.mubr.bf16.mxu0 %v24251_v3  ;;  %v22202_v3 = vld [vmem:[#allocation4 + $0x1da8] ss:$36 sps:$4 sm:$0xff]  }
 0x9b4   : > { %13241 = vmatprep.subr.bf16.mxu1 %v22186_v9  ;;  %19833 = vmatprep.subr.bf16.mxu0 %v22187_v18  ;;  %v22261_v10 = vld [vmem:[#allocation4 + $0x21c4] ss:$36 sps:$4 sm:$0xff]   ;;  %v22264_v9 = vld [vmem:[#allocation4 + $0x25fc] ss:$36 sps:$4 sm:$0xff]  }
 0x9b6   : > { %13242 = vmatpush1.bf16.msra.mxu1 %v22184_v15  ;;  %v22262_v15 = vld [vmem:[#allocation4 + $0x25f8] ss:$36 sps:$4 sm:$0xff]  }
 0x9b7   : > { %19834 = vmatpush3.bf16.msra.mxu0 %v22188_v25  ;;  %13243 = vmatprep.subr.bf16.mxu1 %v22191_v37  ;;  %v22267_v25 = vld [vmem:[#allocation4 + $0x25b4] ss:$36 sps:$4 sm:$0xff]  }
 0x9b8   : > { %19835 = vmatprep.subr.bf16.mxu0 %v22192_v58  ;;  %v22265_v58 = vld [vmem:[#allocation4 + $0x25b0] ss:$36 sps:$4 sm:$0xff]  }
 0x9ba   : > { %13244 = vmatpush1.bf16.msra.mxu1 %v22189_v30 }
 0x9bb   : > { %19836 = vmatpush3.bf16.msra.mxu0 %v22193_v63  ;;  %13245 = vmatprep.subr.bf16.mxu1 %v22196_v54  ;;  %v22270_v63 = vld [vmem:[#allocation4 + $0x256c] ss:$36 sps:$4 sm:$0xff]  }
 0x9bc   : > { %19837 = vmatprep.subr.bf16.mxu0 %v22197_v19  ;;  %v22268_v54 = vld [vmem:[#allocation4 + $0x2568] ss:$36 sps:$4 sm:$0xff]  }
 0x9be   : > { %13246 = vmatpush1.bf16.msra.mxu1 %v22194_v14 }
 0x9bf   : > { %19838 = vmatpush3.bf16.msra.mxu0 %v22198_v31  ;;  %13247 = vmatprep.subr.bf16.mxu1 %v22201_v16  ;;  %v22273_v31 = vld [vmem:[#allocation4 + $0x2524] ss:$36 sps:$4 sm:$0xff]  }
 0x9c0   : > { %19839 = vmatprep.subr.bf16.mxu0 %v22202_v3  ;;  %v22271_v16 = vld [vmem:[#allocation4 + $0x2520] ss:$36 sps:$4 sm:$0xff]  }
 0x9c2   : > { %13248 = vmatpush1.bf16.msra.mxu1 %v22199_v60 }
 0x9c3   : > { %19840 = vmatpush3.bf16.msra.mxu0 %v22203_v61  ;;  %13249 = vmatprep.subr.bf16.mxu1 %v22206_v2  ;;  %v22276_v61 = vld [vmem:[#allocation4 + $0x24dc] ss:$36 sps:$4 sm:$0xff]  }
 0x9c4   : > { %19841 = vmatprep.subr.bf16.mxu0 %v22207_v48  ;;  %v22274_v2 = vld [vmem:[#allocation4 + $0x24d8] ss:$36 sps:$4 sm:$0xff]  }
 0x9c6   : > { %13250 = vmatpush2.bf16.msra.mxu1 %v22204_v34 }
 0x9c7   : > { %19842 = vmatpush3.bf16.msra.mxu0 %v22208_v1  ;;  %13251 = vmatprep.subr.bf16.mxu1 %v22211_v0  ;;  %v22279_v1 = vld [vmem:[#allocation4 + $0x2494] ss:$36 sps:$4 sm:$0xff]  }
 0x9c8   : > { %14926 = vmatprep.subr.bf16.mxu0 %v22240_v50  ;;  %v22277_v0 = vld [vmem:[#allocation4 + $0x2490] ss:$36 sps:$4 sm:$0xff]   ;;  %v22303_v50 = vld [vmem:[#allocation4 + $0x2764] ss:$36 sps:$4 sm:$0xff]  }
 0x9ca   : > { %13252 = vmatpush2.bf16.msra.mxu1 %v22209_v51  ;;  %13372 = vmatmul.mubr.bf16.vlgmr.msra.gmra.mxu0 %v24253_v49 }
 0x9cb   : > { %13379 = vmatprep.mubr.bf16.mxu0 %v24255_v41  ;;  %13253 = vmatprep.subr.bf16.mxu1 %v22214_v56 }
 0x9ce   : > { %13254 = vmatpush2.bf16.msra.mxu1 %v22212_v17  ;;  %v22282_v17 = vld [vmem:[#allocation4 + $0x244c] ss:$36 sps:$4 sm:$0xff]  }
 0x9cf   : > { %13255 = vmatprep.subr.bf16.mxu1 %v22217_v33  ;;  %v22280_v33 = vld [vmem:[#allocation4 + $0x2448] ss:$36 sps:$4 sm:$0xff]  }
 0x9d2   : > { %13256 = vmatpush2.bf16.msra.mxu1 %v22215_v21  ;;  %13380 = vmatmul.mubr.bf16.gmra.mxu0 %v24262_v47 }
 0x9d3   : > { %13257 = vmatprep.subr.bf16.mxu1 %v22220_v39 }
 0x9d6   : > { %13258 = vmatpush2.bf16.msra.mxu1 %v22218_v27  ;;  %v22285_v27 = vld [vmem:[#allocation4 + $0x283c] ss:$36 sps:$4 sm:$0xff]  }
 0x9d7   : > { %13259 = vmatprep.subr.bf16.mxu1 %v22223_v44 }
 0x9da   : > { %13260 = vmatpush2.bf16.msra.mxu1 %v22221_v23  ;;  %v22283_v23 = vld [vmem:[#allocation4 + $0x2838] ss:$36 sps:$4 sm:$0xff]  }
 0x9db   : > { %13261 = vmatprep.subr.bf16.mxu1 %v22226_v6  ;;  %v22288_v6 = vld [vmem:[#allocation4 + $0x2404] ss:$36 sps:$4 sm:$0xff]  }
 0x9de   : > { %13262 = vmatpush2.bf16.msra.mxu1 %v22224_v5  ;;  %v22286_v5 = vld [vmem:[#allocation4 + $0x2400] ss:$36 sps:$4 sm:$0xff]  }
 0x9df   : > { %13263 = vmatprep.subr.bf16.mxu1 %v22229_v40 }
 0x9e2   : > { %13264 = vmatpush2.bf16.msra.mxu1 %v22227_v55  ;;  %v22291_v55 = vld [vmem:[#allocation4 + $0x27f4] ss:$36 sps:$4 sm:$0xff]  }
 0x9e3   : > { %20061 = vmatprep.subr.bf16.mxu1 %v22230_v43 }
 0x9e5   : > { %13266 = vmatmul.mubr.bf16.vlgmr.msra.gmra.mxu1 %v24253_v49  ;;  %v22236_v49 = vld [vmem:[#allocation4 + $0x1fe8] ss:$36 sps:$4 sm:$0xff]  }
 0x9e6   : > { %13275 = vmatprep.mubr.bf16.mxu1 %v24255_v41  ;;  %20062 = vmatpush3.bf16.msra.mxu1 %v22230_v43  ;;  %v22238_v41 = vld [vmem:[#allocation4 + $0x23b8] ss:$36 sps:$4 sm:$0xff]  }
 0x9e7   : > { %20063 = vmatprep.subr.bf16.mxu1 %v22231_v42  ;;  %14927 = vmatpush1.bf16.msra.mxu0 %v22238_v41 }
 0x9e8   : > { %14928 = vmatprep.subr.bf16.mxu0 %v22243_v35 }
 0x9ea   : > { %20064 = vmatpush3.bf16.msra.mxu1 %v22231_v42  ;;  %v24325_v18 = vpop.f32.mrf.mxu0  ;;  %v22289_v42 = vld [vmem:[#allocation4 + $0x27f0] ss:$36 sps:$4 sm:$0xff]  }
 0x9eb   : > { %20065 = vmatprep.subr.bf16.mxu1 %v22232_v52 }
 0x9ec   : > { %v24327_v37 = vpop.f32.mrf.mxu0 }
 0x9ed   : > { %13276 = vmatmul.mubr.bf16.gmra.mxu1 %v24262_v47  ;;  %v22241_v47 = vld [vmem:[#allocation4 + $0x2370] ss:$36 sps:$4 sm:$0xff]  }
 0x9ee   : > { %20066 = vmatpush3.bf16.msra.mxu1 %v22232_v52  ;;  %20077 = vmatprep.mubr.bf16.mxu1 %v24290_v4  ;;  %v22244_v4 = vld [vmem:[#allocation4 + $0x2328] ss:$36 sps:$4 sm:$0xff]   ;;  %v24329_v30 = vpop.f32.mrf.mxu0 }
 0x9ef   : > { %20067 = vmatprep.subr.bf16.mxu1 %v22233_v20  ;;  %14929 = vmatpush1.bf16.msra.mxu0 %v22241_v47  ;;  %v22294_v52 = vld [vmem:[#allocation4 + $0x2844] ss:$36 sps:$4 sm:$0xff]  }
 0x9f0   : > { %14930 = vmatprep.subr.bf16.mxu0 %v22246_v13  ;;  %v24331_v19 = vpop.f32.mrf.mxu0  ;;  %v22301_v47 = vld [vmem:[#allocation4 + $0x2760] ss:$36 sps:$4 sm:$0xff]  }
 0x9f2   : > { %20068 = vmatpush3.bf16.msra.mxu1 %v22233_v20  ;;  %v24335_v3 = vpop.f32.mrf.mxu0 }
 0x9f3   : > { %20069 = vmatprep.subr.bf16.mxu1 %v22234_v26  ;;  %14931 = vmatpush1.bf16.msra.mxu0 %v22244_v4 }
 0x9f4   : > { %14932 = vmatprep.subr.bf16.mxu0 %v22249_v53  ;;  %v24339_v48 = vpop.f32.mrf.mxu0  ;;  %v22309_v53 = vld [vmem:[#allocation4 + $0x271c] ss:$36 sps:$4 sm:$0xff]  }
 0x9f6   : > { %20070 = vmatpush3.bf16.msra.mxu1 %v22234_v26  ;;  %v24343_v51 = vpop.f32.mrf.mxu0  ;;  %v22295_v26 = vld [vmem:[#allocation4 + $0x27a8] ss:$36 sps:$4 sm:$0xff]  }
 0x9f7   : > { %20071 = vmatprep.subr.bf16.mxu1 %v22235_v57  ;;  %14933 = vmatpush1.bf16.msra.mxu0 %v22247_v32 }
 0x9f8   : > { %14934 = vmatprep.subr.bf16.mxu0 %v22252_v46  ;;  %v24347_v21 = vpop.f32.mrf.mxu0 }
 0x9fa   : > { %20072 = vmatpush3.bf16.msra.mxu1 %v22235_v57  ;;  %v22297_v57 = vld [vmem:[#allocation4 + $0x27ac] ss:$36 sps:$4 sm:$0xff]  }
 0x9fb   : > { %20073 = vmatprep.subr.bf16.mxu1 %v22236_v49  ;;  %14935 = vmatpush1.bf16.msra.mxu0 %v22250_v62  ;;  %v22307_v62 = vld [vmem:[#allocation4 + $0x2718] ss:$36 sps:$4 sm:$0xff]  }
 0x9fc   : > { %14936 = vmatprep.subr.bf16.mxu0 %v22255_v12 }
 0x9fe   : > { %20074 = vmatpush3.bf16.msra.mxu1 %v22236_v49 }
 0x9ff   : > { %20075 = vmatprep.subr.bf16.mxu1 %v22237_v11  ;;  %14937 = vmatpush1.bf16.msra.mxu0 %v22253_v38 }
 0xa00   : > { %14938 = vmatprep.subr.bf16.mxu0 %v22258_v36 }
 0xa02   : > { %20076 = vmatpush3.bf16.msra.mxu1 %v22237_v11 }
 0xa03   : > { %14939 = vmatpush1.bf16.msra.mxu0 %v22256_v59  ;;  %14979 = vmatprep.subr.bf16.mxu1 %v22285_v27  ;;  %v22327_v27 = vld [vmem:[#allocation4 + $0x2644] ss:$36 sps:$4 sm:$0xff]  }
 0xa04   : > { %14940 = vmatprep.subr.bf16.mxu0 %v22261_v10  ;;  %v22315_v10 = vld [vmem:[#allocation4 + $0x26d4] ss:$36 sps:$4 sm:$0xff]  }
 0xa05   : > { %20078 = vmatmul.mubr.bf16.vlgmr.msra.gmra.mxu1 %v24288_v45  ;;  %v22259_v45 = vld [vmem:[#allocation4 + $0x21c0] ss:$36 sps:$4 sm:$0xff]   ;;  %v24333_v14 = vpop.f32.mrf.mxu1 }
 0xa06   : > { %15011 = vmatprep.mubr.bf16.mxu1 %v24896_v24  ;;  %14980 = vmatpush1.bf16.msra.mxu1 %v22283_v23 }
 0xa07   : > { %14941 = vmatpush1.bf16.msra.mxu0 %v22259_v45  ;;  %v24337_v60 = vpop.f32.mrf.mxu1  ;;  %14981 = vmatprep.subr.bf16.mxu1 %v22291_v55 }
 0xa08   : > { %14942 = vmatprep.subr.bf16.mxu0 %v22264_v9 }
 0xa09   : > { %v24341_v34 = vpop.f32.mrf.mxu1 }
 0xa0a   : > { %v13108_v44 = vpop.f32.mrf.mxu0  ;;  %14982 = vmatpush1.bf16.msra.mxu1 %v22289_v42 }
 0xa0b   : > { %14943 = vmatpush2.bf16.msra.mxu0 %v22262_v15  ;;  %v24345_v56 = vpop.f32.mrf.mxu1  ;;  %14983 = vmatprep.subr.bf16.mxu1 %v22297_v57  ;;  %v22313_v15 = vld [vmem:[#allocation4 + $0x26d0] ss:$36 sps:$4 sm:$0xff]  }
 0xa0c   : > { %14944 = vmatprep.subr.bf16.mxu0 %v22267_v25  ;;  %v24353_v43 = vpop.f32.mrf.mxu0 }
 0xa0d   : > { %v24349_v39 = vpop.f32.mrf.mxu1 }
 0xa0e   : > { %v13112_v49 = vpop.f32.mrf.mxu0  ;;  %14984 = vmatpush1.bf16.msra.mxu1 %v22295_v26 }
 0xa0f   : > { %14945 = vmatpush2.bf16.msra.mxu0 %v22265_v58  ;;  %v24351_v40 = vpop.f32.mrf.mxu1  ;;  %14985 = vmatprep.subr.bf16.mxu1 %v22303_v50 }
 0xa10   : > { %14946 = vmatprep.subr.bf16.mxu0 %v22270_v63  ;;  %v24359_v35 = vpop.f32.mrf.mxu0 }
 0xa11   : > { %v24355_v20 = vpop.f32.mrf.mxu1 }
 0xa12   : > { %14986 = vmatpush1.bf16.msra.mxu1 %v22301_v47  ;;  %v13118_v32 = vpop.f32.mrf.mxu0 }
 0xa13   : > { %14947 = vmatpush2.bf16.msra.mxu0 %v22268_v54  ;;  %v24357_v41 = vpop.f32.mrf.mxu1  ;;  %14987 = vmatprep.subr.bf16.mxu1 %v22309_v53 }
 0xa14   : > { %14948 = vmatprep.subr.bf16.mxu0 %v22273_v31  ;;  %v24368_v45 = vpop.f32.mrf.mxu0 }
 0xa16   : > { %14988 = vmatpush1.bf16.msra.mxu1 %v22307_v62 }
 0xa17   : > { %14949 = vmatpush2.bf16.msra.mxu0 %v22271_v16  ;;  %14989 = vmatprep.subr.bf16.mxu1 %v22315_v10  ;;  %v22321_v16 = vld [vmem:[#allocation4 + $0x268c] ss:$36 sps:$4 sm:$0xff]  }
 0xa18   : > { %14950 = vmatprep.subr.bf16.mxu0 %v22276_v61  ;;  %v13122_v61 = vpop.f32.mrf.mxu0 }
 0xa1a   : > { %14990 = vmatpush1.bf16.msra.mxu1 %v22313_v15 }
 0xa1b   : > { %14951 = vmatpush2.bf16.msra.mxu0 %v22274_v2  ;;  %14991 = vmatprep.subr.bf16.mxu1 %v22321_v16  ;;  %v24410_v16 = vadd.f32 %v24341_v34, %v24329_v30  ;;  %v13015_v30 = vadd.f32 %v24351_v40, %v24339_v48  ;;  %v24439_v48 = vadd.f32 %v24355_v20, %v24343_v51 }
 0xa1c   : > { %14952 = vmatprep.subr.bf16.mxu0 %v22279_v1  ;;  %v22319_v1 = vld [vmem:[#allocation4 + $0x2688] ss:$36 sps:$4 sm:$0xff]  }
 0xa1e   : > { %14992 = vmatpush1.bf16.msra.mxu1 %v22319_v1  ;;  %v13005_v1 = vadd.f32 %v24337_v60, %v24327_v37 }
 0xa1f   : > { %14953 = vmatpush2.bf16.msra.mxu0 %v22277_v0  ;;  %14993 = vmatprep.subr.bf16.mxu1 %v22327_v27  ;;  %v24888_v27 = vrot.slane %v24410_v16, 7 }
 0xa20   : > { %14954 = vmatprep.subr.bf16.mxu0 %v22282_v17 }
 0xa23   : > { %14955 = vmatpush2.bf16.msra.mxu0 %v22280_v33 }
 0xa24   : > { %14956 = vmatprep.subr.bf16.mxu0 %v22288_v6  ;;  %v22333_v6 = vld [vmem:[#allocation4 + $0x23c4] ss:$36 sps:$4 sm:$0xff]  }
 0xa27   : > { %14957 = vmatpush2.bf16.msra.mxu0 %v22286_v5  ;;  %v24386_v5 = vpop.f32.mrf.mxu0 }
 0xa28   : > { %15085 = vmatprep.subr.bf16.mxu0 %v22294_v52 }
 0xa45   : > { %v13055_v11 = vpop.f32.mrf.mxu1 }
 0xa46   : > { %v24361_v13 = vadd.f32 %v13108_v44, %v13055_v11  ;;  %v22325_v44 = vld [vmem:[#allocation4 + $0x2640] ss:$36 sps:$4 sm:$0xff]  }
 0xa47   : > { %v24363_v4 = vpop.f32.mrf.mxu1  ;;  %14994 = vmatpush1.bf16.msra.mxu1 %v22325_v44 }
 0xa48   : > { %24927 = vst [vmem:[#allocation19_spill] sm:$0xff] %v24361_v13  ;;  %v13439_v36 = vrot.slane %v24361_v13, 7  ;;  %15032 = vmatprep.subr.bf16.mxu1 %v22333_v6 }
 0xa49   : > { %v13059_v46 = vpop.f32.mrf.mxu1 }
 0xa4a   : > { %v13113_v12 = vadd.f32 %v13112_v49, %v13059_v46  ;;  %v13161_v55 = vpop.f32.mrf.mxu0 }
 0xa4b   : > { %v24365_v38 = vpop.f32.mrf.mxu1 }
 0xa4c   : > { %v13442_v59 = vrot.slane %v13113_v12, 7  ;;  %v24388_v42 = vpop.f32.mrf.mxu0 }
 0xa4d   : > { %v13065_v9 = vpop.f32.mrf.mxu1 }
 0xa4e   : > { %v13457_v25 = vsel %vm2303_vm2, %v13439_v36, %v13442_v59  ;;  %v13119_v58 = vadd.f32 %v13118_v32, %v13065_v9  ;;  %v24390_v52 = vpop.f32.mrf.mxu0 }
 0xa4f   : > { %v24374_v63 = vsel %vm373_vm0, %v13113_v12, %v13457_v25  ;;  %v24376_v54 = vpop.f32.mrf.mxu1 }
 0xa50   : > { %24928 = vst [vmem:[#allocation21_spill] sm:$0xff] %v24374_v63  ;;  %v13445_v31 = vrot.slane %v13119_v58, 7  ;;  %v24392_v26 = vpop.f32.mrf.mxu0  ;;  %v13438_v63 = vrot.slane %v13005_v1, 7 }
 0xa51   : > { %v13069_v2 = vpop.f32.mrf.mxu1  ;;  %24929 = vst [vmem:[#allocation20_spill] sm:$0xff] %v24392_v26 }
 0xa52   : > { %v13123_v0 = vadd.f32 %v13122_v61, %v13069_v2  ;;  %v24380_v17 = vsel %vm2303_vm2, %v13442_v59, %v13445_v31  ;;  %v13171_v57 = vpop.f32.mrf.mxu0  ;;  %v13009_v61 = vadd.f32 %v24345_v56, %v24331_v19  ;;  %v13003_v2 = vadd.f32 %v24333_v14, %v24325_v18 }
 0xa53   : > { %v24396_v50 = vpop.f32.mrf.mxu1  ;;  %v24427_v19 = vadd.f32 %v24349_v39, %v24335_v3  ;;  %v13019_v18 = vadd.f32 %v24357_v41, %v24347_v21  ;;  %v13444_v3 = vrot.slane %v13015_v30, 7 }
 0xa54   : > { %v13448_v33 = vrot.slane %v13123_v0, 7  ;;  %v24394_v49 = vpop.f32.mrf.mxu0  ;;  %v13441_v44 = vrot.slane %v13009_v61, 7  ;;  %v13437_v6 = vrot.slane %v13003_v2, 7 }
 0xa56   : > { %v24384_v23 = vsel %vm2303_vm2, %v13445_v31, %v13448_v33  ;;  %v24398_v11 = vpop.f32.mrf.mxu0  ;;  %v13455_v60 = vsel %vm2303_vm2, %v13437_v6, %v24888_v27  ;;  %v13456_v56 = vsel %vm2303_vm2, %v13438_v63, %v13441_v44  ;;  %v13443_v6 = vrot.slane %v24427_v19, 7 }
 0xa57   : > { %v13447_v27 = vrot.slane %v13019_v18, 7  ;;  %v13465_v20 = vsel %vm373_vm0, %v13009_v61, %v13456_v56  ;;  %v13446_v63 = vrot.slane %v24439_v48, 7 }
 0xa58   : > { %v24400_v53 = vpop.f32.mrf.mxu0 }
 0xa65   : > { %v13214_v47 = vpop.f32.mrf.mxu1 }
 0xa66   : > { %v13215_v26 = vadd.f32 %v13214_v47, %v13161_v55  ;;  %v13453_v55 = vsel %vm2303_vm2, %v13441_v44, %v13444_v3 }
 0xa67   : > { %v24402_v32 = vpop.f32.mrf.mxu1 }
 0xa68   : > { %24930 = vst [vmem:[#allocation18_spill] sm:$0xff] %v24402_v32  ;;  %v24452_v32 = vld [vmem:[#allocation6 + $0xc] sm:$0x7]  ;;  %v13510_v48 = vadd.f32 %v13215_v26, %v13005_v1 }
 0xa69   : > { %v13218_v62 = vpop.f32.mrf.mxu1 }
 0xa6a   : > { %v13320_v46 = vpop.f32.mrf.mxu0 }
 0xa6b   : > { %v24404_v36 = vpop.f32.mrf.mxu1 }
 0xa6c   : > { %v13322_v12 = vpop.f32.mrf.mxu0  ;;  %24931 = vst [vmem:[#allocation17_spill] sm:$0xff] %v24404_v36  ;;  %v13464_v36 = vsel %vm373_vm0, %v24410_v16, %v13455_v60 }
 0xa6d   : > { %v13224_v10 = vpop.f32.mrf.mxu1 }
 0xa6e   : > { %v13324_v59 = vpop.f32.mrf.mxu0 }
 0xa6f   : > { %v24406_v15 = vpop.f32.mrf.mxu1 }
 0xa70   : > { %v13326_v9 = vpop.f32.mrf.mxu0 }
 0xa71   : > { %v13228_v58 = vpop.f32.mrf.mxu1 }
 0xa72   : > { %v13330_v25 = vpop.f32.mrf.mxu0  ;;  %v13229_v26 = vadd.f32 %v13228_v58, %v24398_v11 }
 0xa73   : > { %v24418_v0 = vpop.f32.mrf.mxu1 }
 0xa74   : > { %v13332_v31 = vpop.f32.mrf.mxu0 }
 0xa76   : > { %v24420_v33 = vpop.f32.mrf.mxu0 }
 0xa78   : > { %v24431_v37 = vpop.f32.mrf.mxu0 }
 0xa8a   : > { %v24443_v39 = vpop.f32.mrf.mxu0 }
 0xa8c   : > { %v24460_v47 = vpop.f32.mrf.mxu0 }
 0xaa5   : > { %v13267_v34 = vpop.f32.mrf.mxu1 }
 0xaa6   : > { %v13321_v21 = vadd.f32 %v13320_v46, %v13267_v34  ;;  %v13225_v34 = vadd.f32 %v13224_v10, %v13171_v57 }
 0xaa7   : > { %v13269_v14 = vpop.f32.mrf.mxu1 }
 0xaa8   : > { %v13323_v41 = vadd.f32 %v13322_v12, %v13269_v14  ;;  %v13111_v12 = vadd.f32 %v24353_v43, %v24363_v4  ;;  %v13473_v61 = vrot.slane %v13321_v21, 1  ;;  %v13450_v43 = vsel %vm2303_vm2, %v13444_v3, %v13447_v27 }
 0xaa9   : > { %v13271_v40 = vpop.f32.mrf.mxu1  ;;  %v13516_v27 = vadd.f32 %v13453_v55, %v13225_v34  ;;  %v13519_v34 = vadd.f32 %v13450_v43, %v13229_v26 }
 0xaaa   : > { %v13325_v13 = vadd.f32 %v13324_v59, %v13271_v40  ;;  %v13115_v59 = vadd.f32 %v24359_v35, %v24365_v38  ;;  %v13474_v18 = vrot.slane %v13323_v41, 1  ;;  %v13539_v35 = vrot.slane %v24452_v32, %v23339_v28 }
 0xaab   : > { %v13273_v51 = vpop.f32.mrf.mxu1  ;;  %v13509_v56 = vadd.f32 %v13111_v12, %v13003_v2  ;;  %v13121_v41 = vadd.f32 %v24368_v45, %v24376_v54 }
 0xaac   : > { %v13476_v30 = vrot.slane %v13325_v13, 1  ;;  %v13327_v46 = vadd.f32 %v13326_v9, %v13273_v51  ;;  %v13219_v9 = vadd.f32 %v13218_v62, %v24390_v52  ;;  %v24472_v52 = vpop.f32.mrf.mxu0  ;;  %v13543_v62 = vrot.slane %v24452_v32, %v23350_v22 }
 0xaad   : > { %v13277_v19 = vpop.f32.mrf.mxu1 }
 0xaae   : > { %v13477_v14 = vrot.slane %v13327_v46, 1  ;;  %v13331_v60 = vadd.f32 %v13330_v25, %v13277_v19  ;;  %v13491_v38 = vsel %vm2348_vm3, %v13473_v61, %v13476_v30  ;;  %v13512_v25 = vadd.f32 %v13464_v36, %v13115_v59 }
 0xaaf   : > { %v13279_v4 = vpop.f32.mrf.mxu1  ;;  %v13125_v36 = vadd.f32 %v24386_v5, %v24396_v50  ;;  %v13513_v2 = vadd.f32 %v13465_v20, %v13219_v9 }
 0xab0   : > { %v13492_v57 = vsel %vm2348_vm3, %v13474_v18, %v13477_v14  ;;  %v13479_v10 = vrot.slane %v13331_v60, 1  ;;  %v13333_v44 = vadd.f32 %v13332_v31, %v13279_v4  ;;  %v13521_v31 = vadd.f32 %v13509_v56, %v13491_v38 }
 0xab1   : > { %v13281_v1 = vpop.f32.mrf.mxu1  ;;  %v13522_v3 = vadd.f32 %v13510_v48, %v13492_v57 }
 0xab2   : > { %v13488_v40 = vsel %vm2348_vm3, %v13476_v30, %v13479_v10  ;;  %v13480_v21 = vrot.slane %v13333_v44, 1  ;;  %v13528_v59 = vadd.f32 %v13516_v27, %v13333_v44  ;;  %v24486_v30 = vpop.f32.mrf.mxu0  ;;  %v13335_v54 = vadd.f32 %v24420_v33, %v13281_v1  ;;  %v22292_v1 = vld [vmem:[#allocation4 + $0x2840] ss:$36 sps:$4 sm:$0xff]  }
 0xab3   : > { %v13500_v11 = vsel %vm378_vm1, %v13325_v13, %v13488_v40  ;;  %v13283_v58 = vpop.f32.mrf.mxu1  ;;  %v13449_v13 = vsel %vm2303_vm2, %v13443_v6, %v13446_v63  ;;  %v13552_v50 = vadd.f32 %v13543_v62, %v13522_v3  ;;  %v13551_v61 = vadd.f32 %v13539_v35, %v13521_v31  ;;  %v22300_v3 = vld [vmem:[#allocation4 + $0x27fc] ss:$36 sps:$4 sm:$0xff]  }
 0xab4   : > { %v13524_v51 = vadd.f32 %v13512_v25, %v13500_v11  ;;  %v13489_v12 = vsel %vm2348_vm3, %v13477_v14, %v13480_v21  ;;  %v13337_v5 = vadd.f32 %v24431_v37, %v13283_v58  ;;  %v13518_v19 = vadd.f32 %v13449_v13, %v13125_v36  ;;  %v19849_v33 = vpop.f32.mrf.mxu0  ;;  %v22306_v36 = vld [vmem:[#allocation4 + $0x27b4] ss:$36 sps:$4 sm:$0xff]  }
 0xab5   : > { %v13501_v45 = vsel %vm378_vm1, %v13327_v46, %v13489_v12  ;;  %v24932_v14 = vrot.slane %v24410_v16, 7  ;;  %v13558_v46 = vadd.f32 %v13543_v62, %v13528_v59  ;;  %v13564_v57 = vmax.f32 %v13552_v50, 0.0  ;;  %v22312_v59 = vld [vmem:[#allocation4 + $0x276c] ss:$36 sps:$4 sm:$0xff]  }
 0xab6   : > { %v13554_v20 = vadd.f32 %v13539_v35, %v13524_v51  ;;  %v13525_v55 = vadd.f32 %v13513_v2, %v13501_v45  ;;  %v13531_v18 = vadd.f32 %v13519_v34, %v13337_v5  ;;  %v13530_v37 = vadd.f32 %v13518_v19, %v13335_v54  ;;  %v19850_v16 = vpop.f32.mrf.mxu0  ;;  %v22304_v2 = vld [vmem:[#allocation4 + $0x27b0] ss:$36 sps:$4 sm:$0xff]  }
 0xab7   : > { %v13452_v48 = vsel %vm2303_vm2, %v24932_v14, %v13443_v6  ;;  %v13563_v10 = vmax.f32 %v13551_v61, 0.0  ;;  %v13570_v25 = vmax.f32 %v13558_v46, 0.0  ;;  %v13227_v31 = vadd.f32 %v24406_v15, %v24394_v49  ;;  %v24933_v61 = vld [vmem:[#allocation18_spill] sm:$0xff] }
 0xab8   : > { %v13555_v9 = vadd.f32 %v13543_v62, %v13525_v55  ;;  %v13515_v43 = vadd.f32 %v13452_v48, %v13121_v41  ;;  %v13566_v4 = vmax.f32 %v13554_v20, 0.0  ;;  %v13561_v38 = vadd.f32 %v13543_v62, %v13531_v18  ;;  %v19852_v62 = vpop.f32.mrf.mxu0  ;;  %v22310_v20 = vld [vmem:[#allocation4 + $0x2768] ss:$36 sps:$4 sm:$0xff]  }
 0xab9   : > { %v13560_v6 = vadd.f32 %v13539_v35, %v13530_v37  ;;  %v19851_v58 = vadd.f32 %v19850_v16, %v19849_v33  ;;  %v13517_v34 = vadd.f32 %v24380_v17, %v13227_v31  ;;  %v13231_v45 = vadd.f32 %v24418_v0, %v24400_v53  ;;  %v22318_v55 = vld [vmem:[#allocation4 + $0x2724] ss:$36 sps:$4 sm:$0xff]  }
 0xaba   : > { %v13567_v63 = vmax.f32 %v13555_v9, 0.0  ;;  %v13527_v44 = vadd.f32 %v13515_v43, %v13331_v60  ;;  %v13573_v56 = vmax.f32 %v13561_v38, 0.0  ;;  %v24500_v27 = vpack.c.bf16 %v13566_v4, %v13563_v10  ;;  %v22298_v60 = vld [vmem:[#allocation4 + $0x27f8] ss:$36 sps:$4 sm:$0xff]   ;;  %v19853_v51 = vpop.f32.mrf.mxu0  ;;  %v22316_v33 = vld [vmem:[#allocation4 + $0x2720] ss:$36 sps:$4 sm:$0xff]  }
 0xabb   : > { %v13572_v41 = vmax.f32 %v13560_v6, 0.0  ;;  %v13547_v5 = vrot.slane %v24452_v32, %v23424_v29  ;;  %v19845_v15 = vadd.f32 %v24460_v47, %v24443_v39  ;;  %v19854_v13 = vadd.f32 %v19853_v51, %v19852_v62  ;;  %v24934_v39 = vld [vmem:[#allocation20_spill] sm:$0xff]  ;;  %v24935_v47 = vld [vmem:[#allocation17_spill] sm:$0xff] }
 0xabc   : > { %v24498_v26 = vpack.c.bf16 %v13567_v63, %v13564_v57  ;;  %v24502_v40 = vpack.c.bf16 %v13573_v56, %v13570_v25  ;;  %v13557_v21 = vadd.f32 %v13539_v35, %v13527_v44  ;;  %v13520_v53 = vadd.f32 %v24384_v23, %v13231_v45  ;;  %v22324_v4 = vld [vmem:[#allocation4 + $0x26dc] ss:$36 sps:$4 sm:$0xff]  }
 0xabd   : > { %v19848_v32 = vadd.f32 %v24486_v30, %v24472_v52  ;;  %v13217_v18 = vadd.f32 %v24933_v61, %v24388_v42  ;;  %v13221_v14 = vadd.f32 %v24935_v47, %v24934_v39  ;;  %v24936_v30 = vld [vmem:[#allocation19_spill] sm:$0xff]  ;;  %v24937_v63 = vld [vmem:[#allocation21_spill] sm:$0xff] }
 0xabe   : > { %14958 = vmatprep.mubr.bf16.mxu0 %v24498_v26  ;;  %v13569_v11 = vmax.f32 %v13557_v21, 0.0  ;;  %v22337_v45 = vld [vmem:[#allocation4 + $0x2378] ss:$36 sps:$4 sm:$0xff]   ;;  %v22364_v47 = vld [vmem:[#allocation4 + $0x22a8] ss:$36 sps:$4 sm:$0xff]  }
 0xabf   : > { %14959 = vmatmul.mubr.bf16.vlgmr.msra.gmra.mxu0 %v24500_v27  ;;  %v13511_v57 = vadd.f32 %v13217_v18, %v24936_v30  ;;  %v13514_v10 = vadd.f32 %v24937_v63, %v13221_v14  ;;  %v22363_v61 = vld [vmem:[#allocation4 + $0x225c] ss:$36 sps:$4 sm:$0xff]   ;;  %v22366_v18 = vld [vmem:[#allocation4 + $0x22ac] ss:$36 sps:$4 sm:$0xff]   ;;  %v22369_v14 = vld [vmem:[#allocation4 + $0x2214] ss:$36 sps:$4 sm:$0xff]  }
 0xac0   : > { %15086 = vmatpush1.bf16.msra.mxu0 %v22292_v1  ;;  %14968 = vmatprep.mubr.bf16.mxu0 %v24502_v40  ;;  %v24509_v12 = vpack.c.bf16 %v13572_v41, %v13569_v11  ;;  %v22322_v1 = vld [vmem:[#allocation4 + $0x26d8] ss:$36 sps:$4 sm:$0xff]   ;;  %v22336_v11 = vld [vmem:[#allocation4 + $0x264c] ss:$36 sps:$4 sm:$0xff]  }
 0xac1   : > { %15087 = vmatprep.subr.bf16.mxu0 %v22300_v3  ;;  %v22330_v3 = vld [vmem:[#allocation4 + $0x2694] ss:$36 sps:$4 sm:$0xff]   ;;  %v22390_v63 = vld [vmem:[#allocation4 + $0x260c] ss:$36 sps:$4 sm:$0xff]  }
 0xac2   : > { %v22361_v39 = vld [vmem:[#allocation4 + $0x2258] ss:$36 sps:$4 sm:$0xff]   ;;  %v22382_v30 = vld [vmem:[#allocation4 + $0x21d0] ss:$36 sps:$4 sm:$0xff]  }
 0xac4   : > { %15088 = vmatpush1.bf16.msra.mxu0 %v22298_v60 }
 0xac5   : > { %v20079_v35 = vpop.f32.mrf.mxu1  ;;  %15089 = vmatprep.subr.bf16.mxu0 %v22306_v36  ;;  %v22328_v36 = vld [vmem:[#allocation4 + $0x2690] ss:$36 sps:$4 sm:$0xff]  }
 0xac6   : > { %v13431_v54 = vadd.f32 %v20079_v35, %v19851_v58  ;;  %v22334_v35 = vld [vmem:[#allocation4 + $0x2648] ss:$36 sps:$4 sm:$0xff]  }
 0xac7   : > { %v13422_v49 = vpop.f32.mrf.mxu1  ;;  %14969 = vmatmul.mubr.bf16.gmra.mxu0 %v24509_v12 }
 0xac8   : > { %v13529_v50 = vadd.f32 %v13517_v34, %v13431_v54  ;;  %15090 = vmatpush1.bf16.msra.mxu0 %v22304_v2  ;;  %15117 = vmatprep.mubr.bf16.mxu0 %v24896_v24  ;;  %v13423_v0 = vadd.f32 %v19845_v15, %v13422_v49  ;;  %v13481_v23 = vrot.slane %v13431_v54, 1  ;;  %v22331_v2 = vld [vmem:[#allocation4 + $0x23c0] ss:$36 sps:$4 sm:$0xff]   ;;  %v22342_v34 = vld [vmem:[#allocation4 + $0x23cc] ss:$36 sps:$4 sm:$0xff]  }
 0xac9   : > { %v20080_v17 = vpop.f32.mrf.mxu1  ;;  %15091 = vmatprep.subr.bf16.mxu0 %v22312_v59  ;;  %v22339_v59 = vld [vmem:[#allocation4 + $0x237c] ss:$36 sps:$4 sm:$0xff]   ;;  %v22340_v54 = vld [vmem:[#allocation4 + $0x23c8] ss:$36 sps:$4 sm:$0xff]   ;;  %v22343_v15 = vld [vmem:[#allocation4 + $0x2330] ss:$36 sps:$4 sm:$0xff]  }
 0xaca   : > { %v13434_v19 = vadd.f32 %v20080_v17, %v19854_v13  ;;  %v13559_v9 = vadd.f32 %v13547_v5, %v13529_v50  ;;  %v13475_v37 = vrot.slane %v13423_v0, 1  ;;  %v22348_v49 = vld [vmem:[#allocation4 + $0x2384] ss:$36 sps:$4 sm:$0xff]   ;;  %v22351_v50 = vld [vmem:[#allocation4 + $0x22ec] ss:$36 sps:$4 sm:$0xff]  }
 0xacb   : > { %v13425_v48 = vpop.f32.mrf.mxu1  ;;  %v22346_v13 = vld [vmem:[#allocation4 + $0x2380] ss:$36 sps:$4 sm:$0xff]   ;;  %v22349_v17 = vld [vmem:[#allocation4 + $0x22e8] ss:$36 sps:$4 sm:$0xff]  }
 0xacc   : > { %v13532_v46 = vadd.f32 %v13520_v53, %v13434_v19  ;;  %v13426_v43 = vadd.f32 %v19848_v32, %v13425_v48  ;;  %15092 = vmatpush1.bf16.msra.mxu0 %v22310_v20  ;;  %v13571_v42 = vmax.f32 %v13559_v9, 0.0  ;;  %v22354_v20 = vld [vmem:[#allocation4 + $0x233c] ss:$36 sps:$4 sm:$0xff]   ;;  %v22357_v53 = vld [vmem:[#allocation4 + $0x22a4] ss:$36 sps:$4 sm:$0xff]  }
 0xacd   : > { %15093 = vmatprep.subr.bf16.mxu0 %v22318_v55  ;;  %v22352_v55 = vld [vmem:[#allocation4 + $0x2338] ss:$36 sps:$4 sm:$0xff]   ;;  %v22355_v0 = vld [vmem:[#allocation4 + $0x22a0] ss:$36 sps:$4 sm:$0xff]   ;;  %v22358_v19 = vld [vmem:[#allocation4 + $0x22f0] ss:$36 sps:$4 sm:$0xff]  }
 0xace   : > { %v13562_v38 = vadd.f32 %v13547_v5, %v13532_v46  ;;  %v13478_v52 = vrot.slane %v13426_v43, 1  ;;  %v22360_v32 = vld [vmem:[#allocation4 + $0x22f4] ss:$36 sps:$4 sm:$0xff]   ;;  %v22372_v48 = vld [vmem:[#allocation4 + $0x2264] ss:$36 sps:$4 sm:$0xff]  }
 0xacf   : > { %v22367_v9 = vld [vmem:[#allocation4 + $0x2210] ss:$36 sps:$4 sm:$0xff]   ;;  %v22370_v46 = vld [vmem:[#allocation4 + $0x2260] ss:$36 sps:$4 sm:$0xff]  }
 0xad0   : > { %v13574_v44 = vmax.f32 %v13562_v38, 0.0  ;;  %v13490_v56 = vsel %vm2348_vm3, %v13478_v52, %v13481_v23  ;;  %v13493_v25 = vsel %vm2348_vm3, %v13475_v37, %v13478_v52  ;;  %15094 = vmatpush1.bf16.msra.mxu0 %v22316_v33  ;;  %v22378_v33 = vld [vmem:[#allocation4 + $0x221c] ss:$36 sps:$4 sm:$0xff]   ;;  %v22381_v37 = vld [vmem:[#allocation4 + $0x2604] ss:$36 sps:$4 sm:$0xff]  }
 0xad1   : > { %v13502_v16 = vsel %vm378_vm1, %v13426_v43, %v13490_v56  ;;  %v13523_v6 = vadd.f32 %v13511_v57, %v13493_v25  ;;  %15095 = vmatprep.subr.bf16.mxu0 %v22324_v4  ;;  %v22375_v43 = vld [vmem:[#allocation4 + $0x21cc] ss:$36 sps:$4 sm:$0xff]   ;;  %v22376_v23 = vld [vmem:[#allocation4 + $0x2218] ss:$36 sps:$4 sm:$0xff]   ;;  %v22379_v52 = vld [vmem:[#allocation4 + $0x2600] ss:$36 sps:$4 sm:$0xff]  }
 0xad2   : > { %v24535_v21 = vpack.c.bf16 %v13574_v44, %v13571_v42  ;;  %v13526_v60 = vadd.f32 %v13514_v10, %v13502_v16  ;;  %v22373_v4 = vld [vmem:[#allocation4 + $0x21c8] ss:$36 sps:$4 sm:$0xff]   ;;  %v22384_v38 = vld [vmem:[#allocation4 + $0x21d4] ss:$36 sps:$4 sm:$0xff]   ;;  %v22387_v57 = vld [vmem:[#allocation4 + $0x25bc] ss:$36 sps:$4 sm:$0xff]  }
 0xad3   : > { %v13553_v62 = vadd.f32 %v13547_v5, %v13523_v6  ;;  %v22385_v10 = vld [vmem:[#allocation4 + $0x25b8] ss:$36 sps:$4 sm:$0xff]   ;;  %v22388_v42 = vld [vmem:[#allocation4 + $0x2608] ss:$36 sps:$4 sm:$0xff]   ;;  %v22391_v25 = vld [vmem:[#allocation4 + $0x2570] ss:$36 sps:$4 sm:$0xff]  }
 0xad4   : > { %v13556_v41 = vadd.f32 %v13547_v5, %v13526_v60  ;;  %15096 = vmatpush1.bf16.msra.mxu0 %v22322_v1  ;;  %v22345_v5 = vld [vmem:[#allocation4 + $0x2334] ss:$36 sps:$4 sm:$0xff]   ;;  %v22396_v56 = vld [vmem:[#allocation4 + $0x25c4] ss:$36 sps:$4 sm:$0xff]   ;;  %v22399_v16 = vld [vmem:[#allocation4 + $0x252c] ss:$36 sps:$4 sm:$0xff]  }
 0xad5   : > { %v13565_v31 = vmax.f32 %v13553_v62, 0.0  ;;  %15097 = vmatprep.subr.bf16.mxu0 %v22330_v3  ;;  %v22393_v44 = vld [vmem:[#allocation4 + $0x2574] ss:$36 sps:$4 sm:$0xff]   ;;  %v22394_v1 = vld [vmem:[#allocation4 + $0x25c0] ss:$36 sps:$4 sm:$0xff]  }
 0xad6   : > { %v13568_v58 = vmax.f32 %v13556_v41, 0.0  ;;  %v22402_v6 = vld [vmem:[#allocation4 + $0x257c] ss:$36 sps:$4 sm:$0xff]   ;;  %v22397_v3 = vld [vmem:[#allocation4 + $0x2528] ss:$36 sps:$4 sm:$0xff]  }
 0xad7   : > { %v22400_v60 = vld [vmem:[#allocation4 + $0x2578] ss:$36 sps:$4 sm:$0xff]   ;;  %v22405_v62 = vld [vmem:[#allocation4 + $0x24e4] ss:$36 sps:$4 sm:$0xff]  }
 0xad8   : > { %v24537_v51 = vpack.c.bf16 %v13568_v58, %v13565_v31  ;;  %15098 = vmatpush1.bf16.msra.mxu0 %v22328_v36  ;;  %v22408_v41 = vld [vmem:[#allocation4 + $0x2534] ss:$36 sps:$4 sm:$0xff]   ;;  %v22403_v36 = vld [vmem:[#allocation4 + $0x24e0] ss:$36 sps:$4 sm:$0xff]   ;;  %v22414_v58 = vld [vmem:[#allocation4 + $0x24ec] ss:$36 sps:$4 sm:$0xff]  }
 0xad9   : > { %15099 = vmatprep.subr.bf16.mxu0 %v22336_v11  ;;  %v22406_v31 = vld [vmem:[#allocation4 + $0x2530] ss:$36 sps:$4 sm:$0xff]   ;;  %v22411_v11 = vld [vmem:[#allocation4 + $0x249c] ss:$36 sps:$4 sm:$0xff]  }
 0xada   : > { %15012 = vmatmul.mubr.bf16.vlgmr.msra.gmra.mxu1 %v24537_v51 }
 0xadb   : > { %15033 = vmatpush1.bf16.msra.mxu1 %v22331_v2  ;;  %15021 = vmatprep.mubr.bf16.mxu1 %v24896_v24  ;;  %v22409_v2 = vld [vmem:[#allocation4 + $0x2498] ss:$36 sps:$4 sm:$0xff]  }
 0xadc   : > { %15100 = vmatpush1.bf16.msra.mxu0 %v22334_v35  ;;  %15034 = vmatprep.subr.bf16.mxu1 %v22339_v59  ;;  %v22412_v35 = vld [vmem:[#allocation4 + $0x24e8] ss:$36 sps:$4 sm:$0xff]   ;;  %v22417_v59 = vld [vmem:[#allocation4 + $0x2454] ss:$36 sps:$4 sm:$0xff]  }
 0xadd   : > { %15138 = vmatprep.subr.bf16.mxu0 %v22342_v34  ;;  %v22420_v34 = vld [vmem:[#allocation4 + $0x24a4] ss:$36 sps:$4 sm:$0xff]  }
 0xadf   : > { %15035 = vmatpush1.bf16.msra.mxu1 %v22337_v45  ;;  %15118 = vmatmul.mubr.bf16.vlgmr.msra.gmra.mxu0 %v24537_v51  ;;  %v22415_v45 = vld [vmem:[#allocation4 + $0x2450] ss:$36 sps:$4 sm:$0xff]  }
 0xae0   : > { %15139 = vmatpush1.bf16.msra.mxu0 %v22340_v54  ;;  %15036 = vmatprep.subr.bf16.mxu1 %v22345_v5  ;;  %v22418_v54 = vld [vmem:[#allocation4 + $0x24a0] ss:$36 sps:$4 sm:$0xff]   ;;  %v22423_v5 = vld [vmem:[#allocation4 + $0x240c] ss:$36 sps:$4 sm:$0xff]  }
 0xae1   : > { %15140 = vmatprep.subr.bf16.mxu0 %v22348_v49  ;;  %15127 = vmatprep.mubr.bf16.mxu0 %v24896_v24  ;;  %v22426_v49 = vld [vmem:[#allocation4 + $0x245c] ss:$36 sps:$4 sm:$0xff]  }
 0xae2   : > { %15022 = vmatmul.mubr.bf16.gmra.mxu1 %v24535_v21 }
 0xae3   : > { %15037 = vmatpush1.bf16.msra.mxu1 %v22343_v15  ;;  %15064 = vmatprep.mubr.bf16.mxu1 %v24498_v26  ;;  %v22421_v15 = vld [vmem:[#allocation4 + $0x2408] ss:$36 sps:$4 sm:$0xff]  }
 0xae4   : > { %15141 = vmatpush1.bf16.msra.mxu0 %v22346_v13  ;;  %15038 = vmatprep.subr.bf16.mxu1 %v22351_v50  ;;  %v22424_v13 = vld [vmem:[#allocation4 + $0x2458] ss:$36 sps:$4 sm:$0xff]   ;;  %v22429_v50 = vld [vmem:[#allocation4 + $0x284c] ss:$36 sps:$4 sm:$0xff]  }
 0xae5   : > { %15142 = vmatprep.subr.bf16.mxu0 %v22354_v20  ;;  %v22432_v20 = vld [vmem:[#allocation4 + $0x2414] ss:$36 sps:$4 sm:$0xff]  }
 0xae7   : > { %15039 = vmatpush1.bf16.msra.mxu1 %v22349_v17  ;;  %15128 = vmatmul.mubr.bf16.gmra.mxu0 %v24535_v21  ;;  %v22427_v17 = vld [vmem:[#allocation4 + $0x2848] ss:$36 sps:$4 sm:$0xff]  }
 0xae8   : > { %15143 = vmatpush1.bf16.msra.mxu0 %v22352_v55  ;;  %15170 = vmatprep.mubr.bf16.mxu0 %v24498_v26  ;;  %v22430_v55 = vld [vmem:[#allocation4 + $0x2410] ss:$36 sps:$4 sm:$0xff]  }
 0xae9   : > { %15040 = vmatprep.subr.bf16.mxu1 %v22357_v53  ;;  %15144 = vmatprep.subr.bf16.mxu0 %v22360_v32  ;;  %v22435_v53 = vld [vmem:[#allocation4 + $0x2804] ss:$36 sps:$4 sm:$0xff]   ;;  %v22438_v32 = vld [vmem:[#allocation4 + $0x2854] ss:$36 sps:$4 sm:$0xff]  }
 0xaeb   : > { %15041 = vmatpush1.bf16.msra.mxu1 %v22355_v0  ;;  %v22433_v0 = vld [vmem:[#allocation4 + $0x2800] ss:$36 sps:$4 sm:$0xff]  }
 0xaec   : > { %15145 = vmatpush1.bf16.msra.mxu0 %v22358_v19  ;;  %15042 = vmatprep.subr.bf16.mxu1 %v22363_v61  ;;  %v22436_v19 = vld [vmem:[#allocation4 + $0x2850] ss:$36 sps:$4 sm:$0xff]   ;;  %v22441_v61 = vld [vmem:[#allocation4 + $0x27bc] ss:$36 sps:$4 sm:$0xff]  }
 0xaed   : > { %15146 = vmatprep.subr.bf16.mxu0 %v22366_v18  ;;  %v22444_v18 = vld [vmem:[#allocation4 + $0x280c] ss:$36 sps:$4 sm:$0xff]  }
 0xaef   : > { %15043 = vmatpush1.bf16.msra.mxu1 %v22361_v39  ;;  %v22439_v39 = vld [vmem:[#allocation4 + $0x27b8] ss:$36 sps:$4 sm:$0xff]  }
 0xaf0   : > { %15147 = vmatpush1.bf16.msra.mxu0 %v22364_v47  ;;  %15044 = vmatprep.subr.bf16.mxu1 %v22369_v14  ;;  %v22442_v47 = vld [vmem:[#allocation4 + $0x2808] ss:$36 sps:$4 sm:$0xff]   ;;  %v22447_v14 = vld [vmem:[#allocation4 + $0x2774] ss:$36 sps:$4 sm:$0xff]  }
 0xaf1   : > { %15148 = vmatprep.subr.bf16.mxu0 %v22372_v48  ;;  %v22450_v48 = vld [vmem:[#allocation4 + $0x27c4] ss:$36 sps:$4 sm:$0xff]  }
 0xaf3   : > { %15045 = vmatpush1.bf16.msra.mxu1 %v22367_v9  ;;  %v22445_v9 = vld [vmem:[#allocation4 + $0x2770] ss:$36 sps:$4 sm:$0xff]  }
 0xaf4   : > { %15149 = vmatpush1.bf16.msra.mxu0 %v22370_v46  ;;  %15046 = vmatprep.subr.bf16.mxu1 %v22375_v43  ;;  %v22448_v46 = vld [vmem:[#allocation4 + $0x27c0] ss:$36 sps:$4 sm:$0xff]   ;;  %v22453_v43 = vld [vmem:[#allocation4 + $0x272c] ss:$36 sps:$4 sm:$0xff]  }
 0xaf5   : > { %15150 = vmatprep.subr.bf16.mxu0 %v22378_v33  ;;  %v22456_v33 = vld [vmem:[#allocation4 + $0x277c] ss:$36 sps:$4 sm:$0xff]  }
 0xaf7   : > { %15047 = vmatpush1.bf16.msra.mxu1 %v22373_v4  ;;  %v22451_v4 = vld [vmem:[#allocation4 + $0x2728] ss:$36 sps:$4 sm:$0xff]  }
 0xaf8   : > { %15151 = vmatpush1.bf16.msra.mxu0 %v22376_v23  ;;  %15048 = vmatprep.subr.bf16.mxu1 %v22381_v37  ;;  %v22454_v23 = vld [vmem:[#allocation4 + $0x2778] ss:$36 sps:$4 sm:$0xff]   ;;  %v22459_v37 = vld [vmem:[#allocation4 + $0x26e4] ss:$36 sps:$4 sm:$0xff]  }
 0xaf9   : > { %15152 = vmatprep.subr.bf16.mxu0 %v22384_v38  ;;  %v22462_v38 = vld [vmem:[#allocation4 + $0x2734] ss:$36 sps:$4 sm:$0xff]  }
 0xafb   : > { %15049 = vmatpush2.bf16.msra.mxu1 %v22379_v52  ;;  %v22457_v52 = vld [vmem:[#allocation4 + $0x26e0] ss:$36 sps:$4 sm:$0xff]  }
 0xafc   : > { %15153 = vmatpush1.bf16.msra.mxu0 %v22382_v30  ;;  %15050 = vmatprep.subr.bf16.mxu1 %v22387_v57  ;;  %v22460_v30 = vld [vmem:[#allocation4 + $0x2730] ss:$36 sps:$4 sm:$0xff]   ;;  %v22465_v57 = vld [vmem:[#allocation4 + $0x269c] ss:$36 sps:$4 sm:$0xff]  }
 0xafd   : > { %15154 = vmatprep.subr.bf16.mxu0 %v22390_v63  ;;  %v22468_v63 = vld [vmem:[#allocation4 + $0x26ec] ss:$36 sps:$4 sm:$0xff]  }
 0xaff   : > { %15051 = vmatpush2.bf16.msra.mxu1 %v22385_v10  ;;  %v22463_v10 = vld [vmem:[#allocation4 + $0x2698] ss:$36 sps:$4 sm:$0xff]  }
 0xb00   : > { %15155 = vmatpush2.bf16.msra.mxu0 %v22388_v42  ;;  %15052 = vmatprep.subr.bf16.mxu1 %v22393_v44  ;;  %v22466_v42 = vld [vmem:[#allocation4 + $0x26e8] ss:$36 sps:$4 sm:$0xff]   ;;  %v22471_v44 = vld [vmem:[#allocation4 + $0x2654] ss:$36 sps:$4 sm:$0xff]  }
 0xb01   : > { %15156 = vmatprep.subr.bf16.mxu0 %v22396_v56  ;;  %v22474_v56 = vld [vmem:[#allocation4 + $0x26a4] ss:$36 sps:$4 sm:$0xff]  }
 0xb03   : > { %15053 = vmatpush2.bf16.msra.mxu1 %v22391_v25  ;;  %v22469_v25 = vld [vmem:[#allocation4 + $0x2650] ss:$36 sps:$4 sm:$0xff]  }
 0xb04   : > { %15157 = vmatpush2.bf16.msra.mxu0 %v22394_v1  ;;  %15054 = vmatprep.subr.bf16.mxu1 %v22399_v16  ;;  %v22472_v1 = vld [vmem:[#allocation4 + $0x26a0] ss:$36 sps:$4 sm:$0xff]   ;;  %v22477_v16 = vld [vmem:[#allocation4 + $0x23d4] ss:$36 sps:$4 sm:$0xff]  }
 0xb05   : > { %15158 = vmatprep.subr.bf16.mxu0 %v22402_v6  ;;  %v22480_v6 = vld [vmem:[#allocation4 + $0x265c] ss:$36 sps:$4 sm:$0xff]  }
 0xb07   : > { %15055 = vmatpush2.bf16.msra.mxu1 %v22397_v3  ;;  %v22475_v3 = vld [vmem:[#allocation4 + $0x23d0] ss:$36 sps:$4 sm:$0xff]  }
 0xb08   : > { %15159 = vmatpush2.bf16.msra.mxu0 %v22400_v60  ;;  %15056 = vmatprep.subr.bf16.mxu1 %v22405_v62  ;;  %v22478_v60 = vld [vmem:[#allocation4 + $0x2658] ss:$36 sps:$4 sm:$0xff]   ;;  %v22483_v62 = vld [vmem:[#allocation4 + $0x238c] ss:$36 sps:$4 sm:$0xff]  }
 0xb09   : > { %15160 = vmatprep.subr.bf16.mxu0 %v22408_v41  ;;  %v22484_v41 = vld [vmem:[#allocation4 + $0x2618] ss:$36 sps:$4 sm:$0xff]  }
 0xb0b   : > { %15057 = vmatpush2.bf16.msra.mxu1 %v22403_v36  ;;  %v22481_v36 = vld [vmem:[#allocation4 + $0x2388] ss:$36 sps:$4 sm:$0xff]  }
 0xb0c   : > { %15161 = vmatpush2.bf16.msra.mxu0 %v22406_v31  ;;  %15058 = vmatprep.subr.bf16.mxu1 %v22411_v11  ;;  %v22485_v31 = vld [vmem:[#allocation4 + $0x23d8] ss:$36 sps:$4 sm:$0xff]   ;;  %v22488_v11 = vld [vmem:[#allocation4 + $0x2344] ss:$36 sps:$4 sm:$0xff]  }
 0xb0d   : > { %15162 = vmatprep.subr.bf16.mxu0 %v22414_v58  ;;  %v22489_v58 = vld [vmem:[#allocation4 + $0x25d0] ss:$36 sps:$4 sm:$0xff]  }
 0xb0f   : > { %15059 = vmatpush2.bf16.msra.mxu1 %v22409_v2  ;;  %v22486_v2 = vld [vmem:[#allocation4 + $0x2340] ss:$36 sps:$4 sm:$0xff]  }
 0xb10   : > { %15163 = vmatpush2.bf16.msra.mxu0 %v22412_v35  ;;  %15060 = vmatprep.subr.bf16.mxu1 %v22417_v59  ;;  %v22490_v35 = vld [vmem:[#allocation4 + $0x2390] ss:$36 sps:$4 sm:$0xff]   ;;  %v22493_v59 = vld [vmem:[#allocation4 + $0x22fc] ss:$36 sps:$4 sm:$0xff]  }
 0xb11   : > { %15164 = vmatprep.subr.bf16.mxu0 %v22420_v34  ;;  %v22494_v34 = vld [vmem:[#allocation4 + $0x2588] ss:$36 sps:$4 sm:$0xff]  }
 0xb13   : > { %15061 = vmatpush2.bf16.msra.mxu1 %v22415_v45  ;;  %v22491_v45 = vld [vmem:[#allocation4 + $0x22f8] ss:$36 sps:$4 sm:$0xff]  }
 0xb14   : > { %15165 = vmatpush2.bf16.msra.mxu0 %v22418_v54  ;;  %15062 = vmatprep.subr.bf16.mxu1 %v22423_v5  ;;  %v22495_v54 = vld [vmem:[#allocation4 + $0x2348] ss:$36 sps:$4 sm:$0xff]   ;;  %v22498_v5 = vld [vmem:[#allocation4 + $0x22b4] ss:$36 sps:$4 sm:$0xff]  }
 0xb15   : > { %15166 = vmatprep.subr.bf16.mxu0 %v22426_v49  ;;  %v22499_v49 = vld [vmem:[#allocation4 + $0x2540] ss:$36 sps:$4 sm:$0xff]  }
 0xb17   : > { %15063 = vmatpush2.bf16.msra.mxu1 %v22421_v15  ;;  %v22496_v15 = vld [vmem:[#allocation4 + $0x22b0] ss:$36 sps:$4 sm:$0xff]  }
 0xb18   : > { %15167 = vmatpush2.bf16.msra.mxu0 %v22424_v13  ;;  %15191 = vmatprep.subr.bf16.mxu1 %v22429_v50  ;;  %v22500_v13 = vld [vmem:[#allocation4 + $0x2300] ss:$36 sps:$4 sm:$0xff]   ;;  %v22503_v50 = vld [vmem:[#allocation4 + $0x226c] ss:$36 sps:$4 sm:$0xff]  }
 0xb19   : > { %15168 = vmatprep.subr.bf16.mxu0 %v22432_v20  ;;  %v22504_v20 = vld [vmem:[#allocation4 + $0x24f8] ss:$36 sps:$4 sm:$0xff]  }
 0xb1a   : > { %15065 = vmatmul.mubr.bf16.vlgmr.msra.gmra.mxu1 %v24500_v27 }
 0xb1b   : > { %15074 = vmatprep.mubr.bf16.mxu1 %v24502_v40  ;;  %15192 = vmatpush1.bf16.msra.mxu1 %v22427_v17  ;;  %v22501_v17 = vld [vmem:[#allocation4 + $0x2268] ss:$36 sps:$4 sm:$0xff]  }
 0xb1c   : > { %15169 = vmatpush2.bf16.msra.mxu0 %v22430_v55  ;;  %15193 = vmatprep.subr.bf16.mxu1 %v22435_v53  ;;  %v22505_v55 = vld [vmem:[#allocation4 + $0x22b8] ss:$36 sps:$4 sm:$0xff]   ;;  %v22508_v53 = vld [vmem:[#allocation4 + $0x2224] ss:$36 sps:$4 sm:$0xff]  }
 0xb1d   : > { %15297 = vmatprep.subr.bf16.mxu0 %v22438_v32  ;;  %v22509_v32 = vld [vmem:[#allocation4 + $0x24b0] ss:$36 sps:$4 sm:$0xff]  }
 0xb1f   : > { %15171 = vmatmul.mubr.bf16.vlgmr.msra.gmra.mxu0 %v24500_v27  ;;  %15194 = vmatpush1.bf16.msra.mxu1 %v22433_v0  ;;  %v22506_v0 = vld [vmem:[#allocation4 + $0x2220] ss:$36 sps:$4 sm:$0xff]  }
 0xb20   : > { %15180 = vmatprep.mubr.bf16.mxu0 %v24502_v40  ;;  %15298 = vmatpush1.bf16.msra.mxu0 %v22436_v19  ;;  %v22510_v19 = vld [vmem:[#allocation4 + $0x2270] ss:$36 sps:$4 sm:$0xff]  }
 0xb21   : > { %15195 = vmatprep.subr.bf16.mxu1 %v22441_v61  ;;  %15299 = vmatprep.subr.bf16.mxu0 %v22444_v18  ;;  %v22513_v61 = vld [vmem:[#allocation4 + $0x21dc] ss:$36 sps:$4 sm:$0xff]  }
 0xb22   : > { %15075 = vmatmul.mubr.bf16.gmra.mxu1 %v24509_v12  ;;  %v22511_v18 = vld [vmem:[#allocation4 + $0x21d8] ss:$36 sps:$4 sm:$0xff]  }
 0xb23   : > { %15196 = vmatpush1.bf16.msra.mxu1 %v22439_v39  ;;  %15223 = vmatprep.mubr.bf16.mxu1 %v24896_v24  ;;  %v22515_v39 = vld [vmem:[#allocation4 + $0x2228] ss:$36 sps:$4 sm:$0xff]  }
 0xb24   : > { %15300 = vmatpush1.bf16.msra.mxu0 %v22442_v47  ;;  %15197 = vmatprep.subr.bf16.mxu1 %v22447_v14  ;;  %v22518_v47 = vld [vmem:[#allocation4 + $0x2614] ss:$36 sps:$4 sm:$0xff]   ;;  %v22519_v14 = vld [vmem:[#allocation4 + $0x2420] ss:$36 sps:$4 sm:$0xff]  }
 0xb25   : > { %15301 = vmatprep.subr.bf16.mxu0 %v22450_v48  ;;  %v22516_v48 = vld [vmem:[#allocation4 + $0x2610] ss:$36 sps:$4 sm:$0xff]  }
 0xb27   : > { %15181 = vmatmul.mubr.bf16.gmra.mxu0 %v24509_v12  ;;  %15198 = vmatpush1.bf16.msra.mxu1 %v22445_v9  ;;  %v22520_v9 = vld [vmem:[#allocation4 + $0x21e0] ss:$36 sps:$4 sm:$0xff]  }
 0xb28   : > { %15302 = vmatpush1.bf16.msra.mxu0 %v22448_v46  ;;  %15199 = vmatprep.subr.bf16.mxu1 %v22453_v43  ;;  %v22523_v46 = vld [vmem:[#allocation4 + $0x25cc] ss:$36 sps:$4 sm:$0xff]  }
 0xb29   : > { %15303 = vmatprep.subr.bf16.mxu0 %v22456_v33  ;;  %15329 = vmatprep.mubr.bf16.mxu0 %v24896_v24  ;;  %v22521_v43 = vld [vmem:[#allocation4 + $0x25c8] ss:$36 sps:$4 sm:$0xff]  }
 0xb2a   : > { %v22526_v33 = vld [vmem:[#allocation4 + $0x2584] ss:$36 sps:$4 sm:$0xff]  }
 0xb2b   : > { %15200 = vmatpush1.bf16.msra.mxu1 %v22451_v4  ;;  %v22524_v4 = vld [vmem:[#allocation4 + $0x2580] ss:$36 sps:$4 sm:$0xff]  }
 0xb2c   : > { %15304 = vmatpush1.bf16.msra.mxu0 %v22454_v23  ;;  %15201 = vmatprep.subr.bf16.mxu1 %v22459_v37  ;;  %v22529_v23 = vld [vmem:[#allocation4 + $0x253c] ss:$36 sps:$4 sm:$0xff]  }
 0xb2d   : > { %15305 = vmatprep.subr.bf16.mxu0 %v22462_v38  ;;  %v22527_v37 = vld [vmem:[#allocation4 + $0x2538] ss:$36 sps:$4 sm:$0xff]  }
 0xb2e   : > { %v22532_v38 = vld [vmem:[#allocation4 + $0x24f4] ss:$36 sps:$4 sm:$0xff]  }
 0xb2f   : > { %15202 = vmatpush1.bf16.msra.mxu1 %v22457_v52  ;;  %v22530_v52 = vld [vmem:[#allocation4 + $0x24f0] ss:$36 sps:$4 sm:$0xff]  }
 0xb30   : > { %15306 = vmatpush1.bf16.msra.mxu0 %v22460_v30  ;;  %15203 = vmatprep.subr.bf16.mxu1 %v22465_v57  ;;  %v22535_v30 = vld [vmem:[#allocation4 + $0x24ac] ss:$36 sps:$4 sm:$0xff]  }
 0xb31   : > { %15307 = vmatprep.subr.bf16.mxu0 %v22468_v63  ;;  %v22533_v57 = vld [vmem:[#allocation4 + $0x24a8] ss:$36 sps:$4 sm:$0xff]  }
 0xb32   : > { %v22538_v63 = vld [vmem:[#allocation4 + $0x2464] ss:$36 sps:$4 sm:$0xff]  }
 0xb33   : > { %15204 = vmatpush1.bf16.msra.mxu1 %v22463_v10  ;;  %v22536_v10 = vld [vmem:[#allocation4 + $0x2460] ss:$36 sps:$4 sm:$0xff]  }
 0xb34   : > { %15308 = vmatpush1.bf16.msra.mxu0 %v22466_v42  ;;  %15205 = vmatprep.subr.bf16.mxu1 %v22471_v44  ;;  %v22541_v42 = vld [vmem:[#allocation4 + $0x241c] ss:$36 sps:$4 sm:$0xff]  }
 0xb35   : > { %15309 = vmatprep.subr.bf16.mxu0 %v22474_v56  ;;  %v22539_v44 = vld [vmem:[#allocation4 + $0x2418] ss:$36 sps:$4 sm:$0xff]  }
 0xb36   : > { %v22542_v56 = vld [vmem:[#allocation4 + $0x2858] ss:$36 sps:$4 sm:$0xff]  }
 0xb37   : > { %15206 = vmatpush1.bf16.msra.mxu1 %v22469_v25  ;;  %v22543_v25 = vld [vmem:[#allocation4 + $0x2810] ss:$36 sps:$4 sm:$0xff]  }
 0xb38   : > { %15310 = vmatpush1.bf16.msra.mxu0 %v22472_v1  ;;  %15244 = vmatprep.subr.bf16.mxu1 %v22477_v16  ;;  %v22544_v1 = vld [vmem:[#allocation4 + $0x27c8] ss:$36 sps:$4 sm:$0xff]   ;;  %v22545_v16 = vld [vmem:[#allocation4 + $0x2780] ss:$36 sps:$4 sm:$0xff]  }
 0xb39   : > { %15311 = vmatprep.subr.bf16.mxu0 %v22480_v6  ;;  %v22546_v6 = vld [vmem:[#allocation4 + $0x2738] ss:$36 sps:$4 sm:$0xff]  }
 0xb3a   : > { %15224 = vmatmul.mubr.bf16.vlgmr.msra.gmra.mxu1 %v24537_v51 }
 0xb3b   : > { %15245 = vmatpush1.bf16.msra.mxu1 %v22475_v3  ;;  %15233 = vmatprep.mubr.bf16.mxu1 %v24896_v24  ;;  %v22547_v3 = vld [vmem:[#allocation4 + $0x26f0] ss:$36 sps:$4 sm:$0xff]  }
 0xb3c   : > { %15312 = vmatpush1.bf16.msra.mxu0 %v22478_v60  ;;  %15246 = vmatprep.subr.bf16.mxu1 %v22483_v62  ;;  %v22552_v60 = vld [vmem:[#allocation4 + $0x2a7c] ss:$36 sps:$4 sm:$0xff]   ;;  %v22555_v62 = vld [vmem:[#allocation4 + $0x2a34] ss:$36 sps:$4 sm:$0xff]  }
 0xb3d   : > { %19865 = vmatprep.subr.bf16.mxu0 %v22484_v41  ;;  %v22549_v41 = vld [vmem:[#allocation4 + $0x2660] ss:$36 sps:$4 sm:$0xff]  }
 0xb3f   : > { %15247 = vmatpush1.bf16.msra.mxu1 %v22481_v36  ;;  %15330 = vmatmul.mubr.bf16.vlgmr.msra.gmra.mxu0 %v24537_v51  ;;  %v22558_v36 = vld [vmem:[#allocation4 + $0x29ec] ss:$36 sps:$4 sm:$0xff]  }
 0xb40   : > { %19866 = vmatpush3.bf16.msra.mxu0 %v22485_v31  ;;  %15248 = vmatprep.subr.bf16.mxu1 %v22488_v11  ;;  %v22561_v31 = vld [vmem:[#allocation4 + $0x29a4] ss:$36 sps:$4 sm:$0xff]  }
 0xb41   : > { %19867 = vmatprep.subr.bf16.mxu0 %v22489_v58  ;;  %15339 = vmatprep.mubr.bf16.mxu0 %v24896_v24  ;;  %v22559_v11 = vld [vmem:[#allocation4 + $0x29a0] ss:$36 sps:$4 sm:$0xff]  }
 0xb42   : > { %15234 = vmatmul.mubr.bf16.gmra.mxu1 %v24535_v21  ;;  %v22564_v58 = vld [vmem:[#allocation4 + $0x295c] ss:$36 sps:$4 sm:$0xff]  }
 0xb43   : > { %15249 = vmatpush1.bf16.msra.mxu1 %v22486_v2  ;;  %15276 = vmatprep.mubr.bf16.mxu1 %v24498_v26  ;;  %v22562_v2 = vld [vmem:[#allocation4 + $0x2958] ss:$36 sps:$4 sm:$0xff]  }
 0xb44   : > { %19868 = vmatpush3.bf16.msra.mxu0 %v22490_v35  ;;  %15250 = vmatprep.subr.bf16.mxu1 %v22493_v59  ;;  %v22567_v35 = vld [vmem:[#allocation4 + $0x2914] ss:$36 sps:$4 sm:$0xff]  }
 0xb45   : > { %19869 = vmatprep.subr.bf16.mxu0 %v22494_v34  ;;  %v22565_v59 = vld [vmem:[#allocation4 + $0x2910] ss:$36 sps:$4 sm:$0xff]  }
 0xb46   : > { %v22570_v34 = vld [vmem:[#allocation4 + $0x28cc] ss:$36 sps:$4 sm:$0xff]  }
 0xb47   : > { %15251 = vmatpush1.bf16.msra.mxu1 %v22491_v45  ;;  %15340 = vmatmul.mubr.bf16.gmra.mxu0 %v24535_v21  ;;  %v22568_v45 = vld [vmem:[#allocation4 + $0x28c8] ss:$36 sps:$4 sm:$0xff]  }
 0xb48   : > { %19870 = vmatpush3.bf16.msra.mxu0 %v22495_v54  ;;  %15382 = vmatprep.mubr.bf16.mxu0 %v24498_v26  ;;  %v22514_v26 = vld [vmem:[#allocation4 + $0x2468] ss:$36 sps:$4 sm:$0xff]  }
 0xb49   : > { %15252 = vmatprep.subr.bf16.mxu1 %v22498_v5  ;;  %19871 = vmatprep.subr.bf16.mxu0 %v22499_v49  ;;  %v22573_v54 = vld [vmem:[#allocation4 + $0x2884] ss:$36 sps:$4 sm:$0xff]   ;;  %v22576_v5 = vld [vmem:[#allocation4 + $0x2cbc] ss:$36 sps:$4 sm:$0xff]  }
 0xb4b   : > { %15253 = vmatpush1.bf16.msra.mxu1 %v22496_v15  ;;  %v22574_v15 = vld [vmem:[#allocation4 + $0x2cb8] ss:$36 sps:$4 sm:$0xff]  }
 0xb4c   : > { %19872 = vmatpush3.bf16.msra.mxu0 %v22500_v13  ;;  %15254 = vmatprep.subr.bf16.mxu1 %v22503_v50  ;;  %v22579_v13 = vld [vmem:[#allocation4 + $0x2c74] ss:$36 sps:$4 sm:$0xff]  }
 0xb4d   : > { %19873 = vmatprep.subr.bf16.mxu0 %v22504_v20  ;;  %v22577_v20 = vld [vmem:[#allocation4 + $0x2c70] ss:$36 sps:$4 sm:$0xff]  }
 0xb4f   : > { %15255 = vmatpush1.bf16.msra.mxu1 %v22501_v17 }
 0xb50   : > { %19874 = vmatpush3.bf16.msra.mxu0 %v22505_v55  ;;  %15256 = vmatprep.subr.bf16.mxu1 %v22508_v53  ;;  %v22582_v55 = vld [vmem:[#allocation4 + $0x2c2c] ss:$36 sps:$4 sm:$0xff]  }
 0xb51   : > { %19875 = vmatprep.subr.bf16.mxu0 %v22509_v32  ;;  %v22580_v53 = vld [vmem:[#allocation4 + $0x2c28] ss:$36 sps:$4 sm:$0xff]  }
 0xb53   : > { %15257 = vmatpush1.bf16.msra.mxu1 %v22506_v0 }
 0xb54   : > { %19876 = vmatpush3.bf16.msra.mxu0 %v22510_v19  ;;  %15258 = vmatprep.subr.bf16.mxu1 %v22513_v61  ;;  %v22585_v19 = vld [vmem:[#allocation4 + $0x2be4] ss:$36 sps:$4 sm:$0xff]  }
 0xb55   : > { %19877 = vmatprep.subr.bf16.mxu0 %v22514_v26  ;;  %v22583_v61 = vld [vmem:[#allocation4 + $0x2be0] ss:$36 sps:$4 sm:$0xff]  }
 0xb57   : > { %15259 = vmatpush1.bf16.msra.mxu1 %v22511_v18 }
 0xb58   : > { %19878 = vmatpush3.bf16.msra.mxu0 %v22515_v39  ;;  %15260 = vmatprep.subr.bf16.mxu1 %v22518_v47  ;;  %v22588_v39 = vld [vmem:[#allocation4 + $0x2b9c] ss:$36 sps:$4 sm:$0xff]  }
 0xb59   : > { %19879 = vmatprep.subr.bf16.mxu0 %v22519_v14  ;;  %v22586_v47 = vld [vmem:[#allocation4 + $0x2b98] ss:$36 sps:$4 sm:$0xff]  }
 0xb5b   : > { %15261 = vmatpush2.bf16.msra.mxu1 %v22516_v48 }
 0xb5c   : > { %19880 = vmatpush3.bf16.msra.mxu0 %v22520_v9  ;;  %15262 = vmatprep.subr.bf16.mxu1 %v22523_v46  ;;  %v22591_v9 = vld [vmem:[#allocation4 + $0x2b54] ss:$36 sps:$4 sm:$0xff]  }
 0xb5d   : > { %16937 = vmatprep.subr.bf16.mxu0 %v22552_v60  ;;  %v22589_v46 = vld [vmem:[#allocation4 + $0x2b50] ss:$36 sps:$4 sm:$0xff]   ;;  %v22615_v60 = vld [vmem:[#allocation4 + $0x2e24] ss:$36 sps:$4 sm:$0xff]  }
 0xb5f   : > { %15263 = vmatpush2.bf16.msra.mxu1 %v22521_v43  ;;  %15383 = vmatmul.mubr.bf16.vlgmr.msra.gmra.mxu0 %v24500_v27 }
 0xb60   : > { %15390 = vmatprep.mubr.bf16.mxu0 %v24502_v40  ;;  %15264 = vmatprep.subr.bf16.mxu1 %v22526_v33 }
 0xb63   : > { %15265 = vmatpush2.bf16.msra.mxu1 %v22524_v4  ;;  %v22594_v4 = vld [vmem:[#allocation4 + $0x2b0c] ss:$36 sps:$4 sm:$0xff]  }
 0xb64   : > { %15266 = vmatprep.subr.bf16.mxu1 %v22529_v23  ;;  %v22592_v23 = vld [vmem:[#allocation4 + $0x2b08] ss:$36 sps:$4 sm:$0xff]  }
 0xb67   : > { %15267 = vmatpush2.bf16.msra.mxu1 %v22527_v37  ;;  %15391 = vmatmul.mubr.bf16.gmra.mxu0 %v24509_v12 }
 0xb68   : > { %15268 = vmatprep.subr.bf16.mxu1 %v22532_v38 }
 0xb6b   : > { %15269 = vmatpush2.bf16.msra.mxu1 %v22530_v52  ;;  %v22597_v52 = vld [vmem:[#allocation4 + $0x2efc] ss:$36 sps:$4 sm:$0xff]  }
 0xb6c   : > { %15270 = vmatprep.subr.bf16.mxu1 %v22535_v30 }
 0xb6f   : > { %15271 = vmatpush2.bf16.msra.mxu1 %v22533_v57  ;;  %v22595_v57 = vld [vmem:[#allocation4 + $0x2ef8] ss:$36 sps:$4 sm:$0xff]  }
 0xb70   : > { %15272 = vmatprep.subr.bf16.mxu1 %v22538_v63  ;;  %v22600_v63 = vld [vmem:[#allocation4 + $0x2ac4] ss:$36 sps:$4 sm:$0xff]  }
 0xb73   : > { %15273 = vmatpush2.bf16.msra.mxu1 %v22536_v10  ;;  %v22598_v10 = vld [vmem:[#allocation4 + $0x2ac0] ss:$36 sps:$4 sm:$0xff]  }
 0xb74   : > { %15274 = vmatprep.subr.bf16.mxu1 %v22541_v42 }
 0xb77   : > { %15275 = vmatpush2.bf16.msra.mxu1 %v22539_v44  ;;  %v22603_v44 = vld [vmem:[#allocation4 + $0x2eb4] ss:$36 sps:$4 sm:$0xff]  }
 0xb78   : > { %20081 = vmatprep.subr.bf16.mxu1 %v22542_v56 }
 0xb7a   : > { %15277 = vmatmul.mubr.bf16.vlgmr.msra.gmra.mxu1 %v24500_v27  ;;  %v22548_v27 = vld [vmem:[#allocation4 + $0x26a8] ss:$36 sps:$4 sm:$0xff]  }
 0xb7b   : > { %15286 = vmatprep.mubr.bf16.mxu1 %v24502_v40  ;;  %20082 = vmatpush3.bf16.msra.mxu1 %v22542_v56  ;;  %v22550_v40 = vld [vmem:[#allocation4 + $0x2a78] ss:$36 sps:$4 sm:$0xff]  }
 0xb7c   : > { %20083 = vmatprep.subr.bf16.mxu1 %v22543_v25  ;;  %16938 = vmatpush1.bf16.msra.mxu0 %v22550_v40 }
 0xb7d   : > { %16939 = vmatprep.subr.bf16.mxu0 %v22555_v62 }
 0xb7f   : > { %20084 = vmatpush3.bf16.msra.mxu1 %v22543_v25  ;;  %v24572_v49 = vpop.f32.mrf.mxu0  ;;  %v22601_v25 = vld [vmem:[#allocation4 + $0x2eb0] ss:$36 sps:$4 sm:$0xff]  }
 0xb80   : > { %20085 = vmatprep.subr.bf16.mxu1 %v22544_v1 }
 0xb81   : > { %v24574_v50 = vpop.f32.mrf.mxu0 }
 0xb82   : > { %15287 = vmatmul.mubr.bf16.gmra.mxu1 %v24509_v12  ;;  %v22553_v12 = vld [vmem:[#allocation4 + $0x2a30] ss:$36 sps:$4 sm:$0xff]  }
 0xb83   : > { %20086 = vmatpush3.bf16.msra.mxu1 %v22544_v1  ;;  %20097 = vmatprep.mubr.bf16.mxu1 %v24537_v51  ;;  %v22556_v51 = vld [vmem:[#allocation4 + $0x29e8] ss:$36 sps:$4 sm:$0xff]   ;;  %v24576_v17 = vpop.f32.mrf.mxu0 }
 0xb84   : > { %20087 = vmatprep.subr.bf16.mxu1 %v22545_v16  ;;  %16940 = vmatpush1.bf16.msra.mxu0 %v22553_v12  ;;  %v22606_v1 = vld [vmem:[#allocation4 + $0x2f04] ss:$36 sps:$4 sm:$0xff]  }
 0xb85   : > { %16941 = vmatprep.subr.bf16.mxu0 %v22558_v36  ;;  %v24578_v32 = vpop.f32.mrf.mxu0  ;;  %v22613_v12 = vld [vmem:[#allocation4 + $0x2e20] ss:$36 sps:$4 sm:$0xff]  }
 0xb87   : > { %20088 = vmatpush3.bf16.msra.mxu1 %v22545_v16  ;;  %v24582_v26 = vpop.f32.mrf.mxu0 }
 0xb88   : > { %20089 = vmatprep.subr.bf16.mxu1 %v22546_v6  ;;  %16942 = vmatpush1.bf16.msra.mxu0 %v22556_v51 }
 0xb89   : > { %16943 = vmatprep.subr.bf16.mxu0 %v22561_v31  ;;  %v24586_v14 = vpop.f32.mrf.mxu0  ;;  %v22621_v31 = vld [vmem:[#allocation4 + $0x2ddc] ss:$36 sps:$4 sm:$0xff]  }
 0xb8b   : > { %20090 = vmatpush3.bf16.msra.mxu1 %v22546_v6  ;;  %v24590_v43 = vpop.f32.mrf.mxu0  ;;  %v22607_v6 = vld [vmem:[#allocation4 + $0x2e68] ss:$36 sps:$4 sm:$0xff]  }
 0xb8c   : > { %20091 = vmatprep.subr.bf16.mxu1 %v22547_v3  ;;  %16944 = vmatpush1.bf16.msra.mxu0 %v22559_v11 }
 0xb8d   : > { %16945 = vmatprep.subr.bf16.mxu0 %v22564_v58  ;;  %v24594_v37 = vpop.f32.mrf.mxu0 }
 0xb8f   : > { %20092 = vmatpush3.bf16.msra.mxu1 %v22547_v3  ;;  %v22609_v3 = vld [vmem:[#allocation4 + $0x2e6c] ss:$36 sps:$4 sm:$0xff]  }
 0xb90   : > { %20093 = vmatprep.subr.bf16.mxu1 %v22548_v27  ;;  %16946 = vmatpush1.bf16.msra.mxu0 %v22562_v2  ;;  %v22619_v2 = vld [vmem:[#allocation4 + $0x2dd8] ss:$36 sps:$4 sm:$0xff]  }
 0xb91   : > { %16947 = vmatprep.subr.bf16.mxu0 %v22567_v35 }
 0xb93   : > { %20094 = vmatpush3.bf16.msra.mxu1 %v22548_v27 }
 0xb94   : > { %20095 = vmatprep.subr.bf16.mxu1 %v22549_v41  ;;  %16948 = vmatpush1.bf16.msra.mxu0 %v22565_v59 }
 0xb95   : > { %16949 = vmatprep.subr.bf16.mxu0 %v22570_v34 }
 0xb97   : > { %20096 = vmatpush3.bf16.msra.mxu1 %v22549_v41 }
 0xb98   : > { %16950 = vmatpush1.bf16.msra.mxu0 %v22568_v45  ;;  %16988 = vmatprep.subr.bf16.mxu1 %v22597_v52  ;;  %v22639_v52 = vld [vmem:[#allocation4 + $0x2d04] ss:$36 sps:$4 sm:$0xff]  }
 0xb99   : > { %16951 = vmatprep.subr.bf16.mxu0 %v22573_v54  ;;  %v22627_v54 = vld [vmem:[#allocation4 + $0x2d94] ss:$36 sps:$4 sm:$0xff]  }
 0xb9a   : > { %20098 = vmatmul.mubr.bf16.vlgmr.msra.gmra.mxu1 %v24535_v21  ;;  %v22571_v21 = vld [vmem:[#allocation4 + $0x2880] ss:$36 sps:$4 sm:$0xff]   ;;  %v24580_v0 = vpop.f32.mrf.mxu1 }
 0xb9b   : > { %17020 = vmatprep.mubr.bf16.mxu1 %v24896_v24  ;;  %16989 = vmatpush1.bf16.msra.mxu1 %v22595_v57 }
 0xb9c   : > { %16952 = vmatpush1.bf16.msra.mxu0 %v22571_v21  ;;  %v24584_v18 = vpop.f32.mrf.mxu1  ;;  %16990 = vmatprep.subr.bf16.mxu1 %v22603_v44 }
 0xb9d   : > { %16953 = vmatprep.subr.bf16.mxu0 %v22576_v5 }
 0xb9e   : > { %v24588_v48 = vpop.f32.mrf.mxu1 }
 0xb9f   : > { %v15119_v30 = vpop.f32.mrf.mxu0  ;;  %16991 = vmatpush1.bf16.msra.mxu1 %v22601_v25 }
 0xba0   : > { %16954 = vmatpush2.bf16.msra.mxu0 %v22574_v15  ;;  %v24592_v33 = vpop.f32.mrf.mxu1  ;;  %16992 = vmatprep.subr.bf16.mxu1 %v22609_v3  ;;  %v22625_v15 = vld [vmem:[#allocation4 + $0x2d90] ss:$36 sps:$4 sm:$0xff]  }
 0xba1   : > { %16955 = vmatprep.subr.bf16.mxu0 %v22579_v13  ;;  %v24600_v56 = vpop.f32.mrf.mxu0 }
 0xba2   : > { %v24596_v38 = vpop.f32.mrf.mxu1 }
 0xba3   : > { %v15123_v27 = vpop.f32.mrf.mxu0  ;;  %16993 = vmatpush1.bf16.msra.mxu1 %v22607_v6 }
 0xba4   : > { %16956 = vmatpush2.bf16.msra.mxu0 %v22577_v20  ;;  %v24598_v42 = vpop.f32.mrf.mxu1  ;;  %16994 = vmatprep.subr.bf16.mxu1 %v22615_v60 }
 0xba5   : > { %16957 = vmatprep.subr.bf16.mxu0 %v22582_v55  ;;  %v24606_v62 = vpop.f32.mrf.mxu0 }
 0xba6   : > { %v24602_v16 = vpop.f32.mrf.mxu1 }
 0xba7   : > { %16995 = vmatpush1.bf16.msra.mxu1 %v22613_v12  ;;  %v15129_v11 = vpop.f32.mrf.mxu0 }
 0xba8   : > { %16958 = vmatpush2.bf16.msra.mxu0 %v22580_v53  ;;  %v24604_v40 = vpop.f32.mrf.mxu1  ;;  %16996 = vmatprep.subr.bf16.mxu1 %v22621_v31 }
 0xba9   : > { %16959 = vmatprep.subr.bf16.mxu0 %v22585_v19  ;;  %v24615_v21 = vpop.f32.mrf.mxu0 }
 0xbab   : > { %16997 = vmatpush1.bf16.msra.mxu1 %v22619_v2 }
 0xbac   : > { %16960 = vmatpush2.bf16.msra.mxu0 %v22583_v61  ;;  %16998 = vmatprep.subr.bf16.mxu1 %v22627_v54  ;;  %v22633_v61 = vld [vmem:[#allocation4 + $0x2d4c] ss:$36 sps:$4 sm:$0xff]  }
 0xbad   : > { %16961 = vmatprep.subr.bf16.mxu0 %v22588_v39  ;;  %v15133_v39 = vpop.f32.mrf.mxu0 }
 0xbaf   : > { %16999 = vmatpush1.bf16.msra.mxu1 %v22625_v15 }
 0xbb0   : > { %16962 = vmatpush2.bf16.msra.mxu0 %v22586_v47  ;;  %17000 = vmatprep.subr.bf16.mxu1 %v22633_v61  ;;  %v24657_v61 = vadd.f32 %v24588_v48, %v24576_v17  ;;  %v15026_v17 = vadd.f32 %v24598_v42, %v24586_v14  ;;  %v24686_v14 = vadd.f32 %v24602_v16, %v24590_v43 }
 0xbb1   : > { %16963 = vmatprep.subr.bf16.mxu0 %v22591_v9  ;;  %v22631_v9 = vld [vmem:[#allocation4 + $0x2d48] ss:$36 sps:$4 sm:$0xff]  }
 0xbb3   : > { %17001 = vmatpush1.bf16.msra.mxu1 %v22631_v9  ;;  %v15016_v9 = vadd.f32 %v24584_v18, %v24574_v50 }
 0xbb4   : > { %16964 = vmatpush2.bf16.msra.mxu0 %v22589_v46  ;;  %17002 = vmatprep.subr.bf16.mxu1 %v22639_v52  ;;  %v24890_v52 = vrot.slane %v24657_v61, 7 }
 0xbb5   : > { %16965 = vmatprep.subr.bf16.mxu0 %v22594_v4 }
 0xbb8   : > { %16966 = vmatpush2.bf16.msra.mxu0 %v22592_v23 }
 0xbb9   : > { %16967 = vmatprep.subr.bf16.mxu0 %v22600_v63  ;;  %v22645_v63 = vld [vmem:[#allocation4 + $0x2a84] ss:$36 sps:$4 sm:$0xff]  }
 0xbbc   : > { %16968 = vmatpush2.bf16.msra.mxu0 %v22598_v10  ;;  %v24633_v10 = vpop.f32.mrf.mxu0 }
 0xbbd   : > { %17089 = vmatprep.subr.bf16.mxu0 %v22606_v1 }
 0xbda   : > { %v15066_v41 = vpop.f32.mrf.mxu1 }
 0xbdb   : > { %v24608_v36 = vadd.f32 %v15119_v30, %v15066_v41  ;;  %v22637_v30 = vld [vmem:[#allocation4 + $0x2d00] ss:$36 sps:$4 sm:$0xff]  }
 0xbdc   : > { %v24610_v51 = vpop.f32.mrf.mxu1  ;;  %17003 = vmatpush1.bf16.msra.mxu1 %v22637_v30 }
 0xbdd   : > { %24938 = vst [vmem:[#allocation18_spill] sm:$0xff] %v24608_v36  ;;  %v15450_v34 = vrot.slane %v24608_v36, 7  ;;  %17039 = vmatprep.subr.bf16.mxu1 %v22645_v63 }
 0xbde   : > { %v15070_v58 = vpop.f32.mrf.mxu1 }
 0xbdf   : > { %v15124_v35 = vadd.f32 %v15123_v27, %v15070_v58  ;;  %v15172_v44 = vpop.f32.mrf.mxu0 }
 0xbe0   : > { %v24612_v59 = vpop.f32.mrf.mxu1 }
 0xbe1   : > { %v15453_v45 = vrot.slane %v15124_v35, 7  ;;  %v24635_v25 = vpop.f32.mrf.mxu0 }
 0xbe2   : > { %v15076_v5 = vpop.f32.mrf.mxu1 }
 0xbe3   : > { %v15468_v13 = vsel %vm2303_vm2, %v15450_v34, %v15453_v45  ;;  %v15130_v20 = vadd.f32 %v15129_v11, %v15076_v5  ;;  %v24637_v1 = vpop.f32.mrf.mxu0 }
 0xbe4   : > { %v24621_v55 = vsel %vm373_vm0, %v15124_v35, %v15468_v13  ;;  %v24623_v53 = vpop.f32.mrf.mxu1 }
 0xbe5   : > { %24939 = vst [vmem:[#allocation20_spill] sm:$0xff] %v24621_v55  ;;  %v15456_v19 = vrot.slane %v15130_v20, 7  ;;  %v24639_v6 = vpop.f32.mrf.mxu0  ;;  %v15449_v55 = vrot.slane %v15016_v9, 7 }
 0xbe6   : > { %v15080_v47 = vpop.f32.mrf.mxu1  ;;  %24940 = vst [vmem:[#allocation17_spill] sm:$0xff] %v24639_v6 }
 0xbe7   : > { %v15134_v46 = vadd.f32 %v15133_v39, %v15080_v47  ;;  %v24627_v4 = vsel %vm2303_vm2, %v15453_v45, %v15456_v19  ;;  %v15182_v3 = vpop.f32.mrf.mxu0  ;;  %v15020_v39 = vadd.f32 %v24592_v33, %v24578_v32  ;;  %v15014_v47 = vadd.f32 %v24580_v0, %v24572_v49 }
 0xbe8   : > { %v24643_v60 = vpop.f32.mrf.mxu1  ;;  %v24674_v32 = vadd.f32 %v24596_v38, %v24582_v26  ;;  %v15030_v49 = vadd.f32 %v24604_v40, %v24594_v37  ;;  %v15455_v26 = vrot.slane %v15026_v17, 7 }
 0xbe9   : > { %v15459_v23 = vrot.slane %v15134_v46, 7  ;;  %v24641_v27 = vpop.f32.mrf.mxu0  ;;  %v15452_v30 = vrot.slane %v15020_v39, 7  ;;  %v15448_v63 = vrot.slane %v15014_v47, 7 }
 0xbeb   : > { %v24631_v57 = vsel %vm2303_vm2, %v15456_v19, %v15459_v23  ;;  %v24645_v41 = vpop.f32.mrf.mxu0  ;;  %v15466_v18 = vsel %vm2303_vm2, %v15448_v63, %v24890_v52  ;;  %v15467_v33 = vsel %vm2303_vm2, %v15449_v55, %v15452_v30  ;;  %v15454_v63 = vrot.slane %v24674_v32, 7 }
 0xbec   : > { %v15458_v52 = vrot.slane %v15030_v49, 7  ;;  %v15476_v16 = vsel %vm373_vm0, %v15020_v39, %v15467_v33  ;;  %v15457_v55 = vrot.slane %v24686_v14, 7 }
 0xbed   : > { %v24647_v31 = vpop.f32.mrf.mxu0 }
 0xbfa   : > { %v15225_v12 = vpop.f32.mrf.mxu1 }
 0xbfb   : > { %v15226_v6 = vadd.f32 %v15225_v12, %v15172_v44  ;;  %v15464_v44 = vsel %vm2303_vm2, %v15452_v30, %v15455_v26 }
 0xbfc   : > { %v24649_v11 = vpop.f32.mrf.mxu1 }
 0xbfd   : > { %24941 = vst [vmem:[#allocation19_spill] sm:$0xff] %v24649_v11  ;;  %v24699_v11 = vld [vmem:[#allocation6 + $0xf] sm:$0x7]  ;;  %v15521_v14 = vadd.f32 %v15226_v6, %v15016_v9 }
 0xbfe   : > { %v15229_v2 = vpop.f32.mrf.mxu1 }
 0xbff   : > { %v15331_v58 = vpop.f32.mrf.mxu0 }
 0xc00   : > { %v24651_v34 = vpop.f32.mrf.mxu1 }
 0xc01   : > { %v15333_v35 = vpop.f32.mrf.mxu0  ;;  %24942 = vst [vmem:[#allocation21_spill] sm:$0xff] %v24651_v34  ;;  %v15475_v34 = vsel %vm373_vm0, %v24657_v61, %v15466_v18 }
 0xc02   : > { %v15235_v54 = vpop.f32.mrf.mxu1 }
 0xc03   : > { %v15335_v45 = vpop.f32.mrf.mxu0 }
 0xc04   : > { %v24653_v15 = vpop.f32.mrf.mxu1 }
 0xc05   : > { %v15337_v5 = vpop.f32.mrf.mxu0 }
 0xc06   : > { %v15239_v20 = vpop.f32.mrf.mxu1 }
 0xc07   : > { %v15341_v13 = vpop.f32.mrf.mxu0  ;;  %v15240_v6 = vadd.f32 %v15239_v20, %v24645_v41 }
 0xc08   : > { %v24665_v46 = vpop.f32.mrf.mxu1 }
 0xc09   : > { %v15343_v19 = vpop.f32.mrf.mxu0 }
 0xc0b   : > { %v24667_v23 = vpop.f32.mrf.mxu0 }
 0xc0d   : > { %v24678_v50 = vpop.f32.mrf.mxu0 }
 0xc1f   : > { %v24690_v38 = vpop.f32.mrf.mxu0 }
 0xc21   : > { %v24707_v12 = vpop.f32.mrf.mxu0 }
 0xc3a   : > { %v15278_v48 = vpop.f32.mrf.mxu1 }
 0xc3b   : > { %v15332_v37 = vadd.f32 %v15331_v58, %v15278_v48  ;;  %v15236_v48 = vadd.f32 %v15235_v54, %v15182_v3 }
 0xc3c   : > { %v15280_v0 = vpop.f32.mrf.mxu1 }
 0xc3d   : > { %v15334_v40 = vadd.f32 %v15333_v35, %v15280_v0  ;;  %v15122_v35 = vadd.f32 %v24600_v56, %v24610_v51  ;;  %v15484_v39 = vrot.slane %v15332_v37, 1  ;;  %v15461_v56 = vsel %vm2303_vm2, %v15455_v26, %v15458_v52 }
 0xc3e   : > { %v15282_v42 = vpop.f32.mrf.mxu1  ;;  %v15527_v52 = vadd.f32 %v15464_v44, %v15236_v48  ;;  %v15530_v48 = vadd.f32 %v15461_v56, %v15240_v6 }
 0xc3f   : > { %v15336_v36 = vadd.f32 %v15335_v45, %v15282_v42  ;;  %v15126_v45 = vadd.f32 %v24606_v62, %v24612_v59  ;;  %v15485_v49 = vrot.slane %v15334_v40, 1  ;;  %v15550_v62 = vrot.slane %v24699_v11, %v23339_v28 }
 0xc40   : > { %v15284_v43 = vpop.f32.mrf.mxu1  ;;  %v15520_v33 = vadd.f32 %v15122_v35, %v15014_v47  ;;  %v15132_v40 = vadd.f32 %v24615_v21, %v24623_v53 }
 0xc41   : > { %v15487_v17 = vrot.slane %v15336_v36, 1  ;;  %v15338_v58 = vadd.f32 %v15337_v5, %v15284_v43  ;;  %v15230_v5 = vadd.f32 %v15229_v2, %v24637_v1  ;;  %v24719_v1 = vpop.f32.mrf.mxu0  ;;  %v15554_v2 = vrot.slane %v24699_v11, %v23350_v22 }
 0xc42   : > { %v15288_v32 = vpop.f32.mrf.mxu1 }
 0xc43   : > { %v15488_v0 = vrot.slane %v15338_v58, 1  ;;  %v15342_v18 = vadd.f32 %v15341_v13, %v15288_v32  ;;  %v15502_v59 = vsel %vm2348_vm3, %v15484_v39, %v15487_v17  ;;  %v15523_v13 = vadd.f32 %v15475_v34, %v15126_v45 }
 0xc44   : > { %v15290_v51 = vpop.f32.mrf.mxu1  ;;  %v15136_v34 = vadd.f32 %v24633_v10, %v24643_v60  ;;  %v15524_v47 = vadd.f32 %v15476_v16, %v15230_v5 }
 0xc45   : > { %v15503_v3 = vsel %vm2348_vm3, %v15485_v49, %v15488_v0  ;;  %v15490_v54 = vrot.slane %v15342_v18, 1  ;;  %v15344_v30 = vadd.f32 %v15343_v19, %v15290_v51  ;;  %v15532_v19 = vadd.f32 %v15520_v33, %v15502_v59 }
 0xc46   : > { %v15292_v9 = vpop.f32.mrf.mxu1  ;;  %v15533_v26 = vadd.f32 %v15521_v14, %v15503_v3 }
 0xc47   : > { %v15499_v42 = vsel %vm2348_vm3, %v15487_v17, %v15490_v54  ;;  %v15491_v37 = vrot.slane %v15344_v30, 1  ;;  %v15539_v45 = vadd.f32 %v15527_v52, %v15344_v30  ;;  %v24733_v17 = vpop.f32.mrf.mxu0  ;;  %v15346_v53 = vadd.f32 %v24667_v23, %v15292_v9  ;;  %v22604_v9 = vld [vmem:[#allocation4 + $0x2f00] ss:$36 sps:$4 sm:$0xff]  }
 0xc48   : > { %v15511_v41 = vsel %vm378_vm1, %v15336_v36, %v15499_v42  ;;  %v15294_v20 = vpop.f32.mrf.mxu1  ;;  %v15460_v36 = vsel %vm2303_vm2, %v15454_v63, %v15457_v55  ;;  %v15563_v60 = vadd.f32 %v15554_v2, %v15533_v26  ;;  %v15562_v39 = vadd.f32 %v15550_v62, %v15532_v19  ;;  %v22612_v26 = vld [vmem:[#allocation4 + $0x2ebc] ss:$36 sps:$4 sm:$0xff]  }
 0xc49   : > { %v15535_v43 = vadd.f32 %v15523_v13, %v15511_v41  ;;  %v15500_v35 = vsel %vm2348_vm3, %v15488_v0, %v15491_v37  ;;  %v15348_v10 = vadd.f32 %v24678_v50, %v15294_v20  ;;  %v15529_v32 = vadd.f32 %v15460_v36, %v15136_v34  ;;  %v19887_v23 = vpop.f32.mrf.mxu0  ;;  %v22618_v34 = vld [vmem:[#allocation4 + $0x2e74] ss:$36 sps:$4 sm:$0xff]  }
 0xc4a   : > { %v15512_v21 = vsel %vm378_vm1, %v15338_v58, %v15500_v35  ;;  %v24943_v0 = vrot.slane %v24657_v61, 7  ;;  %v15569_v58 = vadd.f32 %v15554_v2, %v15539_v45  ;;  %v15575_v3 = vmax.f32 %v15563_v60, 0.0  ;;  %v22624_v45 = vld [vmem:[#allocation4 + $0x2e2c] ss:$36 sps:$4 sm:$0xff]  }
 0xc4b   : > { %v15565_v16 = vadd.f32 %v15550_v62, %v15535_v43  ;;  %v15536_v44 = vadd.f32 %v15524_v47, %v15512_v21  ;;  %v15542_v49 = vadd.f32 %v15530_v48, %v15348_v10  ;;  %v15541_v50 = vadd.f32 %v15529_v32, %v15346_v53  ;;  %v19888_v61 = vpop.f32.mrf.mxu0  ;;  %v22616_v47 = vld [vmem:[#allocation4 + $0x2e70] ss:$36 sps:$4 sm:$0xff]  }
 0xc4c   : > { %v15463_v14 = vsel %vm2303_vm2, %v24943_v0, %v15454_v63  ;;  %v15574_v54 = vmax.f32 %v15562_v39, 0.0  ;;  %v15581_v13 = vmax.f32 %v15569_v58, 0.0  ;;  %v15238_v19 = vadd.f32 %v24653_v15, %v24641_v27  ;;  %v24944_v39 = vld [vmem:[#allocation19_spill] sm:$0xff] }
 0xc4d   : > { %v15566_v5 = vadd.f32 %v15554_v2, %v15536_v44  ;;  %v15526_v56 = vadd.f32 %v15463_v14, %v15132_v40  ;;  %v15577_v51 = vmax.f32 %v15565_v16, 0.0  ;;  %v15572_v59 = vadd.f32 %v15554_v2, %v15542_v49  ;;  %v19890_v2 = vpop.f32.mrf.mxu0  ;;  %v22622_v16 = vld [vmem:[#allocation4 + $0x2e28] ss:$36 sps:$4 sm:$0xff]  }
 0xc4e   : > { %v15571_v63 = vadd.f32 %v15550_v62, %v15541_v50  ;;  %v19889_v20 = vadd.f32 %v19888_v61, %v19887_v23  ;;  %v15528_v48 = vadd.f32 %v24627_v4, %v15238_v19  ;;  %v15242_v21 = vadd.f32 %v24665_v46, %v24647_v31  ;;  %v22630_v44 = vld [vmem:[#allocation4 + $0x2de4] ss:$36 sps:$4 sm:$0xff]  }
 0xc4f   : > { %v15578_v55 = vmax.f32 %v15566_v5, 0.0  ;;  %v15538_v30 = vadd.f32 %v15526_v56, %v15342_v18  ;;  %v15584_v33 = vmax.f32 %v15572_v59, 0.0  ;;  %v24747_v52 = vpack.c.bf16 %v15577_v51, %v15574_v54  ;;  %v22610_v18 = vld [vmem:[#allocation4 + $0x2eb8] ss:$36 sps:$4 sm:$0xff]   ;;  %v19891_v43 = vpop.f32.mrf.mxu0  ;;  %v22628_v23 = vld [vmem:[#allocation4 + $0x2de0] ss:$36 sps:$4 sm:$0xff]  }
 0xc50   : > { %v15583_v40 = vmax.f32 %v15571_v63, 0.0  ;;  %v15558_v10 = vrot.slane %v24699_v11, %v23424_v29  ;;  %v19883_v15 = vadd.f32 %v24707_v12, %v24690_v38  ;;  %v19892_v36 = vadd.f32 %v19891_v43, %v19890_v2  ;;  %v24945_v38 = vld [vmem:[#allocation17_spill] sm:$0xff] }
 0xc51   : > { %v24745_v6 = vpack.c.bf16 %v15578_v55, %v15575_v3  ;;  %v24749_v42 = vpack.c.bf16 %v15584_v33, %v15581_v13  ;;  %v15568_v37 = vadd.f32 %v15550_v62, %v15538_v30  ;;  %v15531_v31 = vadd.f32 %v24631_v57, %v15242_v21  ;;  %v24946_v12 = vld [vmem:[#allocation21_spill] sm:$0xff]  ;;  %v24948_v55 = vld [vmem:[#allocation20_spill] sm:$0xff] }
 0xc52   : > { %v19886_v11 = vadd.f32 %v24733_v17, %v24719_v1  ;;  %v15228_v49 = vadd.f32 %v24944_v39, %v24635_v25  ;;  %v15232_v0 = vadd.f32 %v24946_v12, %v24945_v38  ;;  %v22636_v51 = vld [vmem:[#allocation4 + $0x2d9c] ss:$36 sps:$4 sm:$0xff]   ;;  %v24947_v17 = vld [vmem:[#allocation18_spill] sm:$0xff] }
 0xc53   : > { %16969 = vmatprep.mubr.bf16.mxu0 %v24745_v6  ;;  %v15580_v41 = vmax.f32 %v15568_v37, 0.0  ;;  %v22649_v21 = vld [vmem:[#allocation4 + $0x2a38] ss:$36 sps:$4 sm:$0xff]   ;;  %v22676_v12 = vld [vmem:[#allocation4 + $0x2968] ss:$36 sps:$4 sm:$0xff]  }
 0xc54   : > { %16970 = vmatmul.mubr.bf16.vlgmr.msra.gmra.mxu0 %v24747_v52  ;;  %v15522_v3 = vadd.f32 %v15228_v49, %v24947_v17  ;;  %v15525_v54 = vadd.f32 %v24948_v55, %v15232_v0  ;;  %v22675_v39 = vld [vmem:[#allocation4 + $0x291c] ss:$36 sps:$4 sm:$0xff]   ;;  %v22678_v49 = vld [vmem:[#allocation4 + $0x296c] ss:$36 sps:$4 sm:$0xff]   ;;  %v22681_v0 = vld [vmem:[#allocation4 + $0x28d4] ss:$36 sps:$4 sm:$0xff]  }
 0xc55   : > { %17090 = vmatpush1.bf16.msra.mxu0 %v22604_v9  ;;  %16979 = vmatprep.mubr.bf16.mxu0 %v24749_v42  ;;  %v24756_v35 = vpack.c.bf16 %v15583_v40, %v15580_v41  ;;  %v22634_v9 = vld [vmem:[#allocation4 + $0x2d98] ss:$36 sps:$4 sm:$0xff]   ;;  %v22648_v41 = vld [vmem:[#allocation4 + $0x2d0c] ss:$36 sps:$4 sm:$0xff]  }
 0xc56   : > { %17091 = vmatprep.subr.bf16.mxu0 %v22612_v26  ;;  %v22642_v26 = vld [vmem:[#allocation4 + $0x2d54] ss:$36 sps:$4 sm:$0xff]   ;;  %v22702_v55 = vld [vmem:[#allocation4 + $0x2ccc] ss:$36 sps:$4 sm:$0xff]  }
 0xc57   : > { %v22673_v38 = vld [vmem:[#allocation4 + $0x2918] ss:$36 sps:$4 sm:$0xff]   ;;  %v22694_v17 = vld [vmem:[#allocation4 + $0x2890] ss:$36 sps:$4 sm:$0xff]  }
 0xc59   : > { %17092 = vmatpush1.bf16.msra.mxu0 %v22610_v18 }
 0xc5a   : > { %v20099_v62 = vpop.f32.mrf.mxu1  ;;  %17093 = vmatprep.subr.bf16.mxu0 %v22618_v34  ;;  %v22640_v34 = vld [vmem:[#allocation4 + $0x2d50] ss:$36 sps:$4 sm:$0xff]  }
 0xc5b   : > { %v15442_v53 = vadd.f32 %v20099_v62, %v19889_v20  ;;  %v22646_v62 = vld [vmem:[#allocation4 + $0x2d08] ss:$36 sps:$4 sm:$0xff]  }
 0xc5c   : > { %v15433_v27 = vpop.f32.mrf.mxu1  ;;  %16980 = vmatmul.mubr.bf16.gmra.mxu0 %v24756_v35 }
 0xc5d   : > { %v15540_v60 = vadd.f32 %v15528_v48, %v15442_v53  ;;  %17094 = vmatpush1.bf16.msra.mxu0 %v22616_v47  ;;  %17121 = vmatprep.mubr.bf16.mxu0 %v24896_v24  ;;  %v15434_v46 = vadd.f32 %v19883_v15, %v15433_v27  ;;  %v15492_v57 = vrot.slane %v15442_v53, 1  ;;  %v22643_v47 = vld [vmem:[#allocation4 + $0x2a80] ss:$36 sps:$4 sm:$0xff]   ;;  %v22654_v48 = vld [vmem:[#allocation4 + $0x2a8c] ss:$36 sps:$4 sm:$0xff]  }
 0xc5e   : > { %v20100_v4 = vpop.f32.mrf.mxu1  ;;  %17095 = vmatprep.subr.bf16.mxu0 %v22624_v45  ;;  %v22651_v45 = vld [vmem:[#allocation4 + $0x2a3c] ss:$36 sps:$4 sm:$0xff]   ;;  %v22652_v53 = vld [vmem:[#allocation4 + $0x2a88] ss:$36 sps:$4 sm:$0xff]   ;;  %v22655_v15 = vld [vmem:[#allocation4 + $0x29f0] ss:$36 sps:$4 sm:$0xff]  }
 0xc5f   : > { %v15445_v32 = vadd.f32 %v20100_v4, %v19892_v36  ;;  %v15570_v5 = vadd.f32 %v15558_v10, %v15540_v60  ;;  %v15486_v50 = vrot.slane %v15434_v46, 1  ;;  %v22660_v27 = vld [vmem:[#allocation4 + $0x2a44] ss:$36 sps:$4 sm:$0xff]   ;;  %v22663_v60 = vld [vmem:[#allocation4 + $0x29ac] ss:$36 sps:$4 sm:$0xff]  }
 0xc60   : > { %v15436_v14 = vpop.f32.mrf.mxu1  ;;  %v22658_v36 = vld [vmem:[#allocation4 + $0x2a40] ss:$36 sps:$4 sm:$0xff]   ;;  %v22661_v4 = vld [vmem:[#allocation4 + $0x29a8] ss:$36 sps:$4 sm:$0xff]  }
 0xc61   : > { %v15543_v58 = vadd.f32 %v15531_v31, %v15445_v32  ;;  %v15437_v56 = vadd.f32 %v19886_v11, %v15436_v14  ;;  %17096 = vmatpush1.bf16.msra.mxu0 %v22622_v16  ;;  %v15582_v25 = vmax.f32 %v15570_v5, 0.0  ;;  %v22666_v16 = vld [vmem:[#allocation4 + $0x29fc] ss:$36 sps:$4 sm:$0xff]   ;;  %v22669_v31 = vld [vmem:[#allocation4 + $0x2964] ss:$36 sps:$4 sm:$0xff]  }
 0xc62   : > { %17097 = vmatprep.subr.bf16.mxu0 %v22630_v44  ;;  %v22664_v44 = vld [vmem:[#allocation4 + $0x29f8] ss:$36 sps:$4 sm:$0xff]   ;;  %v22667_v46 = vld [vmem:[#allocation4 + $0x2960] ss:$36 sps:$4 sm:$0xff]   ;;  %v22670_v32 = vld [vmem:[#allocation4 + $0x29b0] ss:$36 sps:$4 sm:$0xff]  }
 0xc63   : > { %v15573_v59 = vadd.f32 %v15558_v10, %v15543_v58  ;;  %v15489_v1 = vrot.slane %v15437_v56, 1  ;;  %v22672_v11 = vld [vmem:[#allocation4 + $0x29b4] ss:$36 sps:$4 sm:$0xff]   ;;  %v22684_v14 = vld [vmem:[#allocation4 + $0x2924] ss:$36 sps:$4 sm:$0xff]  }
 0xc64   : > { %v22679_v5 = vld [vmem:[#allocation4 + $0x28d0] ss:$36 sps:$4 sm:$0xff]   ;;  %v22682_v58 = vld [vmem:[#allocation4 + $0x2920] ss:$36 sps:$4 sm:$0xff]  }
 0xc65   : > { %v15585_v30 = vmax.f32 %v15573_v59, 0.0  ;;  %v15501_v33 = vsel %vm2348_vm3, %v15489_v1, %v15492_v57  ;;  %v15504_v13 = vsel %vm2348_vm3, %v15486_v50, %v15489_v1  ;;  %17098 = vmatpush1.bf16.msra.mxu0 %v22628_v23  ;;  %v22690_v23 = vld [vmem:[#allocation4 + $0x28dc] ss:$36 sps:$4 sm:$0xff]   ;;  %v22693_v50 = vld [vmem:[#allocation4 + $0x2cc4] ss:$36 sps:$4 sm:$0xff]  }
 0xc66   : > { %v15513_v61 = vsel %vm378_vm1, %v15437_v56, %v15501_v33  ;;  %v15534_v63 = vadd.f32 %v15522_v3, %v15504_v13  ;;  %17099 = vmatprep.subr.bf16.mxu0 %v22636_v51  ;;  %v22687_v56 = vld [vmem:[#allocation4 + $0x288c] ss:$36 sps:$4 sm:$0xff]   ;;  %v22688_v57 = vld [vmem:[#allocation4 + $0x28d8] ss:$36 sps:$4 sm:$0xff]   ;;  %v22691_v1 = vld [vmem:[#allocation4 + $0x2cc0] ss:$36 sps:$4 sm:$0xff]  }
 0xc67   : > { %v24782_v37 = vpack.c.bf16 %v15585_v30, %v15582_v25  ;;  %v15537_v18 = vadd.f32 %v15525_v54, %v15513_v61  ;;  %v22685_v51 = vld [vmem:[#allocation4 + $0x2888] ss:$36 sps:$4 sm:$0xff]   ;;  %v22696_v59 = vld [vmem:[#allocation4 + $0x2894] ss:$36 sps:$4 sm:$0xff]   ;;  %v22699_v3 = vld [vmem:[#allocation4 + $0x2c7c] ss:$36 sps:$4 sm:$0xff]  }
 0xc68   : > { %v15564_v2 = vadd.f32 %v15558_v10, %v15534_v63  ;;  %v22697_v54 = vld [vmem:[#allocation4 + $0x2c78] ss:$36 sps:$4 sm:$0xff]   ;;  %v22700_v25 = vld [vmem:[#allocation4 + $0x2cc8] ss:$36 sps:$4 sm:$0xff]   ;;  %v22703_v13 = vld [vmem:[#allocation4 + $0x2c30] ss:$36 sps:$4 sm:$0xff]  }
 0xc69   : > { %v15567_v40 = vadd.f32 %v15558_v10, %v15537_v18  ;;  %17100 = vmatpush1.bf16.msra.mxu0 %v22634_v9  ;;  %v22657_v10 = vld [vmem:[#allocation4 + $0x29f4] ss:$36 sps:$4 sm:$0xff]   ;;  %v22708_v33 = vld [vmem:[#allocation4 + $0x2c84] ss:$36 sps:$4 sm:$0xff]   ;;  %v22711_v61 = vld [vmem:[#allocation4 + $0x2bec] ss:$36 sps:$4 sm:$0xff]  }
 0xc6a   : > { %v15576_v19 = vmax.f32 %v15564_v2, 0.0  ;;  %17101 = vmatprep.subr.bf16.mxu0 %v22642_v26  ;;  %v22705_v30 = vld [vmem:[#allocation4 + $0x2c34] ss:$36 sps:$4 sm:$0xff]   ;;  %v22706_v9 = vld [vmem:[#allocation4 + $0x2c80] ss:$36 sps:$4 sm:$0xff]  }
 0xc6b   : > { %v15579_v20 = vmax.f32 %v15567_v40, 0.0  ;;  %v22714_v63 = vld [vmem:[#allocation4 + $0x2c3c] ss:$36 sps:$4 sm:$0xff]   ;;  %v22709_v26 = vld [vmem:[#allocation4 + $0x2be8] ss:$36 sps:$4 sm:$0xff]  }
 0xc6c   : > { %v22712_v18 = vld [vmem:[#allocation4 + $0x2c38] ss:$36 sps:$4 sm:$0xff]   ;;  %v22717_v2 = vld [vmem:[#allocation4 + $0x2ba4] ss:$36 sps:$4 sm:$0xff]  }
 0xc6d   : > { %v24784_v43 = vpack.c.bf16 %v15579_v20, %v15576_v19  ;;  %17102 = vmatpush1.bf16.msra.mxu0 %v22640_v34  ;;  %v22720_v40 = vld [vmem:[#allocation4 + $0x2bf4] ss:$36 sps:$4 sm:$0xff]   ;;  %v22715_v34 = vld [vmem:[#allocation4 + $0x2ba0] ss:$36 sps:$4 sm:$0xff]   ;;  %v22726_v20 = vld [vmem:[#allocation4 + $0x2bac] ss:$36 sps:$4 sm:$0xff]  }
 0xc6e   : > { %17103 = vmatprep.subr.bf16.mxu0 %v22648_v41  ;;  %v22718_v19 = vld [vmem:[#allocation4 + $0x2bf0] ss:$36 sps:$4 sm:$0xff]   ;;  %v22723_v41 = vld [vmem:[#allocation4 + $0x2b5c] ss:$36 sps:$4 sm:$0xff]  }
 0xc6f   : > { %17021 = vmatmul.mubr.bf16.vlgmr.msra.gmra.mxu1 %v24784_v43 }
 0xc70   : > { %17040 = vmatpush1.bf16.msra.mxu1 %v22643_v47  ;;  %17030 = vmatprep.mubr.bf16.mxu1 %v24896_v24  ;;  %v22721_v47 = vld [vmem:[#allocation4 + $0x2b58] ss:$36 sps:$4 sm:$0xff]  }
 0xc71   : > { %17104 = vmatpush1.bf16.msra.mxu0 %v22646_v62  ;;  %17041 = vmatprep.subr.bf16.mxu1 %v22651_v45  ;;  %v22724_v62 = vld [vmem:[#allocation4 + $0x2ba8] ss:$36 sps:$4 sm:$0xff]   ;;  %v22729_v45 = vld [vmem:[#allocation4 + $0x2b14] ss:$36 sps:$4 sm:$0xff]  }
 0xc72   : > { %17139 = vmatprep.subr.bf16.mxu0 %v22654_v48  ;;  %v22732_v48 = vld [vmem:[#allocation4 + $0x2b64] ss:$36 sps:$4 sm:$0xff]  }
 0xc74   : > { %17042 = vmatpush1.bf16.msra.mxu1 %v22649_v21  ;;  %17122 = vmatmul.mubr.bf16.vlgmr.msra.gmra.mxu0 %v24784_v43  ;;  %v22727_v21 = vld [vmem:[#allocation4 + $0x2b10] ss:$36 sps:$4 sm:$0xff]  }
 0xc75   : > { %17140 = vmatpush1.bf16.msra.mxu0 %v22652_v53  ;;  %17043 = vmatprep.subr.bf16.mxu1 %v22657_v10  ;;  %v22730_v53 = vld [vmem:[#allocation4 + $0x2b60] ss:$36 sps:$4 sm:$0xff]   ;;  %v22735_v10 = vld [vmem:[#allocation4 + $0x2acc] ss:$36 sps:$4 sm:$0xff]  }
 0xc76   : > { %17141 = vmatprep.subr.bf16.mxu0 %v22660_v27  ;;  %17130 = vmatprep.mubr.bf16.mxu0 %v24896_v24  ;;  %v22738_v27 = vld [vmem:[#allocation4 + $0x2b1c] ss:$36 sps:$4 sm:$0xff]  }
 0xc77   : > { %17031 = vmatmul.mubr.bf16.gmra.mxu1 %v24782_v37 }
 0xc78   : > { %17044 = vmatpush1.bf16.msra.mxu1 %v22655_v15  ;;  %17071 = vmatprep.mubr.bf16.mxu1 %v24745_v6  ;;  %v22733_v15 = vld [vmem:[#allocation4 + $0x2ac8] ss:$36 sps:$4 sm:$0xff]  }
 0xc79   : > { %17142 = vmatpush1.bf16.msra.mxu0 %v22658_v36  ;;  %17045 = vmatprep.subr.bf16.mxu1 %v22663_v60  ;;  %v22736_v36 = vld [vmem:[#allocation4 + $0x2b18] ss:$36 sps:$4 sm:$0xff]   ;;  %v22741_v60 = vld [vmem:[#allocation4 + $0x2f0c] ss:$36 sps:$4 sm:$0xff]  }
 0xc7a   : > { %17143 = vmatprep.subr.bf16.mxu0 %v22666_v16  ;;  %v22744_v16 = vld [vmem:[#allocation4 + $0x2ad4] ss:$36 sps:$4 sm:$0xff]  }
 0xc7c   : > { %17046 = vmatpush1.bf16.msra.mxu1 %v22661_v4  ;;  %17131 = vmatmul.mubr.bf16.gmra.mxu0 %v24782_v37  ;;  %v22739_v4 = vld [vmem:[#allocation4 + $0x2f08] ss:$36 sps:$4 sm:$0xff]  }
 0xc7d   : > { %17144 = vmatpush1.bf16.msra.mxu0 %v22664_v44  ;;  %17171 = vmatprep.mubr.bf16.mxu0 %v24745_v6  ;;  %v22742_v44 = vld [vmem:[#allocation4 + $0x2ad0] ss:$36 sps:$4 sm:$0xff]  }
 0xc7e   : > { %17047 = vmatprep.subr.bf16.mxu1 %v22669_v31  ;;  %17145 = vmatprep.subr.bf16.mxu0 %v22672_v11  ;;  %v22747_v31 = vld [vmem:[#allocation4 + $0x2ec4] ss:$36 sps:$4 sm:$0xff]   ;;  %v22750_v11 = vld [vmem:[#allocation4 + $0x2f14] ss:$36 sps:$4 sm:$0xff]  }
 0xc80   : > { %17048 = vmatpush1.bf16.msra.mxu1 %v22667_v46  ;;  %v22745_v46 = vld [vmem:[#allocation4 + $0x2ec0] ss:$36 sps:$4 sm:$0xff]  }
 0xc81   : > { %17146 = vmatpush1.bf16.msra.mxu0 %v22670_v32  ;;  %17049 = vmatprep.subr.bf16.mxu1 %v22675_v39  ;;  %v22748_v32 = vld [vmem:[#allocation4 + $0x2f10] ss:$36 sps:$4 sm:$0xff]   ;;  %v22753_v39 = vld [vmem:[#allocation4 + $0x2e7c] ss:$36 sps:$4 sm:$0xff]  }
 0xc82   : > { %17147 = vmatprep.subr.bf16.mxu0 %v22678_v49  ;;  %v22756_v49 = vld [vmem:[#allocation4 + $0x2ecc] ss:$36 sps:$4 sm:$0xff]  }
 0xc84   : > { %17050 = vmatpush1.bf16.msra.mxu1 %v22673_v38  ;;  %v22751_v38 = vld [vmem:[#allocation4 + $0x2e78] ss:$36 sps:$4 sm:$0xff]  }
 0xc85   : > { %17148 = vmatpush1.bf16.msra.mxu0 %v22676_v12  ;;  %17051 = vmatprep.subr.bf16.mxu1 %v22681_v0  ;;  %v22754_v12 = vld [vmem:[#allocation4 + $0x2ec8] ss:$36 sps:$4 sm:$0xff]   ;;  %v22759_v0 = vld [vmem:[#allocation4 + $0x2e34] ss:$36 sps:$4 sm:$0xff]  }
 0xc86   : > { %17149 = vmatprep.subr.bf16.mxu0 %v22684_v14  ;;  %v22762_v14 = vld [vmem:[#allocation4 + $0x2e84] ss:$36 sps:$4 sm:$0xff]  }
 0xc88   : > { %17052 = vmatpush1.bf16.msra.mxu1 %v22679_v5  ;;  %v22757_v5 = vld [vmem:[#allocation4 + $0x2e30] ss:$36 sps:$4 sm:$0xff]  }
 0xc89   : > { %17150 = vmatpush1.bf16.msra.mxu0 %v22682_v58  ;;  %17053 = vmatprep.subr.bf16.mxu1 %v22687_v56  ;;  %v22760_v58 = vld [vmem:[#allocation4 + $0x2e80] ss:$36 sps:$4 sm:$0xff]   ;;  %v22765_v56 = vld [vmem:[#allocation4 + $0x2dec] ss:$36 sps:$4 sm:$0xff]  }
 0xc8a   : > { %17151 = vmatprep.subr.bf16.mxu0 %v22690_v23  ;;  %v22768_v23 = vld [vmem:[#allocation4 + $0x2e3c] ss:$36 sps:$4 sm:$0xff]  }
 0xc8c   : > { %17054 = vmatpush1.bf16.msra.mxu1 %v22685_v51  ;;  %v22763_v51 = vld [vmem:[#allocation4 + $0x2de8] ss:$36 sps:$4 sm:$0xff]  }
 0xc8d   : > { %17152 = vmatpush1.bf16.msra.mxu0 %v22688_v57  ;;  %17055 = vmatprep.subr.bf16.mxu1 %v22693_v50  ;;  %v22766_v57 = vld [vmem:[#allocation4 + $0x2e38] ss:$36 sps:$4 sm:$0xff]   ;;  %v22771_v50 = vld [vmem:[#allocation4 + $0x2da4] ss:$36 sps:$4 sm:$0xff]  }
 0xc8e   : > { %17153 = vmatprep.subr.bf16.mxu0 %v22696_v59  ;;  %v22774_v59 = vld [vmem:[#allocation4 + $0x2df4] ss:$36 sps:$4 sm:$0xff]  }
 0xc90   : > { %17056 = vmatpush2.bf16.msra.mxu1 %v22691_v1  ;;  %v22769_v1 = vld [vmem:[#allocation4 + $0x2da0] ss:$36 sps:$4 sm:$0xff]  }
 0xc91   : > { %17154 = vmatpush1.bf16.msra.mxu0 %v22694_v17  ;;  %17057 = vmatprep.subr.bf16.mxu1 %v22699_v3  ;;  %v22772_v17 = vld [vmem:[#allocation4 + $0x2df0] ss:$36 sps:$4 sm:$0xff]   ;;  %v22777_v3 = vld [vmem:[#allocation4 + $0x2d5c] ss:$36 sps:$4 sm:$0xff]  }
 0xc92   : > { %17155 = vmatprep.subr.bf16.mxu0 %v22702_v55  ;;  %v22780_v55 = vld [vmem:[#allocation4 + $0x2dac] ss:$36 sps:$4 sm:$0xff]  }
 0xc94   : > { %17058 = vmatpush2.bf16.msra.mxu1 %v22697_v54  ;;  %v22775_v54 = vld [vmem:[#allocation4 + $0x2d58] ss:$36 sps:$4 sm:$0xff]  }
 0xc95   : > { %17156 = vmatpush2.bf16.msra.mxu0 %v22700_v25  ;;  %17059 = vmatprep.subr.bf16.mxu1 %v22705_v30  ;;  %v22778_v25 = vld [vmem:[#allocation4 + $0x2da8] ss:$36 sps:$4 sm:$0xff]   ;;  %v22783_v30 = vld [vmem:[#allocation4 + $0x2d14] ss:$36 sps:$4 sm:$0xff]  }
 0xc96   : > { %17157 = vmatprep.subr.bf16.mxu0 %v22708_v33  ;;  %v22786_v33 = vld [vmem:[#allocation4 + $0x2d64] ss:$36 sps:$4 sm:$0xff]  }
 0xc98   : > { %17060 = vmatpush2.bf16.msra.mxu1 %v22703_v13  ;;  %v22781_v13 = vld [vmem:[#allocation4 + $0x2d10] ss:$36 sps:$4 sm:$0xff]  }
 0xc99   : > { %17158 = vmatpush2.bf16.msra.mxu0 %v22706_v9  ;;  %17061 = vmatprep.subr.bf16.mxu1 %v22711_v61  ;;  %v22784_v9 = vld [vmem:[#allocation4 + $0x2d60] ss:$36 sps:$4 sm:$0xff]   ;;  %v22789_v61 = vld [vmem:[#allocation4 + $0x2a94] ss:$36 sps:$4 sm:$0xff]  }
 0xc9a   : > { %17159 = vmatprep.subr.bf16.mxu0 %v22714_v63  ;;  %v22792_v63 = vld [vmem:[#allocation4 + $0x2d1c] ss:$36 sps:$4 sm:$0xff]  }
 0xc9c   : > { %17062 = vmatpush2.bf16.msra.mxu1 %v22709_v26  ;;  %v22787_v26 = vld [vmem:[#allocation4 + $0x2a90] ss:$36 sps:$4 sm:$0xff]  }
 0xc9d   : > { %17160 = vmatpush2.bf16.msra.mxu0 %v22712_v18  ;;  %17063 = vmatprep.subr.bf16.mxu1 %v22717_v2  ;;  %v22790_v18 = vld [vmem:[#allocation4 + $0x2d18] ss:$36 sps:$4 sm:$0xff]   ;;  %v22795_v2 = vld [vmem:[#allocation4 + $0x2a4c] ss:$36 sps:$4 sm:$0xff]  }
 0xc9e   : > { %17161 = vmatprep.subr.bf16.mxu0 %v22720_v40  ;;  %v22796_v40 = vld [vmem:[#allocation4 + $0x2cd8] ss:$36 sps:$4 sm:$0xff]  }
 0xca0   : > { %17064 = vmatpush2.bf16.msra.mxu1 %v22715_v34  ;;  %v22793_v34 = vld [vmem:[#allocation4 + $0x2a48] ss:$36 sps:$4 sm:$0xff]  }
 0xca1   : > { %17162 = vmatpush2.bf16.msra.mxu0 %v22718_v19  ;;  %17065 = vmatprep.subr.bf16.mxu1 %v22723_v41  ;;  %v22797_v19 = vld [vmem:[#allocation4 + $0x2a98] ss:$36 sps:$4 sm:$0xff]   ;;  %v22800_v41 = vld [vmem:[#allocation4 + $0x2a04] ss:$36 sps:$4 sm:$0xff]  }
 0xca2   : > { %17163 = vmatprep.subr.bf16.mxu0 %v22726_v20  ;;  %v22801_v20 = vld [vmem:[#allocation4 + $0x2c90] ss:$36 sps:$4 sm:$0xff]  }
 0xca4   : > { %17066 = vmatpush2.bf16.msra.mxu1 %v22721_v47  ;;  %v22798_v47 = vld [vmem:[#allocation4 + $0x2a00] ss:$36 sps:$4 sm:$0xff]  }
 0xca5   : > { %17164 = vmatpush2.bf16.msra.mxu0 %v22724_v62  ;;  %17067 = vmatprep.subr.bf16.mxu1 %v22729_v45  ;;  %v22802_v62 = vld [vmem:[#allocation4 + $0x2a50] ss:$36 sps:$4 sm:$0xff]   ;;  %v22805_v45 = vld [vmem:[#allocation4 + $0x29bc] ss:$36 sps:$4 sm:$0xff]  }
 0xca6   : > { %17165 = vmatprep.subr.bf16.mxu0 %v22732_v48  ;;  %v22806_v48 = vld [vmem:[#allocation4 + $0x2c48] ss:$36 sps:$4 sm:$0xff]  }
 0xca8   : > { %17068 = vmatpush2.bf16.msra.mxu1 %v22727_v21  ;;  %v22803_v21 = vld [vmem:[#allocation4 + $0x29b8] ss:$36 sps:$4 sm:$0xff]  }
 0xca9   : > { %17166 = vmatpush2.bf16.msra.mxu0 %v22730_v53  ;;  %17069 = vmatprep.subr.bf16.mxu1 %v22735_v10  ;;  %v22807_v53 = vld [vmem:[#allocation4 + $0x2a08] ss:$36 sps:$4 sm:$0xff]   ;;  %v22810_v10 = vld [vmem:[#allocation4 + $0x2974] ss:$36 sps:$4 sm:$0xff]  }
 0xcaa   : > { %17167 = vmatprep.subr.bf16.mxu0 %v22738_v27  ;;  %v22811_v27 = vld [vmem:[#allocation4 + $0x2c00] ss:$36 sps:$4 sm:$0xff]  }
 0xcac   : > { %17070 = vmatpush2.bf16.msra.mxu1 %v22733_v15  ;;  %v22808_v15 = vld [vmem:[#allocation4 + $0x2970] ss:$36 sps:$4 sm:$0xff]  }
 0xcad   : > { %17168 = vmatpush2.bf16.msra.mxu0 %v22736_v36  ;;  %17188 = vmatprep.subr.bf16.mxu1 %v22741_v60  ;;  %v22815_v36 = vld [vmem:[#allocation4 + $0x292c] ss:$36 sps:$4 sm:$0xff]   ;;  %v22816_v60 = vld [vmem:[#allocation4 + $0x2bb8] ss:$36 sps:$4 sm:$0xff]  }
 0xcae   : > { %17169 = vmatprep.subr.bf16.mxu0 %v22744_v16  ;;  %v22813_v16 = vld [vmem:[#allocation4 + $0x2928] ss:$36 sps:$4 sm:$0xff]  }
 0xcaf   : > { %17072 = vmatmul.mubr.bf16.vlgmr.msra.gmra.mxu1 %v24747_v52 }
 0xcb0   : > { %17080 = vmatprep.mubr.bf16.mxu1 %v24749_v42  ;;  %17189 = vmatpush1.bf16.msra.mxu1 %v22739_v4  ;;  %v22817_v4 = vld [vmem:[#allocation4 + $0x2978] ss:$36 sps:$4 sm:$0xff]  }
 0xcb1   : > { %17170 = vmatpush2.bf16.msra.mxu0 %v22742_v44  ;;  %17190 = vmatprep.subr.bf16.mxu1 %v22747_v31  ;;  %v22820_v44 = vld [vmem:[#allocation4 + $0x28e4] ss:$36 sps:$4 sm:$0xff]   ;;  %v22821_v31 = vld [vmem:[#allocation4 + $0x2b70] ss:$36 sps:$4 sm:$0xff]  }
 0xcb2   : > { %17288 = vmatprep.subr.bf16.mxu0 %v22750_v11  ;;  %v22818_v11 = vld [vmem:[#allocation4 + $0x28e0] ss:$36 sps:$4 sm:$0xff]  }
 0xcb4   : > { %17172 = vmatmul.mubr.bf16.vlgmr.msra.gmra.mxu0 %v24747_v52  ;;  %17191 = vmatpush1.bf16.msra.mxu1 %v22745_v46  ;;  %v22822_v46 = vld [vmem:[#allocation4 + $0x2930] ss:$36 sps:$4 sm:$0xff]  }
 0xcb5   : > { %17179 = vmatprep.mubr.bf16.mxu0 %v24749_v42  ;;  %17289 = vmatpush1.bf16.msra.mxu0 %v22748_v32  ;;  %v22825_v32 = vld [vmem:[#allocation4 + $0x289c] ss:$36 sps:$4 sm:$0xff]  }
 0xcb6   : > { %17192 = vmatprep.subr.bf16.mxu1 %v22753_v39  ;;  %17290 = vmatprep.subr.bf16.mxu0 %v22756_v49  ;;  %v22823_v39 = vld [vmem:[#allocation4 + $0x2898] ss:$36 sps:$4 sm:$0xff]   ;;  %v22827_v49 = vld [vmem:[#allocation4 + $0x28e8] ss:$36 sps:$4 sm:$0xff]  }
 0xcb7   : > { %17081 = vmatmul.mubr.bf16.gmra.mxu1 %v24756_v35 }
 0xcb8   : > { %17193 = vmatpush1.bf16.msra.mxu1 %v22751_v38  ;;  %17220 = vmatprep.mubr.bf16.mxu1 %v24896_v24  ;;  %v22830_v38 = vld [vmem:[#allocation4 + $0x2cd4] ss:$36 sps:$4 sm:$0xff]  }
 0xcb9   : > { %17291 = vmatpush1.bf16.msra.mxu0 %v22754_v12  ;;  %17194 = vmatprep.subr.bf16.mxu1 %v22759_v0  ;;  %v22831_v12 = vld [vmem:[#allocation4 + $0x2ae0] ss:$36 sps:$4 sm:$0xff]   ;;  %v22828_v0 = vld [vmem:[#allocation4 + $0x2cd0] ss:$36 sps:$4 sm:$0xff]  }
 0xcba   : > { %17292 = vmatprep.subr.bf16.mxu0 %v22762_v14  ;;  %v22832_v14 = vld [vmem:[#allocation4 + $0x28a0] ss:$36 sps:$4 sm:$0xff]  }
 0xcbc   : > { %17180 = vmatmul.mubr.bf16.gmra.mxu0 %v24756_v35  ;;  %17195 = vmatpush1.bf16.msra.mxu1 %v22757_v5  ;;  %v22835_v5 = vld [vmem:[#allocation4 + $0x2c8c] ss:$36 sps:$4 sm:$0xff]  }
 0xcbd   : > { %17293 = vmatpush1.bf16.msra.mxu0 %v22760_v58  ;;  %17196 = vmatprep.subr.bf16.mxu1 %v22765_v56  ;;  %v22833_v58 = vld [vmem:[#allocation4 + $0x2c88] ss:$36 sps:$4 sm:$0xff]  }
 0xcbe   : > { %17294 = vmatprep.subr.bf16.mxu0 %v22768_v23  ;;  %17320 = vmatprep.mubr.bf16.mxu0 %v24896_v24  ;;  %v22838_v56 = vld [vmem:[#allocation4 + $0x2c44] ss:$36 sps:$4 sm:$0xff]  }
 0xcbf   : > { %v22836_v23 = vld [vmem:[#allocation4 + $0x2c40] ss:$36 sps:$4 sm:$0xff]  }
 0xcc0   : > { %17197 = vmatpush1.bf16.msra.mxu1 %v22763_v51  ;;  %v22841_v51 = vld [vmem:[#allocation4 + $0x2bfc] ss:$36 sps:$4 sm:$0xff]  }
 0xcc1   : > { %17295 = vmatpush1.bf16.msra.mxu0 %v22766_v57  ;;  %17198 = vmatprep.subr.bf16.mxu1 %v22771_v50  ;;  %v22839_v57 = vld [vmem:[#allocation4 + $0x2bf8] ss:$36 sps:$4 sm:$0xff]  }
 0xcc2   : > { %17296 = vmatprep.subr.bf16.mxu0 %v22774_v59  ;;  %v22844_v50 = vld [vmem:[#allocation4 + $0x2bb4] ss:$36 sps:$4 sm:$0xff]  }
 0xcc3   : > { %v22842_v59 = vld [vmem:[#allocation4 + $0x2bb0] ss:$36 sps:$4 sm:$0xff]  }
 0xcc4   : > { %17199 = vmatpush1.bf16.msra.mxu1 %v22769_v1  ;;  %v22847_v1 = vld [vmem:[#allocation4 + $0x2b6c] ss:$36 sps:$4 sm:$0xff]  }
 0xcc5   : > { %17297 = vmatpush1.bf16.msra.mxu0 %v22772_v17  ;;  %17200 = vmatprep.subr.bf16.mxu1 %v22777_v3  ;;  %v22845_v17 = vld [vmem:[#allocation4 + $0x2b68] ss:$36 sps:$4 sm:$0xff]  }
 0xcc6   : > { %17298 = vmatprep.subr.bf16.mxu0 %v22780_v55  ;;  %v22850_v3 = vld [vmem:[#allocation4 + $0x2b24] ss:$36 sps:$4 sm:$0xff]  }
 0xcc7   : > { %v22848_v55 = vld [vmem:[#allocation4 + $0x2b20] ss:$36 sps:$4 sm:$0xff]  }
 0xcc8   : > { %17201 = vmatpush1.bf16.msra.mxu1 %v22775_v54  ;;  %v22853_v54 = vld [vmem:[#allocation4 + $0x2adc] ss:$36 sps:$4 sm:$0xff]  }
 0xcc9   : > { %17299 = vmatpush1.bf16.msra.mxu0 %v22778_v25  ;;  %17202 = vmatprep.subr.bf16.mxu1 %v22783_v30  ;;  %v22851_v25 = vld [vmem:[#allocation4 + $0x2ad8] ss:$36 sps:$4 sm:$0xff]  }
 0xcca   : > { %17300 = vmatprep.subr.bf16.mxu0 %v22786_v33  ;;  %v22854_v30 = vld [vmem:[#allocation4 + $0x2f18] ss:$36 sps:$4 sm:$0xff]   ;;  %v22855_v33 = vld [vmem:[#allocation4 + $0x2ed0] ss:$36 sps:$4 sm:$0xff]  }
 0xccc   : > { %17203 = vmatpush1.bf16.msra.mxu1 %v22781_v13  ;;  %v22856_v13 = vld [vmem:[#allocation4 + $0x2e88] ss:$36 sps:$4 sm:$0xff]  }
 0xccd   : > { %17301 = vmatpush1.bf16.msra.mxu0 %v22784_v9  ;;  %17237 = vmatprep.subr.bf16.mxu1 %v22789_v61  ;;  %v22857_v61 = vld [vmem:[#allocation4 + $0x2e40] ss:$36 sps:$4 sm:$0xff]  }
 0xcce   : > { %17302 = vmatprep.subr.bf16.mxu0 %v22792_v63 }
 0xccf   : > { %17221 = vmatmul.mubr.bf16.vlgmr.msra.gmra.mxu1 %v24784_v43 }
 0xcd0   : > { %17238 = vmatpush1.bf16.msra.mxu1 %v22787_v26  ;;  %17228 = vmatprep.mubr.bf16.mxu1 %v24896_v24 }
 0xcd1   : > { %17303 = vmatpush1.bf16.msra.mxu0 %v22790_v18  ;;  %17239 = vmatprep.subr.bf16.mxu1 %v22795_v2  ;;  %v22858_v18 = vld [vmem:[#allocation4 + $0x2df8] ss:$36 sps:$4 sm:$0xff]  }
 0xcd2   : > { %19903 = vmatprep.subr.bf16.mxu0 %v22796_v40 }
 0xcd4   : > { %17240 = vmatpush1.bf16.msra.mxu1 %v22793_v34  ;;  %17321 = vmatmul.mubr.bf16.vlgmr.msra.gmra.mxu0 %v24784_v43 }
 0xcd5   : > { %19904 = vmatpush3.bf16.msra.mxu0 %v22797_v19  ;;  %17241 = vmatprep.subr.bf16.mxu1 %v22800_v41  ;;  %v22860_v19 = vld [vmem:[#allocation4 + $0x2d68] ss:$36 sps:$4 sm:$0xff]  }
 0xcd6   : > { %19905 = vmatprep.subr.bf16.mxu0 %v22801_v20  ;;  %17328 = vmatprep.mubr.bf16.mxu0 %v24896_v24  ;;  %v22812_v24 = vld [vmem:[#allocation4 + $0x29c0] ss:$36 sps:$4 sm:$0xff]  }
 0xcd7   : > { %17229 = vmatmul.mubr.bf16.gmra.mxu1 %v24782_v37 }
 0xcd8   : > { %17242 = vmatpush1.bf16.msra.mxu1 %v22798_v47  ;;  %17269 = vmatprep.mubr.bf16.mxu1 %v24745_v6 }
 0xcd9   : > { %19906 = vmatpush3.bf16.msra.mxu0 %v22802_v62  ;;  %17243 = vmatprep.subr.bf16.mxu1 %v22805_v45 }
 0xcda   : > { %19907 = vmatprep.subr.bf16.mxu0 %v22806_v48 }
 0xcdc   : > { %17244 = vmatpush1.bf16.msra.mxu1 %v22803_v21  ;;  %17329 = vmatmul.mubr.bf16.gmra.mxu0 %v24782_v37 }
 0xcdd   : > { %19908 = vmatpush3.bf16.msra.mxu0 %v22807_v53  ;;  %17371 = vmatprep.mubr.bf16.mxu0 %v24745_v6  ;;  %v22826_v6 = vld [vmem:[#allocation4 + $0x2b28] ss:$36 sps:$4 sm:$0xff]  }
 0xcde   : > { %17245 = vmatprep.subr.bf16.mxu1 %v22810_v10  ;;  %19909 = vmatprep.subr.bf16.mxu0 %v22811_v27 }
 0xce0   : > { %17246 = vmatpush1.bf16.msra.mxu1 %v22808_v15 }
 0xce1   : > { %19910 = vmatpush3.bf16.msra.mxu0 %v22812_v24  ;;  %17247 = vmatprep.subr.bf16.mxu1 %v22815_v36 }
 0xce2   : > { %19911 = vmatprep.subr.bf16.mxu0 %v22816_v60 }
 0xce4   : > { %17248 = vmatpush1.bf16.msra.mxu1 %v22813_v16 }
 0xce5   : > { %19912 = vmatpush3.bf16.msra.mxu0 %v22817_v4  ;;  %17249 = vmatprep.subr.bf16.mxu1 %v22820_v44 }
 0xce6   : > { %19913 = vmatprep.subr.bf16.mxu0 %v22821_v31 }
 0xce8   : > { %17250 = vmatpush1.bf16.msra.mxu1 %v22818_v11 }
 0xce9   : > { %19914 = vmatpush3.bf16.msra.mxu0 %v22822_v46  ;;  %17251 = vmatprep.subr.bf16.mxu1 %v22825_v32 }
 0xcea   : > { %19915 = vmatprep.subr.bf16.mxu0 %v22826_v6 }
 0xcec   : > { %17252 = vmatpush1.bf16.msra.mxu1 %v22823_v39 }
 0xced   : > { %19916 = vmatpush3.bf16.msra.mxu0 %v22827_v49  ;;  %17253 = vmatprep.subr.bf16.mxu1 %v22830_v38 }
 0xcee   : > { %19917 = vmatprep.subr.bf16.mxu0 %v22831_v12 }
 0xcf0   : > { %17254 = vmatpush2.bf16.msra.mxu1 %v22828_v0 }
 0xcf1   : > { %19918 = vmatpush3.bf16.msra.mxu0 %v22832_v14  ;;  %17255 = vmatprep.subr.bf16.mxu1 %v22835_v5 }
 0xcf4   : > { %17256 = vmatpush2.bf16.msra.mxu1 %v22833_v58  ;;  %17372 = vmatmul.mubr.bf16.vlgmr.msra.gmra.mxu0 %v24747_v52 }
 0xcf5   : > { %17378 = vmatprep.mubr.bf16.mxu0 %v24749_v42  ;;  %17257 = vmatprep.subr.bf16.mxu1 %v22838_v56 }
 0xcf8   : > { %17258 = vmatpush2.bf16.msra.mxu1 %v22836_v23 }
 0xcf9   : > { %17259 = vmatprep.subr.bf16.mxu1 %v22841_v51 }
 0xcfc   : > { %17260 = vmatpush2.bf16.msra.mxu1 %v22839_v57  ;;  %17379 = vmatmul.mubr.bf16.gmra.mxu0 %v24756_v35 }
 0xcfd   : > { %17261 = vmatprep.subr.bf16.mxu1 %v22844_v50 }
 0xd00   : > { %17262 = vmatpush2.bf16.msra.mxu1 %v22842_v59 }
 0xd01   : > { %17263 = vmatprep.subr.bf16.mxu1 %v22847_v1 }
 0xd04   : > { %17264 = vmatpush2.bf16.msra.mxu1 %v22845_v17 }
 0xd05   : > { %17265 = vmatprep.subr.bf16.mxu1 %v22850_v3 }
 0xd08   : > { %17266 = vmatpush2.bf16.msra.mxu1 %v22848_v55 }
 0xd09   : > { %17267 = vmatprep.subr.bf16.mxu1 %v22853_v54 }
 0xd0c   : > { %17268 = vmatpush2.bf16.msra.mxu1 %v22851_v25 }
 0xd0d   : > { %20101 = vmatprep.subr.bf16.mxu1 %v22854_v30 }
 0xd0f   : > { %17270 = vmatmul.mubr.bf16.vlgmr.msra.gmra.mxu1 %v24747_v52 }
 0xd10   : > { %17277 = vmatprep.mubr.bf16.mxu1 %v24749_v42  ;;  %20102 = vmatpush3.bf16.msra.mxu1 %v22854_v30  ;;  %v22859_v42 = vld [vmem:[#allocation4 + $0x2db0] ss:$36 sps:$4 sm:$0xff]  }
 0xd11   : > { %20103 = vmatprep.subr.bf16.mxu1 %v22855_v33 }
 0xd14   : > { %20104 = vmatpush3.bf16.msra.mxu1 %v22855_v33  ;;  %v16971_v9 = vpop.f32.mrf.mxu0 }
 0xd15   : > { %20105 = vmatprep.subr.bf16.mxu1 %v22856_v13 }
 0xd16   : > { %v16973_v63 = vpop.f32.mrf.mxu0 }
 0xd17   : > { %17278 = vmatmul.mubr.bf16.gmra.mxu1 %v24756_v35  ;;  %v22861_v35 = vld [vmem:[#allocation4 + $0x2d20] ss:$36 sps:$4 sm:$0xff]  }
 0xd18   : > { %20106 = vmatpush3.bf16.msra.mxu1 %v22856_v13  ;;  %20117 = vmatprep.mubr.bf16.mxu1 %v24784_v43  ;;  %v16975_v26 = vpop.f32.mrf.mxu0 }
 0xd19   : > { %20107 = vmatprep.subr.bf16.mxu1 %v22857_v61 }
 0xd1a   : > { %v16977_v2 = vpop.f32.mrf.mxu0 }
 0xd1c   : > { %20108 = vmatpush3.bf16.msra.mxu1 %v22857_v61  ;;  %v16981_v52 = vpop.f32.mrf.mxu0 }
 0xd1d   : > { %20109 = vmatprep.subr.bf16.mxu1 %v22858_v18 }
 0xd1e   : > { %v16983_v40 = vpop.f32.mrf.mxu0 }
 0xd20   : > { %20110 = vmatpush3.bf16.msra.mxu1 %v22858_v18  ;;  %v16985_v34 = vpop.f32.mrf.mxu0 }
 0xd21   : > { %20111 = vmatprep.subr.bf16.mxu1 %v22859_v42 }
 0xd22   : > { %v16986_v41 = vpop.f32.mrf.mxu0 }
 0xd24   : > { %20112 = vmatpush3.bf16.msra.mxu1 %v22859_v42 }
 0xd25   : > { %20113 = vmatprep.subr.bf16.mxu1 %v22860_v19 }
 0xd28   : > { %20114 = vmatpush3.bf16.msra.mxu1 %v22860_v19 }
 0xd29   : > { %20115 = vmatprep.subr.bf16.mxu1 %v22861_v35 }
 0xd2c   : > { %20116 = vmatpush3.bf16.msra.mxu1 %v22861_v35 }
 0xd2f   : > { %20118 = vmatmul.mubr.bf16.vlgmr.msra.gmra.mxu1 %v24782_v37  ;;  %v17022_v43 = vpop.f32.mrf.mxu1 }
 0xd30   : > { %v17023_v20 = vadd.f32 %v17022_v43, %v16971_v9 }
 0xd31   : > { %v17024_v47 = vpop.f32.mrf.mxu1 }
 0xd32   : > { %v17025_v62 = vadd.f32 %v17024_v47, %v16973_v63  ;;  %v17435_v10 = vrot.slane %v17023_v20, 7 }
 0xd33   : > { %v17026_v45 = vpop.f32.mrf.mxu1 }
 0xd34   : > { %v17027_v48 = vadd.f32 %v17026_v45, %v16975_v26  ;;  %v17123_v21 = vpop.f32.mrf.mxu0  ;;  %v17436_v60 = vrot.slane %v17025_v62, 7 }
 0xd35   : > { %v17028_v53 = vpop.f32.mrf.mxu1 }
 0xd36   : > { %v17438_v27 = vrot.slane %v17027_v48, 7  ;;  %v17029_v15 = vadd.f32 %v17028_v53, %v16977_v2  ;;  %v17125_v24 = vpop.f32.mrf.mxu0 }
 0xd37   : > { %v17032_v36 = vpop.f32.mrf.mxu1 }
 0xd38   : > { %v17447_v16 = vsel %vm2303_vm2, %v17435_v10, %v17438_v27  ;;  %v17439_v4 = vrot.slane %v17029_v15, 7  ;;  %v17033_v44 = vadd.f32 %v17032_v36, %v16981_v52  ;;  %v17126_v37 = vpop.f32.mrf.mxu0 }
 0xd39   : > { %v17450_v31 = vsel %vm373_vm0, %v17027_v48, %v17447_v16  ;;  %v17034_v11 = vpop.f32.mrf.mxu1 }
 0xd3a   : > { %v17448_v46 = vsel %vm2303_vm2, %v17436_v60, %v17439_v4  ;;  %v17441_v32 = vrot.slane %v17033_v44, 7  ;;  %v17035_v6 = vadd.f32 %v17034_v11, %v16983_v40  ;;  %v17128_v39 = vpop.f32.mrf.mxu0 }
 0xd3b   : > { %v17451_v49 = vsel %vm373_vm0, %v17029_v15, %v17448_v46  ;;  %v17036_v38 = vpop.f32.mrf.mxu1 }
 0xd3c   : > { %v17442_v12 = vrot.slane %v17035_v6, 7  ;;  %v17132_v0 = vpop.f32.mrf.mxu0  ;;  %v17444_v14 = vsel %vm2303_vm2, %v17438_v27, %v17441_v32 }
 0xd3d   : > { %v17037_v5 = vpop.f32.mrf.mxu1 }
 0xd3e   : > { %v17134_v58 = vpop.f32.mrf.mxu0  ;;  %v17445_v56 = vsel %vm2303_vm2, %v17439_v4, %v17442_v12 }
 0xd40   : > { %v17136_v23 = vpop.f32.mrf.mxu0 }
 0xd42   : > { %v17137_v51 = vpop.f32.mrf.mxu0 }
 0xd6f   : > { %v17073_v57 = vpop.f32.mrf.mxu1 }
 0xd70   : > { %v17124_v50 = vadd.f32 %v17123_v21, %v17073_v57 }
 0xd71   : > { %v17075_v59 = vpop.f32.mrf.mxu1 }
 0xd72   : > { %v17437_v54 = vrot.slane %v17124_v50, 7 }
 0xd73   : > { %v17076_v1 = vpop.f32.mrf.mxu1 }
 0xd74   : > { %v17127_v17 = vadd.f32 %v17126_v37, %v17076_v1  ;;  %v17173_v3 = vpop.f32.mrf.mxu0 }
 0xd75   : > { %v17078_v55 = vpop.f32.mrf.mxu1 }
 0xd76   : > { %v17440_v25 = vrot.slane %v17127_v17, 7  ;;  %v17129_v30 = vadd.f32 %v17128_v39, %v17078_v55  ;;  %v17174_v33 = vpop.f32.mrf.mxu0  ;;  %v17490_v55 = vld [vmem:[#allocation6 + $0x12] sm:$0x7] }
 0xd77   : > { %v17082_v13 = vpop.f32.mrf.mxu1 }
 0xd78   : > { %v17449_v9 = vsel %vm2303_vm2, %v17437_v54, %v17440_v25  ;;  %v24832_v61 = vadd.f32 %v17450_v31, %v17129_v30  ;;  %v17133_v63 = vadd.f32 %v17132_v0, %v17082_v13  ;;  %v17175_v26 = vpop.f32.mrf.mxu0  ;;  %v17495_v13 = vrot.slane %v17490_v55, %v23339_v28 }
 0xd79   : > { %v17452_v18 = vsel %vm373_vm0, %v17127_v17, %v17449_v9  ;;  %v17084_v2 = vpop.f32.mrf.mxu1 }
 0xd7a   : > { %v17443_v52 = vrot.slane %v17133_v63, 7  ;;  %v17135_v42 = vadd.f32 %v17134_v58, %v17084_v2  ;;  %v17177_v40 = vpop.f32.mrf.mxu0  ;;  %v17499_v63 = vrot.slane %v17490_v55, %v23350_v22 }
 0xd7b   : > { %v17086_v34 = vpop.f32.mrf.mxu1 }
 0xd7c   : > { %v17480_v19 = vadd.f32 %v17444_v14, %v17135_v42  ;;  %v17181_v41 = vpop.f32.mrf.mxu0  ;;  %v17446_v35 = vsel %vm2303_vm2, %v17440_v25, %v17443_v52 }
 0xd7d   : > { %v17087_v43 = vpop.f32.mrf.mxu1 }
 0xd7e   : > { %v17183_v20 = vpop.f32.mrf.mxu0 }
 0xd80   : > { %v17185_v47 = vpop.f32.mrf.mxu0 }
 0xd82   : > { %v17186_v62 = vpop.f32.mrf.mxu0 }
 0xd8f   : > { %v17222_v45 = vpop.f32.mrf.mxu1 }
 0xd91   : > { %v17223_v48 = vpop.f32.mrf.mxu1 }
 0xd93   : > { %v17224_v21 = vpop.f32.mrf.mxu1 }
 0xd94   : > { %v17225_v53 = vadd.f32 %v17224_v21, %v17175_v26  ;;  %v17322_v10 = vpop.f32.mrf.mxu0 }
 0xd95   : > { %v17226_v27 = vpop.f32.mrf.mxu1 }
 0xd96   : > { %v17478_v15 = vadd.f32 %v17451_v49, %v17225_v53  ;;  %v17227_v24 = vadd.f32 %v17226_v27, %v17177_v40  ;;  %v17323_v36 = vpop.f32.mrf.mxu0 }
 0xd97   : > { %v17230_v60 = vpop.f32.mrf.mxu1 }
 0xd98   : > { %v24838_v16 = vadd.f32 %v17452_v18, %v17227_v24  ;;  %v17231_v4 = vadd.f32 %v17230_v60, %v17181_v41  ;;  %v17324_v44 = vpop.f32.mrf.mxu0 }
 0xd99   : > { %v17232_v37 = vpop.f32.mrf.mxu1 }
 0xd9a   : > { %v17481_v31 = vadd.f32 %v17445_v56, %v17231_v4  ;;  %v17233_v11 = vadd.f32 %v17232_v37, %v17183_v20  ;;  %v17326_v46 = vpop.f32.mrf.mxu0  ;;  %v17503_v4 = vrot.slane %v17490_v55, %v23424_v29 }
 0xd9b   : > { %v17234_v32 = vpop.f32.mrf.mxu1 }
 0xd9c   : > { %v17482_v6 = vadd.f32 %v17446_v35, %v17233_v11  ;;  %v17330_v39 = vpop.f32.mrf.mxu0 }
 0xd9d   : > { %v17235_v38 = vpop.f32.mrf.mxu1 }
 0xd9e   : > { %v17332_v12 = vpop.f32.mrf.mxu0 }
 0xda0   : > { %v17334_v0 = vpop.f32.mrf.mxu0 }
 0xda2   : > { %v17336_v14 = vpop.f32.mrf.mxu0 }
 0xdb4   : > { %v19919_v5 = vpop.f32.mrf.mxu0 }
 0xdb6   : > { %v19920_v49 = vpop.f32.mrf.mxu0 }
 0xdb8   : > { %v19922_v58 = vpop.f32.mrf.mxu0 }
 0xdba   : > { %v19923_v23 = vpop.f32.mrf.mxu0 }
 0xdbb   : > { %v19924_v11 = vadd.f32 %v19923_v23, %v19922_v58 }
 0xdbc   : > { %v19925_v51 = vpop.f32.mrf.mxu0 }
 0xdbe   : > { %v19926_v57 = vpop.f32.mrf.mxu0 }
 0xdc0   : > { %v19928_v50 = vpop.f32.mrf.mxu0 }
 0xdc2   : > { %v19929_v59 = vpop.f32.mrf.mxu0 }
 0xdcf   : > { %v17271_v1 = vpop.f32.mrf.mxu1 }
 0xdd1   : > { %v17272_v17 = vpop.f32.mrf.mxu1 }
 0xdd3   : > { %v17273_v56 = vpop.f32.mrf.mxu1 }
 0xdd4   : > { %v17325_v54 = vadd.f32 %v17324_v44, %v17273_v56 }
 0xdd5   : > { %v17275_v3 = vpop.f32.mrf.mxu1 }
 0xdd6   : > { %v17327_v25 = vadd.f32 %v17326_v46, %v17275_v3  ;;  %v17456_v26 = vrot.slane %v17325_v54, 1 }
 0xdd7   : > { %v17279_v30 = vpop.f32.mrf.mxu1 }
 0xdd8   : > { %v17331_v33 = vadd.f32 %v17330_v39, %v17279_v30  ;;  %v17457_v42 = vrot.slane %v17327_v25, 1 }
 0xdd9   : > { %v17281_v9 = vpop.f32.mrf.mxu1 }
 0xdda   : > { %v17459_v18 = vrot.slane %v17331_v33, 1  ;;  %v17486_v2 = vadd.f32 %v17480_v19, %v17331_v33  ;;  %v17333_v52 = vadd.f32 %v17332_v12, %v17281_v9 }
 0xddb   : > { %v17283_v40 = vpop.f32.mrf.mxu1 }
 0xddc   : > { %v17468_v34 = vsel %vm2348_vm3, %v17456_v26, %v17459_v18  ;;  %v17510_v41 = vadd.f32 %v17495_v13, %v17486_v2  ;;  %v17460_v35 = vrot.slane %v17333_v52, 1  ;;  %v17487_v43 = vadd.f32 %v17481_v31, %v17333_v52 }
 0xddd   : > { %v17471_v28 = vsel %vm378_vm1, %v17325_v54, %v17468_v34  ;;  %v17285_v22 = vpop.f32.mrf.mxu1 }
 0xdde   : > { %v17483_v20 = vadd.f32 %v24832_v61, %v17471_v28  ;;  %v17516_v19 = vmax.f32 %v17510_v41, 0.0  ;;  %v17469_v47 = vsel %vm2348_vm3, %v17457_v42, %v17460_v35  ;;  %v17511_v62 = vadd.f32 %v17499_v63, %v17487_v43 }
 0xddf   : > { %v17472_v45 = vsel %vm378_vm1, %v17327_v25, %v17469_v47  ;;  %v19927_v61 = vadd.f32 %v19926_v57, %v19925_v51 }
 0xde0   : > { %v17507_v48 = vadd.f32 %v17495_v13, %v17483_v20  ;;  %17522 = vst [vmem:[%s23186_s13 + $0x18] sm:$0xff] %v17516_v19  ;;  %v17484_v21 = vadd.f32 %v17478_v15, %v17472_v45  ;;  %v17517_v53 = vmax.f32 %v17511_v62, 0.0 }
 0xde2   : > { %v17513_v10 = vmax.f32 %v17507_v48, 0.0  ;;  %v17508_v27 = vadd.f32 %v17499_v63, %v17484_v21  ;;  %17523 = vst [vmem:[%s23186_s13 + $0x20] sm:$0xff] %v17517_v53 }
 0xde4   : > { %17519 = vst [vmem:[%s23186_s13] sm:$0xff] %v17513_v10  ;;  %v17514_v24 = vmax.f32 %v17508_v27, 0.0 }
 0xde6   : > { %17520 = vst [vmem:[%s23186_s13 + $0x8] sm:$0xff] %v17514_v24 }
 0xdef   : > { %v20119_v36 = vpop.f32.mrf.mxu1 }
 0xdf0   : > { %v17429_v60 = vadd.f32 %v20119_v36, %v19927_v61 }
 0xdf1   : > { %v17421_v44 = vpop.f32.mrf.mxu1 }
 0xdf2   : > { %v17488_v37 = vadd.f32 %v17482_v6, %v17429_v60  ;;  %v17461_v38 = vrot.slane %v17429_v60, 1 }
 0xdf3   : > { %v20120_v31 = vpop.f32.mrf.mxu1 }
 0xdf4   : > { %v17512_v46 = vadd.f32 %v17503_v4, %v17488_v37 }
 0xdf5   : > { %v17423_v15 = vpop.f32.mrf.mxu1 }
 0xdf6   : > { %v17518_v32 = vmax.f32 %v17512_v46, 0.0  ;;  %v17424_v39 = vadd.f32 %v19924_v11, %v17423_v15 }
 0xdf8   : > { %17524 = vst [vmem:[%s23186_s13 + $0x28] sm:$0xff] %v17518_v32  ;;  %v17458_v12 = vrot.slane %v17424_v39, 1 }
 0xdfa   : > { %v17470_v0 = vsel %vm2348_vm3, %v17458_v12, %v17461_v38 }
 0xdfb   : > { %v17473_v14 = vsel %vm378_vm1, %v17424_v39, %v17470_v0 }
 0xdfc   : > { %v17485_v29 = vadd.f32 %v24838_v16, %v17473_v14 }
 0xdfe   : > { %v17509_v5 = vadd.f32 %v17503_v4, %v17485_v29 }
 0xe00   : > { %v17515_v49 = vmax.f32 %v17509_v5, 0.0 }
 0xe02   : > { %17521 = vst [vmem:[%s23186_s13 + $0x10] sm:$0xff] %v17515_v49 }
 0xe03 PF: > { %s19_s23 = sadd.s32 1, %s23034_s23   ;;  %s24949_s21 = smov %s23030_s22 }
 0xe04   : > { %p16_p2 = scmp.ge.s32.totalorder %s19_s23, 4   ;;  %s24950_s22 = smov %s24952_s8 }
 0xe06   :  { %18 = sbr.rel (!%p16_p2) target bundleno = 4 (0x4), region = 143 }
 0xe0b   :  { %17557 = vsyncpa [#allocation5], 1 }
 0xe0c   :  { %17559 = vsyncpa [#allocation5 + $0x1], 1 }
 0xe0d   :  { %17560 = vsyncpa [#allocation7], 1 }
 0xe0e   :  { %17561 = vsyncpa [#allocation10], 1 }
 0xe0f   :  { %17562 = vsyncmov [#allocation3] }
 0xe12   :  { %s17563_s27 = vpop.sfrf %17562 }
 0xe13   :  { %p19541_p5 = scmp.ne.s32.totalorder %s17563_s27, 0 }
 0xe15   :  { %17567 = shalt.err (%p19541_p5)  }

</bundles_post_ra>
